<compile_context>
chip_gen: v7x
topology: tpu7x:2x2x1
jax: 0.10.0
libtpu: 0.0.40
codegen_flags: <defaults>
</compile_context>

<pallas_src>
import jax
import jax.numpy as jnp
from jax import lax
from jax.experimental import pallas as pl
from jax.experimental.pallas import tpu as pltpu

SOS_IDX = 1       # deterministic stand-in for letter2index['<sos>'] (undefined global in ref code)
NEG_INF = -1e9    # matches masked_fill_(mask, -1000000000.0)
LANE = 128


def _round_up(x, m):
    return ((x + m - 1) // m) * m


def _perm_gates(w):
    # PyTorch LSTMCell gate order (i, f, g, o) -> (i, f, o, g) so the kernel can apply one
    # sigmoid over a contiguous 3H slab and one tanh over the last H columns.
    i, f, g, o = jnp.split(w, 4, axis=-1)
    return jnp.concatenate([i, f, o, g], axis=-1)


def _make_kernel(Bblk, K, H, Vp, C, sos_idx):
    def lstm_cell(x_pre, h, c, wh_ref, b_ref, hid):
        # Gate columns were pre-permuted to (i, f, o, g); b = b_ih + b_hh precombined.
        gates = (x_pre
                 + jnp.dot(h, wh_ref[...], preferred_element_type=jnp.float32)
                 + b_ref[...])
        sig = jax.nn.sigmoid(gates[:, :3 * hid])        # i, f, o in ONE EUP pass
        g_g = jnp.tanh(gates[:, 3 * hid:])
        i_g = sig[:, 0 * hid:1 * hid]
        f_g = sig[:, 1 * hid:2 * hid]
        o_g = sig[:, 2 * hid:3 * hid]
        c_new = f_g * c + i_g * g_g
        h_new = o_g * jnp.tanh(c_new)
        return h_new, c_new

    def kernel(key_ref, val_ref, bias_ref, embw1_ref, embq_ref, embc_ref,
               w1c_ref, w1h_ref, b1_ref,
               w2x_ref, w2h_ref, b2_ref,
               w3x_ref, w3h_ref, b3_ref, bout_ref,
               pred_out_ref, attn_out_ref,
               h1_ref, c1_ref, h2_ref, c2_ref, h3_ref, c3_ref,
               ctx_ref, prev_ref):
        # Grid = (batch blocks [parallel], decode chunks [arbitrary]); the recurrence state
        # must be (re)initialized at the start of EVERY batch block's decode, so the init is
        # keyed off the decode-chunk program_id (axis 1), not the flat grid step.
        step = pl.program_id(1)

        @pl.when(step == 0)
        def _():
            lane = lax.broadcasted_iota(jnp.int32, (Bblk, Vp), 1)
            h1_ref[...] = jnp.zeros_like(h1_ref)
            c1_ref[...] = jnp.zeros_like(c1_ref)
            h2_ref[...] = jnp.zeros_like(h2_ref)
            c2_ref[...] = jnp.zeros_like(c2_ref)
            h3_ref[...] = jnp.zeros_like(h3_ref)
            c3_ref[...] = jnp.zeros_like(c3_ref)
            ctx_ref[...] = val_ref[:, 0, :]                        # context = value[:, 0, :]
            prev_ref[...] = (lane == sos_idx).astype(jnp.float32)  # one-hot <sos> seed

        # Recurrent state carried as values across the unrolled chunk (written back once).
        h1 = h1_ref[...]
        c1 = c1_ref[...]
        h2 = h2_ref[...]
        c2 = c2_ref[...]
        h3 = h3_ref[...]
        c3 = c3_ref[...]
        ctx = ctx_ref[...]
        prev = prev_ref[...]

        preds = []
        attns = []
        for i in range(C):
            # Greedy token as a one-hot row: single cross-lane max, no tie-break select.
            # (Padded vocab lanes carry a -1e30 bias so they can never be the max; exact
            #  float ties among real logits are the only divergence from torch.argmax.)
            pmax = jnp.max(prev, axis=1, keepdims=True)
            onehot = (prev == pmax).astype(jnp.float32)                           # (Bblk, Vp)

            # Fused embedding lookup + lstm1 input projection:
            #   onehot @ (emb @ w1x[:E,:])  +  ctx @ w1x[E:,:]
            x1 = (jnp.dot(onehot, embw1_ref[...], preferred_element_type=jnp.float32)
                  + jnp.dot(ctx, w1c_ref[...], preferred_element_type=jnp.float32))
            h1, c1 = lstm_cell(x1, h1, c1, w1h_ref, b1_ref, H)

            # LSTM 2
            x2 = jnp.dot(h1, w2x_ref[...], preferred_element_type=jnp.float32)
            h2, c2 = lstm_cell(x2, h2, c2, w2h_ref, b2_ref, H)

            # LSTM 3 (hidden size = key_value_size) — its output is the attention query.
            x3 = jnp.dot(h2, w3x_ref[...], preferred_element_type=jnp.float32)
            h3, c3 = lstm_cell(x3, h3, c3, w3h_ref, b3_ref, K)
            query = h3                                                            # (Bblk, K)

            # Dot-product attention on the MXU: energy = bmm(key, query), additive -1e9 mask,
            # softmax over Tp (padded cols underflow to exactly 0), context = attn @ value.
            energy = jnp.einsum('bqk,btk->bqt', query[:, None, :], key_ref[...],
                                preferred_element_type=jnp.float32)[:, 0, :]      # (Bblk, Tp)
            energy = energy + bias_ref[...]
            emax = jnp.max(energy, axis=1, keepdims=True)
            ee = jnp.exp(energy - emax)
            se = jnp.sum(ee, axis=1, keepdims=True)
            inv = pl.reciprocal(se, approx=True)           # EUP slot (nearly free)
            inv = inv * (2.0 - se * inv)                   # one Newton step -> f32-exact parity
            attn = ee * inv                                                       # (Bblk, Tp)
            ctx = jnp.einsum('bqt,btk->bqk', attn[:, None, :], val_ref[...],
                             preferred_element_type=jnp.float32)[:, 0, :]         # (Bblk, K)

            # character_prob (weight tied to embedding): [query, ctx] @ emb.T + b, done as two
            # transposed-contraction matmuls against the single-copy table halves.
            pred = (lax.dot_general(query, embq_ref[...], (((1,), (1,)), ((), ())),
                                    preferred_element_type=jnp.float32)
                    + lax.dot_general(ctx, embc_ref[...], (((1,), (1,)), ((), ())),
                                      preferred_element_type=jnp.float32)
                    + bout_ref[...])                                              # (Bblk, Vp)

            preds.append(pred)
            attns.append(attn)
            prev = pred

        # ONE dense, lane-aligned store per output per chunk: stacking on the new leading
        # step axis keeps each (Bblk, lanes) tile intact (no relayout, no masked vst).
        pred_out_ref[...] = jnp.stack(preds, axis=0)       # (C, Bblk, Vp)
        attn_out_ref[...] = jnp.stack(attns, axis=0)       # (C, Bblk, Tp)

        # Write recurrent state back for the next chunk.
        h1_ref[...] = h1
        c1_ref[...] = c1
        h2_ref[...] = h2
        c2_ref[...] = c2
        h3_ref[...] = h3
        c3_ref[...] = c3
        ctx_ref[...] = ctx
        prev_ref[...] = prev

    return kernel


def decoder_forward_pallas(key_enc, value_enc, encoder_len, params, max_len,
                           sos_idx=SOS_IDX, chunk=16):
    B, T, K = key_enc.shape
    V, E = params["emb"].shape
    H = params["w1h"].shape[0]
    assert E == 2 * K, "tied weights require embed_dim == 2 * key_value_size"

    f32 = jnp.float32
    hp = lax.Precision.HIGHEST
    Tp = _round_up(T, LANE)                       # lane-pad encoder time axis
    Vp = _round_up(V, LANE)                       # lane-pad vocab axis
    C = max(1, min(chunk, max_len))               # decode steps per grid iteration
    ML = _round_up(max_len, C)
    assert C == ML or C % 8 == 0, "chunk must be a multiple of 8 (or cover max_len)"

    # Batch-parallel grid blocks: split into 2 blocks (one per v7x TensorCore) whenever the
    # per-block batch stays a multiple of 8 (sublane tiling of the (C, Bblk, lanes) output
    # blocks); otherwise keep the whole batch in a single block (v5e/v6e: no loss).
    Bblk = B // 2 if (B % 2 == 0 and (B // 2) % 8 == 0) else B
    assert B % Bblk == 0

    # Lane-pad encoder outputs along T; additive -1e9 mask covers both real padding and
    # the lane padding (padded columns underflow to exactly 0 after softmax).
    key_p = jnp.pad(key_enc.astype(f32), ((0, 0), (0, Tp - T), (0, 0)))
    val_p = jnp.pad(value_enc.astype(f32), ((0, 0), (0, Tp - T), (0, 0)))
    bias = jnp.where(jnp.arange(Tp)[None, :] >= encoder_len[:, None],
                     f32(NEG_INF), f32(0.0))                                   # (B, Tp)

    # Gate columns permuted (i,f,g,o)->(i,f,o,g) so the kernel fuses the three sigmoids.
    w1x = _perm_gates(params["w1x"].astype(f32))
    w1h = _perm_gates(params["w1h"].astype(f32))
    b1 = _perm_gates(params["b1"].astype(f32))
    w2x = _perm_gates(params["w2x"].astype(f32))
    w2h = _perm_gates(params["w2h"].astype(f32))
    b2 = _perm_gates(params["b2"].astype(f32))
    w3x = _perm_gates(params["w3x"].astype(f32))
    w3h = _perm_gates(params["w3h"].astype(f32))
    b3 = _perm_gates(params["b3"].astype(f32))

    # Tied embedding table stored once: padded vocab rows are zero; query/context column
    # halves feed the tied output projection, and the embedding lookup + lstm1 char-embed
    # input projection are FOLDED into one precomputed table embW1 = emb @ w1x[:E,:].
    # Padded output-bias entries are hugely negative so the greedy max never selects them.
    emb_p = jnp.pad(params["emb"].astype(f32), ((0, Vp - V), (0, 0)))          # (Vp, E)
    embq = emb_p[:, :K]                                                        # (Vp, K)
    embc = emb_p[:, K:]                                                        # (Vp, K)
    embW1 = jnp.dot(emb_p, w1x[:E, :], precision=hp)                           # (Vp, 4H)
    w1c = w1x[E:, :]                                                           # (K, 4H)
    bout_p = jnp.concatenate(
        [params["bout"].astype(f32), jnp.full((1, Vp - V), -1e30, f32)], axis=1)

    tensors = (key_p, val_p, bias, embW1, embq, embc,
               w1c, w1h, b1, w2x, w2h, b2, w3x, w3h, b3, bout_p)

    def invariant(x):
        nd = x.ndim
        # Loop-invariant weight block: same block for every grid point.
        # TODO(synk): at production shapes add pipeline_mode=pl.Buffered(1) here to drop the
        # pointless second pipelining buffer of each invariant input (halves weight VMEM).
        return pl.BlockSpec(x.shape, lambda b, s, nd=nd: (0,) * nd)

    in_specs = [
        pl.BlockSpec((Bblk, Tp, K), lambda b, s: (b, 0, 0)),   # key   (batch-blocked)
        pl.BlockSpec((Bblk, Tp, K), lambda b, s: (b, 0, 0)),   # value (batch-blocked)
        pl.BlockSpec((Bblk, Tp), lambda b, s: (b, 0)),         # mask bias (batch-blocked)
    ] + [invariant(x) for x in tensors[3:]]
    out_specs = [
        pl.BlockSpec((C, Bblk, Vp), lambda b, s: (s, b, 0)),   # predictions (ML, B, Vp)
        pl.BlockSpec((C, Bblk, Tp), lambda b, s: (s, b, 0)),   # attentions  (ML, B, Tp)
    ]
    out_shape = [
        jax.ShapeDtypeStruct((ML, B, Vp), f32),
        jax.ShapeDtypeStruct((ML, B, Tp), f32),
    ]
    scratch = [
        pltpu.VMEM((Bblk, H), f32), pltpu.VMEM((Bblk, H), f32),   # h1, c1
        pltpu.VMEM((Bblk, H), f32), pltpu.VMEM((Bblk, H), f32),   # h2, c2
        pltpu.VMEM((Bblk, K), f32), pltpu.VMEM((Bblk, K), f32),   # h3, c3
        pltpu.VMEM((Bblk, K), f32),                               # attention context
        pltpu.VMEM((Bblk, Vp), f32),                              # previous-step logits
    ]

    kernel = _make_kernel(Bblk, K, H, Vp, C, sos_idx)
    preds_p, attns_p = pl.pallas_call(
        kernel,
        out_shape=out_shape,
        grid_spec=pltpu.PrefetchScalarGridSpec(
            num_scalar_prefetch=0,
            grid=(B // Bblk, ML // C),
            in_specs=in_specs,
            out_specs=out_specs,
            scratch_shapes=scratch,
        ),
        compiler_params=pltpu.CompilerParams(
            dimension_semantics=("parallel", "arbitrary"),
            vmem_limit_bytes=64 * 1024 * 1024,
        ),
    )(*tensors)

    # Strip lane / chunk padding; predictions back to the PyTorch (B, max_len, V) layout.
    preds = jnp.transpose(preds_p[:max_len, :, :V], (1, 0, 2))
    attns = attns_p[:max_len, :, :T]
    return preds, attns


def decoder_forward_ref(key_enc, value_enc, encoder_len, params, max_len, sos_idx=SOS_IDX):
    """Pure-JAX reference mirroring the PyTorch eval/greedy forward."""
    B, T, K = key_enc.shape
    V, E = params["emb"].shape
    H = params["w1h"].shape[0]
    hp = lax.Precision.HIGHEST
    mask = jnp.arange(T)[None, :] >= encoder_len[:, None]
    emb = params["emb"]

    def cell(x, h, c, wx, wh, b, hid):
        gates = jnp.dot(x, wx, precision=hp) + jnp.dot(h, wh, precision=hp) + b
        i_g = jax.nn.sigmoid(gates[:, :hid])
        f_g = jax.nn.sigmoid(gates[:, hid:2 * hid])
        g_g = jnp.tanh(gates[:, 2 * hid:3 * hid])
        o_g = jax.nn.sigmoid(gates[:, 3 * hid:])
        c_new = f_g * c + i_g * g_g
        return o_g * jnp.tanh(c_new), c_new

    h1 = c1 = jnp.zeros((B, H), jnp.float32)
    h2 = c2 = jnp.zeros((B, H), jnp.float32)
    h3 = c3 = jnp.zeros((B, K), jnp.float32)
    ctx = value_enc[:, 0, :]
    tok = jnp.full((B,), sos_idx, dtype=jnp.int32)
    preds, attns = [], []
    for _ in range(max_len):
        char_embed = emb[tok]
        y_context = jnp.concatenate([char_embed, ctx], axis=1)
        h1, c1 = cell(y_context, h1, c1, params["w1x"], params["w1h"], params["b1"], H)
        h2, c2 = cell(h1, h2, c2, params["w2x"], params["w2h"], params["b2"], H)
        h3, c3 = cell(h2, h3, c3, params["w3x"], params["w3h"], params["b3"], K)
        query = h3
        energy = jnp.einsum("btk,bk->bt", key_enc, query, precision=hp)
        energy = jnp.where(mask, NEG_INF, energy)
        attn = jax.nn.softmax(energy, axis=1)
        ctx = jnp.einsum("bt,btk->bk", attn, value_enc, precision=hp)
        out_ctx = jnp.concatenate([query, ctx], axis=1)
        pred = jnp.dot(out_ctx, emb.T, precision=hp) + params["bout"]
        preds.append(pred[:, None, :])
        attns.append(attn)
        tok = jnp.argmax(pred, axis=-1).astype(jnp.int32)
    return jnp.concatenate(preds, axis=1), jnp.stack(attns, axis=0)


if __name__ == "__main__":
    B, T = 2, 8
    K = 32          # key_value_size
    E = 2 * K       # embed_dim (weight tying requires embed_dim == 2*key_value_size)
    H = 32          # decoder_hidden_dim
    V = 30          # vocab_size
    max_len = 12    # small decode length; chunk=8 below exercises the chunk-carry grid axis

    root = jax.random.PRNGKey(0)
    ks = jax.random.split(root, 16)
    u = lambda k, shape: jax.random.uniform(k, shape, jnp.float32, -0.1, 0.1)

    emb = u(ks[0], (V, E))
    emb = emb.at[0].set(0.0)   # padding_idx=0

    params = dict(
        emb=emb,
        w1x=u(ks[1], (E + K, 4 * H)), w1h=u(ks[2], (H, 4 * H)), b1=u(ks[3], (1, 4 * H)),
        w2x=u(ks[4], (H, 4 * H)),     w2h=u(ks[5], (H, 4 * H)), b2=u(ks[6], (1, 4 * H)),
        w3x=u(ks[7], (H, 4 * K)),     w3h=u(ks[8], (K, 4 * K)), b3=u(ks[9], (1, 4 * K)),
        bout=u(ks[10], (1, V)),
    )

    key_enc = jax.random.normal(ks[11], (B, T, K), jnp.float32)
    value_enc = jax.random.normal(ks[12], (B, T, K), jnp.float32)
    encoder_len = jnp.array([T, T - 3], dtype=jnp.int32)

    preds, attns = decoder_forward_pallas(key_enc, value_enc, encoder_len, params, max_len,
                                          chunk=8)
    preds, attns = jax.block_until_ready((preds, attns))

    ref_preds, ref_attns = decoder_forward_ref(key_enc, value_enc, encoder_len, params, max_len)

    assert preds.shape == (B, max_len, V) and attns.shape == (max_len, B, T)
    assert jnp.allclose(preds, ref_preds, atol=5e-3, rtol=5e-3), "prediction mismatch vs reference"
    assert jnp.allclose(attns, ref_attns, atol=5e-3, rtol=5e-3), "attention mismatch vs reference"
    print("KERNEL_OK")
</pallas_src>

<mosaic_0001>
module attributes {stable_mosaic.version = 11 : i64} {
  func.func @kernel(%arg0: i32, %arg1: i32, %arg2: memref<2x128x32xf32, #tpu.memory_space<vmem>>, %arg3: memref<2x128x32xf32, #tpu.memory_space<vmem>>, %arg4: memref<2x128xf32, #tpu.memory_space<vmem>>, %arg5: memref<128x128xf32, #tpu.memory_space<vmem>>, %arg6: memref<128x32xf32, #tpu.memory_space<vmem>>, %arg7: memref<128x32xf32, #tpu.memory_space<vmem>>, %arg8: memref<32x128xf32, #tpu.memory_space<vmem>>, %arg9: memref<32x128xf32, #tpu.memory_space<vmem>>, %arg10: memref<1x128xf32, #tpu.memory_space<vmem>>, %arg11: memref<32x128xf32, #tpu.memory_space<vmem>>, %arg12: memref<32x128xf32, #tpu.memory_space<vmem>>, %arg13: memref<1x128xf32, #tpu.memory_space<vmem>>, %arg14: memref<32x128xf32, #tpu.memory_space<vmem>>, %arg15: memref<32x128xf32, #tpu.memory_space<vmem>>, %arg16: memref<1x128xf32, #tpu.memory_space<vmem>>, %arg17: memref<1x128xf32, #tpu.memory_space<vmem>>, %arg18: memref<8x2x128xf32, #tpu.memory_space<vmem>>, %arg19: memref<8x2x128xf32, #tpu.memory_space<vmem>>, %arg20: memref<2x32xf32, #tpu.memory_space<vmem>>, %arg21: memref<2x32xf32, #tpu.memory_space<vmem>>, %arg22: memref<2x32xf32, #tpu.memory_space<vmem>>, %arg23: memref<2x32xf32, #tpu.memory_space<vmem>>, %arg24: memref<2x32xf32, #tpu.memory_space<vmem>>, %arg25: memref<2x32xf32, #tpu.memory_space<vmem>>, %arg26: memref<2x32xf32, #tpu.memory_space<vmem>>, %arg27: memref<2x128xf32, #tpu.memory_space<vmem>>) attributes {dimension_semantics = [#tpu.dimension_semantics<parallel>, #tpu.dimension_semantics<arbitrary>], iteration_bounds = array<i64: 1, 2>, scalar_prefetch = 0 : i64, scratch_operands = 8 : i64, tpu.core_type = #tpu.core_type<tc>, window_params = [{transform_indices = @transform_0, window_bounds = array<i64: 2, 128, 32>}, {transform_indices = @transform_1, window_bounds = array<i64: 2, 128, 32>}, {transform_indices = @transform_2, window_bounds = array<i64: 2, 128>}, {pipeline_mode = #tpu.pipeline_mode<synchronous>, transform_indices = @transform_3, window_bounds = array<i64: 128, 128>}, {pipeline_mode = #tpu.pipeline_mode<synchronous>, transform_indices = @transform_4, window_bounds = array<i64: 128, 32>}, {pipeline_mode = #tpu.pipeline_mode<synchronous>, transform_indices = @transform_5, window_bounds = array<i64: 128, 32>}, {pipeline_mode = #tpu.pipeline_mode<synchronous>, transform_indices = @transform_6, window_bounds = array<i64: 32, 128>}, {pipeline_mode = #tpu.pipeline_mode<synchronous>, transform_indices = @transform_7, window_bounds = array<i64: 32, 128>}, {pipeline_mode = #tpu.pipeline_mode<synchronous>, transform_indices = @transform_8, window_bounds = array<i64: 1, 128>}, {pipeline_mode = #tpu.pipeline_mode<synchronous>, transform_indices = @transform_9, window_bounds = array<i64: 32, 128>}, {pipeline_mode = #tpu.pipeline_mode<synchronous>, transform_indices = @transform_10, window_bounds = array<i64: 32, 128>}, {pipeline_mode = #tpu.pipeline_mode<synchronous>, transform_indices = @transform_11, window_bounds = array<i64: 1, 128>}, {pipeline_mode = #tpu.pipeline_mode<synchronous>, transform_indices = @transform_12, window_bounds = array<i64: 32, 128>}, {pipeline_mode = #tpu.pipeline_mode<synchronous>, transform_indices = @transform_13, window_bounds = array<i64: 32, 128>}, {pipeline_mode = #tpu.pipeline_mode<synchronous>, transform_indices = @transform_14, window_bounds = array<i64: 1, 128>}, {pipeline_mode = #tpu.pipeline_mode<synchronous>, transform_indices = @transform_15, window_bounds = array<i64: 1, 128>}, {transform_indices = @transform_16, window_bounds = array<i64: 8, 2, 128>}, {transform_indices = @transform_17, window_bounds = array<i64: 8, 2, 128>}]} {
    %c0_i32 = arith.constant 0 : i32
    %0 = arith.cmpi eq, %arg1, %c0_i32 : i32
    %1 = arith.extui %0 : i1 to i32
    %c0_i32_0 = arith.constant 0 : i32
    %2 = arith.cmpi ne, %1, %c0_i32_0 : i32
    scf.if %2 {
      %943 = tpu.iota {dimensions = array<i32: 1>} : vector<2x128xi32>
      %cst_453 = arith.constant 0.000000e+00 : f32
      %944 = vector.broadcast %cst_453 : f32 to vector<2x32xf32>
      %c0_454 = arith.constant 0 : index
      %c0_455 = arith.constant 0 : index
      %945 = vector.load %arg20[%c0_454, %c0_455] : memref<2x32xf32, #tpu.memory_space<vmem>>, vector<2x32xf32>
      tpu.vector_store %arg20[%c0_454, %c0_455], %944 {strides = array<i32>} : memref<2x32xf32, #tpu.memory_space<vmem>>, vector<2x32xf32>,
      %cst_456 = arith.constant 0.000000e+00 : f32
      %946 = vector.broadcast %cst_456 : f32 to vector<2x32xf32>
      %c0_457 = arith.constant 0 : index
      %c0_458 = arith.constant 0 : index
      %947 = vector.load %arg21[%c0_457, %c0_458] : memref<2x32xf32, #tpu.memory_space<vmem>>, vector<2x32xf32>
      tpu.vector_store %arg21[%c0_457, %c0_458], %946 {strides = array<i32>} : memref<2x32xf32, #tpu.memory_space<vmem>>, vector<2x32xf32>,
      %cst_459 = arith.constant 0.000000e+00 : f32
      %948 = vector.broadcast %cst_459 : f32 to vector<2x32xf32>
      %c0_460 = arith.constant 0 : index
      %c0_461 = arith.constant 0 : index
      %949 = vector.load %arg22[%c0_460, %c0_461] : memref<2x32xf32, #tpu.memory_space<vmem>>, vector<2x32xf32>
      tpu.vector_store %arg22[%c0_460, %c0_461], %948 {strides = array<i32>} : memref<2x32xf32, #tpu.memory_space<vmem>>, vector<2x32xf32>,
      %cst_462 = arith.constant 0.000000e+00 : f32
      %950 = vector.broadcast %cst_462 : f32 to vector<2x32xf32>
      %c0_463 = arith.constant 0 : index
      %c0_464 = arith.constant 0 : index
      %951 = vector.load %arg23[%c0_463, %c0_464] : memref<2x32xf32, #tpu.memory_space<vmem>>, vector<2x32xf32>
      tpu.vector_store %arg23[%c0_463, %c0_464], %950 {strides = array<i32>} : memref<2x32xf32, #tpu.memory_space<vmem>>, vector<2x32xf32>,
      %cst_465 = arith.constant 0.000000e+00 : f32
      %952 = vector.broadcast %cst_465 : f32 to vector<2x32xf32>
      %c0_466 = arith.constant 0 : index
      %c0_467 = arith.constant 0 : index
      %953 = vector.load %arg24[%c0_466, %c0_467] : memref<2x32xf32, #tpu.memory_space<vmem>>, vector<2x32xf32>
      tpu.vector_store %arg24[%c0_466, %c0_467], %952 {strides = array<i32>} : memref<2x32xf32, #tpu.memory_space<vmem>>, vector<2x32xf32>,
      %cst_468 = arith.constant 0.000000e+00 : f32
      %954 = vector.broadcast %cst_468 : f32 to vector<2x32xf32>
      %c0_469 = arith.constant 0 : index
      %c0_470 = arith.constant 0 : index
      %955 = vector.load %arg25[%c0_469, %c0_470] : memref<2x32xf32, #tpu.memory_space<vmem>>, vector<2x32xf32>
      tpu.vector_store %arg25[%c0_469, %c0_470], %954 {strides = array<i32>} : memref<2x32xf32, #tpu.memory_space<vmem>>, vector<2x32xf32>,
      %c0_471 = arith.constant 0 : index
      %c0_472 = arith.constant 0 : index
      %c0_473 = arith.constant 0 : index
      %956 = vector.load %arg3[%c0_471, %c0_472, %c0_473] : memref<2x128x32xf32, #tpu.memory_space<vmem>>, vector<2x1x32xf32>
      %957 = vector.shape_cast %956 : vector<2x1x32xf32> to vector<2x32xf32>
      %c0_474 = arith.constant 0 : index
      %c0_475 = arith.constant 0 : index
      %958 = vector.load %arg26[%c0_474, %c0_475] : memref<2x32xf32, #tpu.memory_space<vmem>>, vector<2x32xf32>
      tpu.vector_store %arg26[%c0_474, %c0_475], %957 {strides = array<i32>} : memref<2x32xf32, #tpu.memory_space<vmem>>, vector<2x32xf32>,
      %c1_i32 = arith.constant 1 : i32
      %959 = vector.broadcast %c1_i32 : i32 to vector<2x128xi32>
      %960 = arith.cmpi eq, %943, %959 : vector<2x128xi32>
      %961 = arith.extui %960 : vector<2x128xi1> to vector<2x128xi32>
      %962 = arith.sitofp %961 : vector<2x128xi32> to vector<2x128xf32>
      %c0_476 = arith.constant 0 : index
      %c0_477 = arith.constant 0 : index
      %963 = vector.load %arg27[%c0_476, %c0_477] : memref<2x128xf32, #tpu.memory_space<vmem>>, vector<2x128xf32>
      tpu.vector_store %arg27[%c0_476, %c0_477], %962 {strides = array<i32>} : memref<2x128xf32, #tpu.memory_space<vmem>>, vector<2x128xf32>,
    } else {
    }
    %c0 = arith.constant 0 : index
    %c0_1 = arith.constant 0 : index
    %3 = vector.load %arg20[%c0, %c0_1] : memref<2x32xf32, #tpu.memory_space<vmem>>, vector<2x32xf32>
    %c0_2 = arith.constant 0 : index
    %c0_3 = arith.constant 0 : index
    %4 = vector.load %arg21[%c0_2, %c0_3] : memref<2x32xf32, #tpu.memory_space<vmem>>, vector<2x32xf32>
    %c0_4 = arith.constant 0 : index
    %c0_5 = arith.constant 0 : index
    %5 = vector.load %arg22[%c0_4, %c0_5] : memref<2x32xf32, #tpu.memory_space<vmem>>, vector<2x32xf32>
    %c0_6 = arith.constant 0 : index
    %c0_7 = arith.constant 0 : index
    %6 = vector.load %arg23[%c0_6, %c0_7] : memref<2x32xf32, #tpu.memory_space<vmem>>, vector<2x32xf32>
    %c0_8 = arith.constant 0 : index
    %c0_9 = arith.constant 0 : index
    %7 = vector.load %arg24[%c0_8, %c0_9] : memref<2x32xf32, #tpu.memory_space<vmem>>, vector<2x32xf32>
    %c0_10 = arith.constant 0 : index
    %c0_11 = arith.constant 0 : index
    %8 = vector.load %arg25[%c0_10, %c0_11] : memref<2x32xf32, #tpu.memory_space<vmem>>, vector<2x32xf32>
    %c0_12 = arith.constant 0 : index
    %c0_13 = arith.constant 0 : index
    %9 = vector.load %arg26[%c0_12, %c0_13] : memref<2x32xf32, #tpu.memory_space<vmem>>, vector<2x32xf32>
    %c0_14 = arith.constant 0 : index
    %c0_15 = arith.constant 0 : index
    %10 = vector.load %arg27[%c0_14, %c0_15] : memref<2x128xf32, #tpu.memory_space<vmem>>, vector<2x128xf32>
    %cst = arith.constant dense<0xFF800000> : vector<2xf32>
    %11 = vector.multi_reduction <maximumf>, %10, %cst [1] : vector<2x128xf32> to vector<2xf32>
    %12 = vector.shape_cast %11 : vector<2xf32> to vector<2x1xf32>
    %13 = vector.broadcast %12 : vector<2x1xf32> to vector<2x128xf32>
    %14 = arith.cmpf oeq, %10, %13 : vector<2x128xf32>
    %15 = arith.extui %14 : vector<2x128xi1> to vector<2x128xi32>
    %16 = arith.sitofp %15 : vector<2x128xi32> to vector<2x128xf32>
    %c0_16 = arith.constant 0 : index
    %c0_17 = arith.constant 0 : index
    %17 = vector.load %arg5[%c0_16, %c0_17] : memref<128x128xf32, #tpu.memory_space<vmem>>, vector<128x128xf32>
    %cst_18 = arith.constant dense<0.000000e+00> : vector<2x128xf32>
    %18 = tpu.matmul %16, %17, %cst_18 {dimension_numbers = #tpu.dot_dimension_numbers<[1], [0], [0], [1], [0, 0, 1, 1], [], []>} : vector<2x128xf32>, vector<128x128xf32>, vector<2x128xf32> -> vector<2x128xf32>
    %c0_19 = arith.constant 0 : index
    %c0_20 = arith.constant 0 : index
    %19 = vector.load %arg8[%c0_19, %c0_20] : memref<32x128xf32, #tpu.memory_space<vmem>>, vector<32x128xf32>
    %cst_21 = arith.constant dense<0.000000e+00> : vector<2x128xf32>
    %20 = tpu.matmul %9, %19, %cst_21 {dimension_numbers = #tpu.dot_dimension_numbers<[1], [0], [0], [1], [0, 0, 1, 1], [], []>} : vector<2x32xf32>, vector<32x128xf32>, vector<2x128xf32> -> vector<2x128xf32>
    %21 = arith.addf %18, %20 : vector<2x128xf32>
    %c0_22 = arith.constant 0 : index
    %c0_23 = arith.constant 0 : index
    %22 = vector.load %arg9[%c0_22, %c0_23] : memref<32x128xf32, #tpu.memory_space<vmem>>, vector<32x128xf32>
    %cst_24 = arith.constant dense<0.000000e+00> : vector<2x128xf32>
    %23 = tpu.matmul %3, %22, %cst_24 {dimension_numbers = #tpu.dot_dimension_numbers<[1], [0], [0], [1], [0, 0, 1, 1], [], []>} : vector<2x32xf32>, vector<32x128xf32>, vector<2x128xf32> -> vector<2x128xf32>
    %24 = arith.addf %21, %23 : vector<2x128xf32>
    %c0_25 = arith.constant 0 : index
    %c0_26 = arith.constant 0 : index
    %25 = vector.load %arg10[%c0_25, %c0_26] : memref<1x128xf32, #tpu.memory_space<vmem>>, vector<1x128xf32>
    %26 = vector.broadcast %25 : vector<1x128xf32> to vector<2x128xf32>
    %27 = arith.addf %24, %26 : vector<2x128xf32>
    %28 = vector.extract_strided_slice %27 {offsets = [0, 0], sizes = [2, 96], strides = [1, 1]} : vector<2x128xf32> to vector<2x96xf32>
    %29 = arith.negf %28 : vector<2x96xf32>
    %30 = math.exp %29 : vector<2x96xf32>
    %cst_27 = arith.constant 1.000000e+00 : f32
    %31 = vector.broadcast %cst_27 : f32 to vector<2x96xf32>
    %32 = arith.addf %31, %30 : vector<2x96xf32>
    %33 = arith.divf %31, %32 : vector<2x96xf32>
    %34 = vector.extract_strided_slice %27 {offsets = [0, 96], sizes = [2, 32], strides = [1, 1]} : vector<2x128xf32> to vector<2x32xf32>
    %35 = math.tanh %34 : vector<2x32xf32>
    %36 = vector.extract_strided_slice %33 {offsets = [0, 0], sizes = [2, 32], strides = [1, 1]} : vector<2x96xf32> to vector<2x32xf32>
    %37 = vector.extract_strided_slice %33 {offsets = [0, 32], sizes = [2, 32], strides = [1, 1]} : vector<2x96xf32> to vector<2x32xf32>
    %38 = vector.extract_strided_slice %33 {offsets = [0, 64], sizes = [2, 32], strides = [1, 1]} : vector<2x96xf32> to vector<2x32xf32>
    %39 = arith.mulf %37, %4 : vector<2x32xf32>
    %40 = arith.mulf %36, %35 : vector<2x32xf32>
    %41 = arith.addf %39, %40 : vector<2x32xf32>
    %42 = math.tanh %41 : vector<2x32xf32>
    %43 = arith.mulf %38, %42 : vector<2x32xf32>
    %c0_28 = arith.constant 0 : index
    %c0_29 = arith.constant 0 : index
    %44 = vector.load %arg11[%c0_28, %c0_29] : memref<32x128xf32, #tpu.memory_space<vmem>>, vector<32x128xf32>
    %cst_30 = arith.constant dense<0.000000e+00> : vector<2x128xf32>
    %45 = tpu.matmul %43, %44, %cst_30 {dimension_numbers = #tpu.dot_dimension_numbers<[1], [0], [0], [1], [0, 0, 1, 1], [], []>} : vector<2x32xf32>, vector<32x128xf32>, vector<2x128xf32> -> vector<2x128xf32>
    %c0_31 = arith.constant 0 : index
    %c0_32 = arith.constant 0 : index
    %46 = vector.load %arg12[%c0_31, %c0_32] : memref<32x128xf32, #tpu.memory_space<vmem>>, vector<32x128xf32>
    %cst_33 = arith.constant dense<0.000000e+00> : vector<2x128xf32>
    %47 = tpu.matmul %5, %46, %cst_33 {dimension_numbers = #tpu.dot_dimension_numbers<[1], [0], [0], [1], [0, 0, 1, 1], [], []>} : vector<2x32xf32>, vector<32x128xf32>, vector<2x128xf32> -> vector<2x128xf32>
    %48 = arith.addf %45, %47 : vector<2x128xf32>
    %c0_34 = arith.constant 0 : index
    %c0_35 = arith.constant 0 : index
    %49 = vector.load %arg13[%c0_34, %c0_35] : memref<1x128xf32, #tpu.memory_space<vmem>>, vector<1x128xf32>
    %50 = vector.broadcast %49 : vector<1x128xf32> to vector<2x128xf32>
    %51 = arith.addf %48, %50 : vector<2x128xf32>
    %52 = vector.extract_strided_slice %51 {offsets = [0, 0], sizes = [2, 96], strides = [1, 1]} : vector<2x128xf32> to vector<2x96xf32>
    %53 = arith.negf %52 : vector<2x96xf32>
    %54 = math.exp %53 : vector<2x96xf32>
    %cst_36 = arith.constant 1.000000e+00 : f32
    %55 = vector.broadcast %cst_36 : f32 to vector<2x96xf32>
    %56 = arith.addf %55, %54 : vector<2x96xf32>
    %57 = arith.divf %55, %56 : vector<2x96xf32>
    %58 = vector.extract_strided_slice %51 {offsets = [0, 96], sizes = [2, 32], strides = [1, 1]} : vector<2x128xf32> to vector<2x32xf32>
    %59 = math.tanh %58 : vector<2x32xf32>
    %60 = vector.extract_strided_slice %57 {offsets = [0, 0], sizes = [2, 32], strides = [1, 1]} : vector<2x96xf32> to vector<2x32xf32>
    %61 = vector.extract_strided_slice %57 {offsets = [0, 32], sizes = [2, 32], strides = [1, 1]} : vector<2x96xf32> to vector<2x32xf32>
    %62 = vector.extract_strided_slice %57 {offsets = [0, 64], sizes = [2, 32], strides = [1, 1]} : vector<2x96xf32> to vector<2x32xf32>
    %63 = arith.mulf %61, %6 : vector<2x32xf32>
    %64 = arith.mulf %60, %59 : vector<2x32xf32>
    %65 = arith.addf %63, %64 : vector<2x32xf32>
    %66 = math.tanh %65 : vector<2x32xf32>
    %67 = arith.mulf %62, %66 : vector<2x32xf32>
    %c0_37 = arith.constant 0 : index
    %c0_38 = arith.constant 0 : index
    %68 = vector.load %arg14[%c0_37, %c0_38] : memref<32x128xf32, #tpu.memory_space<vmem>>, vector<32x128xf32>
    %cst_39 = arith.constant dense<0.000000e+00> : vector<2x128xf32>
    %69 = tpu.matmul %67, %68, %cst_39 {dimension_numbers = #tpu.dot_dimension_numbers<[1], [0], [0], [1], [0, 0, 1, 1], [], []>} : vector<2x32xf32>, vector<32x128xf32>, vector<2x128xf32> -> vector<2x128xf32>
    %c0_40 = arith.constant 0 : index
    %c0_41 = arith.constant 0 : index
    %70 = vector.load %arg15[%c0_40, %c0_41] : memref<32x128xf32, #tpu.memory_space<vmem>>, vector<32x128xf32>
    %cst_42 = arith.constant dense<0.000000e+00> : vector<2x128xf32>
    %71 = tpu.matmul %7, %70, %cst_42 {dimension_numbers = #tpu.dot_dimension_numbers<[1], [0], [0], [1], [0, 0, 1, 1], [], []>} : vector<2x32xf32>, vector<32x128xf32>, vector<2x128xf32> -> vector<2x128xf32>
    %72 = arith.addf %69, %71 : vector<2x128xf32>
    %c0_43 = arith.constant 0 : index
    %c0_44 = arith.constant 0 : index
    %73 = vector.load %arg16[%c0_43, %c0_44] : memref<1x128xf32, #tpu.memory_space<vmem>>, vector<1x128xf32>
    %74 = vector.broadcast %73 : vector<1x128xf32> to vector<2x128xf32>
    %75 = arith.addf %72, %74 : vector<2x128xf32>
    %76 = vector.extract_strided_slice %75 {offsets = [0, 0], sizes = [2, 96], strides = [1, 1]} : vector<2x128xf32> to vector<2x96xf32>
    %77 = arith.negf %76 : vector<2x96xf32>
    %78 = math.exp %77 : vector<2x96xf32>
    %cst_45 = arith.constant 1.000000e+00 : f32
    %79 = vector.broadcast %cst_45 : f32 to vector<2x96xf32>
    %80 = arith.addf %79, %78 : vector<2x96xf32>
    %81 = arith.divf %79, %80 : vector<2x96xf32>
    %82 = vector.extract_strided_slice %75 {offsets = [0, 96], sizes = [2, 32], strides = [1, 1]} : vector<2x128xf32> to vector<2x32xf32>
    %83 = math.tanh %82 : vector<2x32xf32>
    %84 = vector.extract_strided_slice %81 {offsets = [0, 0], sizes = [2, 32], strides = [1, 1]} : vector<2x96xf32> to vector<2x32xf32>
    %85 = vector.extract_strided_slice %81 {offsets = [0, 32], sizes = [2, 32], strides = [1, 1]} : vector<2x96xf32> to vector<2x32xf32>
    %86 = vector.extract_strided_slice %81 {offsets = [0, 64], sizes = [2, 32], strides = [1, 1]} : vector<2x96xf32> to vector<2x32xf32>
    %87 = arith.mulf %85, %8 : vector<2x32xf32>
    %88 = arith.mulf %84, %83 : vector<2x32xf32>
    %89 = arith.addf %87, %88 : vector<2x32xf32>
    %90 = math.tanh %89 : vector<2x32xf32>
    %91 = arith.mulf %86, %90 : vector<2x32xf32>
    %92 = vector.shape_cast %91 : vector<2x32xf32> to vector<2x1x32xf32>
    %c0_46 = arith.constant 0 : index
    %c0_47 = arith.constant 0 : index
    %c0_48 = arith.constant 0 : index
    %93 = vector.load %arg2[%c0_46, %c0_47, %c0_48] : memref<2x128x32xf32, #tpu.memory_space<vmem>>, vector<2x128x32xf32>
    "tpu.trace_start"() <{level = 10 : i32, message = "bqk,btk->bqt"}> : () -> ()
    %cst_49 = arith.constant dense<0.000000e+00> : vector<2x1x128xf32>
    %94 = tpu.matmul %92, %93, %cst_49 {dimension_numbers = #tpu.dot_dimension_numbers<[2], [2], [1], [1], [0, 0, 0, 1, 1, 1], [0], [0]>} : vector<2x1x32xf32>, vector<2x128x32xf32>, vector<2x1x128xf32> -> vector<2x1x128xf32>
    "tpu.trace_stop"() : () -> ()
    %95 = vector.shape_cast %94 : vector<2x1x128xf32> to vector<2x128xf32>
    %c0_50 = arith.constant 0 : index
    %c0_51 = arith.constant 0 : index
    %96 = vector.load %arg4[%c0_50, %c0_51] : memref<2x128xf32, #tpu.memory_space<vmem>>, vector<2x128xf32>
    %97 = arith.addf %95, %96 : vector<2x128xf32>
    %cst_52 = arith.constant dense<0xFF800000> : vector<2xf32>
    %98 = vector.multi_reduction <maximumf>, %97, %cst_52 [1] : vector<2x128xf32> to vector<2xf32>
    %99 = vector.shape_cast %98 : vector<2xf32> to vector<2x1xf32>
    %100 = vector.broadcast %99 : vector<2x1xf32> to vector<2x128xf32>
    %101 = arith.subf %97, %100 : vector<2x128xf32>
    %102 = math.exp %101 : vector<2x128xf32>
    %cst_53 = arith.constant dense<0.000000e+00> : vector<2xf32>
    %103 = vector.multi_reduction <add>, %102, %cst_53 [1] : vector<2x128xf32> to vector<2xf32>
    %104 = vector.shape_cast %103 : vector<2xf32> to vector<2x1xf32>
    %105 = tpu.reciprocal %104 {approx = true} : vector<2x1xf32> -> vector<2x1xf32>
    %106 = arith.mulf %104, %105 : vector<2x1xf32>
    %cst_54 = arith.constant 2.000000e+00 : f32
    %107 = vector.broadcast %cst_54 : f32 to vector<2x1xf32>
    %108 = arith.subf %107, %106 : vector<2x1xf32>
    %109 = arith.mulf %105, %108 : vector<2x1xf32>
    %110 = vector.broadcast %109 : vector<2x1xf32> to vector<2x128xf32>
    %111 = arith.mulf %102, %110 : vector<2x128xf32>
    %112 = vector.shape_cast %111 : vector<2x128xf32> to vector<2x1x128xf32>
    %c0_55 = arith.constant 0 : index
    %c0_56 = arith.constant 0 : index
    %c0_57 = arith.constant 0 : index
    %113 = vector.load %arg3[%c0_55, %c0_56, %c0_57] : memref<2x128x32xf32, #tpu.memory_space<vmem>>, vector<2x128x32xf32>
    "tpu.trace_start"() <{level = 10 : i32, message = "bqt,btk->bqk"}> : () -> ()
    %cst_58 = arith.constant dense<0.000000e+00> : vector<2x1x32xf32>
    %114 = tpu.matmul %112, %113, %cst_58 {dimension_numbers = #tpu.dot_dimension_numbers<[2], [1], [1], [2], [0, 0, 0, 1, 1, 2], [0], [0]>} : vector<2x1x128xf32>, vector<2x128x32xf32>, vector<2x1x32xf32> -> vector<2x1x32xf32>
    "tpu.trace_stop"() : () -> ()
    %115 = vector.shape_cast %114 : vector<2x1x32xf32> to vector<2x32xf32>
    %c0_59 = arith.constant 0 : index
    %c0_60 = arith.constant 0 : index
    %116 = vector.load %arg6[%c0_59, %c0_60] : memref<128x32xf32, #tpu.memory_space<vmem>>, vector<128x32xf32>
    %cst_61 = arith.constant dense<0.000000e+00> : vector<2x128xf32>
    %117 = tpu.matmul %91, %116, %cst_61 {dimension_numbers = #tpu.dot_dimension_numbers<[1], [1], [0], [0], [0, 0, 1, 0], [], []>} : vector<2x32xf32>, vector<128x32xf32>, vector<2x128xf32> -> vector<2x128xf32>
    %c0_62 = arith.constant 0 : index
    %c0_63 = arith.constant 0 : index
    %118 = vector.load %arg7[%c0_62, %c0_63] : memref<128x32xf32, #tpu.memory_space<vmem>>, vector<128x32xf32>
    %cst_64 = arith.constant dense<0.000000e+00> : vector<2x128xf32>
    %119 = tpu.matmul %115, %118, %cst_64 {dimension_numbers = #tpu.dot_dimension_numbers<[1], [1], [0], [0], [0, 0, 1, 0], [], []>} : vector<2x32xf32>, vector<128x32xf32>, vector<2x128xf32> -> vector<2x128xf32>
    %120 = arith.addf %117, %119 : vector<2x128xf32>
    %c0_65 = arith.constant 0 : index
    %c0_66 = arith.constant 0 : index
    %121 = vector.load %arg17[%c0_65, %c0_66] : memref<1x128xf32, #tpu.memory_space<vmem>>, vector<1x128xf32>
    %122 = vector.broadcast %121 : vector<1x128xf32> to vector<2x128xf32>
    %123 = arith.addf %120, %122 : vector<2x128xf32>
    %cst_67 = arith.constant dense<0xFF800000> : vector<2xf32>
    %124 = vector.multi_reduction <maximumf>, %123, %cst_67 [1] : vector<2x128xf32> to vector<2xf32>
    %125 = vector.shape_cast %124 : vector<2xf32> to vector<2x1xf32>
    %126 = vector.broadcast %125 : vector<2x1xf32> to vector<2x128xf32>
    %127 = arith.cmpf oeq, %123, %126 : vector<2x128xf32>
    %128 = arith.extui %127 : vector<2x128xi1> to vector<2x128xi32>
    %129 = arith.sitofp %128 : vector<2x128xi32> to vector<2x128xf32>
    %c0_68 = arith.constant 0 : index
    %c0_69 = arith.constant 0 : index
    %130 = vector.load %arg5[%c0_68, %c0_69] : memref<128x128xf32, #tpu.memory_space<vmem>>, vector<128x128xf32>
    %cst_70 = arith.constant dense<0.000000e+00> : vector<2x128xf32>
    %131 = tpu.matmul %129, %130, %cst_70 {dimension_numbers = #tpu.dot_dimension_numbers<[1], [0], [0], [1], [0, 0, 1, 1], [], []>} : vector<2x128xf32>, vector<128x128xf32>, vector<2x128xf32> -> vector<2x128xf32>
    %c0_71 = arith.constant 0 : index
    %c0_72 = arith.constant 0 : index
    %132 = vector.load %arg8[%c0_71, %c0_72] : memref<32x128xf32, #tpu.memory_space<vmem>>, vector<32x128xf32>
    %cst_73 = arith.constant dense<0.000000e+00> : vector<2x128xf32>
    %133 = tpu.matmul %115, %132, %cst_73 {dimension_numbers = #tpu.dot_dimension_numbers<[1], [0], [0], [1], [0, 0, 1, 1], [], []>} : vector<2x32xf32>, vector<32x128xf32>, vector<2x128xf32> -> vector<2x128xf32>
    %134 = arith.addf %131, %133 : vector<2x128xf32>
    %c0_74 = arith.constant 0 : index
    %c0_75 = arith.constant 0 : index
    %135 = vector.load %arg9[%c0_74, %c0_75] : memref<32x128xf32, #tpu.memory_space<vmem>>, vector<32x128xf32>
    %cst_76 = arith.constant dense<0.000000e+00> : vector<2x128xf32>
    %136 = tpu.matmul %43, %135, %cst_76 {dimension_numbers = #tpu.dot_dimension_numbers<[1], [0], [0], [1], [0, 0, 1, 1], [], []>} : vector<2x32xf32>, vector<32x128xf32>, vector<2x128xf32> -> vector<2x128xf32>
    %137 = arith.addf %134, %136 : vector<2x128xf32>
    %c0_77 = arith.constant 0 : index
    %c0_78 = arith.constant 0 : index
    %138 = vector.load %arg10[%c0_77, %c0_78] : memref<1x128xf32, #tpu.memory_space<vmem>>, vector<1x128xf32>
    %139 = vector.broadcast %138 : vector<1x128xf32> to vector<2x128xf32>
    %140 = arith.addf %137, %139 : vector<2x128xf32>
    %141 = vector.extract_strided_slice %140 {offsets = [0, 0], sizes = [2, 96], strides = [1, 1]} : vector<2x128xf32> to vector<2x96xf32>
    %142 = arith.negf %141 : vector<2x96xf32>
    %143 = math.exp %142 : vector<2x96xf32>
    %cst_79 = arith.constant 1.000000e+00 : f32
    %144 = vector.broadcast %cst_79 : f32 to vector<2x96xf32>
    %145 = arith.addf %144, %143 : vector<2x96xf32>
    %146 = arith.divf %144, %145 : vector<2x96xf32>
    %147 = vector.extract_strided_slice %140 {offsets = [0, 96], sizes = [2, 32], strides = [1, 1]} : vector<2x128xf32> to vector<2x32xf32>
    %148 = math.tanh %147 : vector<2x32xf32>
    %149 = vector.extract_strided_slice %146 {offsets = [0, 0], sizes = [2, 32], strides = [1, 1]} : vector<2x96xf32> to vector<2x32xf32>
    %150 = vector.extract_strided_slice %146 {offsets = [0, 32], sizes = [2, 32], strides = [1, 1]} : vector<2x96xf32> to vector<2x32xf32>
    %151 = vector.extract_strided_slice %146 {offsets = [0, 64], sizes = [2, 32], strides = [1, 1]} : vector<2x96xf32> to vector<2x32xf32>
    %152 = arith.mulf %150, %41 : vector<2x32xf32>
    %153 = arith.mulf %149, %148 : vector<2x32xf32>
    %154 = arith.addf %152, %153 : vector<2x32xf32>
    %155 = math.tanh %154 : vector<2x32xf32>
    %156 = arith.mulf %151, %155 : vector<2x32xf32>
    %c0_80 = arith.constant 0 : index
    %c0_81 = arith.constant 0 : index
    %157 = vector.load %arg11[%c0_80, %c0_81] : memref<32x128xf32, #tpu.memory_space<vmem>>, vector<32x128xf32>
    %cst_82 = arith.constant dense<0.000000e+00> : vector<2x128xf32>
    %158 = tpu.matmul %156, %157, %cst_82 {dimension_numbers = #tpu.dot_dimension_numbers<[1], [0], [0], [1], [0, 0, 1, 1], [], []>} : vector<2x32xf32>, vector<32x128xf32>, vector<2x128xf32> -> vector<2x128xf32>
    %c0_83 = arith.constant 0 : index
    %c0_84 = arith.constant 0 : index
    %159 = vector.load %arg12[%c0_83, %c0_84] : memref<32x128xf32, #tpu.memory_space<vmem>>, vector<32x128xf32>
    %cst_85 = arith.constant dense<0.000000e+00> : vector<2x128xf32>
    %160 = tpu.matmul %67, %159, %cst_85 {dimension_numbers = #tpu.dot_dimension_numbers<[1], [0], [0], [1], [0, 0, 1, 1], [], []>} : vector<2x32xf32>, vector<32x128xf32>, vector<2x128xf32> -> vector<2x128xf32>
    %161 = arith.addf %158, %160 : vector<2x128xf32>
    %c0_86 = arith.constant 0 : index
    %c0_87 = arith.constant 0 : index
    %162 = vector.load %arg13[%c0_86, %c0_87] : memref<1x128xf32, #tpu.memory_space<vmem>>, vector<1x128xf32>
    %163 = vector.broadcast %162 : vector<1x128xf32> to vector<2x128xf32>
    %164 = arith.addf %161, %163 : vector<2x128xf32>
    %165 = vector.extract_strided_slice %164 {offsets = [0, 0], sizes = [2, 96], strides = [1, 1]} : vector<2x128xf32> to vector<2x96xf32>
    %166 = arith.negf %165 : vector<2x96xf32>
    %167 = math.exp %166 : vector<2x96xf32>
    %cst_88 = arith.constant 1.000000e+00 : f32
    %168 = vector.broadcast %cst_88 : f32 to vector<2x96xf32>
    %169 = arith.addf %168, %167 : vector<2x96xf32>
    %170 = arith.divf %168, %169 : vector<2x96xf32>
    %171 = vector.extract_strided_slice %164 {offsets = [0, 96], sizes = [2, 32], strides = [1, 1]} : vector<2x128xf32> to vector<2x32xf32>
    %172 = math.tanh %171 : vector<2x32xf32>
    %173 = vector.extract_strided_slice %170 {offsets = [0, 0], sizes = [2, 32], strides = [1, 1]} : vector<2x96xf32> to vector<2x32xf32>
    %174 = vector.extract_strided_slice %170 {offsets = [0, 32], sizes = [2, 32], strides = [1, 1]} : vector<2x96xf32> to vector<2x32xf32>
    %175 = vector.extract_strided_slice %170 {offsets = [0, 64], sizes = [2, 32], strides = [1, 1]} : vector<2x96xf32> to vector<2x32xf32>
    %176 = arith.mulf %174, %65 : vector<2x32xf32>
    %177 = arith.mulf %173, %172 : vector<2x32xf32>
    %178 = arith.addf %176, %177 : vector<2x32xf32>
    %179 = math.tanh %178 : vector<2x32xf32>
    %180 = arith.mulf %175, %179 : vector<2x32xf32>
    %c0_89 = arith.constant 0 : index
    %c0_90 = arith.constant 0 : index
    %181 = vector.load %arg14[%c0_89, %c0_90] : memref<32x128xf32, #tpu.memory_space<vmem>>, vector<32x128xf32>
    %cst_91 = arith.constant dense<0.000000e+00> : vector<2x128xf32>
    %182 = tpu.matmul %180, %181, %cst_91 {dimension_numbers = #tpu.dot_dimension_numbers<[1], [0], [0], [1], [0, 0, 1, 1], [], []>} : vector<2x32xf32>, vector<32x128xf32>, vector<2x128xf32> -> vector<2x128xf32>
    %c0_92 = arith.constant 0 : index
    %c0_93 = arith.constant 0 : index
    %183 = vector.load %arg15[%c0_92, %c0_93] : memref<32x128xf32, #tpu.memory_space<vmem>>, vector<32x128xf32>
    %cst_94 = arith.constant dense<0.000000e+00> : vector<2x128xf32>
    %184 = tpu.matmul %91, %183, %cst_94 {dimension_numbers = #tpu.dot_dimension_numbers<[1], [0], [0], [1], [0, 0, 1, 1], [], []>} : vector<2x32xf32>, vector<32x128xf32>, vector<2x128xf32> -> vector<2x128xf32>
    %185 = arith.addf %182, %184 : vector<2x128xf32>
    %c0_95 = arith.constant 0 : index
    %c0_96 = arith.constant 0 : index
    %186 = vector.load %arg16[%c0_95, %c0_96] : memref<1x128xf32, #tpu.memory_space<vmem>>, vector<1x128xf32>
    %187 = vector.broadcast %186 : vector<1x128xf32> to vector<2x128xf32>
    %188 = arith.addf %185, %187 : vector<2x128xf32>
    %189 = vector.extract_strided_slice %188 {offsets = [0, 0], sizes = [2, 96], strides = [1, 1]} : vector<2x128xf32> to vector<2x96xf32>
    %190 = arith.negf %189 : vector<2x96xf32>
    %191 = math.exp %190 : vector<2x96xf32>
    %cst_97 = arith.constant 1.000000e+00 : f32
    %192 = vector.broadcast %cst_97 : f32 to vector<2x96xf32>
    %193 = arith.addf %192, %191 : vector<2x96xf32>
    %194 = arith.divf %192, %193 : vector<2x96xf32>
    %195 = vector.extract_strided_slice %188 {offsets = [0, 96], sizes = [2, 32], strides = [1, 1]} : vector<2x128xf32> to vector<2x32xf32>
    %196 = math.tanh %195 : vector<2x32xf32>
    %197 = vector.extract_strided_slice %194 {offsets = [0, 0], sizes = [2, 32], strides = [1, 1]} : vector<2x96xf32> to vector<2x32xf32>
    %198 = vector.extract_strided_slice %194 {offsets = [0, 32], sizes = [2, 32], strides = [1, 1]} : vector<2x96xf32> to vector<2x32xf32>
    %199 = vector.extract_strided_slice %194 {offsets = [0, 64], sizes = [2, 32], strides = [1, 1]} : vector<2x96xf32> to vector<2x32xf32>
    %200 = arith.mulf %198, %89 : vector<2x32xf32>
    %201 = arith.mulf %197, %196 : vector<2x32xf32>
    %202 = arith.addf %200, %201 : vector<2x32xf32>
    %203 = math.tanh %202 : vector<2x32xf32>
    %204 = arith.mulf %199, %203 : vector<2x32xf32>
    %205 = vector.shape_cast %204 : vector<2x32xf32> to vector<2x1x32xf32>
    %c0_98 = arith.constant 0 : index
    %c0_99 = arith.constant 0 : index
    %c0_100 = arith.constant 0 : index
    %206 = vector.load %arg2[%c0_98, %c0_99, %c0_100] : memref<2x128x32xf32, #tpu.memory_space<vmem>>, vector<2x128x32xf32>
    "tpu.trace_start"() <{level = 10 : i32, message = "bqk,btk->bqt"}> : () -> ()
    %cst_101 = arith.constant dense<0.000000e+00> : vector<2x1x128xf32>
    %207 = tpu.matmul %205, %206, %cst_101 {dimension_numbers = #tpu.dot_dimension_numbers<[2], [2], [1], [1], [0, 0, 0, 1, 1, 1], [0], [0]>} : vector<2x1x32xf32>, vector<2x128x32xf32>, vector<2x1x128xf32> -> vector<2x1x128xf32>
    "tpu.trace_stop"() : () -> ()
    %208 = vector.shape_cast %207 : vector<2x1x128xf32> to vector<2x128xf32>
    %c0_102 = arith.constant 0 : index
    %c0_103 = arith.constant 0 : index
    %209 = vector.load %arg4[%c0_102, %c0_103] : memref<2x128xf32, #tpu.memory_space<vmem>>, vector<2x128xf32>
    %210 = arith.addf %208, %209 : vector<2x128xf32>
    %cst_104 = arith.constant dense<0xFF800000> : vector<2xf32>
    %211 = vector.multi_reduction <maximumf>, %210, %cst_104 [1] : vector<2x128xf32> to vector<2xf32>
    %212 = vector.shape_cast %211 : vector<2xf32> to vector<2x1xf32>
    %213 = vector.broadcast %212 : vector<2x1xf32> to vector<2x128xf32>
    %214 = arith.subf %210, %213 : vector<2x128xf32>
    %215 = math.exp %214 : vector<2x128xf32>
    %cst_105 = arith.constant dense<0.000000e+00> : vector<2xf32>
    %216 = vector.multi_reduction <add>, %215, %cst_105 [1] : vector<2x128xf32> to vector<2xf32>
    %217 = vector.shape_cast %216 : vector<2xf32> to vector<2x1xf32>
    %218 = tpu.reciprocal %217 {approx = true} : vector<2x1xf32> -> vector<2x1xf32>
    %219 = arith.mulf %217, %218 : vector<2x1xf32>
    %cst_106 = arith.constant 2.000000e+00 : f32
    %220 = vector.broadcast %cst_106 : f32 to vector<2x1xf32>
    %221 = arith.subf %220, %219 : vector<2x1xf32>
    %222 = arith.mulf %218, %221 : vector<2x1xf32>
    %223 = vector.broadcast %222 : vector<2x1xf32> to vector<2x128xf32>
    %224 = arith.mulf %215, %223 : vector<2x128xf32>
    %225 = vector.shape_cast %224 : vector<2x128xf32> to vector<2x1x128xf32>
    %c0_107 = arith.constant 0 : index
    %c0_108 = arith.constant 0 : index
    %c0_109 = arith.constant 0 : index
    %226 = vector.load %arg3[%c0_107, %c0_108, %c0_109] : memref<2x128x32xf32, #tpu.memory_space<vmem>>, vector<2x128x32xf32>
    "tpu.trace_start"() <{level = 10 : i32, message = "bqt,btk->bqk"}> : () -> ()
    %cst_110 = arith.constant dense<0.000000e+00> : vector<2x1x32xf32>
    %227 = tpu.matmul %225, %226, %cst_110 {dimension_numbers = #tpu.dot_dimension_numbers<[2], [1], [1], [2], [0, 0, 0, 1, 1, 2], [0], [0]>} : vector<2x1x128xf32>, vector<2x128x32xf32>, vector<2x1x32xf32> -> vector<2x1x32xf32>
    "tpu.trace_stop"() : () -> ()
    %228 = vector.shape_cast %227 : vector<2x1x32xf32> to vector<2x32xf32>
    %c0_111 = arith.constant 0 : index
    %c0_112 = arith.constant 0 : index
    %229 = vector.load %arg6[%c0_111, %c0_112] : memref<128x32xf32, #tpu.memory_space<vmem>>, vector<128x32xf32>
    %cst_113 = arith.constant dense<0.000000e+00> : vector<2x128xf32>
    %230 = tpu.matmul %204, %229, %cst_113 {dimension_numbers = #tpu.dot_dimension_numbers<[1], [1], [0], [0], [0, 0, 1, 0], [], []>} : vector<2x32xf32>, vector<128x32xf32>, vector<2x128xf32> -> vector<2x128xf32>
    %c0_114 = arith.constant 0 : index
    %c0_115 = arith.constant 0 : index
    %231 = vector.load %arg7[%c0_114, %c0_115] : memref<128x32xf32, #tpu.memory_space<vmem>>, vector<128x32xf32>
    %cst_116 = arith.constant dense<0.000000e+00> : vector<2x128xf32>
    %232 = tpu.matmul %228, %231, %cst_116 {dimension_numbers = #tpu.dot_dimension_numbers<[1], [1], [0], [0], [0, 0, 1, 0], [], []>} : vector<2x32xf32>, vector<128x32xf32>, vector<2x128xf32> -> vector<2x128xf32>
    %233 = arith.addf %230, %232 : vector<2x128xf32>
    %c0_117 = arith.constant 0 : index
    %c0_118 = arith.constant 0 : index
    %234 = vector.load %arg17[%c0_117, %c0_118] : memref<1x128xf32, #tpu.memory_space<vmem>>, vector<1x128xf32>
    %235 = vector.broadcast %234 : vector<1x128xf32> to vector<2x128xf32>
    %236 = arith.addf %233, %235 : vector<2x128xf32>
    %cst_119 = arith.constant dense<0xFF800000> : vector<2xf32>
    %237 = vector.multi_reduction <maximumf>, %236, %cst_119 [1] : vector<2x128xf32> to vector<2xf32>
    %238 = vector.shape_cast %237 : vector<2xf32> to vector<2x1xf32>
    %239 = vector.broadcast %238 : vector<2x1xf32> to vector<2x128xf32>
    %240 = arith.cmpf oeq, %236, %239 : vector<2x128xf32>
    %241 = arith.extui %240 : vector<2x128xi1> to vector<2x128xi32>
    %242 = arith.sitofp %241 : vector<2x128xi32> to vector<2x128xf32>
    %c0_120 = arith.constant 0 : index
    %c0_121 = arith.constant 0 : index
    %243 = vector.load %arg5[%c0_120, %c0_121] : memref<128x128xf32, #tpu.memory_space<vmem>>, vector<128x128xf32>
    %cst_122 = arith.constant dense<0.000000e+00> : vector<2x128xf32>
    %244 = tpu.matmul %242, %243, %cst_122 {dimension_numbers = #tpu.dot_dimension_numbers<[1], [0], [0], [1], [0, 0, 1, 1], [], []>} : vector<2x128xf32>, vector<128x128xf32>, vector<2x128xf32> -> vector<2x128xf32>
    %c0_123 = arith.constant 0 : index
    %c0_124 = arith.constant 0 : index
    %245 = vector.load %arg8[%c0_123, %c0_124] : memref<32x128xf32, #tpu.memory_space<vmem>>, vector<32x128xf32>
    %cst_125 = arith.constant dense<0.000000e+00> : vector<2x128xf32>
    %246 = tpu.matmul %228, %245, %cst_125 {dimension_numbers = #tpu.dot_dimension_numbers<[1], [0], [0], [1], [0, 0, 1, 1], [], []>} : vector<2x32xf32>, vector<32x128xf32>, vector<2x128xf32> -> vector<2x128xf32>
    %247 = arith.addf %244, %246 : vector<2x128xf32>
    %c0_126 = arith.constant 0 : index
    %c0_127 = arith.constant 0 : index
    %248 = vector.load %arg9[%c0_126, %c0_127] : memref<32x128xf32, #tpu.memory_space<vmem>>, vector<32x128xf32>
    %cst_128 = arith.constant dense<0.000000e+00> : vector<2x128xf32>
    %249 = tpu.matmul %156, %248, %cst_128 {dimension_numbers = #tpu.dot_dimension_numbers<[1], [0], [0], [1], [0, 0, 1, 1], [], []>} : vector<2x32xf32>, vector<32x128xf32>, vector<2x128xf32> -> vector<2x128xf32>
    %250 = arith.addf %247, %249 : vector<2x128xf32>
    %c0_129 = arith.constant 0 : index
    %c0_130 = arith.constant 0 : index
    %251 = vector.load %arg10[%c0_129, %c0_130] : memref<1x128xf32, #tpu.memory_space<vmem>>, vector<1x128xf32>
    %252 = vector.broadcast %251 : vector<1x128xf32> to vector<2x128xf32>
    %253 = arith.addf %250, %252 : vector<2x128xf32>
    %254 = vector.extract_strided_slice %253 {offsets = [0, 0], sizes = [2, 96], strides = [1, 1]} : vector<2x128xf32> to vector<2x96xf32>
    %255 = arith.negf %254 : vector<2x96xf32>
    %256 = math.exp %255 : vector<2x96xf32>
    %cst_131 = arith.constant 1.000000e+00 : f32
    %257 = vector.broadcast %cst_131 : f32 to vector<2x96xf32>
    %258 = arith.addf %257, %256 : vector<2x96xf32>
    %259 = arith.divf %257, %258 : vector<2x96xf32>
    %260 = vector.extract_strided_slice %253 {offsets = [0, 96], sizes = [2, 32], strides = [1, 1]} : vector<2x128xf32> to vector<2x32xf32>
    %261 = math.tanh %260 : vector<2x32xf32>
    %262 = vector.extract_strided_slice %259 {offsets = [0, 0], sizes = [2, 32], strides = [1, 1]} : vector<2x96xf32> to vector<2x32xf32>
    %263 = vector.extract_strided_slice %259 {offsets = [0, 32], sizes = [2, 32], strides = [1, 1]} : vector<2x96xf32> to vector<2x32xf32>
    %264 = vector.extract_strided_slice %259 {offsets = [0, 64], sizes = [2, 32], strides = [1, 1]} : vector<2x96xf32> to vector<2x32xf32>
    %265 = arith.mulf %263, %154 : vector<2x32xf32>
    %266 = arith.mulf %262, %261 : vector<2x32xf32>
    %267 = arith.addf %265, %266 : vector<2x32xf32>
    %268 = math.tanh %267 : vector<2x32xf32>
    %269 = arith.mulf %264, %268 : vector<2x32xf32>
    %c0_132 = arith.constant 0 : index
    %c0_133 = arith.constant 0 : index
    %270 = vector.load %arg11[%c0_132, %c0_133] : memref<32x128xf32, #tpu.memory_space<vmem>>, vector<32x128xf32>
    %cst_134 = arith.constant dense<0.000000e+00> : vector<2x128xf32>
    %271 = tpu.matmul %269, %270, %cst_134 {dimension_numbers = #tpu.dot_dimension_numbers<[1], [0], [0], [1], [0, 0, 1, 1], [], []>} : vector<2x32xf32>, vector<32x128xf32>, vector<2x128xf32> -> vector<2x128xf32>
    %c0_135 = arith.constant 0 : index
    %c0_136 = arith.constant 0 : index
    %272 = vector.load %arg12[%c0_135, %c0_136] : memref<32x128xf32, #tpu.memory_space<vmem>>, vector<32x128xf32>
    %cst_137 = arith.constant dense<0.000000e+00> : vector<2x128xf32>
    %273 = tpu.matmul %180, %272, %cst_137 {dimension_numbers = #tpu.dot_dimension_numbers<[1], [0], [0], [1], [0, 0, 1, 1], [], []>} : vector<2x32xf32>, vector<32x128xf32>, vector<2x128xf32> -> vector<2x128xf32>
    %274 = arith.addf %271, %273 : vector<2x128xf32>
    %c0_138 = arith.constant 0 : index
    %c0_139 = arith.constant 0 : index
    %275 = vector.load %arg13[%c0_138, %c0_139] : memref<1x128xf32, #tpu.memory_space<vmem>>, vector<1x128xf32>
    %276 = vector.broadcast %275 : vector<1x128xf32> to vector<2x128xf32>
    %277 = arith.addf %274, %276 : vector<2x128xf32>
    %278 = vector.extract_strided_slice %277 {offsets = [0, 0], sizes = [2, 96], strides = [1, 1]} : vector<2x128xf32> to vector<2x96xf32>
    %279 = arith.negf %278 : vector<2x96xf32>
    %280 = math.exp %279 : vector<2x96xf32>
    %cst_140 = arith.constant 1.000000e+00 : f32
    %281 = vector.broadcast %cst_140 : f32 to vector<2x96xf32>
    %282 = arith.addf %281, %280 : vector<2x96xf32>
    %283 = arith.divf %281, %282 : vector<2x96xf32>
    %284 = vector.extract_strided_slice %277 {offsets = [0, 96], sizes = [2, 32], strides = [1, 1]} : vector<2x128xf32> to vector<2x32xf32>
    %285 = math.tanh %284 : vector<2x32xf32>
    %286 = vector.extract_strided_slice %283 {offsets = [0, 0], sizes = [2, 32], strides = [1, 1]} : vector<2x96xf32> to vector<2x32xf32>
    %287 = vector.extract_strided_slice %283 {offsets = [0, 32], sizes = [2, 32], strides = [1, 1]} : vector<2x96xf32> to vector<2x32xf32>
    %288 = vector.extract_strided_slice %283 {offsets = [0, 64], sizes = [2, 32], strides = [1, 1]} : vector<2x96xf32> to vector<2x32xf32>
    %289 = arith.mulf %287, %178 : vector<2x32xf32>
    %290 = arith.mulf %286, %285 : vector<2x32xf32>
    %291 = arith.addf %289, %290 : vector<2x32xf32>
    %292 = math.tanh %291 : vector<2x32xf32>
    %293 = arith.mulf %288, %292 : vector<2x32xf32>
    %c0_141 = arith.constant 0 : index
    %c0_142 = arith.constant 0 : index
    %294 = vector.load %arg14[%c0_141, %c0_142] : memref<32x128xf32, #tpu.memory_space<vmem>>, vector<32x128xf32>
    %cst_143 = arith.constant dense<0.000000e+00> : vector<2x128xf32>
    %295 = tpu.matmul %293, %294, %cst_143 {dimension_numbers = #tpu.dot_dimension_numbers<[1], [0], [0], [1], [0, 0, 1, 1], [], []>} : vector<2x32xf32>, vector<32x128xf32>, vector<2x128xf32> -> vector<2x128xf32>
    %c0_144 = arith.constant 0 : index
    %c0_145 = arith.constant 0 : index
    %296 = vector.load %arg15[%c0_144, %c0_145] : memref<32x128xf32, #tpu.memory_space<vmem>>, vector<32x128xf32>
    %cst_146 = arith.constant dense<0.000000e+00> : vector<2x128xf32>
    %297 = tpu.matmul %204, %296, %cst_146 {dimension_numbers = #tpu.dot_dimension_numbers<[1], [0], [0], [1], [0, 0, 1, 1], [], []>} : vector<2x32xf32>, vector<32x128xf32>, vector<2x128xf32> -> vector<2x128xf32>
    %298 = arith.addf %295, %297 : vector<2x128xf32>
    %c0_147 = arith.constant 0 : index
    %c0_148 = arith.constant 0 : index
    %299 = vector.load %arg16[%c0_147, %c0_148] : memref<1x128xf32, #tpu.memory_space<vmem>>, vector<1x128xf32>
    %300 = vector.broadcast %299 : vector<1x128xf32> to vector<2x128xf32>
    %301 = arith.addf %298, %300 : vector<2x128xf32>
    %302 = vector.extract_strided_slice %301 {offsets = [0, 0], sizes = [2, 96], strides = [1, 1]} : vector<2x128xf32> to vector<2x96xf32>
    %303 = arith.negf %302 : vector<2x96xf32>
    %304 = math.exp %303 : vector<2x96xf32>
    %cst_149 = arith.constant 1.000000e+00 : f32
    %305 = vector.broadcast %cst_149 : f32 to vector<2x96xf32>
    %306 = arith.addf %305, %304 : vector<2x96xf32>
    %307 = arith.divf %305, %306 : vector<2x96xf32>
    %308 = vector.extract_strided_slice %301 {offsets = [0, 96], sizes = [2, 32], strides = [1, 1]} : vector<2x128xf32> to vector<2x32xf32>
    %309 = math.tanh %308 : vector<2x32xf32>
    %310 = vector.extract_strided_slice %307 {offsets = [0, 0], sizes = [2, 32], strides = [1, 1]} : vector<2x96xf32> to vector<2x32xf32>
    %311 = vector.extract_strided_slice %307 {offsets = [0, 32], sizes = [2, 32], strides = [1, 1]} : vector<2x96xf32> to vector<2x32xf32>
    %312 = vector.extract_strided_slice %307 {offsets = [0, 64], sizes = [2, 32], strides = [1, 1]} : vector<2x96xf32> to vector<2x32xf32>
    %313 = arith.mulf %311, %202 : vector<2x32xf32>
    %314 = arith.mulf %310, %309 : vector<2x32xf32>
    %315 = arith.addf %313, %314 : vector<2x32xf32>
    %316 = math.tanh %315 : vector<2x32xf32>
    %317 = arith.mulf %312, %316 : vector<2x32xf32>
    %318 = vector.shape_cast %317 : vector<2x32xf32> to vector<2x1x32xf32>
    %c0_150 = arith.constant 0 : index
    %c0_151 = arith.constant 0 : index
    %c0_152 = arith.constant 0 : index
    %319 = vector.load %arg2[%c0_150, %c0_151, %c0_152] : memref<2x128x32xf32, #tpu.memory_space<vmem>>, vector<2x128x32xf32>
    "tpu.trace_start"() <{level = 10 : i32, message = "bqk,btk->bqt"}> : () -> ()
    %cst_153 = arith.constant dense<0.000000e+00> : vector<2x1x128xf32>
    %320 = tpu.matmul %318, %319, %cst_153 {dimension_numbers = #tpu.dot_dimension_numbers<[2], [2], [1], [1], [0, 0, 0, 1, 1, 1], [0], [0]>} : vector<2x1x32xf32>, vector<2x128x32xf32>, vector<2x1x128xf32> -> vector<2x1x128xf32>
    "tpu.trace_stop"() : () -> ()
    %321 = vector.shape_cast %320 : vector<2x1x128xf32> to vector<2x128xf32>
    %c0_154 = arith.constant 0 : index
    %c0_155 = arith.constant 0 : index
    %322 = vector.load %arg4[%c0_154, %c0_155] : memref<2x128xf32, #tpu.memory_space<vmem>>, vector<2x128xf32>
    %323 = arith.addf %321, %322 : vector<2x128xf32>
    %cst_156 = arith.constant dense<0xFF800000> : vector<2xf32>
    %324 = vector.multi_reduction <maximumf>, %323, %cst_156 [1] : vector<2x128xf32> to vector<2xf32>
    %325 = vector.shape_cast %324 : vector<2xf32> to vector<2x1xf32>
    %326 = vector.broadcast %325 : vector<2x1xf32> to vector<2x128xf32>
    %327 = arith.subf %323, %326 : vector<2x128xf32>
    %328 = math.exp %327 : vector<2x128xf32>
    %cst_157 = arith.constant dense<0.000000e+00> : vector<2xf32>
    %329 = vector.multi_reduction <add>, %328, %cst_157 [1] : vector<2x128xf32> to vector<2xf32>
    %330 = vector.shape_cast %329 : vector<2xf32> to vector<2x1xf32>
    %331 = tpu.reciprocal %330 {approx = true} : vector<2x1xf32> -> vector<2x1xf32>
    %332 = arith.mulf %330, %331 : vector<2x1xf32>
    %cst_158 = arith.constant 2.000000e+00 : f32
    %333 = vector.broadcast %cst_158 : f32 to vector<2x1xf32>
    %334 = arith.subf %333, %332 : vector<2x1xf32>
    %335 = arith.mulf %331, %334 : vector<2x1xf32>
    %336 = vector.broadcast %335 : vector<2x1xf32> to vector<2x128xf32>
    %337 = arith.mulf %328, %336 : vector<2x128xf32>
    %338 = vector.shape_cast %337 : vector<2x128xf32> to vector<2x1x128xf32>
    %c0_159 = arith.constant 0 : index
    %c0_160 = arith.constant 0 : index
    %c0_161 = arith.constant 0 : index
    %339 = vector.load %arg3[%c0_159, %c0_160, %c0_161] : memref<2x128x32xf32, #tpu.memory_space<vmem>>, vector<2x128x32xf32>
    "tpu.trace_start"() <{level = 10 : i32, message = "bqt,btk->bqk"}> : () -> ()
    %cst_162 = arith.constant dense<0.000000e+00> : vector<2x1x32xf32>
    %340 = tpu.matmul %338, %339, %cst_162 {dimension_numbers = #tpu.dot_dimension_numbers<[2], [1], [1], [2], [0, 0, 0, 1, 1, 2], [0], [0]>} : vector<2x1x128xf32>, vector<2x128x32xf32>, vector<2x1x32xf32> -> vector<2x1x32xf32>
    "tpu.trace_stop"() : () -> ()
    %341 = vector.shape_cast %340 : vector<2x1x32xf32> to vector<2x32xf32>
    %c0_163 = arith.constant 0 : index
    %c0_164 = arith.constant 0 : index
    %342 = vector.load %arg6[%c0_163, %c0_164] : memref<128x32xf32, #tpu.memory_space<vmem>>, vector<128x32xf32>
    %cst_165 = arith.constant dense<0.000000e+00> : vector<2x128xf32>
    %343 = tpu.matmul %317, %342, %cst_165 {dimension_numbers = #tpu.dot_dimension_numbers<[1], [1], [0], [0], [0, 0, 1, 0], [], []>} : vector<2x32xf32>, vector<128x32xf32>, vector<2x128xf32> -> vector<2x128xf32>
    %c0_166 = arith.constant 0 : index
    %c0_167 = arith.constant 0 : index
    %344 = vector.load %arg7[%c0_166, %c0_167] : memref<128x32xf32, #tpu.memory_space<vmem>>, vector<128x32xf32>
    %cst_168 = arith.constant dense<0.000000e+00> : vector<2x128xf32>
    %345 = tpu.matmul %341, %344, %cst_168 {dimension_numbers = #tpu.dot_dimension_numbers<[1], [1], [0], [0], [0, 0, 1, 0], [], []>} : vector<2x32xf32>, vector<128x32xf32>, vector<2x128xf32> -> vector<2x128xf32>
    %346 = arith.addf %343, %345 : vector<2x128xf32>
    %c0_169 = arith.constant 0 : index
    %c0_170 = arith.constant 0 : index
    %347 = vector.load %arg17[%c0_169, %c0_170] : memref<1x128xf32, #tpu.memory_space<vmem>>, vector<1x128xf32>
    %348 = vector.broadcast %347 : vector<1x128xf32> to vector<2x128xf32>
    %349 = arith.addf %346, %348 : vector<2x128xf32>
    %cst_171 = arith.constant dense<0xFF800000> : vector<2xf32>
    %350 = vector.multi_reduction <maximumf>, %349, %cst_171 [1] : vector<2x128xf32> to vector<2xf32>
    %351 = vector.shape_cast %350 : vector<2xf32> to vector<2x1xf32>
    %352 = vector.broadcast %351 : vector<2x1xf32> to vector<2x128xf32>
    %353 = arith.cmpf oeq, %349, %352 : vector<2x128xf32>
    %354 = arith.extui %353 : vector<2x128xi1> to vector<2x128xi32>
    %355 = arith.sitofp %354 : vector<2x128xi32> to vector<2x128xf32>
    %c0_172 = arith.constant 0 : index
    %c0_173 = arith.constant 0 : index
    %356 = vector.load %arg5[%c0_172, %c0_173] : memref<128x128xf32, #tpu.memory_space<vmem>>, vector<128x128xf32>
    %cst_174 = arith.constant dense<0.000000e+00> : vector<2x128xf32>
    %357 = tpu.matmul %355, %356, %cst_174 {dimension_numbers = #tpu.dot_dimension_numbers<[1], [0], [0], [1], [0, 0, 1, 1], [], []>} : vector<2x128xf32>, vector<128x128xf32>, vector<2x128xf32> -> vector<2x128xf32>
    %c0_175 = arith.constant 0 : index
    %c0_176 = arith.constant 0 : index
    %358 = vector.load %arg8[%c0_175, %c0_176] : memref<32x128xf32, #tpu.memory_space<vmem>>, vector<32x128xf32>
    %cst_177 = arith.constant dense<0.000000e+00> : vector<2x128xf32>
    %359 = tpu.matmul %341, %358, %cst_177 {dimension_numbers = #tpu.dot_dimension_numbers<[1], [0], [0], [1], [0, 0, 1, 1], [], []>} : vector<2x32xf32>, vector<32x128xf32>, vector<2x128xf32> -> vector<2x128xf32>
    %360 = arith.addf %357, %359 : vector<2x128xf32>
    %c0_178 = arith.constant 0 : index
    %c0_179 = arith.constant 0 : index
    %361 = vector.load %arg9[%c0_178, %c0_179] : memref<32x128xf32, #tpu.memory_space<vmem>>, vector<32x128xf32>
    %cst_180 = arith.constant dense<0.000000e+00> : vector<2x128xf32>
    %362 = tpu.matmul %269, %361, %cst_180 {dimension_numbers = #tpu.dot_dimension_numbers<[1], [0], [0], [1], [0, 0, 1, 1], [], []>} : vector<2x32xf32>, vector<32x128xf32>, vector<2x128xf32> -> vector<2x128xf32>
    %363 = arith.addf %360, %362 : vector<2x128xf32>
    %c0_181 = arith.constant 0 : index
    %c0_182 = arith.constant 0 : index
    %364 = vector.load %arg10[%c0_181, %c0_182] : memref<1x128xf32, #tpu.memory_space<vmem>>, vector<1x128xf32>
    %365 = vector.broadcast %364 : vector<1x128xf32> to vector<2x128xf32>
    %366 = arith.addf %363, %365 : vector<2x128xf32>
    %367 = vector.extract_strided_slice %366 {offsets = [0, 0], sizes = [2, 96], strides = [1, 1]} : vector<2x128xf32> to vector<2x96xf32>
    %368 = arith.negf %367 : vector<2x96xf32>
    %369 = math.exp %368 : vector<2x96xf32>
    %cst_183 = arith.constant 1.000000e+00 : f32
    %370 = vector.broadcast %cst_183 : f32 to vector<2x96xf32>
    %371 = arith.addf %370, %369 : vector<2x96xf32>
    %372 = arith.divf %370, %371 : vector<2x96xf32>
    %373 = vector.extract_strided_slice %366 {offsets = [0, 96], sizes = [2, 32], strides = [1, 1]} : vector<2x128xf32> to vector<2x32xf32>
    %374 = math.tanh %373 : vector<2x32xf32>
    %375 = vector.extract_strided_slice %372 {offsets = [0, 0], sizes = [2, 32], strides = [1, 1]} : vector<2x96xf32> to vector<2x32xf32>
    %376 = vector.extract_strided_slice %372 {offsets = [0, 32], sizes = [2, 32], strides = [1, 1]} : vector<2x96xf32> to vector<2x32xf32>
    %377 = vector.extract_strided_slice %372 {offsets = [0, 64], sizes = [2, 32], strides = [1, 1]} : vector<2x96xf32> to vector<2x32xf32>
    %378 = arith.mulf %376, %267 : vector<2x32xf32>
    %379 = arith.mulf %375, %374 : vector<2x32xf32>
    %380 = arith.addf %378, %379 : vector<2x32xf32>
    %381 = math.tanh %380 : vector<2x32xf32>
    %382 = arith.mulf %377, %381 : vector<2x32xf32>
    %c0_184 = arith.constant 0 : index
    %c0_185 = arith.constant 0 : index
    %383 = vector.load %arg11[%c0_184, %c0_185] : memref<32x128xf32, #tpu.memory_space<vmem>>, vector<32x128xf32>
    %cst_186 = arith.constant dense<0.000000e+00> : vector<2x128xf32>
    %384 = tpu.matmul %382, %383, %cst_186 {dimension_numbers = #tpu.dot_dimension_numbers<[1], [0], [0], [1], [0, 0, 1, 1], [], []>} : vector<2x32xf32>, vector<32x128xf32>, vector<2x128xf32> -> vector<2x128xf32>
    %c0_187 = arith.constant 0 : index
    %c0_188 = arith.constant 0 : index
    %385 = vector.load %arg12[%c0_187, %c0_188] : memref<32x128xf32, #tpu.memory_space<vmem>>, vector<32x128xf32>
    %cst_189 = arith.constant dense<0.000000e+00> : vector<2x128xf32>
    %386 = tpu.matmul %293, %385, %cst_189 {dimension_numbers = #tpu.dot_dimension_numbers<[1], [0], [0], [1], [0, 0, 1, 1], [], []>} : vector<2x32xf32>, vector<32x128xf32>, vector<2x128xf32> -> vector<2x128xf32>
    %387 = arith.addf %384, %386 : vector<2x128xf32>
    %c0_190 = arith.constant 0 : index
    %c0_191 = arith.constant 0 : index
    %388 = vector.load %arg13[%c0_190, %c0_191] : memref<1x128xf32, #tpu.memory_space<vmem>>, vector<1x128xf32>
    %389 = vector.broadcast %388 : vector<1x128xf32> to vector<2x128xf32>
    %390 = arith.addf %387, %389 : vector<2x128xf32>
    %391 = vector.extract_strided_slice %390 {offsets = [0, 0], sizes = [2, 96], strides = [1, 1]} : vector<2x128xf32> to vector<2x96xf32>
    %392 = arith.negf %391 : vector<2x96xf32>
    %393 = math.exp %392 : vector<2x96xf32>
    %cst_192 = arith.constant 1.000000e+00 : f32
    %394 = vector.broadcast %cst_192 : f32 to vector<2x96xf32>
    %395 = arith.addf %394, %393 : vector<2x96xf32>
    %396 = arith.divf %394, %395 : vector<2x96xf32>
    %397 = vector.extract_strided_slice %390 {offsets = [0, 96], sizes = [2, 32], strides = [1, 1]} : vector<2x128xf32> to vector<2x32xf32>
    %398 = math.tanh %397 : vector<2x32xf32>
    %399 = vector.extract_strided_slice %396 {offsets = [0, 0], sizes = [2, 32], strides = [1, 1]} : vector<2x96xf32> to vector<2x32xf32>
    %400 = vector.extract_strided_slice %396 {offsets = [0, 32], sizes = [2, 32], strides = [1, 1]} : vector<2x96xf32> to vector<2x32xf32>
    %401 = vector.extract_strided_slice %396 {offsets = [0, 64], sizes = [2, 32], strides = [1, 1]} : vector<2x96xf32> to vector<2x32xf32>
    %402 = arith.mulf %400, %291 : vector<2x32xf32>
    %403 = arith.mulf %399, %398 : vector<2x32xf32>
    %404 = arith.addf %402, %403 : vector<2x32xf32>
    %405 = math.tanh %404 : vector<2x32xf32>
    %406 = arith.mulf %401, %405 : vector<2x32xf32>
    %c0_193 = arith.constant 0 : index
    %c0_194 = arith.constant 0 : index
    %407 = vector.load %arg14[%c0_193, %c0_194] : memref<32x128xf32, #tpu.memory_space<vmem>>, vector<32x128xf32>
    %cst_195 = arith.constant dense<0.000000e+00> : vector<2x128xf32>
    %408 = tpu.matmul %406, %407, %cst_195 {dimension_numbers = #tpu.dot_dimension_numbers<[1], [0], [0], [1], [0, 0, 1, 1], [], []>} : vector<2x32xf32>, vector<32x128xf32>, vector<2x128xf32> -> vector<2x128xf32>
    %c0_196 = arith.constant 0 : index
    %c0_197 = arith.constant 0 : index
    %409 = vector.load %arg15[%c0_196, %c0_197] : memref<32x128xf32, #tpu.memory_space<vmem>>, vector<32x128xf32>
    %cst_198 = arith.constant dense<0.000000e+00> : vector<2x128xf32>
    %410 = tpu.matmul %317, %409, %cst_198 {dimension_numbers = #tpu.dot_dimension_numbers<[1], [0], [0], [1], [0, 0, 1, 1], [], []>} : vector<2x32xf32>, vector<32x128xf32>, vector<2x128xf32> -> vector<2x128xf32>
    %411 = arith.addf %408, %410 : vector<2x128xf32>
    %c0_199 = arith.constant 0 : index
    %c0_200 = arith.constant 0 : index
    %412 = vector.load %arg16[%c0_199, %c0_200] : memref<1x128xf32, #tpu.memory_space<vmem>>, vector<1x128xf32>
    %413 = vector.broadcast %412 : vector<1x128xf32> to vector<2x128xf32>
    %414 = arith.addf %411, %413 : vector<2x128xf32>
    %415 = vector.extract_strided_slice %414 {offsets = [0, 0], sizes = [2, 96], strides = [1, 1]} : vector<2x128xf32> to vector<2x96xf32>
    %416 = arith.negf %415 : vector<2x96xf32>
    %417 = math.exp %416 : vector<2x96xf32>
    %cst_201 = arith.constant 1.000000e+00 : f32
    %418 = vector.broadcast %cst_201 : f32 to vector<2x96xf32>
    %419 = arith.addf %418, %417 : vector<2x96xf32>
    %420 = arith.divf %418, %419 : vector<2x96xf32>
    %421 = vector.extract_strided_slice %414 {offsets = [0, 96], sizes = [2, 32], strides = [1, 1]} : vector<2x128xf32> to vector<2x32xf32>
    %422 = math.tanh %421 : vector<2x32xf32>
    %423 = vector.extract_strided_slice %420 {offsets = [0, 0], sizes = [2, 32], strides = [1, 1]} : vector<2x96xf32> to vector<2x32xf32>
    %424 = vector.extract_strided_slice %420 {offsets = [0, 32], sizes = [2, 32], strides = [1, 1]} : vector<2x96xf32> to vector<2x32xf32>
    %425 = vector.extract_strided_slice %420 {offsets = [0, 64], sizes = [2, 32], strides = [1, 1]} : vector<2x96xf32> to vector<2x32xf32>
    %426 = arith.mulf %424, %315 : vector<2x32xf32>
    %427 = arith.mulf %423, %422 : vector<2x32xf32>
    %428 = arith.addf %426, %427 : vector<2x32xf32>
    %429 = math.tanh %428 : vector<2x32xf32>
    %430 = arith.mulf %425, %429 : vector<2x32xf32>
    %431 = vector.shape_cast %430 : vector<2x32xf32> to vector<2x1x32xf32>
    %c0_202 = arith.constant 0 : index
    %c0_203 = arith.constant 0 : index
    %c0_204 = arith.constant 0 : index
    %432 = vector.load %arg2[%c0_202, %c0_203, %c0_204] : memref<2x128x32xf32, #tpu.memory_space<vmem>>, vector<2x128x32xf32>
    "tpu.trace_start"() <{level = 10 : i32, message = "bqk,btk->bqt"}> : () -> ()
    %cst_205 = arith.constant dense<0.000000e+00> : vector<2x1x128xf32>
    %433 = tpu.matmul %431, %432, %cst_205 {dimension_numbers = #tpu.dot_dimension_numbers<[2], [2], [1], [1], [0, 0, 0, 1, 1, 1], [0], [0]>} : vector<2x1x32xf32>, vector<2x128x32xf32>, vector<2x1x128xf32> -> vector<2x1x128xf32>
    "tpu.trace_stop"() : () -> ()
    %434 = vector.shape_cast %433 : vector<2x1x128xf32> to vector<2x128xf32>
    %c0_206 = arith.constant 0 : index
    %c0_207 = arith.constant 0 : index
    %435 = vector.load %arg4[%c0_206, %c0_207] : memref<2x128xf32, #tpu.memory_space<vmem>>, vector<2x128xf32>
    %436 = arith.addf %434, %435 : vector<2x128xf32>
    %cst_208 = arith.constant dense<0xFF800000> : vector<2xf32>
    %437 = vector.multi_reduction <maximumf>, %436, %cst_208 [1] : vector<2x128xf32> to vector<2xf32>
    %438 = vector.shape_cast %437 : vector<2xf32> to vector<2x1xf32>
    %439 = vector.broadcast %438 : vector<2x1xf32> to vector<2x128xf32>
    %440 = arith.subf %436, %439 : vector<2x128xf32>
    %441 = math.exp %440 : vector<2x128xf32>
    %cst_209 = arith.constant dense<0.000000e+00> : vector<2xf32>
    %442 = vector.multi_reduction <add>, %441, %cst_209 [1] : vector<2x128xf32> to vector<2xf32>
    %443 = vector.shape_cast %442 : vector<2xf32> to vector<2x1xf32>
    %444 = tpu.reciprocal %443 {approx = true} : vector<2x1xf32> -> vector<2x1xf32>
    %445 = arith.mulf %443, %444 : vector<2x1xf32>
    %cst_210 = arith.constant 2.000000e+00 : f32
    %446 = vector.broadcast %cst_210 : f32 to vector<2x1xf32>
    %447 = arith.subf %446, %445 : vector<2x1xf32>
    %448 = arith.mulf %444, %447 : vector<2x1xf32>
    %449 = vector.broadcast %448 : vector<2x1xf32> to vector<2x128xf32>
    %450 = arith.mulf %441, %449 : vector<2x128xf32>
    %451 = vector.shape_cast %450 : vector<2x128xf32> to vector<2x1x128xf32>
    %c0_211 = arith.constant 0 : index
    %c0_212 = arith.constant 0 : index
    %c0_213 = arith.constant 0 : index
    %452 = vector.load %arg3[%c0_211, %c0_212, %c0_213] : memref<2x128x32xf32, #tpu.memory_space<vmem>>, vector<2x128x32xf32>
    "tpu.trace_start"() <{level = 10 : i32, message = "bqt,btk->bqk"}> : () -> ()
    %cst_214 = arith.constant dense<0.000000e+00> : vector<2x1x32xf32>
    %453 = tpu.matmul %451, %452, %cst_214 {dimension_numbers = #tpu.dot_dimension_numbers<[2], [1], [1], [2], [0, 0, 0, 1, 1, 2], [0], [0]>} : vector<2x1x128xf32>, vector<2x128x32xf32>, vector<2x1x32xf32> -> vector<2x1x32xf32>
    "tpu.trace_stop"() : () -> ()
    %454 = vector.shape_cast %453 : vector<2x1x32xf32> to vector<2x32xf32>
    %c0_215 = arith.constant 0 : index
    %c0_216 = arith.constant 0 : index
    %455 = vector.load %arg6[%c0_215, %c0_216] : memref<128x32xf32, #tpu.memory_space<vmem>>, vector<128x32xf32>
    %cst_217 = arith.constant dense<0.000000e+00> : vector<2x128xf32>
    %456 = tpu.matmul %430, %455, %cst_217 {dimension_numbers = #tpu.dot_dimension_numbers<[1], [1], [0], [0], [0, 0, 1, 0], [], []>} : vector<2x32xf32>, vector<128x32xf32>, vector<2x128xf32> -> vector<2x128xf32>
    %c0_218 = arith.constant 0 : index
    %c0_219 = arith.constant 0 : index
    %457 = vector.load %arg7[%c0_218, %c0_219] : memref<128x32xf32, #tpu.memory_space<vmem>>, vector<128x32xf32>
    %cst_220 = arith.constant dense<0.000000e+00> : vector<2x128xf32>
    %458 = tpu.matmul %454, %457, %cst_220 {dimension_numbers = #tpu.dot_dimension_numbers<[1], [1], [0], [0], [0, 0, 1, 0], [], []>} : vector<2x32xf32>, vector<128x32xf32>, vector<2x128xf32> -> vector<2x128xf32>
    %459 = arith.addf %456, %458 : vector<2x128xf32>
    %c0_221 = arith.constant 0 : index
    %c0_222 = arith.constant 0 : index
    %460 = vector.load %arg17[%c0_221, %c0_222] : memref<1x128xf32, #tpu.memory_space<vmem>>, vector<1x128xf32>
    %461 = vector.broadcast %460 : vector<1x128xf32> to vector<2x128xf32>
    %462 = arith.addf %459, %461 : vector<2x128xf32>
    %cst_223 = arith.constant dense<0xFF800000> : vector<2xf32>
    %463 = vector.multi_reduction <maximumf>, %462, %cst_223 [1] : vector<2x128xf32> to vector<2xf32>
    %464 = vector.shape_cast %463 : vector<2xf32> to vector<2x1xf32>
    %465 = vector.broadcast %464 : vector<2x1xf32> to vector<2x128xf32>
    %466 = arith.cmpf oeq, %462, %465 : vector<2x128xf32>
    %467 = arith.extui %466 : vector<2x128xi1> to vector<2x128xi32>
    %468 = arith.sitofp %467 : vector<2x128xi32> to vector<2x128xf32>
    %c0_224 = arith.constant 0 : index
    %c0_225 = arith.constant 0 : index
    %469 = vector.load %arg5[%c0_224, %c0_225] : memref<128x128xf32, #tpu.memory_space<vmem>>, vector<128x128xf32>
    %cst_226 = arith.constant dense<0.000000e+00> : vector<2x128xf32>
    %470 = tpu.matmul %468, %469, %cst_226 {dimension_numbers = #tpu.dot_dimension_numbers<[1], [0], [0], [1], [0, 0, 1, 1], [], []>} : vector<2x128xf32>, vector<128x128xf32>, vector<2x128xf32> -> vector<2x128xf32>
    %c0_227 = arith.constant 0 : index
    %c0_228 = arith.constant 0 : index
    %471 = vector.load %arg8[%c0_227, %c0_228] : memref<32x128xf32, #tpu.memory_space<vmem>>, vector<32x128xf32>
    %cst_229 = arith.constant dense<0.000000e+00> : vector<2x128xf32>
    %472 = tpu.matmul %454, %471, %cst_229 {dimension_numbers = #tpu.dot_dimension_numbers<[1], [0], [0], [1], [0, 0, 1, 1], [], []>} : vector<2x32xf32>, vector<32x128xf32>, vector<2x128xf32> -> vector<2x128xf32>
    %473 = arith.addf %470, %472 : vector<2x128xf32>
    %c0_230 = arith.constant 0 : index
    %c0_231 = arith.constant 0 : index
    %474 = vector.load %arg9[%c0_230, %c0_231] : memref<32x128xf32, #tpu.memory_space<vmem>>, vector<32x128xf32>
    %cst_232 = arith.constant dense<0.000000e+00> : vector<2x128xf32>
    %475 = tpu.matmul %382, %474, %cst_232 {dimension_numbers = #tpu.dot_dimension_numbers<[1], [0], [0], [1], [0, 0, 1, 1], [], []>} : vector<2x32xf32>, vector<32x128xf32>, vector<2x128xf32> -> vector<2x128xf32>
    %476 = arith.addf %473, %475 : vector<2x128xf32>
    %c0_233 = arith.constant 0 : index
    %c0_234 = arith.constant 0 : index
    %477 = vector.load %arg10[%c0_233, %c0_234] : memref<1x128xf32, #tpu.memory_space<vmem>>, vector<1x128xf32>
    %478 = vector.broadcast %477 : vector<1x128xf32> to vector<2x128xf32>
    %479 = arith.addf %476, %478 : vector<2x128xf32>
    %480 = vector.extract_strided_slice %479 {offsets = [0, 0], sizes = [2, 96], strides = [1, 1]} : vector<2x128xf32> to vector<2x96xf32>
    %481 = arith.negf %480 : vector<2x96xf32>
    %482 = math.exp %481 : vector<2x96xf32>
    %cst_235 = arith.constant 1.000000e+00 : f32
    %483 = vector.broadcast %cst_235 : f32 to vector<2x96xf32>
    %484 = arith.addf %483, %482 : vector<2x96xf32>
    %485 = arith.divf %483, %484 : vector<2x96xf32>
    %486 = vector.extract_strided_slice %479 {offsets = [0, 96], sizes = [2, 32], strides = [1, 1]} : vector<2x128xf32> to vector<2x32xf32>
    %487 = math.tanh %486 : vector<2x32xf32>
    %488 = vector.extract_strided_slice %485 {offsets = [0, 0], sizes = [2, 32], strides = [1, 1]} : vector<2x96xf32> to vector<2x32xf32>
    %489 = vector.extract_strided_slice %485 {offsets = [0, 32], sizes = [2, 32], strides = [1, 1]} : vector<2x96xf32> to vector<2x32xf32>
    %490 = vector.extract_strided_slice %485 {offsets = [0, 64], sizes = [2, 32], strides = [1, 1]} : vector<2x96xf32> to vector<2x32xf32>
    %491 = arith.mulf %489, %380 : vector<2x32xf32>
    %492 = arith.mulf %488, %487 : vector<2x32xf32>
    %493 = arith.addf %491, %492 : vector<2x32xf32>
    %494 = math.tanh %493 : vector<2x32xf32>
    %495 = arith.mulf %490, %494 : vector<2x32xf32>
    %c0_236 = arith.constant 0 : index
    %c0_237 = arith.constant 0 : index
    %496 = vector.load %arg11[%c0_236, %c0_237] : memref<32x128xf32, #tpu.memory_space<vmem>>, vector<32x128xf32>
    %cst_238 = arith.constant dense<0.000000e+00> : vector<2x128xf32>
    %497 = tpu.matmul %495, %496, %cst_238 {dimension_numbers = #tpu.dot_dimension_numbers<[1], [0], [0], [1], [0, 0, 1, 1], [], []>} : vector<2x32xf32>, vector<32x128xf32>, vector<2x128xf32> -> vector<2x128xf32>
    %c0_239 = arith.constant 0 : index
    %c0_240 = arith.constant 0 : index
    %498 = vector.load %arg12[%c0_239, %c0_240] : memref<32x128xf32, #tpu.memory_space<vmem>>, vector<32x128xf32>
    %cst_241 = arith.constant dense<0.000000e+00> : vector<2x128xf32>
    %499 = tpu.matmul %406, %498, %cst_241 {dimension_numbers = #tpu.dot_dimension_numbers<[1], [0], [0], [1], [0, 0, 1, 1], [], []>} : vector<2x32xf32>, vector<32x128xf32>, vector<2x128xf32> -> vector<2x128xf32>
    %500 = arith.addf %497, %499 : vector<2x128xf32>
    %c0_242 = arith.constant 0 : index
    %c0_243 = arith.constant 0 : index
    %501 = vector.load %arg13[%c0_242, %c0_243] : memref<1x128xf32, #tpu.memory_space<vmem>>, vector<1x128xf32>
    %502 = vector.broadcast %501 : vector<1x128xf32> to vector<2x128xf32>
    %503 = arith.addf %500, %502 : vector<2x128xf32>
    %504 = vector.extract_strided_slice %503 {offsets = [0, 0], sizes = [2, 96], strides = [1, 1]} : vector<2x128xf32> to vector<2x96xf32>
    %505 = arith.negf %504 : vector<2x96xf32>
    %506 = math.exp %505 : vector<2x96xf32>
    %cst_244 = arith.constant 1.000000e+00 : f32
    %507 = vector.broadcast %cst_244 : f32 to vector<2x96xf32>
    %508 = arith.addf %507, %506 : vector<2x96xf32>
    %509 = arith.divf %507, %508 : vector<2x96xf32>
    %510 = vector.extract_strided_slice %503 {offsets = [0, 96], sizes = [2, 32], strides = [1, 1]} : vector<2x128xf32> to vector<2x32xf32>
    %511 = math.tanh %510 : vector<2x32xf32>
    %512 = vector.extract_strided_slice %509 {offsets = [0, 0], sizes = [2, 32], strides = [1, 1]} : vector<2x96xf32> to vector<2x32xf32>
    %513 = vector.extract_strided_slice %509 {offsets = [0, 32], sizes = [2, 32], strides = [1, 1]} : vector<2x96xf32> to vector<2x32xf32>
    %514 = vector.extract_strided_slice %509 {offsets = [0, 64], sizes = [2, 32], strides = [1, 1]} : vector<2x96xf32> to vector<2x32xf32>
    %515 = arith.mulf %513, %404 : vector<2x32xf32>
    %516 = arith.mulf %512, %511 : vector<2x32xf32>
    %517 = arith.addf %515, %516 : vector<2x32xf32>
    %518 = math.tanh %517 : vector<2x32xf32>
    %519 = arith.mulf %514, %518 : vector<2x32xf32>
    %c0_245 = arith.constant 0 : index
    %c0_246 = arith.constant 0 : index
    %520 = vector.load %arg14[%c0_245, %c0_246] : memref<32x128xf32, #tpu.memory_space<vmem>>, vector<32x128xf32>
    %cst_247 = arith.constant dense<0.000000e+00> : vector<2x128xf32>
    %521 = tpu.matmul %519, %520, %cst_247 {dimension_numbers = #tpu.dot_dimension_numbers<[1], [0], [0], [1], [0, 0, 1, 1], [], []>} : vector<2x32xf32>, vector<32x128xf32>, vector<2x128xf32> -> vector<2x128xf32>
    %c0_248 = arith.constant 0 : index
    %c0_249 = arith.constant 0 : index
    %522 = vector.load %arg15[%c0_248, %c0_249] : memref<32x128xf32, #tpu.memory_space<vmem>>, vector<32x128xf32>
    %cst_250 = arith.constant dense<0.000000e+00> : vector<2x128xf32>
    %523 = tpu.matmul %430, %522, %cst_250 {dimension_numbers = #tpu.dot_dimension_numbers<[1], [0], [0], [1], [0, 0, 1, 1], [], []>} : vector<2x32xf32>, vector<32x128xf32>, vector<2x128xf32> -> vector<2x128xf32>
    %524 = arith.addf %521, %523 : vector<2x128xf32>
    %c0_251 = arith.constant 0 : index
    %c0_252 = arith.constant 0 : index
    %525 = vector.load %arg16[%c0_251, %c0_252] : memref<1x128xf32, #tpu.memory_space<vmem>>, vector<1x128xf32>
    %526 = vector.broadcast %525 : vector<1x128xf32> to vector<2x128xf32>
    %527 = arith.addf %524, %526 : vector<2x128xf32>
    %528 = vector.extract_strided_slice %527 {offsets = [0, 0], sizes = [2, 96], strides = [1, 1]} : vector<2x128xf32> to vector<2x96xf32>
    %529 = arith.negf %528 : vector<2x96xf32>
    %530 = math.exp %529 : vector<2x96xf32>
    %cst_253 = arith.constant 1.000000e+00 : f32
    %531 = vector.broadcast %cst_253 : f32 to vector<2x96xf32>
    %532 = arith.addf %531, %530 : vector<2x96xf32>
    %533 = arith.divf %531, %532 : vector<2x96xf32>
    %534 = vector.extract_strided_slice %527 {offsets = [0, 96], sizes = [2, 32], strides = [1, 1]} : vector<2x128xf32> to vector<2x32xf32>
    %535 = math.tanh %534 : vector<2x32xf32>
    %536 = vector.extract_strided_slice %533 {offsets = [0, 0], sizes = [2, 32], strides = [1, 1]} : vector<2x96xf32> to vector<2x32xf32>
    %537 = vector.extract_strided_slice %533 {offsets = [0, 32], sizes = [2, 32], strides = [1, 1]} : vector<2x96xf32> to vector<2x32xf32>
    %538 = vector.extract_strided_slice %533 {offsets = [0, 64], sizes = [2, 32], strides = [1, 1]} : vector<2x96xf32> to vector<2x32xf32>
    %539 = arith.mulf %537, %428 : vector<2x32xf32>
    %540 = arith.mulf %536, %535 : vector<2x32xf32>
    %541 = arith.addf %539, %540 : vector<2x32xf32>
    %542 = math.tanh %541 : vector<2x32xf32>
    %543 = arith.mulf %538, %542 : vector<2x32xf32>
    %544 = vector.shape_cast %543 : vector<2x32xf32> to vector<2x1x32xf32>
    %c0_254 = arith.constant 0 : index
    %c0_255 = arith.constant 0 : index
    %c0_256 = arith.constant 0 : index
    %545 = vector.load %arg2[%c0_254, %c0_255, %c0_256] : memref<2x128x32xf32, #tpu.memory_space<vmem>>, vector<2x128x32xf32>
    "tpu.trace_start"() <{level = 10 : i32, message = "bqk,btk->bqt"}> : () -> ()
    %cst_257 = arith.constant dense<0.000000e+00> : vector<2x1x128xf32>
    %546 = tpu.matmul %544, %545, %cst_257 {dimension_numbers = #tpu.dot_dimension_numbers<[2], [2], [1], [1], [0, 0, 0, 1, 1, 1], [0], [0]>} : vector<2x1x32xf32>, vector<2x128x32xf32>, vector<2x1x128xf32> -> vector<2x1x128xf32>
    "tpu.trace_stop"() : () -> ()
    %547 = vector.shape_cast %546 : vector<2x1x128xf32> to vector<2x128xf32>
    %c0_258 = arith.constant 0 : index
    %c0_259 = arith.constant 0 : index
    %548 = vector.load %arg4[%c0_258, %c0_259] : memref<2x128xf32, #tpu.memory_space<vmem>>, vector<2x128xf32>
    %549 = arith.addf %547, %548 : vector<2x128xf32>
    %cst_260 = arith.constant dense<0xFF800000> : vector<2xf32>
    %550 = vector.multi_reduction <maximumf>, %549, %cst_260 [1] : vector<2x128xf32> to vector<2xf32>
    %551 = vector.shape_cast %550 : vector<2xf32> to vector<2x1xf32>
    %552 = vector.broadcast %551 : vector<2x1xf32> to vector<2x128xf32>
    %553 = arith.subf %549, %552 : vector<2x128xf32>
    %554 = math.exp %553 : vector<2x128xf32>
    %cst_261 = arith.constant dense<0.000000e+00> : vector<2xf32>
    %555 = vector.multi_reduction <add>, %554, %cst_261 [1] : vector<2x128xf32> to vector<2xf32>
    %556 = vector.shape_cast %555 : vector<2xf32> to vector<2x1xf32>
    %557 = tpu.reciprocal %556 {approx = true} : vector<2x1xf32> -> vector<2x1xf32>
    %558 = arith.mulf %556, %557 : vector<2x1xf32>
    %cst_262 = arith.constant 2.000000e+00 : f32
    %559 = vector.broadcast %cst_262 : f32 to vector<2x1xf32>
    %560 = arith.subf %559, %558 : vector<2x1xf32>
    %561 = arith.mulf %557, %560 : vector<2x1xf32>
    %562 = vector.broadcast %561 : vector<2x1xf32> to vector<2x128xf32>
    %563 = arith.mulf %554, %562 : vector<2x128xf32>
    %564 = vector.shape_cast %563 : vector<2x128xf32> to vector<2x1x128xf32>
    %c0_263 = arith.constant 0 : index
    %c0_264 = arith.constant 0 : index
    %c0_265 = arith.constant 0 : index
    %565 = vector.load %arg3[%c0_263, %c0_264, %c0_265] : memref<2x128x32xf32, #tpu.memory_space<vmem>>, vector<2x128x32xf32>
    "tpu.trace_start"() <{level = 10 : i32, message = "bqt,btk->bqk"}> : () -> ()
    %cst_266 = arith.constant dense<0.000000e+00> : vector<2x1x32xf32>
    %566 = tpu.matmul %564, %565, %cst_266 {dimension_numbers = #tpu.dot_dimension_numbers<[2], [1], [1], [2], [0, 0, 0, 1, 1, 2], [0], [0]>} : vector<2x1x128xf32>, vector<2x128x32xf32>, vector<2x1x32xf32> -> vector<2x1x32xf32>
    "tpu.trace_stop"() : () -> ()
    %567 = vector.shape_cast %566 : vector<2x1x32xf32> to vector<2x32xf32>
    %c0_267 = arith.constant 0 : index
    %c0_268 = arith.constant 0 : index
    %568 = vector.load %arg6[%c0_267, %c0_268] : memref<128x32xf32, #tpu.memory_space<vmem>>, vector<128x32xf32>
    %cst_269 = arith.constant dense<0.000000e+00> : vector<2x128xf32>
    %569 = tpu.matmul %543, %568, %cst_269 {dimension_numbers = #tpu.dot_dimension_numbers<[1], [1], [0], [0], [0, 0, 1, 0], [], []>} : vector<2x32xf32>, vector<128x32xf32>, vector<2x128xf32> -> vector<2x128xf32>
    %c0_270 = arith.constant 0 : index
    %c0_271 = arith.constant 0 : index
    %570 = vector.load %arg7[%c0_270, %c0_271] : memref<128x32xf32, #tpu.memory_space<vmem>>, vector<128x32xf32>
    %cst_272 = arith.constant dense<0.000000e+00> : vector<2x128xf32>
    %571 = tpu.matmul %567, %570, %cst_272 {dimension_numbers = #tpu.dot_dimension_numbers<[1], [1], [0], [0], [0, 0, 1, 0], [], []>} : vector<2x32xf32>, vector<128x32xf32>, vector<2x128xf32> -> vector<2x128xf32>
    %572 = arith.addf %569, %571 : vector<2x128xf32>
    %c0_273 = arith.constant 0 : index
    %c0_274 = arith.constant 0 : index
    %573 = vector.load %arg17[%c0_273, %c0_274] : memref<1x128xf32, #tpu.memory_space<vmem>>, vector<1x128xf32>
    %574 = vector.broadcast %573 : vector<1x128xf32> to vector<2x128xf32>
    %575 = arith.addf %572, %574 : vector<2x128xf32>
    %cst_275 = arith.constant dense<0xFF800000> : vector<2xf32>
    %576 = vector.multi_reduction <maximumf>, %575, %cst_275 [1] : vector<2x128xf32> to vector<2xf32>
    %577 = vector.shape_cast %576 : vector<2xf32> to vector<2x1xf32>
    %578 = vector.broadcast %577 : vector<2x1xf32> to vector<2x128xf32>
    %579 = arith.cmpf oeq, %575, %578 : vector<2x128xf32>
    %580 = arith.extui %579 : vector<2x128xi1> to vector<2x128xi32>
    %581 = arith.sitofp %580 : vector<2x128xi32> to vector<2x128xf32>
    %c0_276 = arith.constant 0 : index
    %c0_277 = arith.constant 0 : index
    %582 = vector.load %arg5[%c0_276, %c0_277] : memref<128x128xf32, #tpu.memory_space<vmem>>, vector<128x128xf32>
    %cst_278 = arith.constant dense<0.000000e+00> : vector<2x128xf32>
    %583 = tpu.matmul %581, %582, %cst_278 {dimension_numbers = #tpu.dot_dimension_numbers<[1], [0], [0], [1], [0, 0, 1, 1], [], []>} : vector<2x128xf32>, vector<128x128xf32>, vector<2x128xf32> -> vector<2x128xf32>
    %c0_279 = arith.constant 0 : index
    %c0_280 = arith.constant 0 : index
    %584 = vector.load %arg8[%c0_279, %c0_280] : memref<32x128xf32, #tpu.memory_space<vmem>>, vector<32x128xf32>
    %cst_281 = arith.constant dense<0.000000e+00> : vector<2x128xf32>
    %585 = tpu.matmul %567, %584, %cst_281 {dimension_numbers = #tpu.dot_dimension_numbers<[1], [0], [0], [1], [0, 0, 1, 1], [], []>} : vector<2x32xf32>, vector<32x128xf32>, vector<2x128xf32> -> vector<2x128xf32>
    %586 = arith.addf %583, %585 : vector<2x128xf32>
    %c0_282 = arith.constant 0 : index
    %c0_283 = arith.constant 0 : index
    %587 = vector.load %arg9[%c0_282, %c0_283] : memref<32x128xf32, #tpu.memory_space<vmem>>, vector<32x128xf32>
    %cst_284 = arith.constant dense<0.000000e+00> : vector<2x128xf32>
    %588 = tpu.matmul %495, %587, %cst_284 {dimension_numbers = #tpu.dot_dimension_numbers<[1], [0], [0], [1], [0, 0, 1, 1], [], []>} : vector<2x32xf32>, vector<32x128xf32>, vector<2x128xf32> -> vector<2x128xf32>
    %589 = arith.addf %586, %588 : vector<2x128xf32>
    %c0_285 = arith.constant 0 : index
    %c0_286 = arith.constant 0 : index
    %590 = vector.load %arg10[%c0_285, %c0_286] : memref<1x128xf32, #tpu.memory_space<vmem>>, vector<1x128xf32>
    %591 = vector.broadcast %590 : vector<1x128xf32> to vector<2x128xf32>
    %592 = arith.addf %589, %591 : vector<2x128xf32>
    %593 = vector.extract_strided_slice %592 {offsets = [0, 0], sizes = [2, 96], strides = [1, 1]} : vector<2x128xf32> to vector<2x96xf32>
    %594 = arith.negf %593 : vector<2x96xf32>
    %595 = math.exp %594 : vector<2x96xf32>
    %cst_287 = arith.constant 1.000000e+00 : f32
    %596 = vector.broadcast %cst_287 : f32 to vector<2x96xf32>
    %597 = arith.addf %596, %595 : vector<2x96xf32>
    %598 = arith.divf %596, %597 : vector<2x96xf32>
    %599 = vector.extract_strided_slice %592 {offsets = [0, 96], sizes = [2, 32], strides = [1, 1]} : vector<2x128xf32> to vector<2x32xf32>
    %600 = math.tanh %599 : vector<2x32xf32>
    %601 = vector.extract_strided_slice %598 {offsets = [0, 0], sizes = [2, 32], strides = [1, 1]} : vector<2x96xf32> to vector<2x32xf32>
    %602 = vector.extract_strided_slice %598 {offsets = [0, 32], sizes = [2, 32], strides = [1, 1]} : vector<2x96xf32> to vector<2x32xf32>
    %603 = vector.extract_strided_slice %598 {offsets = [0, 64], sizes = [2, 32], strides = [1, 1]} : vector<2x96xf32> to vector<2x32xf32>
    %604 = arith.mulf %602, %493 : vector<2x32xf32>
    %605 = arith.mulf %601, %600 : vector<2x32xf32>
    %606 = arith.addf %604, %605 : vector<2x32xf32>
    %607 = math.tanh %606 : vector<2x32xf32>
    %608 = arith.mulf %603, %607 : vector<2x32xf32>
    %c0_288 = arith.constant 0 : index
    %c0_289 = arith.constant 0 : index
    %609 = vector.load %arg11[%c0_288, %c0_289] : memref<32x128xf32, #tpu.memory_space<vmem>>, vector<32x128xf32>
    %cst_290 = arith.constant dense<0.000000e+00> : vector<2x128xf32>
    %610 = tpu.matmul %608, %609, %cst_290 {dimension_numbers = #tpu.dot_dimension_numbers<[1], [0], [0], [1], [0, 0, 1, 1], [], []>} : vector<2x32xf32>, vector<32x128xf32>, vector<2x128xf32> -> vector<2x128xf32>
    %c0_291 = arith.constant 0 : index
    %c0_292 = arith.constant 0 : index
    %611 = vector.load %arg12[%c0_291, %c0_292] : memref<32x128xf32, #tpu.memory_space<vmem>>, vector<32x128xf32>
    %cst_293 = arith.constant dense<0.000000e+00> : vector<2x128xf32>
    %612 = tpu.matmul %519, %611, %cst_293 {dimension_numbers = #tpu.dot_dimension_numbers<[1], [0], [0], [1], [0, 0, 1, 1], [], []>} : vector<2x32xf32>, vector<32x128xf32>, vector<2x128xf32> -> vector<2x128xf32>
    %613 = arith.addf %610, %612 : vector<2x128xf32>
    %c0_294 = arith.constant 0 : index
    %c0_295 = arith.constant 0 : index
    %614 = vector.load %arg13[%c0_294, %c0_295] : memref<1x128xf32, #tpu.memory_space<vmem>>, vector<1x128xf32>
    %615 = vector.broadcast %614 : vector<1x128xf32> to vector<2x128xf32>
    %616 = arith.addf %613, %615 : vector<2x128xf32>
    %617 = vector.extract_strided_slice %616 {offsets = [0, 0], sizes = [2, 96], strides = [1, 1]} : vector<2x128xf32> to vector<2x96xf32>
    %618 = arith.negf %617 : vector<2x96xf32>
    %619 = math.exp %618 : vector<2x96xf32>
    %cst_296 = arith.constant 1.000000e+00 : f32
    %620 = vector.broadcast %cst_296 : f32 to vector<2x96xf32>
    %621 = arith.addf %620, %619 : vector<2x96xf32>
    %622 = arith.divf %620, %621 : vector<2x96xf32>
    %623 = vector.extract_strided_slice %616 {offsets = [0, 96], sizes = [2, 32], strides = [1, 1]} : vector<2x128xf32> to vector<2x32xf32>
    %624 = math.tanh %623 : vector<2x32xf32>
    %625 = vector.extract_strided_slice %622 {offsets = [0, 0], sizes = [2, 32], strides = [1, 1]} : vector<2x96xf32> to vector<2x32xf32>
    %626 = vector.extract_strided_slice %622 {offsets = [0, 32], sizes = [2, 32], strides = [1, 1]} : vector<2x96xf32> to vector<2x32xf32>
    %627 = vector.extract_strided_slice %622 {offsets = [0, 64], sizes = [2, 32], strides = [1, 1]} : vector<2x96xf32> to vector<2x32xf32>
    %628 = arith.mulf %626, %517 : vector<2x32xf32>
    %629 = arith.mulf %625, %624 : vector<2x32xf32>
    %630 = arith.addf %628, %629 : vector<2x32xf32>
    %631 = math.tanh %630 : vector<2x32xf32>
    %632 = arith.mulf %627, %631 : vector<2x32xf32>
    %c0_297 = arith.constant 0 : index
    %c0_298 = arith.constant 0 : index
    %633 = vector.load %arg14[%c0_297, %c0_298] : memref<32x128xf32, #tpu.memory_space<vmem>>, vector<32x128xf32>
    %cst_299 = arith.constant dense<0.000000e+00> : vector<2x128xf32>
    %634 = tpu.matmul %632, %633, %cst_299 {dimension_numbers = #tpu.dot_dimension_numbers<[1], [0], [0], [1], [0, 0, 1, 1], [], []>} : vector<2x32xf32>, vector<32x128xf32>, vector<2x128xf32> -> vector<2x128xf32>
    %c0_300 = arith.constant 0 : index
    %c0_301 = arith.constant 0 : index
    %635 = vector.load %arg15[%c0_300, %c0_301] : memref<32x128xf32, #tpu.memory_space<vmem>>, vector<32x128xf32>
    %cst_302 = arith.constant dense<0.000000e+00> : vector<2x128xf32>
    %636 = tpu.matmul %543, %635, %cst_302 {dimension_numbers = #tpu.dot_dimension_numbers<[1], [0], [0], [1], [0, 0, 1, 1], [], []>} : vector<2x32xf32>, vector<32x128xf32>, vector<2x128xf32> -> vector<2x128xf32>
    %637 = arith.addf %634, %636 : vector<2x128xf32>
    %c0_303 = arith.constant 0 : index
    %c0_304 = arith.constant 0 : index
    %638 = vector.load %arg16[%c0_303, %c0_304] : memref<1x128xf32, #tpu.memory_space<vmem>>, vector<1x128xf32>
    %639 = vector.broadcast %638 : vector<1x128xf32> to vector<2x128xf32>
    %640 = arith.addf %637, %639 : vector<2x128xf32>
    %641 = vector.extract_strided_slice %640 {offsets = [0, 0], sizes = [2, 96], strides = [1, 1]} : vector<2x128xf32> to vector<2x96xf32>
    %642 = arith.negf %641 : vector<2x96xf32>
    %643 = math.exp %642 : vector<2x96xf32>
    %cst_305 = arith.constant 1.000000e+00 : f32
    %644 = vector.broadcast %cst_305 : f32 to vector<2x96xf32>
    %645 = arith.addf %644, %643 : vector<2x96xf32>
    %646 = arith.divf %644, %645 : vector<2x96xf32>
    %647 = vector.extract_strided_slice %640 {offsets = [0, 96], sizes = [2, 32], strides = [1, 1]} : vector<2x128xf32> to vector<2x32xf32>
    %648 = math.tanh %647 : vector<2x32xf32>
    %649 = vector.extract_strided_slice %646 {offsets = [0, 0], sizes = [2, 32], strides = [1, 1]} : vector<2x96xf32> to vector<2x32xf32>
    %650 = vector.extract_strided_slice %646 {offsets = [0, 32], sizes = [2, 32], strides = [1, 1]} : vector<2x96xf32> to vector<2x32xf32>
    %651 = vector.extract_strided_slice %646 {offsets = [0, 64], sizes = [2, 32], strides = [1, 1]} : vector<2x96xf32> to vector<2x32xf32>
    %652 = arith.mulf %650, %541 : vector<2x32xf32>
    %653 = arith.mulf %649, %648 : vector<2x32xf32>
    %654 = arith.addf %652, %653 : vector<2x32xf32>
    %655 = math.tanh %654 : vector<2x32xf32>
    %656 = arith.mulf %651, %655 : vector<2x32xf32>
    %657 = vector.shape_cast %656 : vector<2x32xf32> to vector<2x1x32xf32>
    %c0_306 = arith.constant 0 : index
    %c0_307 = arith.constant 0 : index
    %c0_308 = arith.constant 0 : index
    %658 = vector.load %arg2[%c0_306, %c0_307, %c0_308] : memref<2x128x32xf32, #tpu.memory_space<vmem>>, vector<2x128x32xf32>
    "tpu.trace_start"() <{level = 10 : i32, message = "bqk,btk->bqt"}> : () -> ()
    %cst_309 = arith.constant dense<0.000000e+00> : vector<2x1x128xf32>
    %659 = tpu.matmul %657, %658, %cst_309 {dimension_numbers = #tpu.dot_dimension_numbers<[2], [2], [1], [1], [0, 0, 0, 1, 1, 1], [0], [0]>} : vector<2x1x32xf32>, vector<2x128x32xf32>, vector<2x1x128xf32> -> vector<2x1x128xf32>
    "tpu.trace_stop"() : () -> ()
    %660 = vector.shape_cast %659 : vector<2x1x128xf32> to vector<2x128xf32>
    %c0_310 = arith.constant 0 : index
    %c0_311 = arith.constant 0 : index
    %661 = vector.load %arg4[%c0_310, %c0_311] : memref<2x128xf32, #tpu.memory_space<vmem>>, vector<2x128xf32>
    %662 = arith.addf %660, %661 : vector<2x128xf32>
    %cst_312 = arith.constant dense<0xFF800000> : vector<2xf32>
    %663 = vector.multi_reduction <maximumf>, %662, %cst_312 [1] : vector<2x128xf32> to vector<2xf32>
    %664 = vector.shape_cast %663 : vector<2xf32> to vector<2x1xf32>
    %665 = vector.broadcast %664 : vector<2x1xf32> to vector<2x128xf32>
    %666 = arith.subf %662, %665 : vector<2x128xf32>
    %667 = math.exp %666 : vector<2x128xf32>
    %cst_313 = arith.constant dense<0.000000e+00> : vector<2xf32>
    %668 = vector.multi_reduction <add>, %667, %cst_313 [1] : vector<2x128xf32> to vector<2xf32>
    %669 = vector.shape_cast %668 : vector<2xf32> to vector<2x1xf32>
    %670 = tpu.reciprocal %669 {approx = true} : vector<2x1xf32> -> vector<2x1xf32>
    %671 = arith.mulf %669, %670 : vector<2x1xf32>
    %cst_314 = arith.constant 2.000000e+00 : f32
    %672 = vector.broadcast %cst_314 : f32 to vector<2x1xf32>
    %673 = arith.subf %672, %671 : vector<2x1xf32>
    %674 = arith.mulf %670, %673 : vector<2x1xf32>
    %675 = vector.broadcast %674 : vector<2x1xf32> to vector<2x128xf32>
    %676 = arith.mulf %667, %675 : vector<2x128xf32>
    %677 = vector.shape_cast %676 : vector<2x128xf32> to vector<2x1x128xf32>
    %c0_315 = arith.constant 0 : index
    %c0_316 = arith.constant 0 : index
    %c0_317 = arith.constant 0 : index
    %678 = vector.load %arg3[%c0_315, %c0_316, %c0_317] : memref<2x128x32xf32, #tpu.memory_space<vmem>>, vector<2x128x32xf32>
    "tpu.trace_start"() <{level = 10 : i32, message = "bqt,btk->bqk"}> : () -> ()
    %cst_318 = arith.constant dense<0.000000e+00> : vector<2x1x32xf32>
    %679 = tpu.matmul %677, %678, %cst_318 {dimension_numbers = #tpu.dot_dimension_numbers<[2], [1], [1], [2], [0, 0, 0, 1, 1, 2], [0], [0]>} : vector<2x1x128xf32>, vector<2x128x32xf32>, vector<2x1x32xf32> -> vector<2x1x32xf32>
    "tpu.trace_stop"() : () -> ()
    %680 = vector.shape_cast %679 : vector<2x1x32xf32> to vector<2x32xf32>
    %c0_319 = arith.constant 0 : index
    %c0_320 = arith.constant 0 : index
    %681 = vector.load %arg6[%c0_319, %c0_320] : memref<128x32xf32, #tpu.memory_space<vmem>>, vector<128x32xf32>
    %cst_321 = arith.constant dense<0.000000e+00> : vector<2x128xf32>
    %682 = tpu.matmul %656, %681, %cst_321 {dimension_numbers = #tpu.dot_dimension_numbers<[1], [1], [0], [0], [0, 0, 1, 0], [], []>} : vector<2x32xf32>, vector<128x32xf32>, vector<2x128xf32> -> vector<2x128xf32>
    %c0_322 = arith.constant 0 : index
    %c0_323 = arith.constant 0 : index
    %683 = vector.load %arg7[%c0_322, %c0_323] : memref<128x32xf32, #tpu.memory_space<vmem>>, vector<128x32xf32>
    %cst_324 = arith.constant dense<0.000000e+00> : vector<2x128xf32>
    %684 = tpu.matmul %680, %683, %cst_324 {dimension_numbers = #tpu.dot_dimension_numbers<[1], [1], [0], [0], [0, 0, 1, 0], [], []>} : vector<2x32xf32>, vector<128x32xf32>, vector<2x128xf32> -> vector<2x128xf32>
    %685 = arith.addf %682, %684 : vector<2x128xf32>
    %c0_325 = arith.constant 0 : index
    %c0_326 = arith.constant 0 : index
    %686 = vector.load %arg17[%c0_325, %c0_326] : memref<1x128xf32, #tpu.memory_space<vmem>>, vector<1x128xf32>
    %687 = vector.broadcast %686 : vector<1x128xf32> to vector<2x128xf32>
    %688 = arith.addf %685, %687 : vector<2x128xf32>
    %cst_327 = arith.constant dense<0xFF800000> : vector<2xf32>
    %689 = vector.multi_reduction <maximumf>, %688, %cst_327 [1] : vector<2x128xf32> to vector<2xf32>
    %690 = vector.shape_cast %689 : vector<2xf32> to vector<2x1xf32>
    %691 = vector.broadcast %690 : vector<2x1xf32> to vector<2x128xf32>
    %692 = arith.cmpf oeq, %688, %691 : vector<2x128xf32>
    %693 = arith.extui %692 : vector<2x128xi1> to vector<2x128xi32>
    %694 = arith.sitofp %693 : vector<2x128xi32> to vector<2x128xf32>
    %c0_328 = arith.constant 0 : index
    %c0_329 = arith.constant 0 : index
    %695 = vector.load %arg5[%c0_328, %c0_329] : memref<128x128xf32, #tpu.memory_space<vmem>>, vector<128x128xf32>
    %cst_330 = arith.constant dense<0.000000e+00> : vector<2x128xf32>
    %696 = tpu.matmul %694, %695, %cst_330 {dimension_numbers = #tpu.dot_dimension_numbers<[1], [0], [0], [1], [0, 0, 1, 1], [], []>} : vector<2x128xf32>, vector<128x128xf32>, vector<2x128xf32> -> vector<2x128xf32>
    %c0_331 = arith.constant 0 : index
    %c0_332 = arith.constant 0 : index
    %697 = vector.load %arg8[%c0_331, %c0_332] : memref<32x128xf32, #tpu.memory_space<vmem>>, vector<32x128xf32>
    %cst_333 = arith.constant dense<0.000000e+00> : vector<2x128xf32>
    %698 = tpu.matmul %680, %697, %cst_333 {dimension_numbers = #tpu.dot_dimension_numbers<[1], [0], [0], [1], [0, 0, 1, 1], [], []>} : vector<2x32xf32>, vector<32x128xf32>, vector<2x128xf32> -> vector<2x128xf32>
    %699 = arith.addf %696, %698 : vector<2x128xf32>
    %c0_334 = arith.constant 0 : index
    %c0_335 = arith.constant 0 : index
    %700 = vector.load %arg9[%c0_334, %c0_335] : memref<32x128xf32, #tpu.memory_space<vmem>>, vector<32x128xf32>
    %cst_336 = arith.constant dense<0.000000e+00> : vector<2x128xf32>
    %701 = tpu.matmul %608, %700, %cst_336 {dimension_numbers = #tpu.dot_dimension_numbers<[1], [0], [0], [1], [0, 0, 1, 1], [], []>} : vector<2x32xf32>, vector<32x128xf32>, vector<2x128xf32> -> vector<2x128xf32>
    %702 = arith.addf %699, %701 : vector<2x128xf32>
    %c0_337 = arith.constant 0 : index
    %c0_338 = arith.constant 0 : index
    %703 = vector.load %arg10[%c0_337, %c0_338] : memref<1x128xf32, #tpu.memory_space<vmem>>, vector<1x128xf32>
    %704 = vector.broadcast %703 : vector<1x128xf32> to vector<2x128xf32>
    %705 = arith.addf %702, %704 : vector<2x128xf32>
    %706 = vector.extract_strided_slice %705 {offsets = [0, 0], sizes = [2, 96], strides = [1, 1]} : vector<2x128xf32> to vector<2x96xf32>
    %707 = arith.negf %706 : vector<2x96xf32>
    %708 = math.exp %707 : vector<2x96xf32>
    %cst_339 = arith.constant 1.000000e+00 : f32
    %709 = vector.broadcast %cst_339 : f32 to vector<2x96xf32>
    %710 = arith.addf %709, %708 : vector<2x96xf32>
    %711 = arith.divf %709, %710 : vector<2x96xf32>
    %712 = vector.extract_strided_slice %705 {offsets = [0, 96], sizes = [2, 32], strides = [1, 1]} : vector<2x128xf32> to vector<2x32xf32>
    %713 = math.tanh %712 : vector<2x32xf32>
    %714 = vector.extract_strided_slice %711 {offsets = [0, 0], sizes = [2, 32], strides = [1, 1]} : vector<2x96xf32> to vector<2x32xf32>
    %715 = vector.extract_strided_slice %711 {offsets = [0, 32], sizes = [2, 32], strides = [1, 1]} : vector<2x96xf32> to vector<2x32xf32>
    %716 = vector.extract_strided_slice %711 {offsets = [0, 64], sizes = [2, 32], strides = [1, 1]} : vector<2x96xf32> to vector<2x32xf32>
    %717 = arith.mulf %715, %606 : vector<2x32xf32>
    %718 = arith.mulf %714, %713 : vector<2x32xf32>
    %719 = arith.addf %717, %718 : vector<2x32xf32>
    %720 = math.tanh %719 : vector<2x32xf32>
    %721 = arith.mulf %716, %720 : vector<2x32xf32>
    %c0_340 = arith.constant 0 : index
    %c0_341 = arith.constant 0 : index
    %722 = vector.load %arg11[%c0_340, %c0_341] : memref<32x128xf32, #tpu.memory_space<vmem>>, vector<32x128xf32>
    %cst_342 = arith.constant dense<0.000000e+00> : vector<2x128xf32>
    %723 = tpu.matmul %721, %722, %cst_342 {dimension_numbers = #tpu.dot_dimension_numbers<[1], [0], [0], [1], [0, 0, 1, 1], [], []>} : vector<2x32xf32>, vector<32x128xf32>, vector<2x128xf32> -> vector<2x128xf32>
    %c0_343 = arith.constant 0 : index
    %c0_344 = arith.constant 0 : index
    %724 = vector.load %arg12[%c0_343, %c0_344] : memref<32x128xf32, #tpu.memory_space<vmem>>, vector<32x128xf32>
    %cst_345 = arith.constant dense<0.000000e+00> : vector<2x128xf32>
    %725 = tpu.matmul %632, %724, %cst_345 {dimension_numbers = #tpu.dot_dimension_numbers<[1], [0], [0], [1], [0, 0, 1, 1], [], []>} : vector<2x32xf32>, vector<32x128xf32>, vector<2x128xf32> -> vector<2x128xf32>
    %726 = arith.addf %723, %725 : vector<2x128xf32>
    %c0_346 = arith.constant 0 : index
    %c0_347 = arith.constant 0 : index
    %727 = vector.load %arg13[%c0_346, %c0_347] : memref<1x128xf32, #tpu.memory_space<vmem>>, vector<1x128xf32>
    %728 = vector.broadcast %727 : vector<1x128xf32> to vector<2x128xf32>
    %729 = arith.addf %726, %728 : vector<2x128xf32>
    %730 = vector.extract_strided_slice %729 {offsets = [0, 0], sizes = [2, 96], strides = [1, 1]} : vector<2x128xf32> to vector<2x96xf32>
    %731 = arith.negf %730 : vector<2x96xf32>
    %732 = math.exp %731 : vector<2x96xf32>
    %cst_348 = arith.constant 1.000000e+00 : f32
    %733 = vector.broadcast %cst_348 : f32 to vector<2x96xf32>
    %734 = arith.addf %733, %732 : vector<2x96xf32>
    %735 = arith.divf %733, %734 : vector<2x96xf32>
    %736 = vector.extract_strided_slice %729 {offsets = [0, 96], sizes = [2, 32], strides = [1, 1]} : vector<2x128xf32> to vector<2x32xf32>
    %737 = math.tanh %736 : vector<2x32xf32>
    %738 = vector.extract_strided_slice %735 {offsets = [0, 0], sizes = [2, 32], strides = [1, 1]} : vector<2x96xf32> to vector<2x32xf32>
    %739 = vector.extract_strided_slice %735 {offsets = [0, 32], sizes = [2, 32], strides = [1, 1]} : vector<2x96xf32> to vector<2x32xf32>
    %740 = vector.extract_strided_slice %735 {offsets = [0, 64], sizes = [2, 32], strides = [1, 1]} : vector<2x96xf32> to vector<2x32xf32>
    %741 = arith.mulf %739, %630 : vector<2x32xf32>
    %742 = arith.mulf %738, %737 : vector<2x32xf32>
    %743 = arith.addf %741, %742 : vector<2x32xf32>
    %744 = math.tanh %743 : vector<2x32xf32>
    %745 = arith.mulf %740, %744 : vector<2x32xf32>
    %c0_349 = arith.constant 0 : index
    %c0_350 = arith.constant 0 : index
    %746 = vector.load %arg14[%c0_349, %c0_350] : memref<32x128xf32, #tpu.memory_space<vmem>>, vector<32x128xf32>
    %cst_351 = arith.constant dense<0.000000e+00> : vector<2x128xf32>
    %747 = tpu.matmul %745, %746, %cst_351 {dimension_numbers = #tpu.dot_dimension_numbers<[1], [0], [0], [1], [0, 0, 1, 1], [], []>} : vector<2x32xf32>, vector<32x128xf32>, vector<2x128xf32> -> vector<2x128xf32>
    %c0_352 = arith.constant 0 : index
    %c0_353 = arith.constant 0 : index
    %748 = vector.load %arg15[%c0_352, %c0_353] : memref<32x128xf32, #tpu.memory_space<vmem>>, vector<32x128xf32>
    %cst_354 = arith.constant dense<0.000000e+00> : vector<2x128xf32>
    %749 = tpu.matmul %656, %748, %cst_354 {dimension_numbers = #tpu.dot_dimension_numbers<[1], [0], [0], [1], [0, 0, 1, 1], [], []>} : vector<2x32xf32>, vector<32x128xf32>, vector<2x128xf32> -> vector<2x128xf32>
    %750 = arith.addf %747, %749 : vector<2x128xf32>
    %c0_355 = arith.constant 0 : index
    %c0_356 = arith.constant 0 : index
    %751 = vector.load %arg16[%c0_355, %c0_356] : memref<1x128xf32, #tpu.memory_space<vmem>>, vector<1x128xf32>
    %752 = vector.broadcast %751 : vector<1x128xf32> to vector<2x128xf32>
    %753 = arith.addf %750, %752 : vector<2x128xf32>
    %754 = vector.extract_strided_slice %753 {offsets = [0, 0], sizes = [2, 96], strides = [1, 1]} : vector<2x128xf32> to vector<2x96xf32>
    %755 = arith.negf %754 : vector<2x96xf32>
    %756 = math.exp %755 : vector<2x96xf32>
    %cst_357 = arith.constant 1.000000e+00 : f32
    %757 = vector.broadcast %cst_357 : f32 to vector<2x96xf32>
    %758 = arith.addf %757, %756 : vector<2x96xf32>
    %759 = arith.divf %757, %758 : vector<2x96xf32>
    %760 = vector.extract_strided_slice %753 {offsets = [0, 96], sizes = [2, 32], strides = [1, 1]} : vector<2x128xf32> to vector<2x32xf32>
    %761 = math.tanh %760 : vector<2x32xf32>
    %762 = vector.extract_strided_slice %759 {offsets = [0, 0], sizes = [2, 32], strides = [1, 1]} : vector<2x96xf32> to vector<2x32xf32>
    %763 = vector.extract_strided_slice %759 {offsets = [0, 32], sizes = [2, 32], strides = [1, 1]} : vector<2x96xf32> to vector<2x32xf32>
    %764 = vector.extract_strided_slice %759 {offsets = [0, 64], sizes = [2, 32], strides = [1, 1]} : vector<2x96xf32> to vector<2x32xf32>
    %765 = arith.mulf %763, %654 : vector<2x32xf32>
    %766 = arith.mulf %762, %761 : vector<2x32xf32>
    %767 = arith.addf %765, %766 : vector<2x32xf32>
    %768 = math.tanh %767 : vector<2x32xf32>
    %769 = arith.mulf %764, %768 : vector<2x32xf32>
    %770 = vector.shape_cast %769 : vector<2x32xf32> to vector<2x1x32xf32>
    %c0_358 = arith.constant 0 : index
    %c0_359 = arith.constant 0 : index
    %c0_360 = arith.constant 0 : index
    %771 = vector.load %arg2[%c0_358, %c0_359, %c0_360] : memref<2x128x32xf32, #tpu.memory_space<vmem>>, vector<2x128x32xf32>
    "tpu.trace_start"() <{level = 10 : i32, message = "bqk,btk->bqt"}> : () -> ()
    %cst_361 = arith.constant dense<0.000000e+00> : vector<2x1x128xf32>
    %772 = tpu.matmul %770, %771, %cst_361 {dimension_numbers = #tpu.dot_dimension_numbers<[2], [2], [1], [1], [0, 0, 0, 1, 1, 1], [0], [0]>} : vector<2x1x32xf32>, vector<2x128x32xf32>, vector<2x1x128xf32> -> vector<2x1x128xf32>
    "tpu.trace_stop"() : () -> ()
    %773 = vector.shape_cast %772 : vector<2x1x128xf32> to vector<2x128xf32>
    %c0_362 = arith.constant 0 : index
    %c0_363 = arith.constant 0 : index
    %774 = vector.load %arg4[%c0_362, %c0_363] : memref<2x128xf32, #tpu.memory_space<vmem>>, vector<2x128xf32>
    %775 = arith.addf %773, %774 : vector<2x128xf32>
    %cst_364 = arith.constant dense<0xFF800000> : vector<2xf32>
    %776 = vector.multi_reduction <maximumf>, %775, %cst_364 [1] : vector<2x128xf32> to vector<2xf32>
    %777 = vector.shape_cast %776 : vector<2xf32> to vector<2x1xf32>
    %778 = vector.broadcast %777 : vector<2x1xf32> to vector<2x128xf32>
    %779 = arith.subf %775, %778 : vector<2x128xf32>
    %780 = math.exp %779 : vector<2x128xf32>
    %cst_365 = arith.constant dense<0.000000e+00> : vector<2xf32>
    %781 = vector.multi_reduction <add>, %780, %cst_365 [1] : vector<2x128xf32> to vector<2xf32>
    %782 = vector.shape_cast %781 : vector<2xf32> to vector<2x1xf32>
    %783 = tpu.reciprocal %782 {approx = true} : vector<2x1xf32> -> vector<2x1xf32>
    %784 = arith.mulf %782, %783 : vector<2x1xf32>
    %cst_366 = arith.constant 2.000000e+00 : f32
    %785 = vector.broadcast %cst_366 : f32 to vector<2x1xf32>
    %786 = arith.subf %785, %784 : vector<2x1xf32>
    %787 = arith.mulf %783, %786 : vector<2x1xf32>
    %788 = vector.broadcast %787 : vector<2x1xf32> to vector<2x128xf32>
    %789 = arith.mulf %780, %788 : vector<2x128xf32>
    %790 = vector.shape_cast %789 : vector<2x128xf32> to vector<2x1x128xf32>
    %c0_367 = arith.constant 0 : index
    %c0_368 = arith.constant 0 : index
    %c0_369 = arith.constant 0 : index
    %791 = vector.load %arg3[%c0_367, %c0_368, %c0_369] : memref<2x128x32xf32, #tpu.memory_space<vmem>>, vector<2x128x32xf32>
    "tpu.trace_start"() <{level = 10 : i32, message = "bqt,btk->bqk"}> : () -> ()
    %cst_370 = arith.constant dense<0.000000e+00> : vector<2x1x32xf32>
    %792 = tpu.matmul %790, %791, %cst_370 {dimension_numbers = #tpu.dot_dimension_numbers<[2], [1], [1], [2], [0, 0, 0, 1, 1, 2], [0], [0]>} : vector<2x1x128xf32>, vector<2x128x32xf32>, vector<2x1x32xf32> -> vector<2x1x32xf32>
    "tpu.trace_stop"() : () -> ()
    %793 = vector.shape_cast %792 : vector<2x1x32xf32> to vector<2x32xf32>
    %c0_371 = arith.constant 0 : index
    %c0_372 = arith.constant 0 : index
    %794 = vector.load %arg6[%c0_371, %c0_372] : memref<128x32xf32, #tpu.memory_space<vmem>>, vector<128x32xf32>
    %cst_373 = arith.constant dense<0.000000e+00> : vector<2x128xf32>
    %795 = tpu.matmul %769, %794, %cst_373 {dimension_numbers = #tpu.dot_dimension_numbers<[1], [1], [0], [0], [0, 0, 1, 0], [], []>} : vector<2x32xf32>, vector<128x32xf32>, vector<2x128xf32> -> vector<2x128xf32>
    %c0_374 = arith.constant 0 : index
    %c0_375 = arith.constant 0 : index
    %796 = vector.load %arg7[%c0_374, %c0_375] : memref<128x32xf32, #tpu.memory_space<vmem>>, vector<128x32xf32>
    %cst_376 = arith.constant dense<0.000000e+00> : vector<2x128xf32>
    %797 = tpu.matmul %793, %796, %cst_376 {dimension_numbers = #tpu.dot_dimension_numbers<[1], [1], [0], [0], [0, 0, 1, 0], [], []>} : vector<2x32xf32>, vector<128x32xf32>, vector<2x128xf32> -> vector<2x128xf32>
    %798 = arith.addf %795, %797 : vector<2x128xf32>
    %c0_377 = arith.constant 0 : index
    %c0_378 = arith.constant 0 : index
    %799 = vector.load %arg17[%c0_377, %c0_378] : memref<1x128xf32, #tpu.memory_space<vmem>>, vector<1x128xf32>
    %800 = vector.broadcast %799 : vector<1x128xf32> to vector<2x128xf32>
    %801 = arith.addf %798, %800 : vector<2x128xf32>
    %cst_379 = arith.constant dense<0xFF800000> : vector<2xf32>
    %802 = vector.multi_reduction <maximumf>, %801, %cst_379 [1] : vector<2x128xf32> to vector<2xf32>
    %803 = vector.shape_cast %802 : vector<2xf32> to vector<2x1xf32>
    %804 = vector.broadcast %803 : vector<2x1xf32> to vector<2x128xf32>
    %805 = arith.cmpf oeq, %801, %804 : vector<2x128xf32>
    %806 = arith.extui %805 : vector<2x128xi1> to vector<2x128xi32>
    %807 = arith.sitofp %806 : vector<2x128xi32> to vector<2x128xf32>
    %c0_380 = arith.constant 0 : index
    %c0_381 = arith.constant 0 : index
    %808 = vector.load %arg5[%c0_380, %c0_381] : memref<128x128xf32, #tpu.memory_space<vmem>>, vector<128x128xf32>
    %cst_382 = arith.constant dense<0.000000e+00> : vector<2x128xf32>
    %809 = tpu.matmul %807, %808, %cst_382 {dimension_numbers = #tpu.dot_dimension_numbers<[1], [0], [0], [1], [0, 0, 1, 1], [], []>} : vector<2x128xf32>, vector<128x128xf32>, vector<2x128xf32> -> vector<2x128xf32>
    %c0_383 = arith.constant 0 : index
    %c0_384 = arith.constant 0 : index
    %810 = vector.load %arg8[%c0_383, %c0_384] : memref<32x128xf32, #tpu.memory_space<vmem>>, vector<32x128xf32>
    %cst_385 = arith.constant dense<0.000000e+00> : vector<2x128xf32>
    %811 = tpu.matmul %793, %810, %cst_385 {dimension_numbers = #tpu.dot_dimension_numbers<[1], [0], [0], [1], [0, 0, 1, 1], [], []>} : vector<2x32xf32>, vector<32x128xf32>, vector<2x128xf32> -> vector<2x128xf32>
    %812 = arith.addf %809, %811 : vector<2x128xf32>
    %c0_386 = arith.constant 0 : index
    %c0_387 = arith.constant 0 : index
    %813 = vector.load %arg9[%c0_386, %c0_387] : memref<32x128xf32, #tpu.memory_space<vmem>>, vector<32x128xf32>
    %cst_388 = arith.constant dense<0.000000e+00> : vector<2x128xf32>
    %814 = tpu.matmul %721, %813, %cst_388 {dimension_numbers = #tpu.dot_dimension_numbers<[1], [0], [0], [1], [0, 0, 1, 1], [], []>} : vector<2x32xf32>, vector<32x128xf32>, vector<2x128xf32> -> vector<2x128xf32>
    %815 = arith.addf %812, %814 : vector<2x128xf32>
    %c0_389 = arith.constant 0 : index
    %c0_390 = arith.constant 0 : index
    %816 = vector.load %arg10[%c0_389, %c0_390] : memref<1x128xf32, #tpu.memory_space<vmem>>, vector<1x128xf32>
    %817 = vector.broadcast %816 : vector<1x128xf32> to vector<2x128xf32>
    %818 = arith.addf %815, %817 : vector<2x128xf32>
    %819 = vector.extract_strided_slice %818 {offsets = [0, 0], sizes = [2, 96], strides = [1, 1]} : vector<2x128xf32> to vector<2x96xf32>
    %820 = arith.negf %819 : vector<2x96xf32>
    %821 = math.exp %820 : vector<2x96xf32>
    %cst_391 = arith.constant 1.000000e+00 : f32
    %822 = vector.broadcast %cst_391 : f32 to vector<2x96xf32>
    %823 = arith.addf %822, %821 : vector<2x96xf32>
    %824 = arith.divf %822, %823 : vector<2x96xf32>
    %825 = vector.extract_strided_slice %818 {offsets = [0, 96], sizes = [2, 32], strides = [1, 1]} : vector<2x128xf32> to vector<2x32xf32>
    %826 = math.tanh %825 : vector<2x32xf32>
    %827 = vector.extract_strided_slice %824 {offsets = [0, 0], sizes = [2, 32], strides = [1, 1]} : vector<2x96xf32> to vector<2x32xf32>
    %828 = vector.extract_strided_slice %824 {offsets = [0, 32], sizes = [2, 32], strides = [1, 1]} : vector<2x96xf32> to vector<2x32xf32>
    %829 = vector.extract_strided_slice %824 {offsets = [0, 64], sizes = [2, 32], strides = [1, 1]} : vector<2x96xf32> to vector<2x32xf32>
    %830 = arith.mulf %828, %719 : vector<2x32xf32>
    %831 = arith.mulf %827, %826 : vector<2x32xf32>
    %832 = arith.addf %830, %831 : vector<2x32xf32>
    %833 = math.tanh %832 : vector<2x32xf32>
    %834 = arith.mulf %829, %833 : vector<2x32xf32>
    %c0_392 = arith.constant 0 : index
    %c0_393 = arith.constant 0 : index
    %835 = vector.load %arg11[%c0_392, %c0_393] : memref<32x128xf32, #tpu.memory_space<vmem>>, vector<32x128xf32>
    %cst_394 = arith.constant dense<0.000000e+00> : vector<2x128xf32>
    %836 = tpu.matmul %834, %835, %cst_394 {dimension_numbers = #tpu.dot_dimension_numbers<[1], [0], [0], [1], [0, 0, 1, 1], [], []>} : vector<2x32xf32>, vector<32x128xf32>, vector<2x128xf32> -> vector<2x128xf32>
    %c0_395 = arith.constant 0 : index
    %c0_396 = arith.constant 0 : index
    %837 = vector.load %arg12[%c0_395, %c0_396] : memref<32x128xf32, #tpu.memory_space<vmem>>, vector<32x128xf32>
    %cst_397 = arith.constant dense<0.000000e+00> : vector<2x128xf32>
    %838 = tpu.matmul %745, %837, %cst_397 {dimension_numbers = #tpu.dot_dimension_numbers<[1], [0], [0], [1], [0, 0, 1, 1], [], []>} : vector<2x32xf32>, vector<32x128xf32>, vector<2x128xf32> -> vector<2x128xf32>
    %839 = arith.addf %836, %838 : vector<2x128xf32>
    %c0_398 = arith.constant 0 : index
    %c0_399 = arith.constant 0 : index
    %840 = vector.load %arg13[%c0_398, %c0_399] : memref<1x128xf32, #tpu.memory_space<vmem>>, vector<1x128xf32>
    %841 = vector.broadcast %840 : vector<1x128xf32> to vector<2x128xf32>
    %842 = arith.addf %839, %841 : vector<2x128xf32>
    %843 = vector.extract_strided_slice %842 {offsets = [0, 0], sizes = [2, 96], strides = [1, 1]} : vector<2x128xf32> to vector<2x96xf32>
    %844 = arith.negf %843 : vector<2x96xf32>
    %845 = math.exp %844 : vector<2x96xf32>
    %cst_400 = arith.constant 1.000000e+00 : f32
    %846 = vector.broadcast %cst_400 : f32 to vector<2x96xf32>
    %847 = arith.addf %846, %845 : vector<2x96xf32>
    %848 = arith.divf %846, %847 : vector<2x96xf32>
    %849 = vector.extract_strided_slice %842 {offsets = [0, 96], sizes = [2, 32], strides = [1, 1]} : vector<2x128xf32> to vector<2x32xf32>
    %850 = math.tanh %849 : vector<2x32xf32>
    %851 = vector.extract_strided_slice %848 {offsets = [0, 0], sizes = [2, 32], strides = [1, 1]} : vector<2x96xf32> to vector<2x32xf32>
    %852 = vector.extract_strided_slice %848 {offsets = [0, 32], sizes = [2, 32], strides = [1, 1]} : vector<2x96xf32> to vector<2x32xf32>
    %853 = vector.extract_strided_slice %848 {offsets = [0, 64], sizes = [2, 32], strides = [1, 1]} : vector<2x96xf32> to vector<2x32xf32>
    %854 = arith.mulf %852, %743 : vector<2x32xf32>
    %855 = arith.mulf %851, %850 : vector<2x32xf32>
    %856 = arith.addf %854, %855 : vector<2x32xf32>
    %857 = math.tanh %856 : vector<2x32xf32>
    %858 = arith.mulf %853, %857 : vector<2x32xf32>
    %c0_401 = arith.constant 0 : index
    %c0_402 = arith.constant 0 : index
    %859 = vector.load %arg14[%c0_401, %c0_402] : memref<32x128xf32, #tpu.memory_space<vmem>>, vector<32x128xf32>
    %cst_403 = arith.constant dense<0.000000e+00> : vector<2x128xf32>
    %860 = tpu.matmul %858, %859, %cst_403 {dimension_numbers = #tpu.dot_dimension_numbers<[1], [0], [0], [1], [0, 0, 1, 1], [], []>} : vector<2x32xf32>, vector<32x128xf32>, vector<2x128xf32> -> vector<2x128xf32>
    %c0_404 = arith.constant 0 : index
    %c0_405 = arith.constant 0 : index
    %861 = vector.load %arg15[%c0_404, %c0_405] : memref<32x128xf32, #tpu.memory_space<vmem>>, vector<32x128xf32>
    %cst_406 = arith.constant dense<0.000000e+00> : vector<2x128xf32>
    %862 = tpu.matmul %769, %861, %cst_406 {dimension_numbers = #tpu.dot_dimension_numbers<[1], [0], [0], [1], [0, 0, 1, 1], [], []>} : vector<2x32xf32>, vector<32x128xf32>, vector<2x128xf32> -> vector<2x128xf32>
    %863 = arith.addf %860, %862 : vector<2x128xf32>
    %c0_407 = arith.constant 0 : index
    %c0_408 = arith.constant 0 : index
    %864 = vector.load %arg16[%c0_407, %c0_408] : memref<1x128xf32, #tpu.memory_space<vmem>>, vector<1x128xf32>
    %865 = vector.broadcast %864 : vector<1x128xf32> to vector<2x128xf32>
    %866 = arith.addf %863, %865 : vector<2x128xf32>
    %867 = vector.extract_strided_slice %866 {offsets = [0, 0], sizes = [2, 96], strides = [1, 1]} : vector<2x128xf32> to vector<2x96xf32>
    %868 = arith.negf %867 : vector<2x96xf32>
    %869 = math.exp %868 : vector<2x96xf32>
    %cst_409 = arith.constant 1.000000e+00 : f32
    %870 = vector.broadcast %cst_409 : f32 to vector<2x96xf32>
    %871 = arith.addf %870, %869 : vector<2x96xf32>
    %872 = arith.divf %870, %871 : vector<2x96xf32>
    %873 = vector.extract_strided_slice %866 {offsets = [0, 96], sizes = [2, 32], strides = [1, 1]} : vector<2x128xf32> to vector<2x32xf32>
    %874 = math.tanh %873 : vector<2x32xf32>
    %875 = vector.extract_strided_slice %872 {offsets = [0, 0], sizes = [2, 32], strides = [1, 1]} : vector<2x96xf32> to vector<2x32xf32>
    %876 = vector.extract_strided_slice %872 {offsets = [0, 32], sizes = [2, 32], strides = [1, 1]} : vector<2x96xf32> to vector<2x32xf32>
    %877 = vector.extract_strided_slice %872 {offsets = [0, 64], sizes = [2, 32], strides = [1, 1]} : vector<2x96xf32> to vector<2x32xf32>
    %878 = arith.mulf %876, %767 : vector<2x32xf32>
    %879 = arith.mulf %875, %874 : vector<2x32xf32>
    %880 = arith.addf %878, %879 : vector<2x32xf32>
    %881 = math.tanh %880 : vector<2x32xf32>
    %882 = arith.mulf %877, %881 : vector<2x32xf32>
    %883 = vector.shape_cast %882 : vector<2x32xf32> to vector<2x1x32xf32>
    %c0_410 = arith.constant 0 : index
    %c0_411 = arith.constant 0 : index
    %c0_412 = arith.constant 0 : index
    %884 = vector.load %arg2[%c0_410, %c0_411, %c0_412] : memref<2x128x32xf32, #tpu.memory_space<vmem>>, vector<2x128x32xf32>
    "tpu.trace_start"() <{level = 10 : i32, message = "bqk,btk->bqt"}> : () -> ()
    %cst_413 = arith.constant dense<0.000000e+00> : vector<2x1x128xf32>
    %885 = tpu.matmul %883, %884, %cst_413 {dimension_numbers = #tpu.dot_dimension_numbers<[2], [2], [1], [1], [0, 0, 0, 1, 1, 1], [0], [0]>} : vector<2x1x32xf32>, vector<2x128x32xf32>, vector<2x1x128xf32> -> vector<2x1x128xf32>
    "tpu.trace_stop"() : () -> ()
    %886 = vector.shape_cast %885 : vector<2x1x128xf32> to vector<2x128xf32>
    %c0_414 = arith.constant 0 : index
    %c0_415 = arith.constant 0 : index
    %887 = vector.load %arg4[%c0_414, %c0_415] : memref<2x128xf32, #tpu.memory_space<vmem>>, vector<2x128xf32>
    %888 = arith.addf %886, %887 : vector<2x128xf32>
    %cst_416 = arith.constant dense<0xFF800000> : vector<2xf32>
    %889 = vector.multi_reduction <maximumf>, %888, %cst_416 [1] : vector<2x128xf32> to vector<2xf32>
    %890 = vector.shape_cast %889 : vector<2xf32> to vector<2x1xf32>
    %891 = vector.broadcast %890 : vector<2x1xf32> to vector<2x128xf32>
    %892 = arith.subf %888, %891 : vector<2x128xf32>
    %893 = math.exp %892 : vector<2x128xf32>
    %cst_417 = arith.constant dense<0.000000e+00> : vector<2xf32>
    %894 = vector.multi_reduction <add>, %893, %cst_417 [1] : vector<2x128xf32> to vector<2xf32>
    %895 = vector.shape_cast %894 : vector<2xf32> to vector<2x1xf32>
    %896 = tpu.reciprocal %895 {approx = true} : vector<2x1xf32> -> vector<2x1xf32>
    %897 = arith.mulf %895, %896 : vector<2x1xf32>
    %cst_418 = arith.constant 2.000000e+00 : f32
    %898 = vector.broadcast %cst_418 : f32 to vector<2x1xf32>
    %899 = arith.subf %898, %897 : vector<2x1xf32>
    %900 = arith.mulf %896, %899 : vector<2x1xf32>
    %901 = vector.broadcast %900 : vector<2x1xf32> to vector<2x128xf32>
    %902 = arith.mulf %893, %901 : vector<2x128xf32>
    %903 = vector.shape_cast %902 : vector<2x128xf32> to vector<2x1x128xf32>
    %c0_419 = arith.constant 0 : index
    %c0_420 = arith.constant 0 : index
    %c0_421 = arith.constant 0 : index
    %904 = vector.load %arg3[%c0_419, %c0_420, %c0_421] : memref<2x128x32xf32, #tpu.memory_space<vmem>>, vector<2x128x32xf32>
    "tpu.trace_start"() <{level = 10 : i32, message = "bqt,btk->bqk"}> : () -> ()
    %cst_422 = arith.constant dense<0.000000e+00> : vector<2x1x32xf32>
    %905 = tpu.matmul %903, %904, %cst_422 {dimension_numbers = #tpu.dot_dimension_numbers<[2], [1], [1], [2], [0, 0, 0, 1, 1, 2], [0], [0]>} : vector<2x1x128xf32>, vector<2x128x32xf32>, vector<2x1x32xf32> -> vector<2x1x32xf32>
    "tpu.trace_stop"() : () -> ()
    %906 = vector.shape_cast %905 : vector<2x1x32xf32> to vector<2x32xf32>
    %c0_423 = arith.constant 0 : index
    %c0_424 = arith.constant 0 : index
    %907 = vector.load %arg6[%c0_423, %c0_424] : memref<128x32xf32, #tpu.memory_space<vmem>>, vector<128x32xf32>
    %cst_425 = arith.constant dense<0.000000e+00> : vector<2x128xf32>
    %908 = tpu.matmul %882, %907, %cst_425 {dimension_numbers = #tpu.dot_dimension_numbers<[1], [1], [0], [0], [0, 0, 1, 0], [], []>} : vector<2x32xf32>, vector<128x32xf32>, vector<2x128xf32> -> vector<2x128xf32>
    %c0_426 = arith.constant 0 : index
    %c0_427 = arith.constant 0 : index
    %909 = vector.load %arg7[%c0_426, %c0_427] : memref<128x32xf32, #tpu.memory_space<vmem>>, vector<128x32xf32>
    %cst_428 = arith.constant dense<0.000000e+00> : vector<2x128xf32>
    %910 = tpu.matmul %906, %909, %cst_428 {dimension_numbers = #tpu.dot_dimension_numbers<[1], [1], [0], [0], [0, 0, 1, 0], [], []>} : vector<2x32xf32>, vector<128x32xf32>, vector<2x128xf32> -> vector<2x128xf32>
    %911 = arith.addf %908, %910 : vector<2x128xf32>
    %c0_429 = arith.constant 0 : index
    %c0_430 = arith.constant 0 : index
    %912 = vector.load %arg17[%c0_429, %c0_430] : memref<1x128xf32, #tpu.memory_space<vmem>>, vector<1x128xf32>
    %913 = vector.broadcast %912 : vector<1x128xf32> to vector<2x128xf32>
    %914 = arith.addf %911, %913 : vector<2x128xf32>
    %915 = vector.shape_cast %123 : vector<2x128xf32> to vector<1x2x128xf32>
    %916 = vector.shape_cast %236 : vector<2x128xf32> to vector<1x2x128xf32>
    %917 = vector.shape_cast %349 : vector<2x128xf32> to vector<1x2x128xf32>
    %918 = vector.shape_cast %462 : vector<2x128xf32> to vector<1x2x128xf32>
    %919 = vector.shape_cast %575 : vector<2x128xf32> to vector<1x2x128xf32>
    %920 = vector.shape_cast %688 : vector<2x128xf32> to vector<1x2x128xf32>
    %921 = vector.shape_cast %801 : vector<2x128xf32> to vector<1x2x128xf32>
    %922 = vector.shape_cast %914 : vector<2x128xf32> to vector<1x2x128xf32>
    %923 = tpu.concatenate %915, %916, %917, %918, %919, %920, %921, %922 in 0 : vector<1x2x128xf32>, vector<1x2x128xf32>, vector<1x2x128xf32>, vector<1x2x128xf32>, vector<1x2x128xf32>, vector<1x2x128xf32>, vector<1x2x128xf32>, vector<1x2x128xf32> -> vector<8x2x128xf32>
    %c0_431 = arith.constant 0 : index
    %c0_432 = arith.constant 0 : index
    %c0_433 = arith.constant 0 : index
    %924 = vector.load %arg18[%c0_431, %c0_432, %c0_433] : memref<8x2x128xf32, #tpu.memory_space<vmem>>, vector<8x2x128xf32>
    tpu.vector_store %arg18[%c0_431, %c0_432, %c0_433], %923 {strides = array<i32>} : memref<8x2x128xf32, #tpu.memory_space<vmem>>, vector<8x2x128xf32>,
    %925 = vector.shape_cast %111 : vector<2x128xf32> to vector<1x2x128xf32>
    %926 = vector.shape_cast %224 : vector<2x128xf32> to vector<1x2x128xf32>
    %927 = vector.shape_cast %337 : vector<2x128xf32> to vector<1x2x128xf32>
    %928 = vector.shape_cast %450 : vector<2x128xf32> to vector<1x2x128xf32>
    %929 = vector.shape_cast %563 : vector<2x128xf32> to vector<1x2x128xf32>
    %930 = vector.shape_cast %676 : vector<2x128xf32> to vector<1x2x128xf32>
    %931 = vector.shape_cast %789 : vector<2x128xf32> to vector<1x2x128xf32>
    %932 = vector.shape_cast %902 : vector<2x128xf32> to vector<1x2x128xf32>
    %933 = tpu.concatenate %925, %926, %927, %928, %929, %930, %931, %932 in 0 : vector<1x2x128xf32>, vector<1x2x128xf32>, vector<1x2x128xf32>, vector<1x2x128xf32>, vector<1x2x128xf32>, vector<1x2x128xf32>, vector<1x2x128xf32>, vector<1x2x128xf32> -> vector<8x2x128xf32>
    %c0_434 = arith.constant 0 : index
    %c0_435 = arith.constant 0 : index
    %c0_436 = arith.constant 0 : index
    %934 = vector.load %arg19[%c0_434, %c0_435, %c0_436] : memref<8x2x128xf32, #tpu.memory_space<vmem>>, vector<8x2x128xf32>
    tpu.vector_store %arg19[%c0_434, %c0_435, %c0_436], %933 {strides = array<i32>} : memref<8x2x128xf32, #tpu.memory_space<vmem>>, vector<8x2x128xf32>,
    %c0_437 = arith.constant 0 : index
    %c0_438 = arith.constant 0 : index
    %935 = vector.load %arg20[%c0_437, %c0_438] : memref<2x32xf32, #tpu.memory_space<vmem>>, vector<2x32xf32>
    tpu.vector_store %arg20[%c0_437, %c0_438], %834 {strides = array<i32>} : memref<2x32xf32, #tpu.memory_space<vmem>>, vector<2x32xf32>,
    %c0_439 = arith.constant 0 : index
    %c0_440 = arith.constant 0 : index
    %936 = vector.load %arg21[%c0_439, %c0_440] : memref<2x32xf32, #tpu.memory_space<vmem>>, vector<2x32xf32>
    tpu.vector_store %arg21[%c0_439, %c0_440], %832 {strides = array<i32>} : memref<2x32xf32, #tpu.memory_space<vmem>>, vector<2x32xf32>,
    %c0_441 = arith.constant 0 : index
    %c0_442 = arith.constant 0 : index
    %937 = vector.load %arg22[%c0_441, %c0_442] : memref<2x32xf32, #tpu.memory_space<vmem>>, vector<2x32xf32>
    tpu.vector_store %arg22[%c0_441, %c0_442], %858 {strides = array<i32>} : memref<2x32xf32, #tpu.memory_space<vmem>>, vector<2x32xf32>,
    %c0_443 = arith.constant 0 : index
    %c0_444 = arith.constant 0 : index
    %938 = vector.load %arg23[%c0_443, %c0_444] : memref<2x32xf32, #tpu.memory_space<vmem>>, vector<2x32xf32>
    tpu.vector_store %arg23[%c0_443, %c0_444], %856 {strides = array<i32>} : memref<2x32xf32, #tpu.memory_space<vmem>>, vector<2x32xf32>,
    %c0_445 = arith.constant 0 : index
    %c0_446 = arith.constant 0 : index
    %939 = vector.load %arg24[%c0_445, %c0_446] : memref<2x32xf32, #tpu.memory_space<vmem>>, vector<2x32xf32>
    tpu.vector_store %arg24[%c0_445, %c0_446], %882 {strides = array<i32>} : memref<2x32xf32, #tpu.memory_space<vmem>>, vector<2x32xf32>,
    %c0_447 = arith.constant 0 : index
    %c0_448 = arith.constant 0 : index
    %940 = vector.load %arg25[%c0_447, %c0_448] : memref<2x32xf32, #tpu.memory_space<vmem>>, vector<2x32xf32>
    tpu.vector_store %arg25[%c0_447, %c0_448], %880 {strides = array<i32>} : memref<2x32xf32, #tpu.memory_space<vmem>>, vector<2x32xf32>,
    %c0_449 = arith.constant 0 : index
    %c0_450 = arith.constant 0 : index
    %941 = vector.load %arg26[%c0_449, %c0_450] : memref<2x32xf32, #tpu.memory_space<vmem>>, vector<2x32xf32>
    tpu.vector_store %arg26[%c0_449, %c0_450], %906 {strides = array<i32>} : memref<2x32xf32, #tpu.memory_space<vmem>>, vector<2x32xf32>,
    %c0_451 = arith.constant 0 : index
    %c0_452 = arith.constant 0 : index
    %942 = vector.load %arg27[%c0_451, %c0_452] : memref<2x128xf32, #tpu.memory_space<vmem>>, vector<2x128xf32>
    tpu.vector_store %arg27[%c0_451, %c0_452], %914 {strides = array<i32>} : memref<2x128xf32, #tpu.memory_space<vmem>>, vector<2x128xf32>,
    return
  }
  func.func @transform_0(%arg0: i32, %arg1: i32) -> (i32, i32, i32) {
    %c0_i32 = arith.constant 0 : i32
    %c0_i32_0 = arith.constant 0 : i32
    %c0_i32_1 = arith.constant 0 : i32
    return %arg0, %c0_i32, %c0_i32_0 : i32, i32, i32
  }
  func.func @transform_1(%arg0: i32, %arg1: i32) -> (i32, i32, i32) {
    %c0_i32 = arith.constant 0 : i32
    %c0_i32_0 = arith.constant 0 : i32
    %c0_i32_1 = arith.constant 0 : i32
    return %arg0, %c0_i32, %c0_i32_0 : i32, i32, i32
  }
  func.func @transform_2(%arg0: i32, %arg1: i32) -> (i32, i32) {
    %c0_i32 = arith.constant 0 : i32
    %c0_i32_0 = arith.constant 0 : i32
    return %arg0, %c0_i32 : i32, i32
  }
  func.func @transform_3(%arg0: i32, %arg1: i32) -> (i32, i32) {
    %c0_i32 = arith.constant 0 : i32
    %c0_i32_0 = arith.constant 0 : i32
    %c0_i32_1 = arith.constant 0 : i32
    return %c0_i32, %c0_i32_0 : i32, i32
  }
  func.func @transform_4(%arg0: i32, %arg1: i32) -> (i32, i32) {
    %c0_i32 = arith.constant 0 : i32
    %c0_i32_0 = arith.constant 0 : i32
    %c0_i32_1 = arith.constant 0 : i32
    return %c0_i32, %c0_i32_0 : i32, i32
  }
  func.func @transform_5(%arg0: i32, %arg1: i32) -> (i32, i32) {
    %c0_i32 = arith.constant 0 : i32
    %c0_i32_0 = arith.constant 0 : i32
    %c0_i32_1 = arith.constant 0 : i32
    return %c0_i32, %c0_i32_0 : i32, i32
  }
  func.func @transform_6(%arg0: i32, %arg1: i32) -> (i32, i32) {
    %c0_i32 = arith.constant 0 : i32
    %c0_i32_0 = arith.constant 0 : i32
    %c0_i32_1 = arith.constant 0 : i32
    return %c0_i32, %c0_i32_0 : i32, i32
  }
  func.func @transform_7(%arg0: i32, %arg1: i32) -> (i32, i32) {
    %c0_i32 = arith.constant 0 : i32
    %c0_i32_0 = arith.constant 0 : i32
    %c0_i32_1 = arith.constant 0 : i32
    return %c0_i32, %c0_i32_0 : i32, i32
  }
  func.func @transform_8(%arg0: i32, %arg1: i32) -> (i32, i32) {
    %c0_i32 = arith.constant 0 : i32
    %c0_i32_0 = arith.constant 0 : i32
    %c0_i32_1 = arith.constant 0 : i32
    return %c0_i32, %c0_i32_0 : i32, i32
  }
  func.func @transform_9(%arg0: i32, %arg1: i32) -> (i32, i32) {
    %c0_i32 = arith.constant 0 : i32
    %c0_i32_0 = arith.constant 0 : i32
    %c0_i32_1 = arith.constant 0 : i32
    return %c0_i32, %c0_i32_0 : i32, i32
  }
  func.func @transform_10(%arg0: i32, %arg1: i32) -> (i32, i32) {
    %c0_i32 = arith.constant 0 : i32
    %c0_i32_0 = arith.constant 0 : i32
    %c0_i32_1 = arith.constant 0 : i32
    return %c0_i32, %c0_i32_0 : i32, i32
  }
  func.func @transform_11(%arg0: i32, %arg1: i32) -> (i32, i32) {
    %c0_i32 = arith.constant 0 : i32
    %c0_i32_0 = arith.constant 0 : i32
    %c0_i32_1 = arith.constant 0 : i32
    return %c0_i32, %c0_i32_0 : i32, i32
  }
  func.func @transform_12(%arg0: i32, %arg1: i32) -> (i32, i32) {
    %c0_i32 = arith.constant 0 : i32
    %c0_i32_0 = arith.constant 0 : i32
    %c0_i32_1 = arith.constant 0 : i32
    return %c0_i32, %c0_i32_0 : i32, i32
  }
  func.func @transform_13(%arg0: i32, %arg1: i32) -> (i32, i32) {
    %c0_i32 = arith.constant 0 : i32
    %c0_i32_0 = arith.constant 0 : i32
    %c0_i32_1 = arith.constant 0 : i32
    return %c0_i32, %c0_i32_0 : i32, i32
  }
  func.func @transform_14(%arg0: i32, %arg1: i32) -> (i32, i32) {
    %c0_i32 = arith.constant 0 : i32
    %c0_i32_0 = arith.constant 0 : i32
    %c0_i32_1 = arith.constant 0 : i32
    return %c0_i32, %c0_i32_0 : i32, i32
  }
  func.func @transform_15(%arg0: i32, %arg1: i32) -> (i32, i32) {
    %c0_i32 = arith.constant 0 : i32
    %c0_i32_0 = arith.constant 0 : i32
    %c0_i32_1 = arith.constant 0 : i32
    return %c0_i32, %c0_i32_0 : i32, i32
  }
  func.func @transform_16(%arg0: i32, %arg1: i32) -> (i32, i32, i32) {
    %c0_i32 = arith.constant 0 : i32
    %c0_i32_0 = arith.constant 0 : i32
    return %arg1, %arg0, %c0_i32 : i32, i32, i32
  }
  func.func @transform_17(%arg0: i32, %arg1: i32) -> (i32, i32, i32) {
    %c0_i32 = arith.constant 0 : i32
    %c0_i32_0 = arith.constant 0 : i32
    return %arg1, %arg0, %c0_i32 : i32, i32, i32
  }
}

</mosaic_0001>

<bundles_post_ra>
// kernel: tpu_custom_call.1
= control target key start
LH: loop header
LB: loop body
LE: loop exit
PB: predicated region body
PF: predicated region fallthrough
CT: control target
= control target key end

     0   :  { %s23720_s0 = inlined_call_operand.hbm [shape: f32[2,128,32], index: 0, kind: input, shape index: {}]   ;;  %s23721_s1 = inlined_call_operand.hbm [shape: f32[2,128,32], index: 1, kind: input, shape index: {}]   ;;  %s23722_s2 = inlined_call_operand.hbm [shape: f32[2,128], index: 2, kind: input, shape index: {}]   ;;  %s23723_s3 = inlined_call_operand.hbm [shape: f32[128,128], index: 3, kind: input, shape index: {}]   ;;  %s23724_s4 = inlined_call_operand.hbm [shape: f32[128,32], index: 4, kind: input, shape index: {}]   ;;  %s23725_s5 = inlined_call_operand.hbm [shape: f32[128,32], index: 5, kind: input, shape index: {}]   ;;  %s23726_s6 = inlined_call_operand.hbm [shape: f32[32,128], index: 6, kind: input, shape index: {}]   ;;  %s23727_s7 = inlined_call_operand.hbm [shape: f32[32,128], index: 7, kind: input, shape index: {}]   ;;  %s23728_s8 = inlined_call_operand.hbm [shape: f32[1,128], index: 8, kind: input, shape index: {}]   ;;  %s23729_s9 = inlined_call_operand.hbm [shape: f32[32,128], index: 9, kind: input, shape index: {}]   ;;  %s23730_s10 = inlined_call_operand.hbm [shape: f32[32,128], index: 10, kind: input, shape index: {}]   ;;  %s23731_s11 = inlined_call_operand.hbm [shape: f32[1,128], index: 11, kind: input, shape index: {}]   ;;  %s23732_s12 = inlined_call_operand.hbm [shape: f32[32,128], index: 12, kind: input, shape index: {}]   ;;  %s23733_s13 = inlined_call_operand.hbm [shape: f32[32,128], index: 13, kind: input, shape index: {}]   ;;  %s23734_s14 = inlined_call_operand.hbm [shape: f32[1,128], index: 14, kind: input, shape index: {}]   ;;  %s23735_s15 = inlined_call_operand.hbm [shape: f32[1,128], index: 15, kind: input, shape index: {}]   ;;  %s23736_s16 = inlined_call_operand.hbm [shape: f32[16,2,128], index: 16, kind: output, shape index: {0}]   ;;  %s23737_s17 = inlined_call_operand.hbm [shape: f32[16,2,128], index: 17, kind: output, shape index: {1}]  }
   0x1   :  { %23832 = sst [smem:[#allocation82_spill]] %s23720_s0 }
   0x2   :  { %23833 = sst [smem:[#allocation83_spill]] %s23721_s1 }
   0x3   :  { %23834 = sst [smem:[#allocation84_spill]] %s23722_s2 }
   0x4   :  { %23835 = sst [smem:[#allocation85_spill]] %s23736_s16 }
   0x5   :  { %23836 = sst [smem:[#allocation86_spill]] %s23737_s17 }
   0x6   :  { %23 = vsyncpa [#allocation11], 0 }
   0x7   :  { %24 = vsyncpa [#allocation14], 0 }
   0x8   :  { %25 = vsyncpa [#allocation17], 0 }
   0x9   :  { %26 = vsyncpa [#allocation20], 0 }
   0xa   :  { %27 = vsyncpa [#allocation23], 0 }
   0xb   :  { %28 = vsyncpa [#allocation26], 0 }
   0xc   :  { %29 = vsyncpa [#allocation29], 0 }
   0xd   :  { %30 = vsyncpa [#allocation32], 0 }
   0xe   :  { %31 = vsyncpa [#allocation35], 0 }
   0xf   :  { %32 = vsyncpa [#allocation12], 0 }
  0x10   :  { %34 = vsyncpa [#allocation12 + $0x1], 0 }
  0x11   :  { %35 = vsyncpa [#allocation38], 0 }
  0x12   :  { %37 = vsyncpa [#allocation38 + $0x1], 0  ;;  %s20319_s24 = smov 0   ;;  %s20321_s25 = smov 0  }
  0x13   :  { %s20323_s26 = smov 0   ;;  %s20325_s27 = smov 0  }
  0x14   :  { %s20327_s28 = smov 0   ;;  %s20329_s29 = smov 0  }
  0x15 LB: > { %23837 = sst [smem:[#allocation50_spill]] %s20177_s24  ;;  %s12848_s0 = sadd.s32 4294967295, %s20197_s29   ;;  %s20197_s29 = sphi %s20329_s29, %s43_s29   ;;  %s20193_s28 = sphi %s20327_s28, %s24010_s28   ;;  %s20189_s27 = sphi %s20325_s27, %s24009_s27   ;;  %s20185_s26 = sphi %s20323_s26, %s24008_s26   ;;  %s20181_s25 = sphi %s20321_s25, %s24007_s25   ;;  %s20177_s24 = sphi %s20319_s24, %s24006_s24  }
  0x16   : > { %23838 = sst [smem:[#allocation51_spill]] %s20181_s25  ;;  %s12849_s30 = sadd.s32 4294967294, %s20197_s29  }
  0x17   : > { %23839 = sst [smem:[#allocation52_spill]] %s20185_s26  ;;  %s52_s18 = sadd.s32 1, %s20193_s28 }
  0x18   : > { %23840 = sst [smem:[#allocation53_spill]] %s20189_s27  ;;  %s415_s19 = sadd.s32 1, %s20185_s26 }
  0x19   : > { %23841 = sst [smem:[#allocation54_spill]] %s20193_s28  ;;  %p53_p0 = scmp.ge.s32.totalorder %s52_s18, 2 }
  0x1a   : > { %23842 = sst [smem:[#allocation55_spill]] %s20197_s29  ;;  %p425_p1 = scmp.ne.s32.totalorder %s20185_s26, %s20181_s25 }
  0x1b   : > { %p426_p2 = scmp.eq.s32.totalorder %s12848_s0, 1  ;;  %p431_p3 = scmp.ne.s32.totalorder %s20181_s25, %s20177_s24 }
  0x1c   : > { %s24012_s18 = smov (%p53_p0, %s52_s18), 0  ;;  %p432_p5 = scmp.eq.s32.totalorder %s12849_s30, 1 }
  0x1d   : > { %23843 = sst [smem:[#allocation56_spill]] %s24012_s18  ;;  %p20359_p4 = por %p426_p2, %p425_p1 }
  0x1e   : > { %s410_s20 = ssub.s32 %s20193_s28, %s24012_s18  ;;  %p12850_p6 = scmp.ge.s32.totalorder %s20197_s29, 1 }
  0x1f   : > { %s23844_s1 = scalar_select %p20359_p4, 1, 0 }
  0x20   : > { %p413_p7 = scmp.eq.s32.totalorder %s410_s20, 0  ;;  %p20366_p8 = por %p432_p5, %p431_p3 }
  0x21   : > { %23845 = sst [smem:[#allocation57_spill]] %s23844_s1  ;;  %p467_p9 = scmp.lt.s32.totalorder %s20197_s29, 3 }
  0x22   : > { %s23846_s21 = scalar_select %p20366_p8, 1, 0 }
  0x23   : > { %s20372_s22 = scalar_select %p413_p7, %s20185_s26, %s415_s19  }
  0x24   : > { %23847 = sst [smem:[#allocation58_spill]] %s23846_s21  ;;  %p20374_p10 = pnand %p12850_p6, %p467_p9 }
  0x25   : > { %23848 = sst [smem:[#allocation59_spill]] %s20372_s22  ;;  %p20378_p11 = scmp.eq.s32.totalorder %s12848_s0, 0 }
  0x26   : > { %s23849_s23 = scalar_select %p20374_p10, 1, 0 }
  0x27   : > { %s23851_s24 = scalar_select %p20378_p11, 1, 0 }
  0x28   : > { %23850 = sst [smem:[#allocation60_spill]] %s23849_s23  ;;  %p19198_p12 = pneg %p20374_p10 }
  0x29   : > { %23852 = sst [smem:[#allocation61_spill]] %s23851_s24  ;;  %s20199_s30 = smov [#allocation13]  }
  0x2a   : > { %s500_s20 = sshll.u32 %s20199_s30, 4  ;;  %p20386_p13 = pnand %p20378_p11, %p19198_p12  ;;  %s501_s20 = int_to_ptr.vmem [resolvable:$true] %s500_s20 }
  0x2b   : > { %s20200_s19 = smov [#allocation16]   ;;  %s23854_s26 = sld [smem:[#allocation83_spill]] }
  0x2c   : > { %s526_s28 = sshll.u32 %s20200_s19, 4  ;;  %p20400_p1 = pneg %p20386_p13  ;;  %s20390_s28 = int_to_ptr.vmem [resolvable:$true] %s526_s28 }
  0x31   : > { %s23855_s21 = smov %s23854_s26  ;;  %s19603_s29 = scalar_lea.hbm %s23854_s26, 4096 }
  0x32   : > { %p19604_p0 = scmp.ne.s32.totalorder %s23855_s21, %s19603_s29  ;;  %p19610_p5 = scmp.lt.u32.totalorder %s19603_s29, %s23855_s21 }
  0x34   : > { %p19606_p2 = pnand %p20400_p1, %p19604_p0 }
  0x36   : > { %p19607_p3 = pneg %p19606_p2 }
  0x38   : > { %p19612_p6 = pnand %p19610_p5, %p19607_p3 }
  0x3a   : > { %19615 = shalt.err (!%p19612_p6)
}
  0x3b   : > { %s19616_s26 = scalar_lea.vmem %s501_s20, 4096  ;;  %p19624_p8 = scmp.lt.s32.totalorder %s501_s20, %s501_s20 }
  0x3c   : > { %p19617_p7 = scmp.ne.s32.totalorder %s501_s20, %s19616_s26  ;;  %p19625_p4 = scmp.lt.s32.totalorder %s19616_s26, %s19616_s26 }
  0x3e   : > { %p19619_p9 = pnand %p19617_p7, %p20400_p1  ;;  %p19626_p11 = por %p19625_p4, %p19624_p8 }
  0x40   : > { %p19620_p12 = pneg %p19619_p9 }
  0x42   : > { %p19627_p10 = pnand %p19626_p11, %p19620_p12 }
  0x44   : > { %19630 = shalt.err (!%p19627_p10)
}
  0x45   : > { %s20201_s16 = smov 128   ;;  %s20202_s17 = smov 8  }
  0x46   : > { %19204 = dma.hbm_to_vmem [thread:$0]  (!%p20386_p13), %s23855_s21, 4096, %s501_s20, [#allocation14], %s20201_s16, %s20201_s16, %s20202_s17  }
  0x47   : > { %s19631_s19 = scalar_lea.hbm %s23723_s3, 2048 }
  0x48   : > { %p19632_p4 = scmp.ne.s32.totalorder %s23723_s3, %s19631_s19  ;;  %p19638_p11 = scmp.lt.u32.totalorder %s19631_s19, %s23723_s3 }
  0x4a   : > { %p19634_p8 = pnand %p19632_p4, %p20400_p1 }
  0x4c   : > { %p19635_p10 = pneg %p19634_p8 }
  0x4e   : > { %p19640_p0 = pnand %p19638_p11, %p19635_p10 }
  0x50   : > { %19643 = shalt.err (!%p19640_p0)
}
  0x51   : > { %s19644_s20 = scalar_lea.vmem %s20390_s28, 2048  ;;  %p19652_p6 = scmp.lt.s32.totalorder %s20390_s28, %s20390_s28 }
  0x52   : > { %p19645_p2 = scmp.ne.s32.totalorder %s20390_s28, %s19644_s20  ;;  %p19653_p7 = scmp.lt.s32.totalorder %s19644_s20, %s19644_s20 }
  0x54   : > { %p19647_p3 = pnand %p19645_p2, %p20400_p1  ;;  %p19654_p9 = por %p19653_p7, %p19652_p6 }
  0x56   : > { %p19648_p5 = pneg %p19647_p3 }
  0x58   : > { %p19655_p12 = pnand %p19654_p9, %p19648_p5 }
  0x5a   : > { %19658 = shalt.err (!%p19655_p12)
}
  0x5b   : > { %19210 = dma.hbm_to_vmem [thread:$0]  (!%p20386_p13), %s23723_s3, 2048, %s20390_s28, [#allocation17], %s20201_s16, %s20201_s16, %s20202_s17  }
  0x5c   : > { %s20203_s27 = smov [#allocation19]   ;;  %s20204_s1 = smov [#allocation22]  }
  0x5d   : > { %s552_s29 = sshll.u32 %s20203_s27, 4  ;;  %s578_s22 = sshll.u32 %s20204_s1, 4  ;;  %s553_s29 = int_to_ptr.vmem [resolvable:$true] %s552_s29  ;;  %s579_s22 = int_to_ptr.vmem [resolvable:$true] %s578_s22 }
  0x5e   : > { %s19659_s26 = scalar_lea.hbm %s23725_s5, 2048 }
  0x5f   : > { %p19660_p4 = scmp.ne.s32.totalorder %s23725_s5, %s19659_s26  ;;  %p19666_p11 = scmp.lt.u32.totalorder %s19659_s26, %s23725_s5 }
  0x61   : > { %p19662_p8 = pnand %p19660_p4, %p20400_p1 }
  0x63   : > { %p19663_p10 = pneg %p19662_p8 }
  0x65   : > { %p19668_p0 = pnand %p19666_p11, %p19663_p10 }
  0x67   : > { %19671 = shalt.err (!%p19668_p0)
}
  0x68   : > { %s19672_s28 = scalar_lea.vmem %s553_s29, 2048  ;;  %p19680_p6 = scmp.lt.s32.totalorder %s553_s29, %s553_s29 }
  0x69   : > { %p19673_p2 = scmp.ne.s32.totalorder %s553_s29, %s19672_s28  ;;  %p19681_p7 = scmp.lt.s32.totalorder %s19672_s28, %s19672_s28 }
  0x6b   : > { %p19675_p3 = pnand %p19673_p2, %p20400_p1  ;;  %p19682_p9 = por %p19681_p7, %p19680_p6 }
  0x6d   : > { %p19676_p5 = pneg %p19675_p3 }
  0x6f   : > { %p19683_p12 = pnand %p19682_p9, %p19676_p5 }
  0x71   : > { %19686 = shalt.err (!%p19683_p12)
}
  0x72   : > { %19216 = dma.hbm_to_vmem [thread:$0]  (!%p20386_p13), %s23725_s5, 2048, %s553_s29, [#allocation20], %s20201_s16, %s20201_s16, %s20202_s17  }
  0x73   : > { %s19687_s1 = scalar_lea.hbm %s23727_s7, 512 }
  0x74   : > { %p19688_p4 = scmp.ne.s32.totalorder %s23727_s7, %s19687_s1  ;;  %p19694_p11 = scmp.lt.u32.totalorder %s19687_s1, %s23727_s7 }
  0x76   : > { %p19690_p8 = pnand %p19688_p4, %p20400_p1 }
  0x78   : > { %p19691_p10 = pneg %p19690_p8 }
  0x7a   : > { %p19696_p0 = pnand %p19694_p11, %p19691_p10 }
  0x7c   : > { %19699 = shalt.err (!%p19696_p0)
}
  0x7d   : > { %s19700_s24 = scalar_lea.vmem %s579_s22, 512  ;;  %p19708_p6 = scmp.lt.s32.totalorder %s579_s22, %s579_s22 }
  0x7e   : > { %p19701_p2 = scmp.ne.s32.totalorder %s579_s22, %s19700_s24  ;;  %p19709_p7 = scmp.lt.s32.totalorder %s19700_s24, %s19700_s24 }
  0x80   : > { %p19703_p3 = pnand %p19701_p2, %p20400_p1  ;;  %p19710_p9 = por %p19709_p7, %p19708_p6 }
  0x82   : > { %p19704_p5 = pneg %p19703_p3 }
  0x84   : > { %p19711_p12 = pnand %p19710_p9, %p19704_p5 }
  0x86   : > { %19714 = shalt.err (!%p19711_p12)
}
  0x87   : > { %19222 = dma.hbm_to_vmem [thread:$0]  (!%p20386_p13), %s23727_s7, 512, %s579_s22, [#allocation23], %s20201_s16, %s20201_s16, %s20202_s17  }
  0x88   : > { %s20205_s21 = smov [#allocation25]   ;;  %s20206_s25 = smov [#allocation28]  }
  0x89   : > { %s602_s23 = sshll.u32 %s20205_s21, 4  ;;  %s629_s27 = sshll.u32 %s20206_s25, 4  ;;  %s603_s23 = int_to_ptr.vmem [resolvable:$true] %s602_s23  ;;  %s630_s27 = int_to_ptr.vmem [resolvable:$true] %s629_s27 }
  0x8a   : > { %s19715_s19 = scalar_lea.hbm %s23729_s9, 512 }
  0x8b   : > { %p19716_p4 = scmp.ne.s32.totalorder %s23729_s9, %s19715_s19  ;;  %p19722_p11 = scmp.lt.u32.totalorder %s19715_s19, %s23729_s9 }
  0x8d   : > { %p19718_p8 = pnand %p19716_p4, %p20400_p1 }
  0x8f   : > { %p19719_p10 = pneg %p19718_p8 }
  0x91   : > { %p19724_p0 = pnand %p19722_p11, %p19719_p10 }
  0x93   : > { %19727 = shalt.err (!%p19724_p0)
}
  0x94   : > { %s19728_s22 = scalar_lea.vmem %s603_s23, 512  ;;  %p19736_p6 = scmp.lt.s32.totalorder %s603_s23, %s603_s23 }
  0x95   : > { %p19729_p2 = scmp.ne.s32.totalorder %s603_s23, %s19728_s22  ;;  %p19737_p7 = scmp.lt.s32.totalorder %s19728_s22, %s19728_s22 }
  0x97   : > { %p19731_p3 = pnand %p19729_p2, %p20400_p1  ;;  %p19738_p9 = por %p19737_p7, %p19736_p6 }
  0x99   : > { %p19732_p5 = pneg %p19731_p3 }
  0x9b   : > { %p19739_p12 = pnand %p19738_p9, %p19732_p5 }
  0x9d   : > { %19742 = shalt.err (!%p19739_p12)
}
  0x9e   : > { %19228 = dma.hbm_to_vmem [thread:$0]  (!%p20386_p13), %s23729_s9, 512, %s603_s23, [#allocation26], %s20201_s16, %s20201_s16, %s20202_s17  }
  0x9f   : > { %s19743_s0 = scalar_lea.hbm %s23731_s11, 16 }
  0xa0   : > { %p19744_p4 = scmp.ne.s32.totalorder %s23731_s11, %s19743_s0  ;;  %p19750_p11 = scmp.lt.u32.totalorder %s19743_s0, %s23731_s11 }
  0xa2   : > { %p19746_p8 = pnand %p19744_p4, %p20400_p1 }
  0xa4   : > { %p19747_p10 = pneg %p19746_p8 }
  0xa6   : > { %p19752_p0 = pnand %p19750_p11, %p19747_p10 }
  0xa8   : > { %19755 = shalt.err (!%p19752_p0)
}
  0xa9   : > { %s19756_s29 = scalar_lea.vmem %s630_s27, 16  ;;  %s19763_s23 = scalar_lea.vmem %s630_s27, 32 }
  0xaa   : > { %p19757_p2 = scmp.ne.s32.totalorder %s630_s27, %s19756_s29  ;;  %p19764_p6 = scmp.lt.s32.totalorder %s630_s27, %s630_s27 }
  0xab   : > { %p19765_p7 = scmp.lt.s32.totalorder %s19763_s23, %s19756_s29 }
  0xac   : > { %p19759_p3 = pnand %p19757_p2, %p20400_p1 }
  0xad   : > { %p19766_p9 = por %p19765_p7, %p19764_p6 }
  0xae   : > { %p19760_p5 = pneg %p19759_p3 }
  0xb0   : > { %p19767_p12 = pnand %p19766_p9, %p19760_p5 }
  0xb2   : > { %19770 = shalt.err (!%p19767_p12)
}
  0xb3   : > { %19234 = dma.hbm_to_vmem [thread:$0]  (!%p20386_p13), %s23731_s11, 16, %s630_s27, [#allocation29]  }
  0xb4   : > { %s20207_s21 = smov [#allocation31]   ;;  %s19771_s19 = scalar_lea.hbm %s23733_s13, 512 }
  0xb5   : > { %s652_s25 = sshll.u32 %s20207_s21, 4  ;;  %p19772_p4 = scmp.ne.s32.totalorder %s23733_s13, %s19771_s19  ;;  %s653_s25 = int_to_ptr.vmem [resolvable:$true] %s652_s25 }
  0xb6   : > { %p19778_p11 = scmp.lt.u32.totalorder %s19771_s19, %s23733_s13 }
  0xb7   : > { %p19774_p8 = pnand %p19772_p4, %p20400_p1 }
  0xb9   : > { %p19775_p10 = pneg %p19774_p8 }
  0xbb   : > { %p19780_p0 = pnand %p19778_p11, %p19775_p10 }
  0xbd   : > { %19783 = shalt.err (!%p19780_p0)
}
  0xbe   : > { %s19784_s27 = scalar_lea.vmem %s653_s25, 512  ;;  %p19792_p6 = scmp.lt.s32.totalorder %s653_s25, %s653_s25 }
  0xbf   : > { %p19785_p2 = scmp.ne.s32.totalorder %s653_s25, %s19784_s27  ;;  %p19793_p7 = scmp.lt.s32.totalorder %s19784_s27, %s19784_s27 }
  0xc1   : > { %p19787_p3 = pnand %p19785_p2, %p20400_p1  ;;  %p19794_p9 = por %p19793_p7, %p19792_p6 }
  0xc3   : > { %p19788_p5 = pneg %p19787_p3 }
  0xc5   : > { %p19795_p12 = pnand %p19794_p9, %p19788_p5 }
  0xc7   : > { %19798 = shalt.err (!%p19795_p12)
}
  0xc8   : > { %19240 = dma.hbm_to_vmem [thread:$0]  (!%p20386_p13), %s23733_s13, 512, %s653_s25, [#allocation32], %s20201_s16, %s20201_s16, %s20202_s17  }
  0xc9   : > { %s20208_s28 = smov [#allocation10]   ;;  %s20209_s1 = smov [#allocation15]  }
  0xca   : > { %s483_s21 = sshll.u32 %s20208_s28, 4  ;;  %s516_s0 = sshll.u32 %s20209_s1, 4  ;;  %s484_s21 = int_to_ptr.vmem [resolvable:$true] %s483_s21  ;;  %s20547_s0 = int_to_ptr.vmem [resolvable:$true] %s516_s0 }
  0xcb   : > { %s23857_s20 = sld [smem:[#allocation82_spill]] }
  0xd1   : > { %s19799_s24 = scalar_lea.hbm %s23857_s20, 4096 }
  0xd2   : > { %p19800_p4 = scmp.ne.s32.totalorder %s23857_s20, %s19799_s24  ;;  %p19806_p11 = scmp.lt.u32.totalorder %s19799_s24, %s23857_s20 }
  0xd4   : > { %p19802_p8 = pnand %p19800_p4, %p20400_p1 }
  0xd6   : > { %p19803_p10 = pneg %p19802_p8 }
  0xd8   : > { %p19808_p0 = pnand %p19806_p11, %p19803_p10 }
  0xda   : > { %19811 = shalt.err (!%p19808_p0)
}
  0xdb   : > { %s19812_s22 = scalar_lea.vmem %s484_s21, 4096  ;;  %p19820_p6 = scmp.lt.s32.totalorder %s484_s21, %s484_s21 }
  0xdc   : > { %p19813_p2 = scmp.ne.s32.totalorder %s484_s21, %s19812_s22  ;;  %p19821_p7 = scmp.lt.s32.totalorder %s19812_s22, %s19812_s22 }
  0xde   : > { %p19815_p3 = pnand %p19813_p2, %p20400_p1  ;;  %p19822_p9 = por %p19821_p7, %p19820_p6 }
  0xe0   : > { %p19816_p5 = pneg %p19815_p3 }
  0xe2   : > { %p19823_p12 = pnand %p19822_p9, %p19816_p5 }
  0xe4   : > { %19826 = shalt.err (!%p19823_p12)
}
  0xe5   : > { %19201 = dma.hbm_to_vmem [thread:$0]  (!%p20386_p13), %s23857_s20, 4096, %s484_s21, [#allocation11], %s20201_s16, %s20201_s16, %s20202_s17  }
  0xe6   : > { %s23858_s2 = sld [smem:[#allocation84_spill]] }
  0xec   : > { %s19827_s24 = scalar_lea.hbm %s23858_s2, 32 }
  0xed   : > { %p19828_p4 = scmp.ne.s32.totalorder %s23858_s2, %s19827_s24  ;;  %p19834_p11 = scmp.lt.u32.totalorder %s19827_s24, %s23858_s2 }
  0xef   : > { %p19830_p8 = pnand %p19828_p4, %p20400_p1 }
  0xf1   : > { %p19831_p10 = pneg %p19830_p8 }
  0xf3   : > { %p19836_p0 = pnand %p19834_p11, %p19831_p10 }
  0xf5   : > { %19839 = shalt.err (!%p19836_p0)
}
  0xf6   : > { %s19840_s21 = scalar_lea.vmem %s20547_s0, 32  ;;  %p19848_p6 = scmp.lt.s32.totalorder %s20547_s0, %s20547_s0 }
  0xf7   : > { %p19841_p2 = scmp.ne.s32.totalorder %s20547_s0, %s19840_s21  ;;  %p19849_p7 = scmp.lt.s32.totalorder %s19840_s21, %s19840_s21 }
  0xf9   : > { %p19843_p3 = pnand %p19841_p2, %p20400_p1  ;;  %p19850_p9 = por %p19849_p7, %p19848_p6 }
  0xfb   : > { %p19844_p5 = pneg %p19843_p3 }
  0xfd   : > { %p19851_p12 = pnand %p19850_p9, %p19844_p5 }
  0xff   : > { %19854 = shalt.err (!%p19851_p12)
}
 0x100   : > { %19207 = dma.hbm_to_vmem [thread:$0]  (!%p20386_p13), %s23858_s2, 32, %s20547_s0, [#allocation14]  }
 0x101   : > { %s20210_s1 = smov [#allocation18]   ;;  %s20211_s26 = smov [#allocation21]  }
 0x102   : > { %s539_s19 = sshll.u32 %s20210_s1, 4  ;;  %s565_s24 = sshll.u32 %s20211_s26, 4  ;;  %s540_s19 = int_to_ptr.vmem [resolvable:$true] %s539_s19  ;;  %s20593_s24 = int_to_ptr.vmem [resolvable:$true] %s565_s24 }
 0x103   : > { %s19855_s23 = scalar_lea.hbm %s23724_s4, 2048 }
 0x104   : > { %p19856_p4 = scmp.ne.s32.totalorder %s23724_s4, %s19855_s23  ;;  %p19862_p11 = scmp.lt.u32.totalorder %s19855_s23, %s23724_s4 }
 0x106   : > { %p19858_p8 = pnand %p19856_p4, %p20400_p1 }
 0x108   : > { %p19859_p10 = pneg %p19858_p8 }
 0x10a   : > { %p19864_p0 = pnand %p19862_p11, %p19859_p10 }
 0x10c   : > { %19867 = shalt.err (!%p19864_p0)
}
 0x10d   : > { %s19868_s28 = scalar_lea.vmem %s540_s19, 2048  ;;  %p19876_p6 = scmp.lt.s32.totalorder %s540_s19, %s540_s19 }
 0x10e   : > { %p19869_p2 = scmp.ne.s32.totalorder %s540_s19, %s19868_s28  ;;  %p19877_p7 = scmp.lt.s32.totalorder %s19868_s28, %s19868_s28 }
 0x110   : > { %p19871_p3 = pnand %p19869_p2, %p20400_p1  ;;  %p19878_p9 = por %p19877_p7, %p19876_p6 }
 0x112   : > { %p19872_p5 = pneg %p19871_p3 }
 0x114   : > { %p19879_p12 = pnand %p19878_p9, %p19872_p5 }
 0x116   : > { %19882 = shalt.err (!%p19879_p12)
}
 0x117   : > { %19213 = dma.hbm_to_vmem [thread:$0]  (!%p20386_p13), %s23724_s4, 2048, %s540_s19, [#allocation17], %s20201_s16, %s20201_s16, %s20202_s17  }
 0x118   : > { %s19883_s23 = scalar_lea.hbm %s23726_s6, 512 }
 0x119   : > { %p19884_p4 = scmp.ne.s32.totalorder %s23726_s6, %s19883_s23  ;;  %p19890_p11 = scmp.lt.u32.totalorder %s19883_s23, %s23726_s6 }
 0x11b   : > { %p19886_p8 = pnand %p19884_p4, %p20400_p1 }
 0x11d   : > { %p19887_p10 = pneg %p19886_p8 }
 0x11f   : > { %p19892_p0 = pnand %p19890_p11, %p19887_p10 }
 0x121   : > { %19895 = shalt.err (!%p19892_p0)
}
 0x122   : > { %s19896_s19 = scalar_lea.vmem %s20593_s24, 512  ;;  %p19904_p6 = scmp.lt.s32.totalorder %s20593_s24, %s20593_s24 }
 0x123   : > { %p19897_p2 = scmp.ne.s32.totalorder %s20593_s24, %s19896_s19  ;;  %p19905_p7 = scmp.lt.s32.totalorder %s19896_s19, %s19896_s19 }
 0x125   : > { %p19899_p3 = pnand %p19897_p2, %p20400_p1  ;;  %p19906_p9 = por %p19905_p7, %p19904_p6 }
 0x127   : > { %p19900_p5 = pneg %p19899_p3 }
 0x129   : > { %p19907_p12 = pnand %p19906_p9, %p19900_p5 }
 0x12b   : > { %19910 = shalt.err (!%p19907_p12)
}
 0x12c   : > { %19219 = dma.hbm_to_vmem [thread:$0]  (!%p20386_p13), %s23726_s6, 512, %s20593_s24, [#allocation20], %s20201_s16, %s20201_s16, %s20202_s17  }
 0x12d   : > { %s20212_s26 = smov [#allocation24]   ;;  %s20213_s27 = smov [#allocation27]  }
 0x12e   : > { %s592_s29 = sshll.u32 %s20212_s26, 4  ;;  %s615_s23 = sshll.u32 %s20213_s27, 4  ;;  %s593_s29 = int_to_ptr.vmem [resolvable:$true] %s592_s29  ;;  %s20642_s23 = int_to_ptr.vmem [resolvable:$true] %s615_s23 }
 0x12f   : > { %s19911_s22 = scalar_lea.hbm %s23728_s8, 16 }
 0x130   : > { %p19912_p4 = scmp.ne.s32.totalorder %s23728_s8, %s19911_s22  ;;  %p19918_p11 = scmp.lt.u32.totalorder %s19911_s22, %s23728_s8 }
 0x132   : > { %p19914_p8 = pnand %p19912_p4, %p20400_p1 }
 0x134   : > { %p19915_p10 = pneg %p19914_p8 }
 0x136   : > { %p19920_p0 = pnand %p19918_p11, %p19915_p10 }
 0x138   : > { %19923 = shalt.err (!%p19920_p0)
}
 0x139   : > { %s19924_s1 = scalar_lea.vmem %s593_s29, 16  ;;  %s19931_s26 = scalar_lea.vmem %s593_s29, 32 }
 0x13a   : > { %p19925_p2 = scmp.ne.s32.totalorder %s593_s29, %s19924_s1  ;;  %p19932_p6 = scmp.lt.s32.totalorder %s593_s29, %s593_s29 }
 0x13b   : > { %p19933_p7 = scmp.lt.s32.totalorder %s19931_s26, %s19924_s1 }
 0x13c   : > { %p19927_p3 = pnand %p19925_p2, %p20400_p1 }
 0x13d   : > { %p19934_p9 = por %p19933_p7, %p19932_p6 }
 0x13e   : > { %p19928_p5 = pneg %p19927_p3 }
 0x140   : > { %p19935_p12 = pnand %p19934_p9, %p19928_p5 }
 0x142   : > { %19938 = shalt.err (!%p19935_p12)
}
 0x143   : > { %19225 = dma.hbm_to_vmem [thread:$0]  (!%p20386_p13), %s23728_s8, 16, %s593_s29, [#allocation23]  }
 0x144   : > { %s19939_s0 = scalar_lea.hbm %s23730_s10, 512 }
 0x145   : > { %p19940_p4 = scmp.ne.s32.totalorder %s23730_s10, %s19939_s0  ;;  %p19946_p11 = scmp.lt.u32.totalorder %s19939_s0, %s23730_s10 }
 0x147   : > { %p19942_p8 = pnand %p19940_p4, %p20400_p1 }
 0x149   : > { %p19943_p10 = pneg %p19942_p8 }
 0x14b   : > { %p19948_p0 = pnand %p19946_p11, %p19943_p10 }
 0x14d   : > { %19951 = shalt.err (!%p19948_p0)
}
 0x14e   : > { %s19952_s29 = scalar_lea.vmem %s20642_s23, 512  ;;  %p19960_p6 = scmp.lt.s32.totalorder %s20642_s23, %s20642_s23 }
 0x14f   : > { %p19953_p2 = scmp.ne.s32.totalorder %s20642_s23, %s19952_s29  ;;  %p19961_p7 = scmp.lt.s32.totalorder %s19952_s29, %s19952_s29 }
 0x151   : > { %p19955_p3 = pnand %p19953_p2, %p20400_p1  ;;  %p19962_p9 = por %p19961_p7, %p19960_p6 }
 0x153   : > { %p19956_p5 = pneg %p19955_p3 }
 0x155   : > { %p19963_p12 = pnand %p19962_p9, %p19956_p5 }
 0x157   : > { %19966 = shalt.err (!%p19963_p12)
}
 0x158   : > { %19231 = dma.hbm_to_vmem [thread:$0]  (!%p20386_p13), %s23730_s10, 512, %s20642_s23, [#allocation26], %s20201_s16, %s20201_s16, %s20202_s17  }
 0x159   : > { %s20214_s25 = smov [#allocation30]   ;;  %s20215_s22 = smov [#allocation33]  }
 0x15a   : > { %s639_s21 = sshll.u32 %s20214_s25, 4  ;;  %s666_s0 = sshll.u32 %s20215_s22, 4  ;;  %s640_s21 = int_to_ptr.vmem [resolvable:$true] %s639_s21  ;;  %s20688_s0 = int_to_ptr.vmem [resolvable:$true] %s666_s0 }
 0x15b   : > { %s19967_s24 = scalar_lea.hbm %s23732_s12, 512 }
 0x15c   : > { %p19968_p4 = scmp.ne.s32.totalorder %s23732_s12, %s19967_s24  ;;  %p19974_p11 = scmp.lt.u32.totalorder %s19967_s24, %s23732_s12 }
 0x15e   : > { %p19970_p8 = pnand %p19968_p4, %p20400_p1 }
 0x160   : > { %p19971_p10 = pneg %p19970_p8 }
 0x162   : > { %p19976_p0 = pnand %p19974_p11, %p19971_p10 }
 0x164   : > { %19979 = shalt.err (!%p19976_p0)
}
 0x165   : > { %s19980_s27 = scalar_lea.vmem %s640_s21, 512  ;;  %p19988_p6 = scmp.lt.s32.totalorder %s640_s21, %s640_s21 }
 0x166   : > { %p19981_p2 = scmp.ne.s32.totalorder %s640_s21, %s19980_s27  ;;  %p19989_p7 = scmp.lt.s32.totalorder %s19980_s27, %s19980_s27 }
 0x168   : > { %p19983_p3 = pnand %p19981_p2, %p20400_p1  ;;  %p19990_p9 = por %p19989_p7, %p19988_p6 }
 0x16a   : > { %p19984_p5 = pneg %p19983_p3 }
 0x16c   : > { %p19991_p12 = pnand %p19990_p9, %p19984_p5 }
 0x16e   : > { %19994 = shalt.err (!%p19991_p12)
}
 0x16f   : > { %19237 = dma.hbm_to_vmem [thread:$0]  (!%p20386_p13), %s23732_s12, 512, %s640_s21, [#allocation29], %s20201_s16, %s20201_s16, %s20202_s17  }
 0x170   : > { %s19995_s24 = scalar_lea.hbm %s23734_s14, 16 }
 0x171   : > { %p19996_p4 = scmp.ne.s32.totalorder %s23734_s14, %s19995_s24  ;;  %p20002_p11 = scmp.lt.u32.totalorder %s19995_s24, %s23734_s14 }
 0x173   : > { %p19998_p8 = pnand %p19996_p4, %p20400_p1 }
 0x175   : > { %p19999_p10 = pneg %p19998_p8 }
 0x177   : > { %p20004_p0 = pnand %p20002_p11, %p19999_p10 }
 0x179   : > { %20007 = shalt.err (!%p20004_p0)
}
 0x17a   : > { %s20008_s16 = scalar_lea.vmem %s20688_s0, 16  ;;  %s20015_s17 = scalar_lea.vmem %s20688_s0, 32 }
 0x17b   : > { %p20009_p2 = scmp.ne.s32.totalorder %s20688_s0, %s20008_s16  ;;  %p20016_p6 = scmp.lt.s32.totalorder %s20688_s0, %s20688_s0 }
 0x17c   : > { %p20017_p7 = scmp.lt.s32.totalorder %s20015_s17, %s20008_s16 }
 0x17d   : > { %p20011_p3 = pnand %p20009_p2, %p20400_p1 }
 0x17e   : > { %p20018_p9 = por %p20017_p7, %p20016_p6 }
 0x17f   : > { %p20012_p5 = pneg %p20011_p3 }
 0x181   : > { %p20019_p12 = pnand %p20018_p9, %p20012_p5 }
 0x183   : > { %20022 = shalt.err (!%p20019_p12)
}
 0x184   : > { %19243 = dma.hbm_to_vmem [thread:$0]  (!%p20386_p13), %s23734_s14, 16, %s20688_s0, [#allocation32]  }
 0x185   : > { %s20216_s25 = smov [#allocation34]   ;;  %s20023_s24 = scalar_lea.hbm %s23735_s15, 16 }
 0x186   : > { %s677_s22 = sshll.u32 %s20216_s25, 4  ;;  %p20024_p4 = scmp.ne.s32.totalorder %s23735_s15, %s20023_s24  ;;  %s678_s22 = int_to_ptr.vmem [resolvable:$true] %s677_s22 }
 0x187   : > { %p20030_p11 = scmp.lt.u32.totalorder %s20023_s24, %s23735_s15 }
 0x188   : > { %p20026_p8 = pnand %p20024_p4, %p20400_p1 }
 0x18a   : > { %p20027_p10 = pneg %p20026_p8 }
 0x18c   : > { %p20032_p0 = pnand %p20030_p11, %p20027_p10 }
 0x18e   : > { %20035 = shalt.err (!%p20032_p0)
}
 0x18f   : > { %s20036_s0 = scalar_lea.vmem %s678_s22, 16  ;;  %s20043_s16 = scalar_lea.vmem %s678_s22, 32 }
 0x190   : > { %p20037_p2 = scmp.ne.s32.totalorder %s678_s22, %s20036_s0  ;;  %p20044_p6 = scmp.lt.s32.totalorder %s678_s22, %s678_s22 }
 0x191   : > { %p20045_p7 = scmp.lt.s32.totalorder %s20043_s16, %s20036_s0 }
 0x192   : > { %p20039_p3 = pnand %p20037_p2, %p20400_p1 }
 0x193   : > { %p20046_p9 = por %p20045_p7, %p20044_p6 }
 0x194   : > { %p20040_p5 = pneg %p20039_p3 }
 0x196   : > { %p20047_p12 = pnand %p20046_p9, %p20040_p5 }
 0x198   : > { %20050 = shalt.err (!%p20047_p12)
}
 0x199   : > { %19246 = dma.hbm_to_vmem [thread:$0]  (!%p20386_p13), %s23735_s15, 16, %s678_s22, [#allocation35]  }
 0x19a   : > { %s23859_s27 = sld [smem:[#allocation60_spill]] }
 0x1a0   : > { %p23860_p4 = scmp.ne.s32.totalorder %s23859_s27, 0 }
 0x1a2   : > { %690 = sbr.rel (%p23860_p4) target bundleno = 26415 (0x672f), region = 84 }
 0x1a9   : > { %s23861_s25 = sld [smem:[#allocation61_spill]] }
 0x1af   : > { %p23862_p8 = scmp.ne.s32.totalorder %s23861_s25, 0 }
 0x1b1   : > { %20132 = dma.done.wait (%p23862_p8), [#allocation11], 4096  }
 0x1b2   : > { %20134 = vsyncadd (%p23862_p8), [#allocation11], 4294963200 }
 0x1b3   : > { %20136 = dma.done.wait (%p23862_p8), [#allocation14], 4128  }
 0x1b4   : > { %20138 = vsyncadd (%p23862_p8), [#allocation14], 4294963168 }
 0x1b5   : > { %20140 = dma.done.wait (%p23862_p8), [#allocation17], 4096  }
 0x1b6   : > { %20142 = vsyncadd (%p23862_p8), [#allocation17], 4294963200 }
 0x1b7   : > { %20144 = dma.done.wait (%p23862_p8), [#allocation20], 2560  }
 0x1b8   : > { %20146 = vsyncadd (%p23862_p8), [#allocation20], 4294964736 }
 0x1b9   : > { %20148 = dma.done.wait (%p23862_p8), [#allocation23], 528  }
 0x1ba   : > { %20150 = vsyncadd (%p23862_p8), [#allocation23], 4294966768 }
 0x1bb   : > { %20152 = dma.done.wait (%p23862_p8), [#allocation26], 1024  }
 0x1bc   : > { %20154 = vsyncadd (%p23862_p8), [#allocation26], 4294966272 }
 0x1bd   : > { %20156 = dma.done.wait (%p23862_p8), [#allocation29], 528  }
 0x1be   : > { %20158 = vsyncadd (%p23862_p8), [#allocation29], 4294966768 }
 0x1bf   : > { %20160 = dma.done.wait (%p23862_p8), [#allocation32], 528  }
 0x1c0   : > { %20162 = vsyncadd (%p23862_p8), [#allocation32], 4294966768 }
 0x1c1   : > { %20164 = dma.done.wait (%p23862_p8), [#allocation35], 16  }
 0x1c2   : > { %20166 = vsyncadd (%p23862_p8), [#allocation35], 4294967280  ;;  %s23863_s18 = sld [smem:[#allocation51_spill]]  ;;  %s23864_s24 = sld [smem:[#allocation53_spill]] }
 0x1c8   : > { %s20792_s30 = sand.u32 1, %s23863_s18   ;;  %p12886_p13 = scmp.ne.s32.totalorder %s23864_s24, 0 }
 0x1c9   : > { %s12884_s22 = sshll.u32 %s20792_s30, 4  ;;  %vm812_vm0 = vcmask (!%p12886_p13), 254976   ;;  %v819_v0 = vld [vmem:[#allocation13] sm:$0x1] (!%p12886_p13)  ;;  %v810_v2 = vlaneseq (!%p12886_p13)  ;;  %v20217_v3 = vmov (!%p12886_p13), 0.0   ;;  %vm824_vm1 = vcmask (!%p12886_p13), 1041409  }
 0x1ca   : > { %s20795_s19 = scalar_lea.vmem [#allocation36], %s12884_s22  ;;  %s20797_s28 = scalar_lea.vmem [#allocation37], %s12884_s22  ;;  %v820_v1 = vld [vmem:[#allocation13 + $0x80] sm:$0x1] (!%p12886_p13)  ;;  %813 = vst.msk [vmem:[#allocation2] sm:$0x3] (!%p12886_p13), %vm812_vm0, %v20217_v3 }
 0x1cb   : > { %809 = sbr.rel (%p12886_p13) target bundleno = 466 (0x1d2), region = 152  ;;  %814 = vst.msk [vmem:[#allocation3] sm:$0x3] (!%p12886_p13), %vm812_vm0, %v20217_v3  ;;  %815 = vst.msk [vmem:[#allocation4] sm:$0x3] (!%p12886_p13), %vm812_vm0, %v20217_v3  ;;  %v823_v4 = vrot.slane (!%p12886_p13), %v820_v1, 7 }
 0x1cc   : > { %816 = vst.msk [vmem:[#allocation5] sm:$0x3] (!%p12886_p13), %vm812_vm0, %v20217_v3  ;;  %817 = vst.msk [vmem:[#allocation6] sm:$0x3] (!%p12886_p13), %vm812_vm0, %v20217_v3  ;;  %v811_v5 = vand.u32 (!%p12886_p13), 127, %v810_v2 }
 0x1cd   : > { %818 = vst.msk [vmem:[#allocation7] sm:$0x3] (!%p12886_p13), %vm812_vm0, %v20217_v3  ;;  %v825_v6 = vsel (!%p12886_p13), %vm824_vm1, %v823_v4, %v819_v0 }
 0x1ce   : > { %827 = vst.msk [vmem:[#allocation8] sm:$0x3] (!%p12886_p13), %vm812_vm0, %v825_v6  ;;  %vm828_vm2 = vcmp.eq.s32.totalorder (!%p12886_p13), %v811_v5, 1 }
 0x1cf   : > { %v12887_v7 = vsel (!%p12886_p13), %vm828_vm2, 1.0, %v20217_v3 }
 0x1d0   : > { %831 = vst [vmem:[#allocation9] sm:$0x3] (!%p12886_p13), %v12887_v7 }
 0x1d2 PF: > { %vm840_vm3 = vcmask 1041408   ;;  %v847_v9 = vld [vmem:[#allocation16] sm:$0xff]  ;;  %v848_v10 = vld [vmem:[#allocation16 + $0x8] sm:$0xff]  ;;  %v23765_v12 = vmov 0.0|0.0   ;;  %v849_v14 = vld [vmem:[#allocation16 + $0x10] sm:$0xff]  ;;  %vm20219_vm4 = vmmov 0  }
 0x1d3   : > { %17248 = vmatprep.subr.bf16.mxu1 %v23765_v12  ;;  %v17249_v13 = vpack.c.bf16 %v848_v10, %v847_v9  ;;  %v850_v15 = vld [vmem:[#allocation16 + $0x18] sm:$0xff]  ;;  %17242 = vmatprep.subr.bf16.mxu0 %v23765_v12  ;;  %v23763_v16 = vmov 0.0   ;;  %v863_v18 = vld [vmem:[#allocation21] sm:$0xff]  ;;  %v852_v20 = vld [vmem:[#allocation16 + $0x28] sm:$0xff]  ;;  %vm867_vm5 = vcmask 261120   ;;  %s23829_s1 = smov 32  }
 0x1d4   : > { %14762 = vmatprep.mubr.msk.f32.mxu0 %vm20219_vm4, %v23763_v16  ;;  %v17252_v17 = vpack.c.bf16 %v850_v15, %v849_v14  ;;  %14797 = vmatprep.mubr.msk.f32.mxu1 %vm20219_vm4, %v23763_v16  ;;  %v851_v19 = vld [vmem:[#allocation16 + $0x20] sm:$0xff]  ;;  %v864_v21 = vld [vmem:[#allocation21 + $0x8] sm:$0xff]  ;;  %v865_v23 = vld [vmem:[#allocation21 + $0x10] sm:$0xff]  ;;  %v23761_v52 = vmov 1.0   ;;  %s20223_s29 = smov 64   ;;  %vm1826_vm8 = vcmask 1041409  }
 0x1d5   : > { %17250 = vmatpush3.bf16.msra.mxu1 %v17249_v13  ;;  %v20811_v22 = vpack.c.bf16 %v864_v21, %v863_v18  ;;  %v866_v24 = vld [vmem:[#allocation21 + $0x18] sm:$0xff]  ;;  %v17255_v25 = vpack.c.bf16 %v852_v20, %v851_v19  ;;  %v853_v26 = vld [vmem:[#allocation16 + $0x30] sm:$0xff]  ;;  %v1011_v29 = vld [vmem:[#allocation22] sm:$0xff]  ;;  %vm12532_vm0 = vcmask 254976   ;;  %s20225_s26 = smov 96   ;;  %s23993_s23 = sld [smem:[#allocation53_spill]] }
 0x1d6   : > { %17251 = vmatprep.subr.bf16.mxu1 %v23765_v12  ;;  %v20814_v27 = vpack.c.bf16 %v866_v24, %v865_v23  ;;  %v854_v28 = vld [vmem:[#allocation16 + $0x38] sm:$0xff]  ;;  %v1012_v30 = vld [vmem:[#allocation22 + $0x8] sm:$0xff]  ;;  %v855_v32 = vld [vmem:[#allocation16 + $0x40] sm:$0xff]  ;;  %s23994_s0 = sld [smem:[#allocation57_spill]]  ;;  %s23995_s27 = sld [smem:[#allocation86_spill]] }
 0x1d7   : > { %v20800_v8 = vld [vmem:[#allocation9] sm:$0x3]  ;;  %17244 = vmatpush3.bf16.msra.mxu0 %v20811_v22  ;;  %v17258_v31 = vpack.c.bf16 %v854_v28, %v853_v26  ;;  %v838_v33 = vld [vmem:[#allocation8] sm:$0x3]  ;;  %v20819_v34 = vpack.c.bf16 %v1012_v30, %v1011_v29  ;;  %v856_v35 = vld [vmem:[#allocation16 + $0x48] sm:$0xff]  ;;  %s12593_s22 = sshll.u32 %s20797_s28, 4  ;;  %s23630_s22 = int_to_ptr.vmem [resolvable:$true] %s12593_s22 }
 0x1d8   : > { %v841_v11 = vsel %vm840_vm3, %v20800_v8, -inf  ;;  %17245 = vmatprep.subr.bf16.mxu0 %v23765_v12  ;;  %v1013_v36 = vld [vmem:[#allocation22 + $0x10] sm:$0xff]  ;;  %v1014_v37 = vld [vmem:[#allocation22 + $0x18] sm:$0xff]  ;;  %v17261_v38 = vpack.c.bf16 %v856_v35, %v855_v32  ;;  %v832_v44 = vld [vmem:[#allocation2] sm:$0x3]  ;;  %s12562_s24 = scalar_lea.sflag [#allocation38], %s20792_s30 }
 0x1d9   : > { %842 = vmax.xlane.f32.xlu0 %v841_v11  ;;  %17253 = vmatpush3.bf16.msra.mxu1 %v17252_v17  ;;  %v20825_v39 = vpack.c.bf16 %v1014_v37, %v1013_v36  ;;  %v857_v40 = vld [vmem:[#allocation16 + $0x50] sm:$0xff]  ;;  %v858_v41 = vld [vmem:[#allocation16 + $0x58] sm:$0xff]  ;;  %v859_v45 = vld [vmem:[#allocation16 + $0x60] sm:$0xff] }
 0x1da   : > { %17254 = vmatprep.subr.bf16.mxu1 %v23765_v12  ;;  %v833_v42 = vld [vmem:[#allocation3] sm:$0x3]  ;;  %v17264_v43 = vpack.c.bf16 %v858_v41, %v857_v40  ;;  %v860_v46 = vld [vmem:[#allocation16 + $0x68] sm:$0xff]  ;;  %v862_v49 = vld [vmem:[#allocation16 + $0x78] sm:$0xff] }
 0x1db   : > { %17247 = vmatpush3.bf16.msra.mxu0 %v20814_v27  ;;  %1105 = vrot.lane.b32.xlu1 %v833_v42, %s23829_s1  ;;  %v17267_v47 = vpack.c.bf16 %v860_v46, %v859_v45  ;;  %v861_v48 = vld [vmem:[#allocation16 + $0x70] sm:$0xff]  ;;  %v12892_v60 = vld [vmem:[#allocation24] ss:$0 sm:$0xff]  ;;  %v1129_v10 = vld [vmem:[#allocation27] sm:$0xff]  ;;  %s13560_s16 = sshll.u32 %s23993_s23, 8 }
 0x1dc   : > { %17272 = vmatprep.subr.bf16.mxu0 %v23765_v12  ;;  %v17270_v50 = vpack.c.bf16 %v862_v49, %v861_v48  ;;  %v1130_v11 = vld [vmem:[#allocation27 + $0x8] sm:$0xff]  ;;  %v1131_v13 = vld [vmem:[#allocation27 + $0x10] sm:$0xff]  ;;  %v1132_v15 = vld [vmem:[#allocation27 + $0x18] sm:$0xff]  ;;  %s23996_s18 = smov %s23995_s27  ;;  %s23627_s25 = scalar_lea.hbm %s23995_s27, %s13560_s16 }
 0x1dd   : > { %17256 = vmatpush3.bf16.msra.mxu1 %v17255_v25  ;;  %v20850_v14 = vpack.c.bf16 %v1130_v11, %v1129_v10  ;;  %v20853_v17 = vpack.c.bf16 %v1132_v15, %v1131_v13  ;;  %v1125_v18 = vld [vmem:[#allocation25] sm:$0xff]  ;;  %v1126_v19 = vld [vmem:[#allocation25 + $0x8] sm:$0xff]  ;;  %v834_v20 = vld [vmem:[#allocation4] sm:$0x3]  ;;  %p23997_p10 = scmp.ne.s32.totalorder %s23994_s0, 0 }
 0x1de   : > { %17257 = vmatprep.subr.bf16.mxu1 %v23765_v12  ;;  %14763 = vmatmul.mubr.msk.f32.vlgmr.msra.gmra.mrb[0].mxu0 %vm867_vm5, %v838_v33  ;;  %v17285_v21 = vpack.c.bf16 %v1126_v19, %v1125_v18  ;;  %v1127_v23 = vld [vmem:[#allocation25 + $0x10] sm:$0xff]  ;;  %v1128_v24 = vld [vmem:[#allocation25 + $0x18] sm:$0xff]  ;;  %v12896_v35 = vld [vmem:[#allocation28] ss:$0 sm:$0xff] }
 0x1df   : > { %17274 = vmatpush3.bf16.msra.mxu0 %v20819_v34  ;;  %14808 = vmatprep.mubr.msk.f32.mxu0 %vm20219_vm4, %v23763_v16  ;;  %v17288_v26 = vpack.c.bf16 %v1128_v24, %v1127_v23  ;;  %v835_v41 = vld [vmem:[#allocation5] sm:$0x3]  ;;  %v12900_v11 = vld [vmem:[#allocation33] ss:$0 sm:$0xff]  ;;  %vm20910_vm7 = vmpackc.low %vm867_vm5, %vm867_vm5 }
 0x1e0   : > { %17275 = vmatprep.subr.bf16.mxu0 %v23765_v12 }
 0x1e1   : > { %17259 = vmatpush3.bf16.msra.mxu1 %v17258_v31 }
 0x1e2   : > { %17260 = vmatprep.subr.bf16.mxu1 %v23765_v12 }
 0x1e3   : > { %17277 = vmatpush3.bf16.msra.mxu0 %v20825_v39 }
 0x1e4   : > { %17278 = vmatprep.subr.bf16.mxu0 %v23765_v12 }
 0x1e5   : > { %17262 = vmatpush3.bf16.msra.mxu1 %v17261_v38 }
 0x1e6   : > { %17263 = vmatprep.subr.bf16.mxu1 %v23765_v12  ;;  %14809 = vmatmul.mubr.msk.f32.vlgmr.msra.gmra.mrb[2].mxu0 %vm867_vm5, %v832_v44 }
 0x1e7   : > { %14819 = vmatprep.mubr.msk.f32.mxu0 %vm20219_vm4, %v23763_v16  ;;  %17280 = vmatpush3.bf16.msra.mxu0 %v20850_v14 }
 0x1e8   : > { %17281 = vmatprep.subr.bf16.mxu0 %v23765_v12 }
 0x1e9   : > { %17265 = vmatpush3.bf16.msra.mxu1 %v17264_v43 }
 0x1ea   : > { %17266 = vmatprep.subr.bf16.mxu1 %v23765_v12 }
 0x1eb   : > { %17283 = vmatpush3.bf16.msra.mxu0 %v20853_v17 }
 0x1ec   : > { %17284 = vmatprep.subr.bf16.mxu0 %v23765_v12 }
 0x1ed   : > { %17268 = vmatpush3.bf16.msra.mxu1 %v17267_v47 }
 0x1ee   : > { %17269 = vmatprep.subr.bf16.mxu1 %v23765_v12  ;;  %14820 = vmatmul.mubr.msk.f32.vlgmr.msra.gmra.mrb[4].mxu0 %vm867_vm5, %v834_v20 }
 0x1ef   : > { %17286 = vmatpush3.bf16.msra.mxu0 %v17285_v21  ;;  %14830 = vmatprep.mubr.msk.f32.mxu0 %vm20219_vm4, %v23763_v16 }
 0x1f0   : > { %17287 = vmatprep.subr.bf16.mxu0 %v23765_v12 }
 0x1f1   : > { %17271 = vmatpush3.bf16.msra.mxu1 %v17270_v50 }
 0x1f2   : > { %17296 = vmatprep.subr.bf16.mxu1 %v23765_v12 }
 0x1f3   : > { %17289 = vmatpush3.bf16.msra.mxu0 %v17288_v26 }
 0x1f4   : > { %17290 = vmatprep.subr.bf16.mxu0 %v23765_v12 }
 0x24d   : > { %v1106_v6 = vpop.permute.xlu1 %1105 }
 0x266   : > { %v843_v51 = vpop.xlane.xlu0 %842 }
 0x267   : > { %vm844_vm6 = vcmp.eq.f32.partialorder %v20800_v8, %v843_v51 }
 0x268   : > { %14798 = vmatmul.mubr.msk.f32.vlgmr.msra.gmra.mrb[0].mxu1 %vm844_vm6, %v23761_v52 }
 0x269   : > { %14852 = vmatprep.mubr.msk.f32.mxu1 %vm20219_vm4, %v23763_v16 }
 0x2b1   : > { %v937_v53 = vpop.f32.mrb[0].mxu0 }
 0x2b2   : > { %v14764_v54 = vpop.f32.mrb[1].mxu0 }
 0x2b3   : > { %v1322_v54 = vld [vmem:[#allocation31 + $0x8] sm:$0xff] }
 0x2b9   : > { %v1084_v55 = vpop.f32.mrb[2].mxu0 }
 0x2ba   : > { %v14810_v56 = vpop.f32.mrb[3].mxu0 }
 0x2c1   : > { %v1202_v30 = vpop.f32.mrb[4].mxu0 }
 0x2c2   : > { %v14821_v31 = vpop.f32.mrb[5].mxu0 }
 0x33b   : > { %v1007_v57 = vpop.f32.mrb[0].mxu1 }
 0x33c   : > { %v1008_v58 = vadd.f32 %v1007_v57, %v937_v53  ;;  %v14799_v59 = vpop.f32.mrb[1].mxu1  ;;  %v1321_v53 = vld [vmem:[#allocation31] sm:$0xff]  ;;  %v1318_v57 = vld [vmem:[#allocation30 + $0x8] sm:$0xff] }
 0x33d   : > { %v20877_v56 = vpack.c.bf16 %v1322_v54, %v1321_v53  ;;  %v1324_v59 = vld [vmem:[#allocation31 + $0x18] sm:$0xff]  ;;  %v1553_v54 = vld [vmem:[#allocation10 + $0xa8] sm:$0xff] }
 0x33e   : > { %v1088_v61 = vadd.f32 %v1084_v55, %v1008_v58  ;;  %v1317_v55 = vld [vmem:[#allocation30] sm:$0xff]  ;;  %v1323_v58 = vld [vmem:[#allocation31 + $0x10] sm:$0xff] }
 0x33f   : > { %v1552_v53 = vld [vmem:[#allocation10 + $0xa0] sm:$0xff] }
 0x340   : > { %v1096_v62 = vadd.f32 %v12892_v60, %v1088_v61  ;;  %v17297_v60 = vpack.c.bf16 %v1318_v57, %v1317_v55  ;;  %v1319_v61 = vld [vmem:[#allocation30 + $0x10] sm:$0xff]  ;;  %v20941_v57 = vpack.c.bf16 %v1553_v54, %v1552_v53 }
 0x342   : > { %19363 = vtanh.f32 %v1096_v62  ;;  %v12893_v0 = vmul.f32 -1.442695, %v1096_v62  ;;  %v1320_v62 = vld [vmem:[#allocation30 + $0x18] sm:$0xff]  ;;  %17298 = vmatpush3.bf16.msra.mxu1 %v17297_v60  ;;  %v1554_v60 = vld [vmem:[#allocation10 + $0xb0] sm:$0xff] }
 0x343   : > { %17299 = vmatprep.subr.bf16.mxu1 %v23765_v12 }
 0x344   : > { %19365 = vpow2.f32 %v12893_v0  ;;  %v17300_v0 = vpack.c.bf16 %v1320_v62, %v1319_v61  ;;  %v1555_v61 = vld [vmem:[#allocation10 + $0xb8] sm:$0xff] }
 0x346   : > { %17301 = vmatpush3.bf16.msra.mxu1 %v17300_v0  ;;  %v20953_v0 = vpack.c.bf16 %v1555_v61, %v1554_v60 }
 0x347   : > { %17334 = vmatprep.subr.bf16.mxu1 %v23765_v12 }
 0x34c   : > { %v19364_v63 = vpop.eup %19363 }
 0x34d   : > { %1110 = vrot.lane.b32.xlu0 %v19364_v63, %s23829_s1  ;;  %v20880_v63 = vpack.c.bf16 %v1324_v59, %v1323_v58  ;;  %v1538_v58 = vld [vmem:[#allocation10 + $0x30] sm:$0xff]  ;;  %v1539_v59 = vld [vmem:[#allocation10 + $0x38] sm:$0xff] }
 0x34e   : > { %v19366_v1 = vpop.eup %19365  ;;  %v20951_v62 = vpack.c.bf16 %v1539_v59, %v1538_v58 }
 0x34f   : > { %v1100_v2 = vadd.f32 1.0, %v19366_v1  ;;  %v836_v1 = vld [vmem:[#allocation6] sm:$0x3] }
 0x351   : > { %19367 = vrcp.f32 %v1100_v2 }
 0x35b   : > { %v19368_v3 = vpop.eup %19367 }
 0x35c   : > { %v1108_v7 = vmul.f32 %v19368_v3, %v1106_v6 }
 0x3bf   : > { %v1111_v4 = vpop.permute.xlu0 %1110 }
 0x3c0   : > { %v1113_v5 = vmul.f32 %v19368_v3, %v1111_v4 }
 0x3c2   : > { %1115 = vrot.lane.b32.xlu1 %v1113_v5, %s23829_s1  ;;  %v837_v5 = vld [vmem:[#allocation7] sm:$0x3] }
 0x434   : > { %v1116_v8 = vpop.permute.xlu1 %1115 }
 0x435   : > { %v20847_v9 = vadd.f32 %v1116_v8, %v1108_v7 }
 0x437   : > { %19369 = vtanh.f32 %v20847_v9 }
 0x441   : > { %v19370_v25 = vpop.eup %19369 }
 0x442   : > { %1121 = vrot.lane.b32.xlu1 %v19370_v25, %s23829_s1 }
 0x4b4   : > { %v1122_v28 = vpop.permute.xlu1 %1121 }
 0x4b5   : > { %v1124_v29 = vmul.f32 %v19368_v3, %v1122_v28 }
 0x4b7   : > { %1207 = vrot.lane.b32.xlu1 %v1124_v29, %s20223_s29 }
 0x529   : > { %v20865_v32 = vpop.permute.xlu1 %1207 }
 0x52a   : > { %14831 = vmatmul.mubr.msk.f32.vlgmr.msra.gmra.mrb[6].mxu0 %vm867_vm5, %v20865_v32 }
 0x52b   : > { %14841 = vmatprep.mubr.msk.f32.mxu0 %vm20219_vm4, %v23763_v16  ;;  %17292 = vmatpush3.bf16.msra.mxu0 %v20877_v56 }
 0x52c   : > { %17293 = vmatprep.subr.bf16.mxu0 %v23765_v12 }
 0x52f   : > { %17295 = vmatpush3.bf16.msra.mxu0 %v20880_v63 }
 0x530   : > { %17302 = vmatprep.subr.bf16.mxu0 %v23765_v12 }
 0x532   : > { %14842 = vmatmul.mubr.msk.f32.vlgmr.msra.gmra.mrb[8].mxu0 %vm867_vm5, %v836_v1  ;;  %v1540_v1 = vld [vmem:[#allocation10 + $0x40] sm:$0xff] }
 0x533   : > { %14887 = vmatprep.mubr.msk.f32.mxu0 %vm20219_vm4, %v23763_v16 }
 0x5fd   : > { %v1277_v33 = vpop.f32.mrb[6].mxu0 }
 0x5fe   : > { %v1278_v36 = vadd.f32 %v1277_v33, %v1202_v30  ;;  %v14832_v37 = vpop.f32.mrb[7].mxu0  ;;  %v1532_v33 = vld [vmem:[#allocation10] sm:$0xff] }
 0x600   : > { %v1288_v38 = vadd.f32 %v12896_v35, %v1278_v36  ;;  %v1533_v35 = vld [vmem:[#allocation10 + $0x8] sm:$0xff] }
 0x601   : > { %v20914_v37 = vpack.c.bf16 %v1533_v35, %v1532_v33  ;;  %v1563_v33 = vld [vmem:[#allocation10 + $0xf8] sm:$0xff] }
 0x602   : > { %19371 = vtanh.f32 %v1288_v38  ;;  %v12897_v42 = vmul.f32 -1.442695, %v1288_v38  ;;  %v1548_v38 = vld [vmem:[#allocation10 + $0x80] sm:$0xff] }
 0x603   : > { %17305 = vmatpush3.bf16.xpose.msk.msra.mxu0 %vm20910_vm7, %v20914_v37 }
 0x604   : > { %19373 = vpow2.f32 %v12897_v42  ;;  %17306 = vmatprep.subr.bf16.mxu0 %v23765_v12 }
 0x605   : > { %v1394_v6 = vpop.f32.mrb[8].mxu0 }
 0x606   : > { %v14843_v7 = vpop.f32.mrb[9].mxu0 }
 0x607   : > { %v1542_v7 = vld [vmem:[#allocation10 + $0x50] sm:$0xff] }
 0x60c   : > { %v19372_v40 = vpop.eup %19371 }
 0x60d   : > { %1302 = vrot.lane.b32.xlu1 %v19372_v40, %s23829_s1  ;;  %v1549_v40 = vld [vmem:[#allocation10 + $0x88] sm:$0xff] }
 0x60e   : > { %v19374_v43 = vpop.eup %19373  ;;  %v20916_v42 = vpack.c.bf16 %v1549_v40, %v1548_v38  ;;  %v20224_v40 = vmov 1966171168  }
 0x60f   : > { %v1292_v44 = vadd.f32 1.0, %v19374_v43  ;;  %v1534_v43 = vld [vmem:[#allocation10 + $0x10] sm:$0xff] }
 0x611   : > { %1297 = vrot.lane.b32.xlu1 %v835_v41, %s23829_s1  ;;  %19375 = vrcp.f32 %v1292_v44  ;;  %v1535_v44 = vld [vmem:[#allocation10 + $0x18] sm:$0xff] }
 0x61b   : > { %v19376_v45 = vpop.eup %19375 }
 0x67f   : > { %v1303_v46 = vpop.permute.xlu1 %1302 }
 0x680   : > { %v1305_v47 = vmul.f32 %v19376_v45, %v1303_v46  ;;  %v1551_v46 = vld [vmem:[#allocation10 + $0x98] sm:$0xff] }
 0x682   : > { %1307 = vrot.lane.b32.xlu1 %v1305_v47, %s23829_s1  ;;  %v20927_v47 = vpack.c.bf16 %v1535_v44, %v1534_v43  ;;  %v1513_v43 = vlaneseq }
 0x683   : > { %v1298_v48 = vpop.permute.xlu1 %1297 }
 0x684   : > { %v1300_v49 = vmul.f32 %v19376_v45, %v1298_v48  ;;  %17309 = vmatpush3.bf16.xpose.msk.msra.mxu0 %vm20910_vm7, %v20927_v47 }
 0x685   : > { %17310 = vmatprep.subr.bf16.mxu0 %v23765_v12 }
 0x6f4   : > { %v1308_v50 = vpop.permute.xlu1 %1307 }
 0x6f5   : > { %v20874_v51 = vadd.f32 %v1308_v50, %v1300_v49  ;;  %v1536_v49 = vld [vmem:[#allocation10 + $0x20] sm:$0xff]  ;;  %v1537_v50 = vld [vmem:[#allocation10 + $0x28] sm:$0xff] }
 0x6f6   : > { %v20939_v55 = vpack.c.bf16 %v1537_v50, %v1536_v49 }
 0x6f7   : > { %19377 = vtanh.f32 %v20874_v51 }
 0x6f8   : > { %17313 = vmatpush3.bf16.xpose.msk.msra.mxu0 %vm20910_vm7, %v20939_v55 }
 0x6f9   : > { %17314 = vmatprep.subr.bf16.mxu0 %v23765_v12 }
 0x700   : > { %17317 = vmatpush3.bf16.xpose.msk.msra.mxu0 %vm20910_vm7, %v20951_v62 }
 0x701   : > { %v19378_v2 = vpop.eup %19377  ;;  %17318 = vmatprep.subr.bf16.mxu0 %v23765_v12 }
 0x702   : > { %1313 = vrot.lane.b32.xlu0 %v19378_v2, %s23829_s1  ;;  %v1541_v2 = vld [vmem:[#allocation10 + $0x48] sm:$0xff] }
 0x774   : > { %v1314_v3 = vpop.permute.xlu0 %1313 }
 0x775   : > { %v1316_v4 = vmul.f32 %v19376_v45, %v1314_v3  ;;  %v1550_v45 = vld [vmem:[#allocation10 + $0x90] sm:$0xff]  ;;  %v1556_v3 = vld [vmem:[#allocation10 + $0xc0] sm:$0xff] }
 0x776   : > { %v20929_v48 = vpack.c.bf16 %v1551_v46, %v1550_v45  ;;  %v1514_v45 = vshrl.u32 %v1513_v43, 7  ;;  %v1878_v43 = vld [vmem:[#allocation13 + $0x90] sm:$0xff] }
 0x777   : > { %1399 = vrot.lane.b32.xlu1 %v1316_v4, %s20223_s29  ;;  %v1557_v4 = vld [vmem:[#allocation10 + $0xc8] sm:$0xff] }
 0x778   : > { %v21015_v54 = vsub.s32 0, %v1514_v45 }
 0x77b   : > { %1489 = vrot.lane.b32.xlu1 %v837_v5, %s23829_s1  ;;  %v20963_v5 = vpack.c.bf16 %v1541_v2, %v1540_v1 }
 0x77d   : > { %17321 = vmatpush3.bf16.xpose.msk.msra.mxu0 %vm20910_vm7, %v20963_v5 }
 0x77e   : > { %17322 = vmatprep.subr.bf16.mxu0 %v23765_v12 }
 0x7e9   : > { %v20893_v8 = vpop.permute.xlu1 %1399 }
 0x7ea   : > { %14853 = vmatmul.mubr.msk.f32.vlgmr.msra.gmra.mrb[2].mxu1 %vm867_vm5, %v20893_v8 }
 0x7eb   : > { %14922 = vmatprep.mubr.msk.f32.mxu1 %vm20219_vm4, %v23763_v16  ;;  %17337 = vmatpush3.bf16.xpose.msk.msra.mxu1 %vm20910_vm7, %v20916_v42 }
 0x7ec   : > { %17338 = vmatprep.subr.bf16.mxu1 %v23765_v12 }
 0x7ed   : > { %v1490_v28 = vpop.permute.xlu1 %1489 }
 0x7f3   : > { %17341 = vmatpush3.bf16.xpose.msk.msra.mxu1 %vm20910_vm7, %v20929_v48 }
 0x7f4   : > { %17342 = vmatprep.subr.bf16.mxu1 %v23765_v12 }
 0x7fb   : > { %17345 = vmatpush3.bf16.xpose.msk.msra.mxu1 %vm20910_vm7, %v20941_v57 }
 0x7fc   : > { %17346 = vmatprep.subr.bf16.mxu1 %v23765_v12 }
 0x803   : > { %17349 = vmatpush3.bf16.xpose.msk.msra.mxu1 %vm20910_vm7, %v20953_v0 }
 0x804   : > { %17350 = vmatprep.subr.bf16.mxu1 %v23765_v12 }
 0x8bd   : > { %v1469_v10 = vpop.f32.mrb[2].mxu1 }
 0x8be   : > { %v1470_v13 = vadd.f32 %v1469_v10, %v1394_v6  ;;  %v14854_v15 = vpop.f32.mrb[3].mxu1  ;;  %v20965_v6 = vpack.c.bf16 %v1557_v4, %v1556_v3  ;;  %v1543_v10 = vld [vmem:[#allocation10 + $0x58] sm:$0xff]  ;;  %v1816_v3 = vld [vmem:[#allocation15] sm:$0x3] }
 0x8bf   : > { %v20975_v15 = vpack.c.bf16 %v1543_v10, %v1542_v7  ;;  %v1818_v4 = vrot.slane %v1816_v3, 1 }
 0x8c0   : > { %v1480_v18 = vadd.f32 %v12900_v11, %v1470_v13  ;;  %17353 = vmatpush3.bf16.xpose.msk.msra.mxu1 %vm20910_vm7, %v20965_v6  ;;  %v1558_v11 = vld [vmem:[#allocation10 + $0xd0] sm:$0xff]  ;;  %v1559_v13 = vld [vmem:[#allocation10 + $0xd8] sm:$0xff] }
 0x8c1   : > { %17354 = vmatprep.subr.bf16.mxu1 %v23765_v12  ;;  %17325 = vmatpush3.bf16.xpose.msk.msra.mxu0 %vm20910_vm7, %v20975_v15 }
 0x8c2   : > { %19379 = vtanh.f32 %v1480_v18  ;;  %v12901_v20 = vmul.f32 -1.442695, %v1480_v18  ;;  %v20977_v18 = vpack.c.bf16 %v1559_v13, %v1558_v11  ;;  %17326 = vmatprep.subr.bf16.mxu0 %v23765_v12 }
 0x8c4   : > { %19381 = vpow2.f32 %v12901_v20  ;;  %v1545_v20 = vld [vmem:[#allocation10 + $0x68] sm:$0xff] }
 0x8c8   : > { %17357 = vmatpush3.bf16.xpose.msk.msra.mxu1 %vm20910_vm7, %v20977_v18 }
 0x8c9   : > { %17358 = vmatprep.subr.bf16.mxu1 %v23765_v12 }
 0x8cc   : > { %v19380_v19 = vpop.eup %19379 }
 0x8cd   : > { %1494 = vrot.lane.b32.xlu0 %v19380_v19, %s23829_s1  ;;  %v1544_v19 = vld [vmem:[#allocation10 + $0x60] sm:$0xff] }
 0x8ce   : > { %v19382_v21 = vpop.eup %19381 }
 0x8cf   : > { %v1484_v23 = vadd.f32 1.0, %v19382_v21  ;;  %v1560_v21 = vld [vmem:[#allocation10 + $0xe0] sm:$0xff] }
 0x8d1   : > { %19383 = vrcp.f32 %v1484_v23  ;;  %v1561_v23 = vld [vmem:[#allocation10 + $0xe8] sm:$0xff] }
 0x8db   : > { %v20900_v24 = vpop.eup %19383 }
 0x8dc   : > { %v1492_v29 = vmul.f32 %v20900_v24, %v1490_v28  ;;  %v1546_v28 = vld [vmem:[#allocation10 + $0x70] sm:$0xff] }
 0x93f   : > { %v1495_v25 = vpop.permute.xlu0 %1494 }
 0x940   : > { %v1497_v26 = vmul.f32 %v20900_v24, %v1495_v25  ;;  %v20987_v25 = vpack.c.bf16 %v1545_v20, %v1544_v19 }
 0x942   : > { %1499 = vrot.lane.b32.xlu0 %v1497_v26, %s23829_s1  ;;  %v20989_v26 = vpack.c.bf16 %v1561_v23, %v1560_v21  ;;  %17329 = vmatpush3.bf16.xpose.msk.msra.mxu0 %vm20910_vm7, %v20987_v25 }
 0x943   : > { %17330 = vmatprep.subr.bf16.mxu0 %v23765_v12 }
 0x944   : > { %17361 = vmatpush3.bf16.xpose.msk.msra.mxu1 %vm20910_vm7, %v20989_v26 }
 0x945   : > { %17362 = vmatprep.subr.bf16.mxu1 %v23765_v12 }
 0x9b4   : > { %v1500_v30 = vpop.permute.xlu0 %1499 }
 0x9b5   : > { %v20905_v31 = vadd.f32 %v1500_v30, %v1492_v29  ;;  %v1547_v29 = vld [vmem:[#allocation10 + $0x78] sm:$0xff]  ;;  %v1562_v30 = vld [vmem:[#allocation10 + $0xf0] sm:$0xff] }
 0x9b6   : > { %v20999_v35 = vpack.c.bf16 %v1547_v29, %v1546_v28  ;;  %v21001_v38 = vpack.c.bf16 %v1563_v33, %v1562_v30  ;;  %v1876_v29 = vld [vmem:[#allocation13 + $0x80] sm:$0xff]  ;;  %v1877_v30 = vld [vmem:[#allocation13 + $0x88] sm:$0xff] }
 0x9b7   : > { %19385 = vtanh.f32 %v20905_v31  ;;  %v1860_v33 = vld [vmem:[#allocation13] sm:$0xff] }
 0x9b8   : > { %17333 = vmatpush3.bf16.xpose.msk.msra.mxu0 %vm20910_vm7, %v20999_v35  ;;  %17365 = vmatpush3.bf16.xpose.msk.msra.mxu1 %vm20910_vm7, %v21001_v38 }
 0x9b9   : > { %17366 = vmatprep.subr.bf16.mxu0 %v23765_v12  ;;  %17390 = vmatprep.subr.bf16.mxu1 %v23765_v12 }
 0x9c1   : > { %v19386_v41 = vpop.eup %19385 }
 0x9c2   : > { %1505 = vrot.lane.b32.xlu1 %v19386_v41, %s23829_s1  ;;  %v1511_v41 = vunpack.c.l.s4 %v20224_v40  ;;  %v21032_v40 = vpack.c.bf16 %v1877_v30, %v1876_v29 }
 0x9c4   : > { %v1512_v44 = vunpack.c.0.s8 %v1511_v41  ;;  %v1861_v41 = vld [vmem:[#allocation13 + $0x8] sm:$0xff] }
 0x9c6   : > { %v21011_v46 = vsub.s32 %v1512_v44, %v1514_v45  ;;  %v1879_v44 = vld [vmem:[#allocation13 + $0x98] sm:$0xff]  ;;  %v21034_v45 = vpack.c.bf16 %v1861_v41, %v1860_v33 }
 0xa34   : > { %v1506_v49 = vpop.permute.xlu1 %1505 }
 0xa35   : > { %v1508_v50 = vmul.f32 %v20900_v24, %v1506_v49  ;;  %v1862_v49 = vld [vmem:[#allocation13 + $0x10] sm:$0xff] }
 0xa37   : > { %v1516_v53 = vrot.slane %v1508_v50, %v21011_v46 }
 0xa39   : > { %v1517_v58 = vcombine.high %v1516_v53, %v1516_v53  ;;  %v1524_v59 = vrot.slane %v1516_v53, %v21011_v46  ;;  %v1863_v53 = vld [vmem:[#allocation13 + $0x18] sm:$0xff] }
 0xa3b   : > { %v1567_v60 = vrot.slane %v1524_v59, %v21015_v54  ;;  %v1531_v61 = vrot.slane %v1517_v58, %v21011_v46  ;;  %v21037_v58 = vpack.c.bf16 %v1879_v44, %v1878_v43  ;;  %v1880_v59 = vld [vmem:[#allocation13 + $0xa0] sm:$0xff]  ;;  %v1866_v44 = vld [vmem:[#allocation13 + $0x30] sm:$0xff] }
 0xa3d   : > { %1568 = vrot.lane.b32.xlu1 %v1567_v60, %s20223_s29  ;;  %v1693_v1 = vrot.slane %v1531_v61, %v21015_v54  ;;  %v1881_v60 = vld [vmem:[#allocation13 + $0xa8] sm:$0xff]  ;;  %v1864_v61 = vld [vmem:[#allocation13 + $0x20] sm:$0xff] }
 0xa3f   : > { %1694 = vrot.lane.b32.xlu0 %v1693_v1, %s20223_s29  ;;  %v1865_v1 = vld [vmem:[#allocation13 + $0x28] sm:$0xff] }
 0xaaf   : > { %v1569_v2 = vpop.permute.xlu1 %1568 }
 0xab0   : > { %14888 = vmatmul.mubr.msk.f32.vlgmr.msra.gmra.mrb[10].mxu0 %vm867_vm5, %v1569_v2  ;;  %v21045_v2 = vpack.c.bf16 %v1881_v60, %v1880_v59  ;;  %v1868_v60 = vld [vmem:[#allocation13 + $0x40] sm:$0xff] }
 0xab1   : > { %v1695_v24 = vpop.permute.xlu0 %1694  ;;  %14957 = vmatprep.mubr.msk.f32.mxu0 %vm20219_vm4, %v23763_v16  ;;  %17368 = vmatpush3.bf16.msra.mxu0 %v21034_v45 }
 0xab2   : > { %14923 = vmatmul.mubr.msk.f32.vlgmr.msra.gmra.mrb[4].mxu1 %vm867_vm5, %v1695_v24  ;;  %17369 = vmatprep.subr.bf16.mxu0 %v23765_v12  ;;  %v21049_v24 = vpack.c.bf16 %v1865_v1, %v1864_v61  ;;  %v1869_v61 = vld [vmem:[#allocation13 + $0x48] sm:$0xff]  ;;  %v1886_v1 = vld [vmem:[#allocation13 + $0xd0] sm:$0xff] }
 0xab3   : > { %14992 = vmatprep.mubr.msk.f32.mxu1 %vm20219_vm4, %v23763_v16  ;;  %17392 = vmatpush3.bf16.msra.mxu1 %v21032_v40 }
 0xab4   : > { %17393 = vmatprep.subr.bf16.mxu1 %v23765_v12 }
 0xab7   : > { %17395 = vmatpush3.bf16.msra.mxu1 %v21037_v58 }
 0xab8   : > { %17396 = vmatprep.subr.bf16.mxu1 %v23765_v12 }
 0xabb   : > { %17398 = vmatpush3.bf16.msra.mxu1 %v21045_v2 }
 0xabc   : > { %17399 = vmatprep.subr.bf16.mxu1 %v23765_v12 }
 0xb83   : > { %v1686_v7 = vpop.f32.mrb[10].mxu0 }
 0xb84   : > { %v14889_v10 = vpop.f32.mrb[11].mxu0  ;;  %v1821_v20 = vadd.f32 %v1816_v3, %v1686_v7  ;;  %v1882_v3 = vld [vmem:[#allocation13 + $0xb0] sm:$0xff] }
 0xb85   : > { %v1812_v11 = vpop.f32.mrb[4].mxu1 }
 0xb86   : > { %v1822_v13 = vadd.f32 %v1818_v4, %v1812_v11  ;;  %v14924_v19 = vpop.f32.mrb[5].mxu1  ;;  %v1883_v4 = vld [vmem:[#allocation13 + $0xb8] sm:$0xff] }
 0xb87   : > { %v21053_v7 = vpack.c.bf16 %v1883_v4, %v1882_v3  ;;  %v21073_v3 = vpack.c.bf16 %v1869_v61, %v1868_v60  ;;  %v1887_v4 = vld [vmem:[#allocation13 + $0xd8] sm:$0xff]  ;;  %v1874_v60 = vld [vmem:[#allocation13 + $0x70] sm:$0xff] }
 0xb88   : > { %v1825_v21 = vrot.slane %v1822_v13, 7  ;;  %v1875_v61 = vld [vmem:[#allocation13 + $0x78] sm:$0xff] }
 0xb89   : > { %17401 = vmatpush3.bf16.msra.mxu1 %v21053_v7 }
 0xb8a   : > { %v1827_v23 = vsel %vm1826_vm8, %v1825_v21, %v1821_v20  ;;  %17402 = vmatprep.subr.bf16.mxu1 %v23765_v12 }
 0xb8b   : > { %v1829_v28 = vsel %vm840_vm3, %v1827_v23, -inf }
 0xb8c   : > { %1830 = vmax.xlane.f32.xlu0 %v1829_v28 }
 0xba2   : > { %2188 = vrot.lane.b32.xlu0 %v1508_v50, %s20223_s29  ;;  %v21041_v50 = vpack.c.bf16 %v1863_v53, %v1862_v49  ;;  %v1867_v49 = vld [vmem:[#allocation13 + $0x38] sm:$0xff]  ;;  %v1884_v53 = vld [vmem:[#allocation13 + $0xc0] sm:$0xff] }
 0xba3   : > { %v21065_v59 = vpack.c.bf16 %v1867_v49, %v1866_v44  ;;  %v1890_v44 = vld [vmem:[#allocation13 + $0xf0] sm:$0xff] }
 0xba4   : > { %17371 = vmatpush3.bf16.msra.mxu0 %v21041_v50 }
 0xba5   : > { %17372 = vmatprep.subr.bf16.mxu0 %v23765_v12 }
 0xba8   : > { %17374 = vmatpush3.bf16.msra.mxu0 %v21049_v24 }
 0xba9   : > { %17375 = vmatprep.subr.bf16.mxu0 %v23765_v12 }
 0xbac   : > { %17377 = vmatpush3.bf16.msra.mxu0 %v21065_v59 }
 0xbad   : > { %17378 = vmatprep.subr.bf16.mxu0 %v23765_v12 }
 0xbb0   : > { %17380 = vmatpush3.bf16.msra.mxu0 %v21073_v3 }
 0xbb1   : > { %17381 = vmatprep.subr.bf16.mxu0 %v23765_v12 }
 0xc19   : > { %v1831_v10 = vpop.xlane.xlu0 %1830 }
 0xc1a   : > { %v1833_v11 = vrot.slane %v1831_v10, 1  ;;  %v1836_v19 = vsub.f32 %v1821_v20, %v1831_v10  ;;  %v21075_v10 = vpack.c.bf16 %v1887_v4, %v1886_v1  ;;  %v21096_v1 = vpack.c.bf16 %v1875_v61, %v1874_v60 }
 0xc1c   : > { %v1837_v21 = vsub.f32 %v1822_v13, %v1833_v11  ;;  %v1838_v23 = vmul.f32 1.442695, %v1836_v19  ;;  %v1885_v13 = vld [vmem:[#allocation13 + $0xc8] sm:$0xff]  ;;  %v1870_v11 = vld [vmem:[#allocation13 + $0x50] sm:$0xff]  ;;  %v1871_v19 = vld [vmem:[#allocation13 + $0x58] sm:$0xff] }
 0xc1d   : > { %v21067_v20 = vpack.c.bf16 %v1885_v13, %v1884_v53  ;;  %v1891_v53 = vld [vmem:[#allocation13 + $0xf8] sm:$0xff] }
 0xc1e   : > { %v1840_v28 = vmul.f32 1.442695, %v1837_v21  ;;  %v1888_v21 = vld [vmem:[#allocation13 + $0xe0] sm:$0xff]  ;;  %v21091_v13 = vpack.c.bf16 %v1891_v53, %v1890_v44  ;;  %v2033_v53 = vld [vmem:[#allocation18 + $0x8] sm:$0xff] }
 0xc1f   : > { %17404 = vmatpush3.bf16.msra.mxu1 %v21067_v20  ;;  %v2032_v44 = vld [vmem:[#allocation18] sm:$0xff] }
 0xc20   : > { %19387 = vpow2.f32 %v1840_v28  ;;  %17405 = vmatprep.subr.bf16.mxu1 %v23765_v12  ;;  %v1889_v28 = vld [vmem:[#allocation13 + $0xe8] sm:$0xff]  ;;  %v21103_v16 = vpack.c.bf16 %v2033_v53, %v2032_v44 }
 0xc21   : > { %19389 = vpow2.f32 %v1838_v23  ;;  %v21081_v23 = vpack.c.bf16 %v1871_v19, %v1870_v11  ;;  %v2052_v44 = vld [vmem:[#allocation19 + $0x20] sm:$0xff]  ;;  %v2053_v53 = vld [vmem:[#allocation19 + $0x28] sm:$0xff] }
 0xc23   : > { %17407 = vmatpush3.bf16.msra.mxu1 %v21075_v10  ;;  %17383 = vmatpush3.bf16.msra.mxu0 %v21081_v23 }
 0xc24   : > { %17408 = vmatprep.subr.bf16.mxu1 %v23765_v12  ;;  %17384 = vmatprep.subr.bf16.mxu0 %v23765_v12 }
 0xc2a   : > { %v21060_v29 = vpop.eup %19387 }
 0xc2b   : > { %v1844_v30 = vrot.slane %v21060_v29, 7  ;;  %v19390_v33 = vpop.eup %19389 }
 0xc2d   : > { %v1845_v41 = vsel %vm1826_vm8, %v1844_v30, %v19390_v33  ;;  %v21083_v30 = vpack.c.bf16 %v1889_v28, %v1888_v21  ;;  %v2048_v28 = vld [vmem:[#allocation19] sm:$0xff] }
 0xc2e   : > { %v1847_v43 = vsel %vm840_vm3, %v1845_v41, 0.0  ;;  %v1872_v41 = vld [vmem:[#allocation13 + $0x60] sm:$0xff] }
 0xc2f   : > { %1848 = vadd.xlane.f32.xlu1 %v1847_v43  ;;  %17410 = vmatpush3.bf16.msra.mxu1 %v21083_v30  ;;  %v1873_v43 = vld [vmem:[#allocation13 + $0x68] sm:$0xff] }
 0xc30   : > { %17411 = vmatprep.subr.bf16.mxu1 %v23765_v12  ;;  %v21089_v49 = vpack.c.bf16 %v1873_v43, %v1872_v41  ;;  %v2049_v41 = vld [vmem:[#allocation19 + $0x8] sm:$0xff] }
 0xc31   : > { %v21101_v52 = vpack.c.bf16 %v2049_v41, %v2048_v28  ;;  %v2051_v28 = vld [vmem:[#allocation19 + $0x18] sm:$0xff] }
 0xc32   : > { %17386 = vmatpush3.bf16.msra.mxu0 %v21089_v49  ;;  %v2035_v41 = vld [vmem:[#allocation18 + $0x18] sm:$0xff] }
 0xc33   : > { %17413 = vmatpush3.bf16.msra.mxu1 %v21091_v13  ;;  %17387 = vmatprep.subr.bf16.mxu0 %v23765_v12 }
 0xc34   : > { %17446 = vmatprep.subr.bf16.mxu1 %v23765_v12 }
 0xc36   : > { %17389 = vmatpush3.bf16.msra.mxu0 %v21096_v1 }
 0xc37   : > { %17414 = vmatprep.subr.bf16.mxu0 %v23765_v12 }
 0xcbc   : > { %v1849_v4 = vpop.xlane.xlu1 %1848 }
 0xcbd   : > { %19391 = vrcp.f32 %v1849_v4 }
 0xcc7   : > { %v19392_v11 = vpop.eup %19391 }
 0xcc8   : > { %v1851_v19 = vmul.f32 %v19392_v11, %v1849_v4  ;;  %v23867_v4 = vmov 0.0  }
 0xcca   : > { %v1852_v21 = vsub.f32 2.0, %v1851_v19  ;;  %v23868_v19 = vmov 0.0|0.0  }
 0xccc   : > { %v1853_v43 = vmul.f32 %v19392_v11, %v1852_v21  ;;  %v2050_v21 = vld [vmem:[#allocation19 + $0x10] sm:$0xff] }
 0xcce   : > { %v1855_v60 = vrot.slane %v1853_v43, 1  ;;  %v1858_v61 = vmul.f32 %v19390_v33, %v1853_v43  ;;  %v2034_v33 = vld [vmem:[#allocation18 + $0x10] sm:$0xff]  ;;  %v21120_v43 = vpack.c.bf16 %v2051_v28, %v2050_v21 }
 0xccf   : > { %v2054_v28 = vld [vmem:[#allocation19 + $0x30] sm:$0xff] }
 0xcd0   : > { %14958 = vmatmul.mubr.f32.vlgmr.msra.gmra.mrb[12].mxu0 %v1858_v61  ;;  %v1859_v12 = vmul.f32 %v21060_v29, %v1855_v60  ;;  %v2036_v60 = vld [vmem:[#allocation18 + $0x20] sm:$0xff] }
 0xcd1   : > { %17417 = vmatpush3.bf16.xpose.msk.msra.mxu0 %vm20910_vm7, %v21101_v52  ;;  %15027 = vmatprep.mubr.msk.f32.mxu0 %vm20219_vm4, %v23867_v4 }
 0xcd2   : > { %14993 = vmatmul.mubr.f32.vlgmr.msra.gmra.mrb[6].mxu1 %v1859_v12  ;;  %v12499_v11 = vrot.slane %v1859_v12, 7  ;;  %17418 = vmatprep.subr.bf16.mxu0 %v23868_v19  ;;  %v21122_v12 = vpack.c.bf16 %v2035_v41, %v2034_v33  ;;  %v2038_v33 = vld [vmem:[#allocation18 + $0x30] sm:$0xff]  ;;  %v2039_v41 = vld [vmem:[#allocation18 + $0x38] sm:$0xff] }
 0xcd3   : > { %17449 = vmatpush3.bf16.xpose.msk.msra.mxu1 %vm20910_vm7, %v21103_v16  ;;  %15062 = vmatprep.mubr.msk.f32.mxu1 %vm20219_vm4, %v23867_v4 }
 0xcd4   : > { %v12500_v29 = vsel %vm1826_vm8, %v12499_v11, %v1858_v61  ;;  %17450 = vmatprep.subr.bf16.mxu1 %v23868_v19  ;;  %v2037_v61 = vld [vmem:[#allocation18 + $0x28] sm:$0xff]  ;;  %v21132_v11 = vpack.c.bf16 %v2053_v53, %v2052_v44  ;;  %v21146_v53 = vpack.c.bf16 %v2039_v41, %v2038_v33  ;;  %v2058_v33 = vld [vmem:[#allocation19 + $0x50] sm:$0xff]  ;;  %v2059_v41 = vld [vmem:[#allocation19 + $0x58] sm:$0xff] }
 0xcd5   : > { %12523 = vst [vmem:[%s20797_s28] sm:$0x3] %v12500_v29  ;;  %v21134_v21 = vpack.c.bf16 %v2037_v61, %v2036_v60  ;;  %v2055_v29 = vld [vmem:[#allocation19 + $0x38] sm:$0xff]  ;;  %v2056_v60 = vld [vmem:[#allocation19 + $0x40] sm:$0xff]  ;;  %v2057_v61 = vld [vmem:[#allocation19 + $0x48] sm:$0xff] }
 0xcd6   : > { %23869 = vst [vmem:[#allocation62_spill] sm:$0xff] %v21132_v11  ;;  %v21144_v44 = vpack.c.bf16 %v2055_v29, %v2054_v28  ;;  %23872 = vst [vmem:[#allocation65_spill] sm:$0xff] %v21146_v53  ;;  %v21156_v28 = vpack.c.bf16 %v2057_v61, %v2056_v60  ;;  %v21168_v60 = vpack.c.bf16 %v2059_v41, %v2058_v33  ;;  %v2061_v61 = vld [vmem:[#allocation19 + $0x68] sm:$0xff]  ;;  %v2063_v41 = vld [vmem:[#allocation19 + $0x78] sm:$0xff] }
 0xcd7   : > { %23870 = vst [vmem:[#allocation63_spill] sm:$0xff] %v21134_v21 }
 0xcd8   : > { %23871 = vst [vmem:[#allocation64_spill] sm:$0xff] %v21144_v44  ;;  %23873 = vst [vmem:[#allocation66_spill] sm:$0xff] %v21156_v28 }
 0xcd9   : > { %17421 = vmatpush3.bf16.xpose.msk.msra.mxu0 %vm20910_vm7, %v21120_v43  ;;  %23875 = vst [vmem:[#allocation68_spill] sm:$0xff] %v21168_v60 }
 0xcda   : > { %17422 = vmatprep.subr.bf16.mxu0 %v23868_v19 }
 0xcdb   : > { %17453 = vmatpush3.bf16.xpose.msk.msra.mxu1 %vm20910_vm7, %v21122_v12 }
 0xcdc   : > { %17454 = vmatprep.subr.bf16.mxu1 %v23868_v19 }
 0xce1   : > { %17425 = vmatpush3.bf16.xpose.msk.msra.mxu0 %vm20910_vm7, %v21132_v11  ;;  %v2041_v11 = vld [vmem:[#allocation18 + $0x48] sm:$0xff] }
 0xce2   : > { %17426 = vmatprep.subr.bf16.mxu0 %v23868_v19 }
 0xce3   : > { %17457 = vmatpush3.bf16.xpose.msk.msra.mxu1 %vm20910_vm7, %v21134_v21  ;;  %v2040_v21 = vld [vmem:[#allocation18 + $0x40] sm:$0xff] }
 0xce4   : > { %17458 = vmatprep.subr.bf16.mxu1 %v23868_v19  ;;  %v21158_v29 = vpack.c.bf16 %v2041_v11, %v2040_v21  ;;  %v2060_v21 = vld [vmem:[#allocation19 + $0x60] sm:$0xff] }
 0xce5   : > { %v21180_v33 = vpack.c.bf16 %v2061_v61, %v2060_v21 }
 0xce6   : > { %23874 = vst [vmem:[#allocation67_spill] sm:$0xff] %v21158_v29 }
 0xce9   : > { %17429 = vmatpush3.bf16.xpose.msk.msra.mxu0 %vm20910_vm7, %v21144_v44  ;;  %v2043_v44 = vld [vmem:[#allocation18 + $0x58] sm:$0xff] }
 0xcea   : > { %17430 = vmatprep.subr.bf16.mxu0 %v23868_v19 }
 0xceb   : > { %17461 = vmatpush3.bf16.xpose.msk.msra.mxu1 %vm20910_vm7, %v21146_v53  ;;  %v2042_v53 = vld [vmem:[#allocation18 + $0x50] sm:$0xff] }
 0xcec   : > { %17462 = vmatprep.subr.bf16.mxu1 %v23868_v19  ;;  %v21170_v11 = vpack.c.bf16 %v2043_v44, %v2042_v53  ;;  %v2062_v53 = vld [vmem:[#allocation19 + $0x70] sm:$0xff] }
 0xced   : > { %v21192_v21 = vpack.c.bf16 %v2063_v41, %v2062_v53 }
 0xcee   : > { %23876 = vst [vmem:[#allocation69_spill] sm:$0xff] %v21170_v11 }
 0xcef   : > { %23878 = vst [vmem:[#allocation71_spill] sm:$0xff] %v21192_v21 }
 0xcf1   : > { %17433 = vmatpush3.bf16.xpose.msk.msra.mxu0 %vm20910_vm7, %v21156_v28  ;;  %v2045_v28 = vld [vmem:[#allocation18 + $0x68] sm:$0xff] }
 0xcf2   : > { %17434 = vmatprep.subr.bf16.mxu0 %v23868_v19 }
 0xcf3   : > { %17465 = vmatpush3.bf16.xpose.msk.msra.mxu1 %vm20910_vm7, %v21158_v29  ;;  %v2044_v29 = vld [vmem:[#allocation18 + $0x60] sm:$0xff] }
 0xcf4   : > { %17466 = vmatprep.subr.bf16.mxu1 %v23868_v19  ;;  %v21182_v44 = vpack.c.bf16 %v2045_v28, %v2044_v29  ;;  %v21204_v29 = vpop.permute.xlu0 %2188 }
 0xcf6   : > { %23877 = vst [vmem:[#allocation70_spill] sm:$0xff] %v21182_v44 }
 0xcf9   : > { %17437 = vmatpush3.bf16.xpose.msk.msra.mxu0 %vm20910_vm7, %v21168_v60  ;;  %v2047_v60 = vld [vmem:[#allocation18 + $0x78] sm:$0xff] }
 0xcfa   : > { %17438 = vmatprep.subr.bf16.mxu0 %v23868_v19 }
 0xcfb   : > { %17469 = vmatpush3.bf16.xpose.msk.msra.mxu1 %vm20910_vm7, %v21170_v11  ;;  %v2046_v11 = vld [vmem:[#allocation18 + $0x70] sm:$0xff] }
 0xcfc   : > { %17470 = vmatprep.subr.bf16.mxu1 %v23868_v19  ;;  %v21194_v28 = vpack.c.bf16 %v2047_v60, %v2046_v11 }
 0xcfe   : > { %23879 = vst [vmem:[#allocation72_spill] sm:$0xff] %v21194_v28 }
 0xd01   : > { %17441 = vmatpush3.bf16.xpose.msk.msra.mxu0 %vm20910_vm7, %v21180_v33 }
 0xd02   : > { %17442 = vmatprep.subr.bf16.mxu0 %v23868_v19 }
 0xd03   : > { %17473 = vmatpush3.bf16.xpose.msk.msra.mxu1 %vm20910_vm7, %v21182_v44 }
 0xd04   : > { %17474 = vmatprep.subr.bf16.mxu1 %v23868_v19 }
 0xd09   : > { %17445 = vmatpush3.bf16.xpose.msk.msra.mxu0 %vm20910_vm7, %v21192_v21 }
 0xd0a   : > { %17478 = vmatprep.subr.bf16.mxu0 %v23868_v19 }
 0xd0b   : > { %17477 = vmatpush3.bf16.xpose.msk.msra.mxu1 %vm20910_vm7, %v21194_v28  ;;  %v23889_v28 = vmov 1.0  }
 0xd0c   : > { %17484 = vmatprep.subr.bf16.mxu1 %v23868_v19 }
 0xd12   : > { %15063 = vmatmul.mubr.msk.f32.vlgmr.msra.gmra.mrb[8].mxu1 %vm867_vm5, %v21204_v29 }
 0xd13   : > { %15108 = vmatprep.mubr.msk.f32.mxu1 %vm20219_vm4, %v23867_v4 }
 0xda3   : > { %v1958_v60 = vpop.f32.mrb[12].mxu0 }
 0xda4   : > { %v14959_v11 = vpop.f32.mrb[13].mxu0 }
 0xda5   : > { %v2028_v61 = vpop.f32.mrb[6].mxu1  ;;  %v2329_v11 = vld [vmem:[#allocation16 + $0x28] sm:$0xff] }
 0xda6   : > { %v2066_v53 = vrot.slane %v2028_v61, 7  ;;  %v14994_v41 = vpop.f32.mrb[7].mxu1  ;;  %v2330_v61 = vld [vmem:[#allocation16 + $0x30] sm:$0xff] }
 0xda8   : > { %v2067_v21 = vsel %vm1826_vm8, %v2066_v53, %v1958_v60  ;;  %v2331_v53 = vld [vmem:[#allocation16 + $0x38] sm:$0xff] }
 0xda9   : > { %15028 = vmatmul.mubr.msk.f32.vlgmr.msra.gmra.mrb[14].mxu0 %vm867_vm5, %v2067_v21  ;;  %v21248_v41 = vpack.c.bf16 %v2331_v53, %v2330_v61  ;;  %v2337_v61 = vld [vmem:[#allocation16 + $0x68] sm:$0xff] }
 0xdaa   : > { %17480 = vmatpush3.bf16.msra.mxu0 %v20811_v22  ;;  %15073 = vmatprep.mubr.msk.f32.mxu0 %vm20219_vm4, %v23867_v4 }
 0xdab   : > { %17481 = vmatprep.subr.bf16.mxu0 %v23868_v19  ;;  %23883 = vst [vmem:[#allocation76_spill] sm:$0xff] %v21248_v41 }
 0xdae   : > { %17483 = vmatpush3.bf16.msra.mxu0 %v20814_v27 }
 0xdaf   : > { %17508 = vmatprep.subr.bf16.mxu0 %v23868_v19 }
 0xdb1   : > { %15074 = vmatmul.mubr.msk.f32.vlgmr.msra.gmra.mrb[16].mxu0 %vm867_vm5, %v2067_v21  ;;  %v2327_v21 = vld [vmem:[#allocation16 + $0x18] sm:$0xff] }
 0xdb2   : > { %17510 = vmatpush3.bf16.msra.mxu0 %v20819_v34  ;;  %15119 = vmatprep.mubr.msk.f32.mxu0 %vm20219_vm4, %v23867_v4  ;;  %v2324_v34 = vld [vmem:[#allocation16] sm:$0xff] }
 0xdb3   : > { %17511 = vmatprep.subr.bf16.mxu0 %v23868_v19 }
 0xdb6   : > { %17513 = vmatpush3.bf16.msra.mxu0 %v20825_v39  ;;  %v2325_v39 = vld [vmem:[#allocation16 + $0x8] sm:$0xff] }
 0xdb7   : > { %17514 = vmatprep.subr.bf16.mxu0 %v23868_v19 }
 0xdb9   : > { %15120 = vmatmul.mubr.msk.f32.vlgmr.msra.gmra.mrb[18].mxu0 %vm867_vm5, %v20865_v32  ;;  %v21237_v32 = vpack.c.bf16 %v2325_v39, %v2324_v34  ;;  %v2333_v34 = vld [vmem:[#allocation16 + $0x48] sm:$0xff] }
 0xdba   : > { %17516 = vmatpush3.bf16.msra.mxu0 %v20850_v14  ;;  %15130 = vmatprep.mubr.msk.f32.mxu0 %vm20219_vm4, %v23867_v4  ;;  %v2326_v14 = vld [vmem:[#allocation16 + $0x10] sm:$0xff] }
 0xdbb   : > { %17517 = vmatprep.subr.bf16.mxu0 %v23868_v19  ;;  %23880 = vst [vmem:[#allocation73_spill] sm:$0xff] %v21237_v32  ;;  %17486 = vmatpush3.bf16.msra.mxu1 %v21237_v32  ;;  %v21240_v60 = vpack.c.bf16 %v2327_v21, %v2326_v14  ;;  %v2334_v14 = vld [vmem:[#allocation16 + $0x50] sm:$0xff]  ;;  %v2335_v21 = vld [vmem:[#allocation16 + $0x58] sm:$0xff] }
 0xdbc   : > { %17487 = vmatprep.subr.bf16.mxu1 %v23868_v19 }
 0xdbd   : > { %23881 = vst [vmem:[#allocation74_spill] sm:$0xff] %v21240_v60 }
 0xdbe   : > { %17519 = vmatpush3.bf16.msra.mxu0 %v20853_v17  ;;  %v2328_v17 = vld [vmem:[#allocation16 + $0x20] sm:$0xff] }
 0xdbf   : > { %17520 = vmatprep.subr.bf16.mxu0 %v23868_v19  ;;  %17489 = vmatpush3.bf16.msra.mxu1 %v21240_v60 }
 0xdc0   : > { %17490 = vmatprep.subr.bf16.mxu1 %v23868_v19 }
 0xdc1   : > { %15131 = vmatmul.mubr.msk.f32.vlgmr.msra.gmra.mrb[20].mxu0 %vm867_vm5, %v20893_v8  ;;  %v21244_v8 = vpack.c.bf16 %v2329_v11, %v2328_v17  ;;  %v21256_v17 = vpack.c.bf16 %v2335_v21, %v2334_v14  ;;  %v2336_v11 = vld [vmem:[#allocation16 + $0x60] sm:$0xff] }
 0xdc2   : > { %15141 = vmatprep.mubr.msk.f32.mxu0 %vm20219_vm4, %v23867_v4  ;;  %v21260_v53 = vpack.c.bf16 %v2337_v61, %v2336_v11  ;;  %v21269_v21 = vld [vmem:[#allocation34] ss:$0 sm:$0xff] }
 0xdc3   : > { %23882 = vst [vmem:[#allocation75_spill] sm:$0xff] %v21244_v8  ;;  %17492 = vmatpush3.bf16.msra.mxu1 %v21244_v8  ;;  %23885 = vst [vmem:[#allocation78_spill] sm:$0xff] %v21256_v17 }
 0xdc4   : > { %17493 = vmatprep.subr.bf16.mxu1 %v23868_v19  ;;  %23886 = vst [vmem:[#allocation79_spill] sm:$0xff] %v21260_v53  ;;  %23888 = vst [vmem:[#allocation81_spill] sm:$0xff] %v21269_v21 }
 0xdc7   : > { %17495 = vmatpush3.bf16.msra.mxu1 %v21248_v41 }
 0xdc8   : > { %17496 = vmatprep.subr.bf16.mxu1 %v23868_v19 }
 0xde5   : > { %v2306_v22 = vpop.f32.mrb[8].mxu1 }
 0xde6   : > { %v15064_v27 = vpop.f32.mrb[9].mxu1 }
 0xde7   : > { %v2332_v27 = vld [vmem:[#allocation16 + $0x40] sm:$0xff] }
 0xde8   : > { %v21252_v39 = vpack.c.bf16 %v2333_v34, %v2332_v27  ;;  %v2338_v27 = vld [vmem:[#allocation16 + $0x70] sm:$0xff]  ;;  %v2339_v34 = vld [vmem:[#allocation16 + $0x78] sm:$0xff] }
 0xde9   : > { %v21264_v41 = vpack.c.bf16 %v2339_v34, %v2338_v27 }
 0xdea   : > { %23884 = vst [vmem:[#allocation77_spill] sm:$0xff] %v21252_v39  ;;  %17498 = vmatpush3.bf16.msra.mxu1 %v21252_v39 }
 0xdeb   : > { %17499 = vmatprep.subr.bf16.mxu1 %v23868_v19  ;;  %23887 = vst [vmem:[#allocation80_spill] sm:$0xff] %v21264_v41 }
 0xdee   : > { %17501 = vmatpush3.bf16.msra.mxu1 %v21256_v17 }
 0xdef   : > { %17502 = vmatprep.subr.bf16.mxu1 %v23868_v19 }
 0xdf2   : > { %17504 = vmatpush3.bf16.msra.mxu1 %v21260_v53 }
 0xdf3   : > { %17505 = vmatprep.subr.bf16.mxu1 %v23868_v19 }
 0xdf6   : > { %17507 = vmatpush3.bf16.msra.mxu1 %v21264_v41 }
 0xdf7   : > { %17532 = vmatprep.subr.bf16.mxu1 %v23868_v19 }
 0xe7c   : > { %v2184_v14 = vpop.f32.mrb[14].mxu0 }
 0xe7d   : > { %v2307_v17 = vadd.f32 %v2306_v22, %v2184_v14  ;;  %v15029_v11 = vpop.f32.mrb[15].mxu0 }
 0xe7e   : > { %v21279_v11 = vld [vmem:[#allocation24] ss:$0 sm:$0xff] }
 0xe7f   : > { %v2317_v61 = vadd.f32 %v21269_v21, %v2307_v17 }
 0xe81   : > { %12475 = vst [vmem:[%s20795_s19] sm:$0x3] %v2317_v61  ;;  %v2318_v39 = vsel %vm840_vm3, %v2317_v61, -inf }
 0xe82   : > { %2319 = vmax.xlane.f32.xlu1 %v2318_v39 }
 0xe84   : > { %v2410_v53 = vpop.f32.mrb[16].mxu0 }
 0xe85   : > { %v15075_v27 = vpop.f32.mrb[17].mxu0 }
 0xe8c   : > { %v2554_v34 = vpop.f32.mrb[18].mxu0 }
 0xe8d   : > { %v15121_v8 = vpop.f32.mrb[19].mxu0 }
 0xe94   : > { %v21274_v60 = vpop.f32.mrb[20].mxu0 }
 0xe95   : > { %v15132_v41 = vpop.f32.mrb[21].mxu0 }
 0xf0f   : > { %v2320_v32 = vpop.xlane.xlu1 %2319 }
 0xf10   : > { %vm2321_vm9 = vcmp.eq.f32.partialorder %v2317_v61, %v2320_v32 }
 0xf11   : > { %15109 = vmatmul.mubr.msk.f32.vlgmr.msra.gmra.mrb[10].mxu1 %vm2321_vm9, %v23889_v28 }
 0xf12   : > { %15163 = vmatprep.mubr.msk.f32.mxu1 %vm20219_vm4, %v23867_v4 }
 0xfe4   : > { %v2480_v22 = vpop.f32.mrb[10].mxu1 }
 0xfe5   : > { %v2481_v17 = vadd.f32 %v2480_v22, %v2410_v53  ;;  %v15110_v14 = vpop.f32.mrb[11].mxu1 }
 0xfe6   : > { %v2592_v14 = vld [vmem:[#allocation25 + $0x8] sm:$0xff] }
 0xfe7   : > { %v2558_v39 = vadd.f32 %v2554_v34, %v2481_v17  ;;  %v2591_v17 = vld [vmem:[#allocation25] sm:$0xff] }
 0xfe9   : > { %v2566_v27 = vadd.f32 %v21279_v11, %v2558_v39  ;;  %v2593_v39 = vld [vmem:[#allocation25 + $0x10] sm:$0xff] }
 0xfeb   : > { %19393 = vtanh.f32 %v2566_v27  ;;  %v12976_v41 = vmul.f32 -1.442695, %v2566_v27  ;;  %v21288_v27 = vpack.c.bf16 %v2592_v14, %v2591_v17  ;;  %v2776_v14 = vld [vmem:[#allocation30] sm:$0xff] }
 0xfed   : > { %19395 = vpow2.f32 %v12976_v41  ;;  %17522 = vmatpush3.bf16.msra.mxu0 %v21288_v27 }
 0xfee   : > { %17523 = vmatprep.subr.bf16.mxu0 %v23868_v19 }
 0xff5   : > { %v19394_v8 = vpop.eup %19393 }
 0xff6   : > { %2576 = vrot.lane.b32.xlu1 %v19394_v8, %s23829_s1  ;;  %v2594_v8 = vld [vmem:[#allocation25 + $0x18] sm:$0xff] }
 0xff7   : > { %v19396_v32 = vpop.eup %19395  ;;  %v21291_v41 = vpack.c.bf16 %v2594_v8, %v2593_v39  ;;  %v2777_v39 = vld [vmem:[#allocation30 + $0x8] sm:$0xff]  ;;  %v2778_v8 = vld [vmem:[#allocation30 + $0x10] sm:$0xff] }
 0xff8   : > { %v2570_v61 = vadd.f32 1.0, %v19396_v32 }
 0xff9   : > { %17525 = vmatpush3.bf16.msra.mxu0 %v21291_v41 }
 0xffa   : > { %19397 = vrcp.f32 %v2570_v61  ;;  %17526 = vmatprep.subr.bf16.mxu0 %v23868_v19 }
0x1004   : > { %v19398_v28 = vpop.eup %19397 }
0x1005   : > { %v2574_v53 = vmul.f32 %v19398_v28, %v20847_v9 }
0x1068   : > { %v2577_v21 = vpop.permute.xlu1 %2576 }
0x1069   : > { %v2579_v44 = vmul.f32 %v19398_v28, %v2577_v21 }
0x106b   : > { %2581 = vrot.lane.b32.xlu0 %v2579_v44, %s23829_s1 }
0x10dd   : > { %v2582_v22 = vpop.permute.xlu0 %2581 }
0x10de   : > { %v21285_v34 = vadd.f32 %v2582_v22, %v2574_v53 }
0x10e0   : > { %19399 = vtanh.f32 %v21285_v34 }
0x10ea   : > { %v19400_v9 = vpop.eup %19399 }
0x10eb   : > { %2587 = vrot.lane.b32.xlu0 %v19400_v9, %s23829_s1  ;;  %v21354_v9 = vpack.c.bf16 %v2777_v39, %v2776_v14 }
0x10ed   : > { %17534 = vmatpush3.bf16.msra.mxu1 %v21354_v9 }
0x10ee   : > { %17535 = vmatprep.subr.bf16.mxu1 %v23868_v19 }
0x115d   : > { %v2588_v44 = vpop.permute.xlu0 %2587 }
0x115e   : > { %v2590_v21 = vmul.f32 %v19398_v28, %v2588_v44  ;;  %v2779_v44 = vld [vmem:[#allocation30 + $0x18] sm:$0xff] }
0x1160   : > { %2670 = vrot.lane.b32.xlu1 %v2590_v21, %s20223_s29  ;;  %v21357_v21 = vpack.c.bf16 %v2779_v44, %v2778_v8 }
0x1162   : > { %17537 = vmatpush3.bf16.msra.mxu1 %v21357_v21 }
0x1163   : > { %17570 = vmatprep.subr.bf16.mxu1 %v23868_v19 }
0x11d2   : > { %v21298_v32 = vpop.permute.xlu1 %2670 }
0x11d3   : > { %15142 = vmatmul.mubr.msk.f32.vlgmr.msra.gmra.mrb[22].mxu0 %vm867_vm5, %v21298_v32 }
0x11d4   : > { %17528 = vmatpush3.bf16.msra.mxu0 %v20877_v56  ;;  %15152 = vmatprep.mubr.msk.f32.mxu0 %vm20219_vm4, %v23867_v4 }
0x11d5   : > { %17529 = vmatprep.subr.bf16.mxu0 %v23868_v19 }
0x11d8   : > { %17531 = vmatpush3.bf16.msra.mxu0 %v20880_v63  ;;  %v21344_v63 = vld [vmem:[#allocation28] ss:$0 sm:$0xff] }
0x11d9   : > { %17538 = vmatprep.subr.bf16.mxu0 %v23868_v19 }
0x11db   : > { %15153 = vmatmul.mubr.msk.f32.vlgmr.msra.gmra.mrb[24].mxu0 %vm867_vm5, %v21204_v29 }
0x11dc   : > { %15198 = vmatprep.mubr.msk.f32.mxu0 %vm20219_vm4, %v23867_v4 }
0x11e1   : > { %17541 = vmatpush3.bf16.xpose.msk.msra.mxu0 %vm20910_vm7, %v20914_v37 }
0x11e2   : > { %17542 = vmatprep.subr.bf16.mxu0 %v23868_v19 }
0x11e9   : > { %17545 = vmatpush3.bf16.xpose.msk.msra.mxu0 %vm20910_vm7, %v20927_v47 }
0x11ea   : > { %17546 = vmatprep.subr.bf16.mxu0 %v23868_v19 }
0x11f1   : > { %17549 = vmatpush3.bf16.xpose.msk.msra.mxu0 %vm20910_vm7, %v20939_v55 }
0x11f2   : > { %17550 = vmatprep.subr.bf16.mxu0 %v23868_v19 }
0x11f9   : > { %17553 = vmatpush3.bf16.xpose.msk.msra.mxu0 %vm20910_vm7, %v20951_v62 }
0x11fa   : > { %17554 = vmatprep.subr.bf16.mxu0 %v23868_v19 }
0x1201   : > { %17557 = vmatpush3.bf16.xpose.msk.msra.mxu0 %vm20910_vm7, %v20963_v5 }
0x1202   : > { %17558 = vmatprep.subr.bf16.mxu0 %v23868_v19 }
0x1209   : > { %17561 = vmatpush3.bf16.xpose.msk.msra.mxu0 %vm20910_vm7, %v20975_v15 }
0x120a   : > { %17562 = vmatprep.subr.bf16.mxu0 %v23868_v19 }
0x1211   : > { %17565 = vmatpush3.bf16.xpose.msk.msra.mxu0 %vm20910_vm7, %v20987_v25 }
0x1212   : > { %17566 = vmatprep.subr.bf16.mxu0 %v23868_v19 }
0x1219   : > { %17569 = vmatpush3.bf16.xpose.msk.msra.mxu0 %vm20910_vm7, %v20999_v35 }
0x121a   : > { %17602 = vmatprep.subr.bf16.mxu0 %v23868_v19 }
0x12a6   : > { %v2740_v56 = vpop.f32.mrb[22].mxu0 }
0x12a7   : > { %v2741_v37 = vadd.f32 %v2740_v56, %v21274_v60  ;;  %v15143_v47 = vpop.f32.mrb[23].mxu0 }
0x12a9   : > { %v2751_v55 = vadd.f32 %v21344_v63, %v2741_v37 }
0x12ab   : > { %19401 = vtanh.f32 %v2751_v55  ;;  %v12980_v25 = vmul.f32 -1.442695, %v2751_v55 }
0x12ad   : > { %19403 = vpow2.f32 %v12980_v25 }
0x12ae   : > { %v2850_v62 = vpop.f32.mrb[24].mxu0 }
0x12af   : > { %v15154_v5 = vpop.f32.mrb[25].mxu0 }
0x12b5   : > { %v19402_v15 = vpop.eup %19401 }
0x12b6   : > { %2761 = vrot.lane.b32.xlu0 %v19402_v15, %s23829_s1 }
0x12b7   : > { %v19404_v28 = vpop.eup %19403 }
0x12b8   : > { %v2755_v35 = vadd.f32 1.0, %v19404_v28 }
0x12ba   : > { %19405 = vrcp.f32 %v2755_v35 }
0x12c4   : > { %v19406_v29 = vpop.eup %19405 }
0x12c5   : > { %v2759_v60 = vmul.f32 %v19406_v29, %v20874_v51 }
0x1328   : > { %v2762_v61 = vpop.permute.xlu0 %2761 }
0x1329   : > { %v2764_v53 = vmul.f32 %v19406_v29, %v2762_v61 }
0x132b   : > { %2766 = vrot.lane.b32.xlu1 %v2764_v53, %s23829_s1 }
0x139d   : > { %v2767_v22 = vpop.permute.xlu1 %2766 }
0x139e   : > { %v21351_v17 = vadd.f32 %v2767_v22, %v2759_v60 }
0x13a0   : > { %19407 = vtanh.f32 %v21351_v17 }
0x13aa   : > { %v19408_v51 = vpop.eup %19407 }
0x13ab   : > { %2772 = vrot.lane.b32.xlu0 %v19408_v51, %s23829_s1 }
0x141d   : > { %v2773_v56 = vpop.permute.xlu0 %2772 }
0x141e   : > { %v2775_v37 = vmul.f32 %v19406_v29, %v2773_v56 }
0x1420   : > { %2855 = vrot.lane.b32.xlu1 %v2775_v37, %s20223_s29 }
0x1492   : > { %v21364_v47 = vpop.permute.xlu1 %2855 }
0x1493   : > { %15164 = vmatmul.mubr.msk.f32.vlgmr.msra.gmra.mrb[12].mxu1 %vm867_vm5, %v21364_v47 }
0x1494   : > { %17573 = vmatpush3.bf16.xpose.msk.msra.mxu1 %vm20910_vm7, %v20916_v42  ;;  %15233 = vmatprep.mubr.msk.f32.mxu1 %vm20219_vm4, %v23867_v4 }
0x1495   : > { %17574 = vmatprep.subr.bf16.mxu1 %v23868_v19 }
0x149c   : > { %17577 = vmatpush3.bf16.xpose.msk.msra.mxu1 %vm20910_vm7, %v20929_v48  ;;  %v21402_v48 = vld [vmem:[#allocation33] ss:$0 sm:$0xff] }
0x149d   : > { %17578 = vmatprep.subr.bf16.mxu1 %v23868_v19 }
0x14a4   : > { %17581 = vmatpush3.bf16.xpose.msk.msra.mxu1 %vm20910_vm7, %v20941_v57 }
0x14a5   : > { %17582 = vmatprep.subr.bf16.mxu1 %v23868_v19 }
0x14ac   : > { %17585 = vmatpush3.bf16.xpose.msk.msra.mxu1 %vm20910_vm7, %v20953_v0 }
0x14ad   : > { %17586 = vmatprep.subr.bf16.mxu1 %v23868_v19 }
0x14b4   : > { %17589 = vmatpush3.bf16.xpose.msk.msra.mxu1 %vm20910_vm7, %v20965_v6 }
0x14b5   : > { %17590 = vmatprep.subr.bf16.mxu1 %v23868_v19 }
0x14bc   : > { %17593 = vmatpush3.bf16.xpose.msk.msra.mxu1 %vm20910_vm7, %v20977_v18 }
0x14bd   : > { %17594 = vmatprep.subr.bf16.mxu1 %v23868_v19 }
0x14c4   : > { %17597 = vmatpush3.bf16.xpose.msk.msra.mxu1 %vm20910_vm7, %v20989_v26 }
0x14c5   : > { %17598 = vmatprep.subr.bf16.mxu1 %v23868_v19 }
0x14cc   : > { %17601 = vmatpush3.bf16.xpose.msk.msra.mxu1 %vm20910_vm7, %v21001_v38 }
0x14cd   : > { %17626 = vmatprep.subr.bf16.mxu1 %v23868_v19 }
0x1566   : > { %v2925_v42 = vpop.f32.mrb[12].mxu1 }
0x1567   : > { %v2926_v57 = vadd.f32 %v2925_v42, %v2850_v62  ;;  %v15165_v0 = vpop.f32.mrb[13].mxu1 }
0x1569   : > { %v2936_v6 = vadd.f32 %v21402_v48, %v2926_v57 }
0x156b   : > { %19409 = vtanh.f32 %v2936_v6  ;;  %v12984_v26 = vmul.f32 -1.442695, %v2936_v6 }
0x156d   : > { %19411 = vpow2.f32 %v12984_v26 }
0x1575   : > { %v19410_v18 = vpop.eup %19409 }
0x1576   : > { %2946 = vrot.lane.b32.xlu0 %v19410_v18, %s23829_s1 }
0x1577   : > { %v19412_v55 = vpop.eup %19411 }
0x1578   : > { %v2940_v5 = vadd.f32 1.0, %v19412_v55 }
0x157a   : > { %19413 = vrcp.f32 %v2940_v5 }
0x1584   : > { %v19414_v15 = vpop.eup %19413 }
0x1585   : > { %v2944_v28 = vmul.f32 %v19414_v15, %v20905_v31 }
0x15e8   : > { %v2947_v38 = vpop.permute.xlu0 %2946 }
0x15e9   : > { %v2949_v25 = vmul.f32 %v19414_v15, %v2947_v38 }
0x15eb   : > { %2951 = vrot.lane.b32.xlu1 %v2949_v25, %s23829_s1 }
0x165d   : > { %v2952_v62 = vpop.permute.xlu1 %2951 }
0x165e   : > { %v21408_v35 = vadd.f32 %v2952_v62, %v2944_v28 }
0x1660   : > { %19415 = vtanh.f32 %v21408_v35 }
0x166a   : > { %v19416_v29 = vpop.eup %19415 }
0x166b   : > { %2957 = vrot.lane.b32.xlu0 %v19416_v29, %s23829_s1 }
0x16dd   : > { %v2958_v61 = vpop.permute.xlu0 %2957 }
0x16de   : > { %v21412_v53 = vmul.f32 %v19414_v15, %v2958_v61  ;;  %v23894_v61 = vld [vmem:[#allocation66_spill] sm:$0xff] }
0x16e0   : > { %v2968_v60 = vrot.slane %v21412_v53, %v21011_v46 }
0x16e2   : > { %v2969_v22 = vcombine.high %v2968_v60, %v2968_v60  ;;  %v2976_v14 = vrot.slane %v2968_v60, %v21011_v46  ;;  %v23896_v60 = vld [vmem:[#allocation68_spill] sm:$0xff] }
0x16e4   : > { %v3019_v39 = vrot.slane %v2976_v14, %v21015_v54  ;;  %v2983_v31 = vrot.slane %v2969_v22, %v21011_v46  ;;  %v23897_v22 = vld [vmem:[#allocation69_spill] sm:$0xff]  ;;  %v23898_v14 = vld [vmem:[#allocation70_spill] sm:$0xff] }
0x16e6   : > { %3020 = vrot.lane.b32.xlu0 %v3019_v39, %s20223_s29  ;;  %v3145_v8 = vrot.slane %v2983_v31, %v21015_v54  ;;  %v23899_v39 = vld [vmem:[#allocation71_spill] sm:$0xff]  ;;  %v23900_v31 = vld [vmem:[#allocation72_spill] sm:$0xff] }
0x16e8   : > { %3146 = vrot.lane.b32.xlu1 %v3145_v8, %s20223_s29  ;;  %v23901_v8 = vld [vmem:[#allocation73_spill] sm:$0xff] }
0x1758   : > { %v3021_v44 = vpop.permute.xlu0 %3020 }
0x1759   : > { %15199 = vmatmul.mubr.msk.f32.vlgmr.msra.gmra.mrb[26].mxu0 %vm867_vm5, %v3021_v44  ;;  %v23902_v44 = vld [vmem:[#allocation74_spill] sm:$0xff] }
0x175a   : > { %v3147_v51 = vpop.permute.xlu1 %3146  ;;  %17604 = vmatpush3.bf16.msra.mxu0 %v21034_v45  ;;  %15268 = vmatprep.mubr.msk.f32.mxu0 %vm20219_vm4, %v23867_v4 }
0x175b   : > { %15234 = vmatmul.mubr.msk.f32.vlgmr.msra.gmra.mrb[14].mxu1 %vm867_vm5, %v3147_v51  ;;  %17605 = vmatprep.subr.bf16.mxu0 %v23868_v19  ;;  %v23903_v51 = vld [vmem:[#allocation75_spill] sm:$0xff] }
0x175c   : > { %17628 = vmatpush3.bf16.msra.mxu1 %v21032_v40  ;;  %15303 = vmatprep.mubr.msk.f32.mxu1 %vm20219_vm4, %v23867_v4  ;;  %v3268_v40 = vld [vmem:[#allocation15] sm:$0x3] }
0x175d   : > { %17629 = vmatprep.subr.bf16.mxu1 %v23868_v19  ;;  %v3270_v45 = vrot.slane %v3268_v40, 1 }
0x175e   : > { %17607 = vmatpush3.bf16.msra.mxu0 %v21041_v50 }
0x175f   : > { %17608 = vmatprep.subr.bf16.mxu0 %v23868_v19 }
0x1760   : > { %17631 = vmatpush3.bf16.msra.mxu1 %v21037_v58 }
0x1761   : > { %17632 = vmatprep.subr.bf16.mxu1 %v23868_v19 }
0x1762   : > { %17610 = vmatpush3.bf16.msra.mxu0 %v21049_v24 }
0x1763   : > { %17611 = vmatprep.subr.bf16.mxu0 %v23868_v19 }
0x1764   : > { %17634 = vmatpush3.bf16.msra.mxu1 %v21045_v2 }
0x1765   : > { %17635 = vmatprep.subr.bf16.mxu1 %v23868_v19 }
0x1766   : > { %17613 = vmatpush3.bf16.msra.mxu0 %v21065_v59 }
0x1767   : > { %17614 = vmatprep.subr.bf16.mxu0 %v23868_v19 }
0x1768   : > { %17637 = vmatpush3.bf16.msra.mxu1 %v21053_v7 }
0x1769   : > { %17638 = vmatprep.subr.bf16.mxu1 %v23868_v19 }
0x176a   : > { %17616 = vmatpush3.bf16.msra.mxu0 %v21073_v3 }
0x176b   : > { %17617 = vmatprep.subr.bf16.mxu0 %v23868_v19 }
0x176c   : > { %17640 = vmatpush3.bf16.msra.mxu1 %v21067_v20 }
0x176d   : > { %17641 = vmatprep.subr.bf16.mxu1 %v23868_v19 }
0x176e   : > { %17619 = vmatpush3.bf16.msra.mxu0 %v21081_v23 }
0x176f   : > { %17620 = vmatprep.subr.bf16.mxu0 %v23868_v19 }
0x1770   : > { %17643 = vmatpush3.bf16.msra.mxu1 %v21075_v10 }
0x1771   : > { %17644 = vmatprep.subr.bf16.mxu1 %v23868_v19 }
0x1772   : > { %17622 = vmatpush3.bf16.msra.mxu0 %v21089_v49 }
0x1773   : > { %17623 = vmatprep.subr.bf16.mxu0 %v23868_v19 }
0x1774   : > { %17646 = vmatpush3.bf16.msra.mxu1 %v21083_v30 }
0x1775   : > { %17647 = vmatprep.subr.bf16.mxu1 %v23868_v19 }
0x1776   : > { %17625 = vmatpush3.bf16.msra.mxu0 %v21096_v1 }
0x1777   : > { %17650 = vmatprep.subr.bf16.mxu0 %v23868_v19 }
0x1778   : > { %17649 = vmatpush3.bf16.msra.mxu1 %v21091_v13 }
0x1779   : > { %17682 = vmatprep.subr.bf16.mxu1 %v23868_v19 }
0x182c   : > { %v3138_v58 = vpop.f32.mrb[26].mxu0 }
0x182d   : > { %v15200_v50 = vpop.f32.mrb[27].mxu0  ;;  %v3273_v59 = vadd.f32 %v3268_v40, %v3138_v58  ;;  %v23904_v40 = vld [vmem:[#allocation76_spill] sm:$0xff]  ;;  %v23906_v58 = vld [vmem:[#allocation78_spill] sm:$0xff] }
0x182e   : > { %v3264_v2 = vpop.f32.mrb[14].mxu1  ;;  %v23907_v50 = vld [vmem:[#allocation79_spill] sm:$0xff] }
0x182f   : > { %v3274_v24 = vadd.f32 %v3270_v45, %v3264_v2  ;;  %v15235_v7 = vpop.f32.mrb[15].mxu1  ;;  %v23905_v45 = vld [vmem:[#allocation77_spill] sm:$0xff]  ;;  %v23908_v2 = vld [vmem:[#allocation80_spill] sm:$0xff] }
0x1830   : > { %v3791_v7 = vld [vmem:[#allocation21] sm:$0xff] }
0x1831   : > { %v3277_v20 = vrot.slane %v3274_v24, 7 }
0x1833   : > { %v3278_v3 = vsel %vm1826_vm8, %v3277_v20, %v3273_v59 }
0x1834   : > { %v3280_v10 = vsel %vm840_vm3, %v3278_v3, -inf }
0x1835   : > { %3281 = vmax.xlane.f32.xlu1 %v3280_v10 }
0x18c2   : > { %v3282_v23 = vpop.xlane.xlu1 %3281 }
0x18c3   : > { %v3284_v30 = vrot.slane %v3282_v23, 1  ;;  %v3287_v49 = vsub.f32 %v3273_v59, %v3282_v23  ;;  %v3792_v59 = vld [vmem:[#allocation21 + $0x8] sm:$0xff] }
0x18c5   : > { %v3288_v13 = vsub.f32 %v3274_v24, %v3284_v30  ;;  %v3289_v1 = vmul.f32 1.442695, %v3287_v49  ;;  %v21558_v30 = vpack.c.bf16 %v3792_v59, %v3791_v7  ;;  %v3793_v49 = vld [vmem:[#allocation21 + $0x10] sm:$0xff] }
0x18c7   : > { %v3291_v56 = vmul.f32 1.442695, %v3288_v13  ;;  %v3794_v13 = vld [vmem:[#allocation21 + $0x18] sm:$0xff] }
0x18c9   : > { %19417 = vpow2.f32 %v3291_v56  ;;  %v21563_v56 = vpack.c.bf16 %v3794_v13, %v3793_v49  ;;  %v4233_v13 = vld [vmem:[#allocation31 + $0x10] sm:$0xff] }
0x18ca   : > { %19419 = vpow2.f32 %v3289_v1 }
0x18d3   : > { %v19418_v37 = vpop.eup %19417 }
0x18d4   : > { %v3295_v42 = vrot.slane %v19418_v37, 7  ;;  %v19420_v57 = vpop.eup %19419 }
0x18d6   : > { %v3296_v0 = vsel %vm1826_vm8, %v3295_v42, %v19420_v57  ;;  %v3936_v42 = vld [vmem:[#allocation22 + $0x8] sm:$0xff] }
0x18d7   : > { %v3298_v6 = vsel %vm840_vm3, %v3296_v0, 0.0  ;;  %v3937_v0 = vld [vmem:[#allocation22 + $0x10] sm:$0xff] }
0x18d8   : > { %3299 = vadd.xlane.f32.xlu0 %v3298_v6  ;;  %v3938_v6 = vld [vmem:[#allocation22 + $0x18] sm:$0xff] }
0x18ee   : > { %3639 = vrot.lane.b32.xlu0 %v21412_v53, %s20223_s29  ;;  %v23895_v53 = vld [vmem:[#allocation67_spill] sm:$0xff] }
0x1965   : > { %v3300_v18 = vpop.xlane.xlu0 %3299 }
0x1966   : > { %19421 = vrcp.f32 %v3300_v18 }
0x1970   : > { %v19422_v26 = vpop.eup %19421 }
0x1971   : > { %v3302_v55 = vmul.f32 %v19422_v26, %v3300_v18  ;;  %v21574_v18 = vpack.c.bf16 %v3938_v6, %v3937_v0 }
0x1973   : > { %v3303_v5 = vsub.f32 2.0, %v3302_v55  ;;  %v4047_v55 = vld [vmem:[#allocation27 + $0x8] sm:$0xff] }
0x1975   : > { %v3304_v15 = vmul.f32 %v19422_v26, %v3303_v5  ;;  %v4046_v26 = vld [vmem:[#allocation27] sm:$0xff] }
0x1976   : > { %v21580_v5 = vpack.c.bf16 %v4047_v55, %v4046_v26 }
0x1977   : > { %v3306_v38 = vrot.slane %v3304_v15, 1  ;;  %v3309_v25 = vmul.f32 %v19420_v57, %v3304_v15  ;;  %v4048_v15 = vld [vmem:[#allocation27 + $0x10] sm:$0xff] }
0x1979   : > { %15269 = vmatmul.mubr.f32.vlgmr.msra.gmra.mrb[28].mxu0 %v3309_v25  ;;  %v3310_v28 = vmul.f32 %v19418_v37, %v3306_v38  ;;  %v3935_v37 = vld [vmem:[#allocation22] sm:$0xff] }
0x197a   : > { %17653 = vmatpush3.bf16.xpose.msk.msra.mxu0 %vm20910_vm7, %v21101_v52  ;;  %15338 = vmatprep.mubr.msk.f32.mxu0 %vm20219_vm4, %v23867_v4  ;;  %v23891_v52 = vld [vmem:[#allocation63_spill] sm:$0xff]  ;;  %v21569_v57 = vpack.c.bf16 %v3936_v42, %v3935_v37  ;;  %v4049_v38 = vld [vmem:[#allocation27 + $0x18] sm:$0xff] }
0x197b   : > { %15304 = vmatmul.mubr.f32.vlgmr.msra.gmra.mrb[16].mxu1 %v3310_v28  ;;  %v12501_v62 = vrot.slane %v3310_v28, 7  ;;  %17654 = vmatprep.subr.bf16.mxu0 %v23868_v19 }
0x197c   : > { %17685 = vmatpush3.bf16.xpose.msk.msra.mxu1 %vm20910_vm7, %v21103_v16  ;;  %15373 = vmatprep.mubr.msk.f32.mxu1 %vm20219_vm4, %v23867_v4  ;;  %v23890_v16 = vld [vmem:[#allocation62_spill] sm:$0xff] }
0x197d   : > { %v12502_v29 = vsel %vm1826_vm8, %v12501_v62, %v3309_v25  ;;  %17686 = vmatprep.subr.bf16.mxu1 %v23868_v19  ;;  %v21586_v25 = vpack.c.bf16 %v4049_v38, %v4048_v15 }
0x197e   : > { %12524 = vst [vmem:[%s20797_s28 + $0x2] sm:$0x3] %v12502_v29 }
0x1982   : > { %17657 = vmatpush3.bf16.xpose.msk.msra.mxu0 %vm20910_vm7, %v21120_v43  ;;  %v23892_v43 = vld [vmem:[#allocation64_spill] sm:$0xff] }
0x1983   : > { %17658 = vmatprep.subr.bf16.mxu0 %v23868_v19 }
0x1984   : > { %17689 = vmatpush3.bf16.xpose.msk.msra.mxu1 %vm20910_vm7, %v21122_v12  ;;  %v23893_v12 = vld [vmem:[#allocation65_spill] sm:$0xff] }
0x1985   : > { %17690 = vmatprep.subr.bf16.mxu1 %v23868_v19 }
0x198a   : > { %17661 = vmatpush3.bf16.xpose.msk.msra.mxu0 %vm20910_vm7, %v23890_v16 }
0x198b   : > { %17662 = vmatprep.subr.bf16.mxu0 %v23868_v19 }
0x198c   : > { %17693 = vmatpush3.bf16.xpose.msk.msra.mxu1 %vm20910_vm7, %v23891_v52  ;;  %v23909_v52 = vld [vmem:[#allocation81_spill] sm:$0xff] }
0x198d   : > { %17694 = vmatprep.subr.bf16.mxu1 %v23868_v19 }
0x1992   : > { %17665 = vmatpush3.bf16.xpose.msk.msra.mxu0 %vm20910_vm7, %v23892_v43 }
0x1993   : > { %17666 = vmatprep.subr.bf16.mxu0 %v23868_v19 }
0x1994   : > { %17697 = vmatpush3.bf16.xpose.msk.msra.mxu1 %vm20910_vm7, %v23893_v12 }
0x1995   : > { %17698 = vmatprep.subr.bf16.mxu1 %v23868_v19 }
0x199a   : > { %17669 = vmatpush3.bf16.xpose.msk.msra.mxu0 %vm20910_vm7, %v23894_v61 }
0x199b   : > { %17670 = vmatprep.subr.bf16.mxu0 %v23868_v19 }
0x199c   : > { %17701 = vmatpush3.bf16.xpose.msk.msra.mxu1 %vm20910_vm7, %v23895_v53 }
0x199d   : > { %17702 = vmatprep.subr.bf16.mxu1 %v23868_v19 }
0x19a2   : > { %17673 = vmatpush3.bf16.xpose.msk.msra.mxu0 %vm20910_vm7, %v23896_v60 }
0x19a3   : > { %17674 = vmatprep.subr.bf16.mxu0 %v23868_v19 }
0x19a4   : > { %17705 = vmatpush3.bf16.xpose.msk.msra.mxu1 %vm20910_vm7, %v23897_v22 }
0x19a5   : > { %17706 = vmatprep.subr.bf16.mxu1 %v23868_v19 }
0x19aa   : > { %17677 = vmatpush3.bf16.xpose.msk.msra.mxu0 %vm20910_vm7, %v21180_v33  ;;  %v21536_v33 = vpop.permute.xlu0 %3639 }
0x19ab   : > { %17678 = vmatprep.subr.bf16.mxu0 %v23868_v19 }
0x19ac   : > { %17709 = vmatpush3.bf16.xpose.msk.msra.mxu1 %vm20910_vm7, %v23898_v14  ;;  %v23910_v14 = vmov 1.0  }
0x19ad   : > { %17710 = vmatprep.subr.bf16.mxu1 %v23868_v19 }
0x19b2   : > { %17681 = vmatpush3.bf16.xpose.msk.msra.mxu0 %vm20910_vm7, %v23899_v39 }
0x19b3   : > { %17714 = vmatprep.subr.bf16.mxu0 %v23868_v19 }
0x19b4   : > { %17713 = vmatpush3.bf16.xpose.msk.msra.mxu1 %vm20910_vm7, %v23900_v31 }
0x19b5   : > { %17720 = vmatprep.subr.bf16.mxu1 %v23868_v19 }
0x19bb   : > { %15374 = vmatmul.mubr.msk.f32.vlgmr.msra.gmra.mrb[18].mxu1 %vm867_vm5, %v21536_v33 }
0x19bc   : > { %17722 = vmatpush3.bf16.msra.mxu1 %v23901_v8  ;;  %15419 = vmatprep.mubr.msk.f32.mxu1 %vm20219_vm4, %v23867_v4 }
0x19bd   : > { %17723 = vmatprep.subr.bf16.mxu1 %v23868_v19 }
0x19c0   : > { %17725 = vmatpush3.bf16.msra.mxu1 %v23902_v44 }
0x19c1   : > { %17726 = vmatprep.subr.bf16.mxu1 %v23868_v19 }
0x19c4   : > { %17728 = vmatpush3.bf16.msra.mxu1 %v23903_v51 }
0x19c5   : > { %17729 = vmatprep.subr.bf16.mxu1 %v23868_v19 }
0x19c8   : > { %17731 = vmatpush3.bf16.msra.mxu1 %v23904_v40 }
0x19c9   : > { %17732 = vmatprep.subr.bf16.mxu1 %v23868_v19 }
0x19cc   : > { %17734 = vmatpush3.bf16.msra.mxu1 %v23905_v45 }
0x19cd   : > { %17735 = vmatprep.subr.bf16.mxu1 %v23868_v19 }
0x19d0   : > { %17737 = vmatpush3.bf16.msra.mxu1 %v23906_v58 }
0x19d1   : > { %17738 = vmatprep.subr.bf16.mxu1 %v23868_v19 }
0x19d4   : > { %17740 = vmatpush3.bf16.msra.mxu1 %v23907_v50 }
0x19d5   : > { %17741 = vmatprep.subr.bf16.mxu1 %v23868_v19 }
0x19d8   : > { %17743 = vmatpush3.bf16.msra.mxu1 %v23908_v2 }
0x19d9   : > { %17768 = vmatprep.subr.bf16.mxu1 %v23868_v19 }
0x1a4c   : > { %v3409_v24 = vpop.f32.mrb[28].mxu0 }
0x1a4d   : > { %v15270_v20 = vpop.f32.mrb[29].mxu0 }
0x1a4e   : > { %v3479_v3 = vpop.f32.mrb[16].mxu1 }
0x1a4f   : > { %v3517_v10 = vrot.slane %v3479_v3, 7  ;;  %v15305_v23 = vpop.f32.mrb[17].mxu1 }
0x1a50   : > { %v4232_v23 = vld [vmem:[#allocation31 + $0x8] sm:$0xff] }
0x1a51   : > { %v3518_v1 = vsel %vm1826_vm8, %v3517_v10, %v3409_v24  ;;  %v4231_v10 = vld [vmem:[#allocation31] sm:$0xff] }
0x1a52   : > { %15339 = vmatmul.mubr.msk.f32.vlgmr.msra.gmra.mrb[30].mxu0 %vm867_vm5, %v3518_v1  ;;  %v21620_v49 = vpack.c.bf16 %v4232_v23, %v4231_v10  ;;  %v4454_v10 = vld [vmem:[#allocation10 + $0x98] sm:$0xff] }
0x1a53   : > { %17716 = vmatpush3.bf16.msra.mxu0 %v21558_v30  ;;  %15384 = vmatprep.mubr.msk.f32.mxu0 %vm20219_vm4, %v23867_v4 }
0x1a54   : > { %17717 = vmatprep.subr.bf16.mxu0 %v23868_v19 }
0x1a57   : > { %17719 = vmatpush3.bf16.msra.mxu0 %v21563_v56 }
0x1a58   : > { %17744 = vmatprep.subr.bf16.mxu0 %v23868_v19 }
0x1a5a   : > { %15385 = vmatmul.mubr.msk.f32.vlgmr.msra.gmra.mrb[32].mxu0 %vm867_vm5, %v3518_v1  ;;  %v4234_v1 = vld [vmem:[#allocation31 + $0x18] sm:$0xff] }
0x1a5b   : > { %17746 = vmatpush3.bf16.msra.mxu0 %v21569_v57  ;;  %15430 = vmatprep.mubr.msk.f32.mxu0 %vm20219_vm4, %v23867_v4 }
0x1a5c   : > { %17747 = vmatprep.subr.bf16.mxu0 %v23868_v19 }
0x1a5f   : > { %17749 = vmatpush3.bf16.msra.mxu0 %v21574_v18 }
0x1a60   : > { %17750 = vmatprep.subr.bf16.mxu0 %v23868_v19 }
0x1a62   : > { %15431 = vmatmul.mubr.msk.f32.vlgmr.msra.gmra.mrb[34].mxu0 %vm867_vm5, %v21298_v32 }
0x1a63   : > { %17752 = vmatpush3.bf16.msra.mxu0 %v21580_v5  ;;  %15441 = vmatprep.mubr.msk.f32.mxu0 %vm20219_vm4, %v23867_v4 }
0x1a64   : > { %17753 = vmatprep.subr.bf16.mxu0 %v23868_v19 }
0x1a67   : > { %17755 = vmatpush3.bf16.msra.mxu0 %v21586_v25 }
0x1a68   : > { %17756 = vmatprep.subr.bf16.mxu0 %v23868_v19 }
0x1a6a   : > { %15442 = vmatmul.mubr.msk.f32.vlgmr.msra.gmra.mrb[36].mxu0 %vm867_vm5, %v21364_v47 }
0x1a6b   : > { %17758 = vmatpush3.bf16.msra.mxu0 %v21288_v27  ;;  %15452 = vmatprep.mubr.msk.f32.mxu0 %vm20219_vm4, %v23867_v4 }
0x1a6c   : > { %17759 = vmatprep.subr.bf16.mxu0 %v23868_v19 }
0x1a6f   : > { %17761 = vmatpush3.bf16.msra.mxu0 %v21291_v41 }
0x1a70   : > { %17762 = vmatprep.subr.bf16.mxu0 %v23868_v19 }
0x1a8e   : > { %v3757_v32 = vpop.f32.mrb[18].mxu1 }
0x1a8f   : > { %v15375_v28 = vpop.f32.mrb[19].mxu1 }
0x1b25   : > { %v3635_v62 = vpop.f32.mrb[30].mxu0 }
0x1b26   : > { %v3758_v29 = vadd.f32 %v3757_v32, %v3635_v62  ;;  %v15340_v16 = vpop.f32.mrb[31].mxu0 }
0x1b28   : > { %v3768_v43 = vadd.f32 %v23909_v52, %v3758_v29 }
0x1b2a   : > { %12476 = vst [vmem:[%s20795_s19 + $0x2] sm:$0x3] %v3768_v43  ;;  %v3769_v47 = vsel %vm840_vm3, %v3768_v43, -inf }
0x1b2b   : > { %3770 = vmax.xlane.f32.xlu1 %v3769_v47 }
0x1b2d   : > { %v3861_v27 = vpop.f32.mrb[32].mxu0 }
0x1b2e   : > { %v15386_v12 = vpop.f32.mrb[33].mxu0 }
0x1b35   : > { %v4005_v61 = vpop.f32.mrb[34].mxu0 }
0x1b36   : > { %v15432_v53 = vpop.f32.mrb[35].mxu0 }
0x1b3d   : > { %v4116_v60 = vpop.f32.mrb[36].mxu0 }
0x1b3e   : > { %v15443_v22 = vpop.f32.mrb[37].mxu0 }
0x1bb8   : > { %v3771_v41 = vpop.xlane.xlu1 %3770 }
0x1bb9   : > { %vm3772_vm10 = vcmp.eq.f32.partialorder %v3768_v43, %v3771_v41 }
0x1bba   : > { %15420 = vmatmul.mubr.msk.f32.vlgmr.msra.gmra.mrb[20].mxu1 %vm3772_vm10, %v23910_v14 }
0x1bbb   : > { %17770 = vmatpush3.bf16.msra.mxu1 %v21354_v9  ;;  %15474 = vmatprep.mubr.msk.f32.mxu1 %vm20219_vm4, %v23867_v4 }
0x1bbc   : > { %17771 = vmatprep.subr.bf16.mxu1 %v23868_v19 }
0x1bbf   : > { %17773 = vmatpush3.bf16.msra.mxu1 %v21357_v21 }
0x1bc0   : > { %17806 = vmatprep.subr.bf16.mxu1 %v23868_v19 }
0x1c8d   : > { %v3931_v39 = vpop.f32.mrb[20].mxu1 }
0x1c8e   : > { %v3932_v31 = vadd.f32 %v3931_v39, %v3861_v27  ;;  %v15421_v8 = vpop.f32.mrb[21].mxu1 }
0x1c90   : > { %v4009_v44 = vadd.f32 %v4005_v61, %v3932_v31 }
0x1c92   : > { %v4017_v51 = vadd.f32 %v21279_v11, %v4009_v44 }
0x1c94   : > { %19423 = vtanh.f32 %v4017_v51  ;;  %v13059_v9 = vmul.f32 -1.442695, %v4017_v51 }
0x1c96   : > { %19425 = vpow2.f32 %v13059_v9 }
0x1c9e   : > { %v19424_v40 = vpop.eup %19423 }
0x1c9f   : > { %4027 = vrot.lane.b32.xlu1 %v19424_v40, %s23829_s1 }
0x1ca0   : > { %v19426_v45 = vpop.eup %19425 }
0x1ca1   : > { %v4021_v58 = vadd.f32 1.0, %v19426_v45 }
0x1ca3   : > { %19427 = vrcp.f32 %v4021_v58  ;;  %v4435_v58 = vld [vmem:[#allocation10] sm:$0xff] }
0x1cad   : > { %v19428_v50 = vpop.eup %19427 }
0x1cae   : > { %v4025_v24 = vmul.f32 %v19428_v50, %v21285_v34  ;;  %v21627_v34 = vpack.c.bf16 %v4234_v1, %v4233_v13  ;;  %v4439_v1 = vld [vmem:[#allocation10 + $0x20] sm:$0xff] }
0x1d11   : > { %v4028_v2 = vpop.permute.xlu1 %4027 }
0x1d12   : > { %v4030_v21 = vmul.f32 %v19428_v50, %v4028_v2  ;;  %v4451_v2 = vld [vmem:[#allocation10 + $0x80] sm:$0xff] }
0x1d14   : > { %4032 = vrot.lane.b32.xlu0 %v4030_v21, %s23829_s1 }
0x1d86   : > { %v4033_v7 = vpop.permute.xlu0 %4032 }
0x1d87   : > { %v21615_v59 = vadd.f32 %v4033_v7, %v4025_v24  ;;  %v4452_v24 = vld [vmem:[#allocation10 + $0x88] sm:$0xff] }
0x1d89   : > { %19429 = vtanh.f32 %v21615_v59 }
0x1d93   : > { %v19430_v11 = vpop.eup %19429 }
0x1d94   : > { %4038 = vrot.lane.b32.xlu1 %v19430_v11, %s23829_s1  ;;  %v21666_v11 = vpack.c.bf16 %v4452_v24, %v4451_v2  ;;  %v4466_v2 = vld [vmem:[#allocation10 + $0xf8] sm:$0xff] }
0x1e06   : > { %v4039_v20 = vpop.permute.xlu1 %4038 }
0x1e07   : > { %v4041_v3 = vmul.f32 %v19428_v50, %v4039_v20  ;;  %v4436_v50 = vld [vmem:[#allocation10 + $0x8] sm:$0xff]  ;;  %v4438_v20 = vld [vmem:[#allocation10 + $0x18] sm:$0xff] }
0x1e08   : > { %v21664_v21 = vpack.c.bf16 %v4436_v50, %v4435_v58  ;;  %v4450_v58 = vld [vmem:[#allocation10 + $0x78] sm:$0xff]  ;;  %v4465_v50 = vld [vmem:[#allocation10 + $0xf0] sm:$0xff] }
0x1e09   : > { %4121 = vrot.lane.b32.xlu0 %v4041_v3, %s20223_s29  ;;  %v4453_v3 = vld [vmem:[#allocation10 + $0x90] sm:$0xff] }
0x1e0a   : > { %v21679_v13 = vpack.c.bf16 %v4454_v10, %v4453_v3 }
0x1e7b   : > { %v21622_v37 = vpop.permute.xlu0 %4121 }
0x1e7c   : > { %15453 = vmatmul.mubr.msk.f32.vlgmr.msra.gmra.mrb[38].mxu0 %vm867_vm5, %v21622_v37 }
0x1e7d   : > { %17764 = vmatpush3.bf16.msra.mxu0 %v21620_v49  ;;  %15463 = vmatprep.mubr.msk.f32.mxu0 %vm20219_vm4, %v23867_v4 }
0x1e7e   : > { %17765 = vmatprep.subr.bf16.mxu0 %v23868_v19 }
0x1e81   : > { %17767 = vmatpush3.bf16.msra.mxu0 %v21627_v34 }
0x1e82   : > { %17774 = vmatprep.subr.bf16.mxu0 %v23868_v19 }
0x1e84   : > { %15464 = vmatmul.mubr.msk.f32.vlgmr.msra.gmra.mrb[40].mxu0 %vm867_vm5, %v21536_v33 }
0x1e85   : > { %15509 = vmatprep.mubr.msk.f32.mxu0 %vm20219_vm4, %v23867_v4 }
0x1e8a   : > { %17777 = vmatpush3.bf16.xpose.msk.msra.mxu0 %vm20910_vm7, %v21664_v21 }
0x1e8b   : > { %17778 = vmatprep.subr.bf16.mxu0 %v23868_v19 }
0x1f4f   : > { %v4191_v42 = vpop.f32.mrb[38].mxu0 }
0x1f50   : > { %v4192_v0 = vadd.f32 %v4191_v42, %v4116_v60  ;;  %v15454_v6 = vpop.f32.mrb[39].mxu0  ;;  %v4440_v42 = vld [vmem:[#allocation10 + $0x28] sm:$0xff] }
0x1f51   : > { %v4456_v6 = vld [vmem:[#allocation10 + $0xa8] sm:$0xff] }
0x1f52   : > { %v4202_v26 = vadd.f32 %v21344_v63, %v4192_v0  ;;  %v4455_v0 = vld [vmem:[#allocation10 + $0xa0] sm:$0xff] }
0x1f54   : > { %19431 = vtanh.f32 %v4202_v26  ;;  %v13063_v32 = vmul.f32 -1.442695, %v4202_v26  ;;  %v21689_v26 = vpack.c.bf16 %v4440_v42, %v4439_v1 }
0x1f56   : > { %19433 = vpow2.f32 %v13063_v32  ;;  %v4457_v32 = vld [vmem:[#allocation10 + $0xb0] sm:$0xff] }
0x1f57   : > { %v4301_v55 = vpop.f32.mrb[40].mxu0 }
0x1f58   : > { %v15465_v15 = vpop.f32.mrb[41].mxu0 }
0x1f59   : > { %v4441_v15 = vld [vmem:[#allocation10 + $0x30] sm:$0xff] }
0x1f5e   : > { %v19432_v38 = vpop.eup %19431 }
0x1f5f   : > { %4212 = vrot.lane.b32.xlu1 %v19432_v38, %s23829_s1  ;;  %v4442_v38 = vld [vmem:[#allocation10 + $0x38] sm:$0xff] }
0x1f60   : > { %v19434_v28 = vpop.eup %19433 }
0x1f61   : > { %v4206_v62 = vadd.f32 1.0, %v19434_v28  ;;  %v4458_v28 = vld [vmem:[#allocation10 + $0xb8] sm:$0xff] }
0x1f63   : > { %19435 = vrcp.f32 %v4206_v62  ;;  %v21701_v62 = vpack.c.bf16 %v4442_v38, %v4441_v15 }
0x1f6d   : > { %v19436_v33 = vpop.eup %19435 }
0x1f6e   : > { %v4210_v52 = vmul.f32 %v19436_v33, %v21351_v17 }
0x1fd1   : > { %v4213_v29 = vpop.permute.xlu1 %4212 }
0x1fd2   : > { %v4215_v16 = vmul.f32 %v19436_v33, %v4213_v29  ;;  %v4443_v29 = vld [vmem:[#allocation10 + $0x40] sm:$0xff] }
0x1fd4   : > { %4217 = vrot.lane.b32.xlu0 %v4215_v16, %s23829_s1  ;;  %v4444_v16 = vld [vmem:[#allocation10 + $0x48] sm:$0xff] }
0x2046   : > { %v4218_v43 = vpop.permute.xlu0 %4217 }
0x2047   : > { %v21642_v63 = vadd.f32 %v4218_v43, %v4210_v52  ;;  %v4459_v52 = vld [vmem:[#allocation10 + $0xc0] sm:$0xff]  ;;  %v4460_v43 = vld [vmem:[#allocation10 + $0xc8] sm:$0xff] }
0x2049   : > { %19437 = vtanh.f32 %v21642_v63 }
0x2053   : > { %v19438_v47 = vpop.eup %19437 }
0x2054   : > { %4223 = vrot.lane.b32.xlu1 %v19438_v47, %s23829_s1  ;;  %v21713_v47 = vpack.c.bf16 %v4444_v16, %v4443_v29 }
0x20c6   : > { %v4224_v27 = vpop.permute.xlu1 %4223 }
0x20c7   : > { %v4226_v12 = vmul.f32 %v19436_v33, %v4224_v27  ;;  %v21703_v33 = vpack.c.bf16 %v4458_v28, %v4457_v32  ;;  %v21715_v27 = vpack.c.bf16 %v4460_v43, %v4459_v52 }
0x20c9   : > { %4306 = vrot.lane.b32.xlu0 %v4226_v12, %s20223_s29  ;;  %v4445_v12 = vld [vmem:[#allocation10 + $0x50] sm:$0xff] }
0x213b   : > { %v21647_v61 = vpop.permute.xlu0 %4306 }
0x213c   : > { %15475 = vmatmul.mubr.msk.f32.vlgmr.msra.gmra.mrb[22].mxu1 %vm867_vm5, %v21647_v61 }
0x213d   : > { %15544 = vmatprep.mubr.msk.f32.mxu1 %vm20219_vm4, %v23867_v4  ;;  %17809 = vmatpush3.bf16.xpose.msk.msra.mxu1 %vm20910_vm7, %v21666_v11 }
0x213e   : > { %17810 = vmatprep.subr.bf16.mxu1 %v23868_v19 }
0x2145   : > { %17813 = vmatpush3.bf16.xpose.msk.msra.mxu1 %vm20910_vm7, %v21679_v13 }
0x2146   : > { %17814 = vmatprep.subr.bf16.mxu1 %v23868_v19 }
0x220f   : > { %v4376_v17 = vpop.f32.mrb[22].mxu1 }
0x2210   : > { %v4377_v53 = vadd.f32 %v4376_v17, %v4301_v55  ;;  %v15476_v60 = vpop.f32.mrb[23].mxu1  ;;  %v21691_v55 = vpack.c.bf16 %v4456_v6, %v4455_v0  ;;  %v4446_v17 = vld [vmem:[#allocation10 + $0x58] sm:$0xff] }
0x2211   : > { %v4462_v60 = vld [vmem:[#allocation10 + $0xd8] sm:$0xff] }
0x2212   : > { %v4387_v22 = vadd.f32 %v21402_v48, %v4377_v53  ;;  %17817 = vmatpush3.bf16.xpose.msk.msra.mxu1 %vm20910_vm7, %v21691_v55  ;;  %v4461_v53 = vld [vmem:[#allocation10 + $0xd0] sm:$0xff] }
0x2213   : > { %17818 = vmatprep.subr.bf16.mxu1 %v23868_v19 }
0x2214   : > { %19439 = vtanh.f32 %v4387_v22  ;;  %v13067_v39 = vmul.f32 -1.442695, %v4387_v22  ;;  %v21725_v22 = vpack.c.bf16 %v4446_v17, %v4445_v12 }
0x2216   : > { %19441 = vpow2.f32 %v13067_v39  ;;  %v4447_v39 = vld [vmem:[#allocation10 + $0x60] sm:$0xff] }
0x221a   : > { %17821 = vmatpush3.bf16.xpose.msk.msra.mxu1 %vm20910_vm7, %v21703_v33 }
0x221b   : > { %17822 = vmatprep.subr.bf16.mxu1 %v23868_v19 }
0x221e   : > { %v19440_v41 = vpop.eup %19439 }
0x221f   : > { %4397 = vrot.lane.b32.xlu1 %v19440_v41, %s23829_s1  ;;  %v21727_v41 = vpack.c.bf16 %v4462_v60, %v4461_v53 }
0x2220   : > { %v19442_v31 = vpop.eup %19441 }
0x2221   : > { %v4391_v8 = vadd.f32 1.0, %v19442_v31  ;;  %v4448_v31 = vld [vmem:[#allocation10 + $0x68] sm:$0xff] }
0x2222   : > { %17825 = vmatpush3.bf16.xpose.msk.msra.mxu1 %vm20910_vm7, %v21715_v27 }
0x2223   : > { %19443 = vrcp.f32 %v4391_v8  ;;  %17826 = vmatprep.subr.bf16.mxu1 %v23868_v19  ;;  %v4463_v8 = vld [vmem:[#allocation10 + $0xe0] sm:$0xff] }
0x222a   : > { %17829 = vmatpush3.bf16.xpose.msk.msra.mxu1 %vm20910_vm7, %v21727_v41 }
0x222b   : > { %17830 = vmatprep.subr.bf16.mxu1 %v23868_v19 }
0x222d   : > { %v21655_v44 = vpop.eup %19443 }
0x222e   : > { %v4395_v9 = vmul.f32 %v21655_v44, %v21408_v35  ;;  %v4437_v35 = vld [vmem:[#allocation10 + $0x10] sm:$0xff] }
0x222f   : > { %v21677_v23 = vpack.c.bf16 %v4438_v20, %v4437_v35 }
0x2231   : > { %17781 = vmatpush3.bf16.xpose.msk.msra.mxu0 %vm20910_vm7, %v21677_v23 }
0x2232   : > { %17782 = vmatprep.subr.bf16.mxu0 %v23868_v19 }
0x2239   : > { %17785 = vmatpush3.bf16.xpose.msk.msra.mxu0 %vm20910_vm7, %v21689_v26 }
0x223a   : > { %17786 = vmatprep.subr.bf16.mxu0 %v23868_v19 }
0x2241   : > { %17789 = vmatpush3.bf16.xpose.msk.msra.mxu0 %vm20910_vm7, %v21701_v62 }
0x2242   : > { %17790 = vmatprep.subr.bf16.mxu0 %v23868_v19 }
0x2249   : > { %17793 = vmatpush3.bf16.xpose.msk.msra.mxu0 %vm20910_vm7, %v21713_v47 }
0x224a   : > { %17794 = vmatprep.subr.bf16.mxu0 %v23868_v19 }
0x2251   : > { %17797 = vmatpush3.bf16.xpose.msk.msra.mxu0 %vm20910_vm7, %v21725_v22 }
0x2252   : > { %17798 = vmatprep.subr.bf16.mxu0 %v23868_v19 }
0x2291   : > { %v4398_v51 = vpop.permute.xlu1 %4397 }
0x2292   : > { %v4400_v40 = vmul.f32 %v21655_v44, %v4398_v51  ;;  %v4464_v51 = vld [vmem:[#allocation10 + $0xe8] sm:$0xff] }
0x2294   : > { %4402 = vrot.lane.b32.xlu0 %v4400_v40, %s23829_s1  ;;  %v21737_v40 = vpack.c.bf16 %v4448_v31, %v4447_v39  ;;  %v4778_v39 = vld [vmem:[#allocation13 + $0x80] sm:$0xff]  ;;  %v4779_v31 = vld [vmem:[#allocation13 + $0x88] sm:$0xff] }
0x2296   : > { %17801 = vmatpush3.bf16.xpose.msk.msra.mxu0 %vm20910_vm7, %v21737_v40 }
0x2297   : > { %17802 = vmatprep.subr.bf16.mxu0 %v23868_v19 }
0x2306   : > { %v4403_v48 = vpop.permute.xlu0 %4402 }
0x2307   : > { %v21661_v45 = vadd.f32 %v4403_v48, %v4395_v9  ;;  %v21739_v9 = vpack.c.bf16 %v4464_v51, %v4463_v8  ;;  %v4449_v48 = vld [vmem:[#allocation10 + $0x70] sm:$0xff]  ;;  %v4762_v8 = vld [vmem:[#allocation13] sm:$0xff]  ;;  %v21778_v51 = vpack.c.bf16 %v4779_v31, %v4778_v39 }
0x2308   : > { %v21749_v24 = vpack.c.bf16 %v4450_v58, %v4449_v48  ;;  %v4763_v48 = vld [vmem:[#allocation13 + $0x8] sm:$0xff]  ;;  %v4780_v58 = vld [vmem:[#allocation13 + $0x90] sm:$0xff] }
0x2309   : > { %19445 = vtanh.f32 %v21661_v45  ;;  %17833 = vmatpush3.bf16.xpose.msk.msra.mxu1 %vm20910_vm7, %v21739_v9 }
0x230a   : > { %17834 = vmatprep.subr.bf16.mxu1 %v23868_v19  ;;  %17805 = vmatpush3.bf16.xpose.msk.msra.mxu0 %vm20910_vm7, %v21749_v24 }
0x230b   : > { %17838 = vmatprep.subr.bf16.mxu0 %v23868_v19 }
0x2313   : > { %v19446_v7 = vpop.eup %19445 }
0x2314   : > { %4408 = vrot.lane.b32.xlu1 %v19446_v7, %s23829_s1  ;;  %v21751_v7 = vpack.c.bf16 %v4466_v2, %v4465_v50  ;;  %v4781_v50 = vld [vmem:[#allocation13 + $0x98] sm:$0xff]  ;;  %v21780_v2 = vpack.c.bf16 %v4763_v48, %v4762_v8 }
0x2316   : > { %17837 = vmatpush3.bf16.xpose.msk.msra.mxu1 %vm20910_vm7, %v21751_v7 }
0x2317   : > { %17862 = vmatprep.subr.bf16.mxu1 %v23868_v19 }
0x2386   : > { %v4409_v35 = vpop.permute.xlu1 %4408 }
0x2387   : > { %v4411_v20 = vmul.f32 %v21655_v44, %v4409_v35  ;;  %v4719_v44 = vld [vmem:[#allocation15] sm:$0x3]  ;;  %v4764_v35 = vld [vmem:[#allocation13 + $0x10] sm:$0xff] }
0x2388   : > { %v4721_v32 = vrot.slane %v4719_v44, 1 }
0x2389   : > { %v4419_v3 = vrot.slane %v4411_v20, %v21011_v46 }
0x238b   : > { %v4420_v10 = vcombine.high %v4419_v3, %v4419_v3  ;;  %v4427_v1 = vrot.slane %v4419_v3, %v21011_v46  ;;  %v4765_v3 = vld [vmem:[#allocation13 + $0x18] sm:$0xff] }
0x238d   : > { %v4470_v42 = vrot.slane %v4427_v1, %v21015_v54  ;;  %v4434_v0 = vrot.slane %v4420_v10, %v21011_v46  ;;  %v21783_v10 = vpack.c.bf16 %v4781_v50, %v4780_v58  ;;  %v4782_v1 = vld [vmem:[#allocation13 + $0xa0] sm:$0xff]  ;;  %v4768_v50 = vld [vmem:[#allocation13 + $0x30] sm:$0xff] }
0x238f   : > { %4471 = vrot.lane.b32.xlu1 %v4470_v42, %s20223_s29  ;;  %v4596_v6 = vrot.slane %v4434_v0, %v21015_v54  ;;  %v4783_v42 = vld [vmem:[#allocation13 + $0xa8] sm:$0xff]  ;;  %v4766_v0 = vld [vmem:[#allocation13 + $0x20] sm:$0xff] }
0x2391   : > { %4597 = vrot.lane.b32.xlu0 %v4596_v6, %s20223_s29  ;;  %v4767_v6 = vld [vmem:[#allocation13 + $0x28] sm:$0xff] }
0x2401   : > { %v4472_v15 = vpop.permute.xlu1 %4471 }
0x2402   : > { %15510 = vmatmul.mubr.msk.f32.vlgmr.msra.gmra.mrb[42].mxu0 %vm867_vm5, %v4472_v15  ;;  %v21791_v15 = vpack.c.bf16 %v4783_v42, %v4782_v1  ;;  %v4770_v42 = vld [vmem:[#allocation13 + $0x40] sm:$0xff] }
0x2403   : > { %v4598_v38 = vpop.permute.xlu0 %4597  ;;  %15579 = vmatprep.mubr.msk.f32.mxu0 %vm20219_vm4, %v23867_v4  ;;  %17840 = vmatpush3.bf16.msra.mxu0 %v21780_v2 }
0x2404   : > { %15545 = vmatmul.mubr.msk.f32.vlgmr.msra.gmra.mrb[24].mxu1 %vm867_vm5, %v4598_v38  ;;  %17841 = vmatprep.subr.bf16.mxu0 %v23868_v19  ;;  %v21795_v38 = vpack.c.bf16 %v4767_v6, %v4766_v0  ;;  %v4771_v0 = vld [vmem:[#allocation13 + $0x48] sm:$0xff]  ;;  %v4788_v6 = vld [vmem:[#allocation13 + $0xd0] sm:$0xff] }
0x2405   : > { %15614 = vmatprep.mubr.msk.f32.mxu1 %vm20219_vm4, %v23867_v4  ;;  %17864 = vmatpush3.bf16.msra.mxu1 %v21778_v51 }
0x2406   : > { %17865 = vmatprep.subr.bf16.mxu1 %v23868_v19 }
0x2409   : > { %17867 = vmatpush3.bf16.msra.mxu1 %v21783_v10 }
0x240a   : > { %17868 = vmatprep.subr.bf16.mxu1 %v23868_v19 }
0x240d   : > { %17870 = vmatpush3.bf16.msra.mxu1 %v21791_v15 }
0x240e   : > { %17871 = vmatprep.subr.bf16.mxu1 %v23868_v19 }
0x24d5   : > { %v4589_v28 = vpop.f32.mrb[42].mxu0 }
0x24d6   : > { %v15511_v29 = vpop.f32.mrb[43].mxu0  ;;  %v4724_v12 = vadd.f32 %v4719_v44, %v4589_v28  ;;  %v4784_v44 = vld [vmem:[#allocation13 + $0xb0] sm:$0xff] }
0x24d7   : > { %v4715_v16 = vpop.f32.mrb[24].mxu1 }
0x24d8   : > { %v4725_v52 = vadd.f32 %v4721_v32, %v4715_v16  ;;  %v15546_v43 = vpop.f32.mrb[25].mxu1  ;;  %v4785_v32 = vld [vmem:[#allocation13 + $0xb8] sm:$0xff] }
0x24d9   : > { %v21799_v28 = vpack.c.bf16 %v4785_v32, %v4784_v44  ;;  %v21819_v44 = vpack.c.bf16 %v4771_v0, %v4770_v42  ;;  %v4789_v32 = vld [vmem:[#allocation13 + $0xd8] sm:$0xff]  ;;  %v4776_v42 = vld [vmem:[#allocation13 + $0x70] sm:$0xff] }
0x24da   : > { %v4728_v17 = vrot.slane %v4725_v52, 7  ;;  %v4777_v0 = vld [vmem:[#allocation13 + $0x78] sm:$0xff] }
0x24db   : > { %17873 = vmatpush3.bf16.msra.mxu1 %v21799_v28 }
0x24dc   : > { %v4729_v53 = vsel %vm1826_vm8, %v4728_v17, %v4724_v12  ;;  %17874 = vmatprep.subr.bf16.mxu1 %v23868_v19 }
0x24dd   : > { %v4731_v60 = vsel %vm840_vm3, %v4729_v53, -inf }
0x24de   : > { %4732 = vmax.xlane.f32.xlu0 %v4731_v60 }
0x24f4   : > { %5090 = vrot.lane.b32.xlu0 %v4411_v20, %s20223_s29  ;;  %v21787_v20 = vpack.c.bf16 %v4765_v3, %v4764_v35  ;;  %v4769_v35 = vld [vmem:[#allocation13 + $0x38] sm:$0xff]  ;;  %v4786_v3 = vld [vmem:[#allocation13 + $0xc0] sm:$0xff] }
0x24f5   : > { %v21811_v1 = vpack.c.bf16 %v4769_v35, %v4768_v50  ;;  %v4792_v50 = vld [vmem:[#allocation13 + $0xf0] sm:$0xff] }
0x24f6   : > { %17843 = vmatpush3.bf16.msra.mxu0 %v21787_v20 }
0x24f7   : > { %17844 = vmatprep.subr.bf16.mxu0 %v23868_v19 }
0x24fa   : > { %17846 = vmatpush3.bf16.msra.mxu0 %v21795_v38 }
0x24fb   : > { %17847 = vmatprep.subr.bf16.mxu0 %v23868_v19 }
0x24fe   : > { %17849 = vmatpush3.bf16.msra.mxu0 %v21811_v1 }
0x24ff   : > { %17850 = vmatprep.subr.bf16.mxu0 %v23868_v19 }
0x2502   : > { %17852 = vmatpush3.bf16.msra.mxu0 %v21819_v44 }
0x2503   : > { %17853 = vmatprep.subr.bf16.mxu0 %v23868_v19 }
0x256b   : > { %v4733_v29 = vpop.xlane.xlu0 %4732 }
0x256c   : > { %v4735_v16 = vrot.slane %v4733_v29, 1  ;;  %v4738_v43 = vsub.f32 %v4724_v12, %v4733_v29  ;;  %v21821_v29 = vpack.c.bf16 %v4789_v32, %v4788_v6  ;;  %v21842_v6 = vpack.c.bf16 %v4777_v0, %v4776_v42 }
0x256e   : > { %v4739_v17 = vsub.f32 %v4725_v52, %v4735_v16  ;;  %v4740_v53 = vmul.f32 1.442695, %v4738_v43  ;;  %v4787_v52 = vld [vmem:[#allocation13 + $0xc8] sm:$0xff]  ;;  %v4772_v16 = vld [vmem:[#allocation13 + $0x50] sm:$0xff]  ;;  %v4773_v43 = vld [vmem:[#allocation13 + $0x58] sm:$0xff]  ;;  %23913 = vst [vmem:[#allocation64_spill] sm:$0xff] %v21842_v6 }
0x256f   : > { %v21813_v12 = vpack.c.bf16 %v4787_v52, %v4786_v3  ;;  %v4793_v3 = vld [vmem:[#allocation13 + $0xf8] sm:$0xff] }
0x2570   : > { %v4742_v60 = vmul.f32 1.442695, %v4739_v17  ;;  %v4790_v17 = vld [vmem:[#allocation13 + $0xe0] sm:$0xff]  ;;  %v21837_v52 = vpack.c.bf16 %v4793_v3, %v4792_v50  ;;  %v4935_v3 = vld [vmem:[#allocation18 + $0x8] sm:$0xff] }
0x2571   : > { %17876 = vmatpush3.bf16.msra.mxu1 %v21813_v12  ;;  %v4934_v50 = vld [vmem:[#allocation18] sm:$0xff] }
0x2572   : > { %19447 = vpow2.f32 %v4742_v60  ;;  %17877 = vmatprep.subr.bf16.mxu1 %v23868_v19  ;;  %v4791_v60 = vld [vmem:[#allocation13 + $0xe8] sm:$0xff]  ;;  %23912 = vst [vmem:[#allocation63_spill] sm:$0xff] %v21837_v52 }
0x2573   : > { %19449 = vpow2.f32 %v4740_v53  ;;  %v21827_v53 = vpack.c.bf16 %v4773_v43, %v4772_v16 }
0x2575   : > { %17879 = vmatpush3.bf16.msra.mxu1 %v21821_v29  ;;  %17855 = vmatpush3.bf16.msra.mxu0 %v21827_v53 }
0x2576   : > { %17880 = vmatprep.subr.bf16.mxu1 %v23868_v19  ;;  %17856 = vmatprep.subr.bf16.mxu0 %v23868_v19 }
0x257c   : > { %v21806_v39 = vpop.eup %19447 }
0x257d   : > { %v4746_v31 = vrot.slane %v21806_v39, 7  ;;  %v19450_v8 = vpop.eup %19449 }
0x257f   : > { %v4747_v48 = vsel %vm1826_vm8, %v4746_v31, %v19450_v8  ;;  %v21829_v31 = vpack.c.bf16 %v4791_v60, %v4790_v17  ;;  %v4950_v60 = vld [vmem:[#allocation19] sm:$0xff] }
0x2580   : > { %v4749_v58 = vsel %vm840_vm3, %v4747_v48, 0.0  ;;  %v4774_v48 = vld [vmem:[#allocation13 + $0x60] sm:$0xff] }
0x2581   : > { %4750 = vadd.xlane.f32.xlu1 %v4749_v58  ;;  %23911 = vst [vmem:[#allocation62_spill] sm:$0xff] %v21829_v31  ;;  %17882 = vmatpush3.bf16.msra.mxu1 %v21829_v31  ;;  %v4775_v58 = vld [vmem:[#allocation13 + $0x68] sm:$0xff]  ;;  %v21849_v31 = vpack.c.bf16 %v4935_v3, %v4934_v50 }
0x2582   : > { %17883 = vmatprep.subr.bf16.mxu1 %v23868_v19  ;;  %v21835_v35 = vpack.c.bf16 %v4775_v58, %v4774_v48  ;;  %v4951_v48 = vld [vmem:[#allocation19 + $0x8] sm:$0xff]  ;;  %v4938_v50 = vld [vmem:[#allocation18 + $0x20] sm:$0xff] }
0x2583   : > { %v4939_v3 = vld [vmem:[#allocation18 + $0x28] sm:$0xff] }
0x2584   : > { %17858 = vmatpush3.bf16.msra.mxu0 %v21835_v35 }
0x2585   : > { %17885 = vmatpush3.bf16.msra.mxu1 %v21837_v52  ;;  %17859 = vmatprep.subr.bf16.mxu0 %v23868_v19  ;;  %v21847_v52 = vpack.c.bf16 %v4951_v48, %v4950_v60  ;;  %v4954_v48 = vld [vmem:[#allocation19 + $0x20] sm:$0xff] }
0x2586   : > { %17918 = vmatprep.subr.bf16.mxu1 %v23868_v19 }
0x2588   : > { %17861 = vmatpush3.bf16.msra.mxu0 %v21842_v6 }
0x2589   : > { %17886 = vmatprep.subr.bf16.mxu0 %v23868_v19 }
0x260e   : > { %v4751_v32 = vpop.xlane.xlu1 %4750 }
0x260f   : > { %19451 = vrcp.f32 %v4751_v32 }
0x2619   : > { %v19452_v16 = vpop.eup %19451 }
0x261a   : > { %v4753_v43 = vmul.f32 %v19452_v16, %v4751_v32 }
0x261c   : > { %v4754_v17 = vsub.f32 2.0, %v4753_v43  ;;  %v4953_v43 = vld [vmem:[#allocation19 + $0x18] sm:$0xff] }
0x261e   : > { %v4755_v58 = vmul.f32 %v19452_v16, %v4754_v17  ;;  %v4952_v16 = vld [vmem:[#allocation19 + $0x10] sm:$0xff]  ;;  %v4937_v17 = vld [vmem:[#allocation18 + $0x18] sm:$0xff] }
0x261f   : > { %v21866_v60 = vpack.c.bf16 %v4953_v43, %v4952_v16  ;;  %v4957_v16 = vld [vmem:[#allocation19 + $0x38] sm:$0xff]  ;;  %v4940_v43 = vld [vmem:[#allocation18 + $0x30] sm:$0xff] }
0x2620   : > { %v4757_v42 = vrot.slane %v4755_v58, 1  ;;  %v4760_v0 = vmul.f32 %v19450_v8, %v4755_v58  ;;  %v4936_v8 = vld [vmem:[#allocation18 + $0x10] sm:$0xff]  ;;  %v4955_v58 = vld [vmem:[#allocation19 + $0x28] sm:$0xff] }
0x2622   : > { %15580 = vmatmul.mubr.f32.vlgmr.msra.gmra.mrb[44].mxu0 %v4760_v0  ;;  %v4761_v6 = vmul.f32 %v21806_v39, %v4757_v42  ;;  %v21878_v42 = vpack.c.bf16 %v4955_v58, %v4954_v48  ;;  %v4958_v48 = vld [vmem:[#allocation19 + $0x40] sm:$0xff]  ;;  %v4959_v58 = vld [vmem:[#allocation19 + $0x48] sm:$0xff] }
0x2623   : > { %17889 = vmatpush3.bf16.xpose.msk.msra.mxu0 %vm20910_vm7, %v21847_v52  ;;  %15649 = vmatprep.mubr.msk.f32.mxu0 %vm20219_vm4, %v23867_v4 }
0x2624   : > { %15615 = vmatmul.mubr.f32.vlgmr.msra.gmra.mrb[26].mxu1 %v4761_v6  ;;  %v12503_v32 = vrot.slane %v4761_v6, 7  ;;  %17890 = vmatprep.subr.bf16.mxu0 %v23868_v19  ;;  %v21868_v6 = vpack.c.bf16 %v4937_v17, %v4936_v8 }
0x2625   : > { %17921 = vmatpush3.bf16.xpose.msk.msra.mxu1 %vm20910_vm7, %v21849_v31  ;;  %15684 = vmatprep.mubr.msk.f32.mxu1 %vm20219_vm4, %v23867_v4 }
0x2626   : > { %v12504_v39 = vsel %vm1826_vm8, %v12503_v32, %v4760_v0  ;;  %17922 = vmatprep.subr.bf16.mxu1 %v23868_v19  ;;  %v21880_v0 = vpack.c.bf16 %v4939_v3, %v4938_v50  ;;  %v4956_v32 = vld [vmem:[#allocation19 + $0x30] sm:$0xff]  ;;  %v4942_v50 = vld [vmem:[#allocation18 + $0x40] sm:$0xff]  ;;  %v4943_v3 = vld [vmem:[#allocation18 + $0x48] sm:$0xff] }
0x2627   : > { %12525 = vst [vmem:[%s20797_s28 + $0x4] sm:$0x3] %v12504_v39  ;;  %v4941_v39 = vld [vmem:[#allocation18 + $0x38] sm:$0xff]  ;;  %v21890_v8 = vpack.c.bf16 %v4957_v16, %v4956_v32  ;;  %v21902_v32 = vpack.c.bf16 %v4959_v58, %v4958_v48  ;;  %v21904_v16 = vpack.c.bf16 %v4943_v3, %v4942_v50  ;;  %v4962_v50 = vld [vmem:[#allocation19 + $0x60] sm:$0xff]  ;;  %v4963_v3 = vld [vmem:[#allocation19 + $0x68] sm:$0xff] }
0x2628   : > { %v21892_v17 = vpack.c.bf16 %v4941_v39, %v4940_v43  ;;  %v4960_v43 = vld [vmem:[#allocation19 + $0x50] sm:$0xff]  ;;  %v4961_v39 = vld [vmem:[#allocation19 + $0x58] sm:$0xff] }
0x2629   : > { %23914 = vst [vmem:[#allocation65_spill] sm:$0xff] %v21890_v8  ;;  %23916 = vst [vmem:[#allocation67_spill] sm:$0xff] %v21902_v32  ;;  %v21914_v48 = vpack.c.bf16 %v4961_v39, %v4960_v43  ;;  %v21926_v43 = vpack.c.bf16 %v4963_v3, %v4962_v50  ;;  %v4965_v39 = vld [vmem:[#allocation19 + $0x78] sm:$0xff] }
0x262a   : > { %23915 = vst [vmem:[#allocation66_spill] sm:$0xff] %v21892_v17  ;;  %23917 = vst [vmem:[#allocation68_spill] sm:$0xff] %v21904_v16 }
0x262b   : > { %17893 = vmatpush3.bf16.xpose.msk.msra.mxu0 %vm20910_vm7, %v21866_v60  ;;  %23918 = vst [vmem:[#allocation69_spill] sm:$0xff] %v21914_v48 }
0x262c   : > { %17894 = vmatprep.subr.bf16.mxu0 %v23868_v19 }
0x262d   : > { %17925 = vmatpush3.bf16.xpose.msk.msra.mxu1 %vm20910_vm7, %v21868_v6 }
0x262e   : > { %17926 = vmatprep.subr.bf16.mxu1 %v23868_v19 }
0x2633   : > { %17897 = vmatpush3.bf16.xpose.msk.msra.mxu0 %vm20910_vm7, %v21878_v42 }
0x2634   : > { %17898 = vmatprep.subr.bf16.mxu0 %v23868_v19 }
0x2635   : > { %17929 = vmatpush3.bf16.xpose.msk.msra.mxu1 %vm20910_vm7, %v21880_v0 }
0x2636   : > { %17930 = vmatprep.subr.bf16.mxu1 %v23868_v19 }
0x263b   : > { %17901 = vmatpush3.bf16.xpose.msk.msra.mxu0 %vm20910_vm7, %v21890_v8  ;;  %v4945_v8 = vld [vmem:[#allocation18 + $0x58] sm:$0xff] }
0x263c   : > { %17902 = vmatprep.subr.bf16.mxu0 %v23868_v19 }
0x263d   : > { %17933 = vmatpush3.bf16.xpose.msk.msra.mxu1 %vm20910_vm7, %v21892_v17  ;;  %v4944_v17 = vld [vmem:[#allocation18 + $0x50] sm:$0xff] }
0x263e   : > { %17934 = vmatprep.subr.bf16.mxu1 %v23868_v19  ;;  %v21916_v58 = vpack.c.bf16 %v4945_v8, %v4944_v17  ;;  %v4964_v17 = vld [vmem:[#allocation19 + $0x70] sm:$0xff] }
0x263f   : > { %v21938_v50 = vpack.c.bf16 %v4965_v39, %v4964_v17 }
0x2640   : > { %23919 = vst [vmem:[#allocation70_spill] sm:$0xff] %v21916_v58 }
0x2641   : > { %23920 = vst [vmem:[#allocation71_spill] sm:$0xff] %v21938_v50 }
0x2643   : > { %17905 = vmatpush3.bf16.xpose.msk.msra.mxu0 %vm20910_vm7, %v21902_v32  ;;  %v4947_v32 = vld [vmem:[#allocation18 + $0x68] sm:$0xff] }
0x2644   : > { %17906 = vmatprep.subr.bf16.mxu0 %v23868_v19 }
0x2645   : > { %17937 = vmatpush3.bf16.xpose.msk.msra.mxu1 %vm20910_vm7, %v21904_v16  ;;  %v4946_v16 = vld [vmem:[#allocation18 + $0x60] sm:$0xff] }
0x2646   : > { %17938 = vmatprep.subr.bf16.mxu1 %v23868_v19  ;;  %v21928_v8 = vpack.c.bf16 %v4947_v32, %v4946_v16  ;;  %v21950_v16 = vpop.permute.xlu0 %5090 }
0x264b   : > { %17909 = vmatpush3.bf16.xpose.msk.msra.mxu0 %vm20910_vm7, %v21914_v48  ;;  %v4949_v48 = vld [vmem:[#allocation18 + $0x78] sm:$0xff] }
0x264c   : > { %17910 = vmatprep.subr.bf16.mxu0 %v23868_v19 }
0x264d   : > { %17941 = vmatpush3.bf16.xpose.msk.msra.mxu1 %vm20910_vm7, %v21916_v58  ;;  %v4948_v58 = vld [vmem:[#allocation18 + $0x70] sm:$0xff] }
0x264e   : > { %17942 = vmatprep.subr.bf16.mxu1 %v23868_v19  ;;  %v21940_v32 = vpack.c.bf16 %v4949_v48, %v4948_v58 }
0x2650   : > { %23921 = vst [vmem:[#allocation72_spill] sm:$0xff] %v21940_v32 }
0x2653   : > { %17913 = vmatpush3.bf16.xpose.msk.msra.mxu0 %vm20910_vm7, %v21926_v43 }
0x2654   : > { %17914 = vmatprep.subr.bf16.mxu0 %v23868_v19 }
0x2655   : > { %17945 = vmatpush3.bf16.xpose.msk.msra.mxu1 %vm20910_vm7, %v21928_v8 }
0x2656   : > { %17946 = vmatprep.subr.bf16.mxu1 %v23868_v19 }
0x265b   : > { %17917 = vmatpush3.bf16.xpose.msk.msra.mxu0 %vm20910_vm7, %v21938_v50 }
0x265c   : > { %17950 = vmatprep.subr.bf16.mxu0 %v23868_v19 }
0x265d   : > { %17949 = vmatpush3.bf16.xpose.msk.msra.mxu1 %vm20910_vm7, %v21940_v32 }
0x265e   : > { %17956 = vmatprep.subr.bf16.mxu1 %v23868_v19 }
0x2664   : > { %15685 = vmatmul.mubr.msk.f32.vlgmr.msra.gmra.mrb[28].mxu1 %vm867_vm5, %v21950_v16 }
0x2665   : > { %15730 = vmatprep.mubr.msk.f32.mxu1 %vm20219_vm4, %v23867_v4 }
0x26f5   : > { %v4860_v48 = vpop.f32.mrb[44].mxu0 }
0x26f6   : > { %v15581_v58 = vpop.f32.mrb[45].mxu0 }
0x26f7   : > { %v4930_v3 = vpop.f32.mrb[26].mxu1  ;;  %v5231_v58 = vld [vmem:[#allocation16 + $0x28] sm:$0xff] }
0x26f8   : > { %v4968_v17 = vrot.slane %v4930_v3, 7  ;;  %v15616_v39 = vpop.f32.mrb[27].mxu1  ;;  %v5232_v3 = vld [vmem:[#allocation16 + $0x30] sm:$0xff] }
0x26fa   : > { %v4969_v50 = vsel %vm1826_vm8, %v4968_v17, %v4860_v48  ;;  %v5233_v17 = vld [vmem:[#allocation16 + $0x38] sm:$0xff] }
0x26fb   : > { %15650 = vmatmul.mubr.msk.f32.vlgmr.msra.gmra.mrb[46].mxu0 %vm867_vm5, %v4969_v50  ;;  %v21994_v39 = vpack.c.bf16 %v5233_v17, %v5232_v3  ;;  %v5239_v3 = vld [vmem:[#allocation16 + $0x68] sm:$0xff] }
0x26fc   : > { %17952 = vmatpush3.bf16.msra.mxu0 %v21558_v30  ;;  %15695 = vmatprep.mubr.msk.f32.mxu0 %vm20219_vm4, %v23867_v4 }
0x26fd   : > { %17953 = vmatprep.subr.bf16.mxu0 %v23868_v19  ;;  %23925 = vst [vmem:[#allocation76_spill] sm:$0xff] %v21994_v39 }
0x2700   : > { %17955 = vmatpush3.bf16.msra.mxu0 %v21563_v56 }
0x2701   : > { %17980 = vmatprep.subr.bf16.mxu0 %v23868_v19 }
0x2703   : > { %15696 = vmatmul.mubr.msk.f32.vlgmr.msra.gmra.mrb[48].mxu0 %vm867_vm5, %v4969_v50  ;;  %v5229_v50 = vld [vmem:[#allocation16 + $0x18] sm:$0xff] }
0x2704   : > { %17982 = vmatpush3.bf16.msra.mxu0 %v21569_v57  ;;  %15741 = vmatprep.mubr.msk.f32.mxu0 %vm20219_vm4, %v23867_v4  ;;  %v5226_v57 = vld [vmem:[#allocation16] sm:$0xff] }
0x2705   : > { %17983 = vmatprep.subr.bf16.mxu0 %v23868_v19 }
0x2708   : > { %17985 = vmatpush3.bf16.msra.mxu0 %v21574_v18  ;;  %v5227_v18 = vld [vmem:[#allocation16 + $0x8] sm:$0xff] }
0x2709   : > { %17986 = vmatprep.subr.bf16.mxu0 %v23868_v19 }
0x270b   : > { %15742 = vmatmul.mubr.msk.f32.vlgmr.msra.gmra.mrb[50].mxu0 %vm867_vm5, %v21622_v37  ;;  %v21983_v37 = vpack.c.bf16 %v5227_v18, %v5226_v57  ;;  %v5235_v57 = vld [vmem:[#allocation16 + $0x48] sm:$0xff] }
0x270c   : > { %17988 = vmatpush3.bf16.msra.mxu0 %v21580_v5  ;;  %15752 = vmatprep.mubr.msk.f32.mxu0 %vm20219_vm4, %v23867_v4  ;;  %v5228_v5 = vld [vmem:[#allocation16 + $0x10] sm:$0xff] }
0x270d   : > { %17989 = vmatprep.subr.bf16.mxu0 %v23868_v19  ;;  %23922 = vst [vmem:[#allocation73_spill] sm:$0xff] %v21983_v37  ;;  %17958 = vmatpush3.bf16.msra.mxu1 %v21983_v37  ;;  %v21986_v48 = vpack.c.bf16 %v5229_v50, %v5228_v5  ;;  %v5236_v5 = vld [vmem:[#allocation16 + $0x50] sm:$0xff]  ;;  %v5237_v50 = vld [vmem:[#allocation16 + $0x58] sm:$0xff] }
0x270e   : > { %17959 = vmatprep.subr.bf16.mxu1 %v23868_v19 }
0x270f   : > { %23923 = vst [vmem:[#allocation74_spill] sm:$0xff] %v21986_v48 }
0x2710   : > { %17991 = vmatpush3.bf16.msra.mxu0 %v21586_v25  ;;  %v5230_v25 = vld [vmem:[#allocation16 + $0x20] sm:$0xff] }
0x2711   : > { %17992 = vmatprep.subr.bf16.mxu0 %v23868_v19  ;;  %17961 = vmatpush3.bf16.msra.mxu1 %v21986_v48 }
0x2712   : > { %17962 = vmatprep.subr.bf16.mxu1 %v23868_v19 }
0x2713   : > { %15753 = vmatmul.mubr.msk.f32.vlgmr.msra.gmra.mrb[52].mxu0 %vm867_vm5, %v21647_v61  ;;  %v21990_v61 = vpack.c.bf16 %v5231_v58, %v5230_v25  ;;  %v22002_v25 = vpack.c.bf16 %v5237_v50, %v5236_v5  ;;  %v5238_v58 = vld [vmem:[#allocation16 + $0x60] sm:$0xff] }
0x2714   : > { %15763 = vmatprep.mubr.msk.f32.mxu0 %vm20219_vm4, %v23867_v4  ;;  %v22006_v17 = vpack.c.bf16 %v5239_v3, %v5238_v58  ;;  %v22015_v50 = vld [vmem:[#allocation34] ss:$0 sm:$0xff] }
0x2715   : > { %23924 = vst [vmem:[#allocation75_spill] sm:$0xff] %v21990_v61  ;;  %17964 = vmatpush3.bf16.msra.mxu1 %v21990_v61  ;;  %23927 = vst [vmem:[#allocation78_spill] sm:$0xff] %v22002_v25 }
0x2716   : > { %17965 = vmatprep.subr.bf16.mxu1 %v23868_v19  ;;  %23928 = vst [vmem:[#allocation79_spill] sm:$0xff] %v22006_v17  ;;  %23930 = vst [vmem:[#allocation81_spill] sm:$0xff] %v22015_v50 }
0x2719   : > { %17967 = vmatpush3.bf16.msra.mxu1 %v21994_v39 }
0x271a   : > { %17968 = vmatprep.subr.bf16.mxu1 %v23868_v19 }
0x2737   : > { %v5208_v30 = vpop.f32.mrb[28].mxu1 }
0x2738   : > { %v15686_v56 = vpop.f32.mrb[29].mxu1 }
0x2739   : > { %v5234_v56 = vld [vmem:[#allocation16 + $0x40] sm:$0xff] }
0x273a   : > { %v21998_v18 = vpack.c.bf16 %v5235_v57, %v5234_v56  ;;  %v5240_v56 = vld [vmem:[#allocation16 + $0x70] sm:$0xff]  ;;  %v5241_v57 = vld [vmem:[#allocation16 + $0x78] sm:$0xff] }
0x273b   : > { %v22010_v39 = vpack.c.bf16 %v5241_v57, %v5240_v56 }
0x273c   : > { %23926 = vst [vmem:[#allocation77_spill] sm:$0xff] %v21998_v18  ;;  %17970 = vmatpush3.bf16.msra.mxu1 %v21998_v18 }
0x273d   : > { %17971 = vmatprep.subr.bf16.mxu1 %v23868_v19  ;;  %23929 = vst [vmem:[#allocation80_spill] sm:$0xff] %v22010_v39 }
0x2740   : > { %17973 = vmatpush3.bf16.msra.mxu1 %v22002_v25 }
0x2741   : > { %17974 = vmatprep.subr.bf16.mxu1 %v23868_v19 }
0x2744   : > { %17976 = vmatpush3.bf16.msra.mxu1 %v22006_v17 }
0x2745   : > { %17977 = vmatprep.subr.bf16.mxu1 %v23868_v19 }
0x2748   : > { %17979 = vmatpush3.bf16.msra.mxu1 %v22010_v39 }
0x2749   : > { %18004 = vmatprep.subr.bf16.mxu1 %v23868_v19 }
0x27ce   : > { %v5086_v5 = vpop.f32.mrb[46].mxu0 }
0x27cf   : > { %v5209_v25 = vadd.f32 %v5208_v30, %v5086_v5  ;;  %v15651_v58 = vpop.f32.mrb[47].mxu0 }
0x27d0   : > { %v22025_v58 = vld [vmem:[#allocation24] ss:$0 sm:$0xff] }
0x27d1   : > { %v5219_v3 = vadd.f32 %v22015_v50, %v5209_v25 }
0x27d3   : > { %12477 = vst [vmem:[%s20795_s19 + $0x4] sm:$0x3] %v5219_v3  ;;  %v5220_v18 = vsel %vm840_vm3, %v5219_v3, -inf }
0x27d4   : > { %5221 = vmax.xlane.f32.xlu1 %v5220_v18 }
0x27d6   : > { %v5312_v17 = vpop.f32.mrb[48].mxu0 }
0x27d7   : > { %v15697_v56 = vpop.f32.mrb[49].mxu0 }
0x27de   : > { %v5456_v57 = vpop.f32.mrb[50].mxu0 }
0x27df   : > { %v15743_v61 = vpop.f32.mrb[51].mxu0 }
0x27e6   : > { %v22020_v48 = vpop.f32.mrb[52].mxu0 }
0x27e7   : > { %v15754_v39 = vpop.f32.mrb[53].mxu0 }
0x2861   : > { %v5222_v37 = vpop.xlane.xlu1 %5221 }
0x2862   : > { %vm5223_vm11 = vcmp.eq.f32.partialorder %v5219_v3, %v5222_v37 }
0x2863   : > { %15731 = vmatmul.mubr.msk.f32.vlgmr.msra.gmra.mrb[30].mxu1 %vm5223_vm11, %v23910_v14 }
0x2864   : > { %15785 = vmatprep.mubr.msk.f32.mxu1 %vm20219_vm4, %v23867_v4 }
0x2936   : > { %v5382_v30 = vpop.f32.mrb[30].mxu1 }
0x2937   : > { %v5383_v25 = vadd.f32 %v5382_v30, %v5312_v17  ;;  %v15732_v5 = vpop.f32.mrb[31].mxu1 }
0x2938   : > { %v5494_v5 = vld [vmem:[#allocation25 + $0x8] sm:$0xff] }
0x2939   : > { %v5460_v18 = vadd.f32 %v5456_v57, %v5383_v25  ;;  %v5493_v25 = vld [vmem:[#allocation25] sm:$0xff] }
0x293b   : > { %v5468_v56 = vadd.f32 %v22025_v58, %v5460_v18  ;;  %v5495_v18 = vld [vmem:[#allocation25 + $0x10] sm:$0xff] }
0x293d   : > { %19453 = vtanh.f32 %v5468_v56  ;;  %v13142_v39 = vmul.f32 -1.442695, %v5468_v56  ;;  %v22034_v56 = vpack.c.bf16 %v5494_v5, %v5493_v25  ;;  %v5678_v5 = vld [vmem:[#allocation30] sm:$0xff] }
0x293f   : > { %19455 = vpow2.f32 %v13142_v39  ;;  %17994 = vmatpush3.bf16.msra.mxu0 %v22034_v56 }
0x2940   : > { %17995 = vmatprep.subr.bf16.mxu0 %v23868_v19 }
0x2947   : > { %v19454_v61 = vpop.eup %19453 }
0x2948   : > { %5478 = vrot.lane.b32.xlu1 %v19454_v61, %s23829_s1  ;;  %v5496_v61 = vld [vmem:[#allocation25 + $0x18] sm:$0xff] }
0x2949   : > { %v19456_v37 = vpop.eup %19455  ;;  %v22037_v39 = vpack.c.bf16 %v5496_v61, %v5495_v18  ;;  %v5679_v18 = vld [vmem:[#allocation30 + $0x8] sm:$0xff]  ;;  %v5680_v61 = vld [vmem:[#allocation30 + $0x10] sm:$0xff] }
0x294a   : > { %v5472_v3 = vadd.f32 1.0, %v19456_v37 }
0x294b   : > { %17997 = vmatpush3.bf16.msra.mxu0 %v22037_v39 }
0x294c   : > { %19457 = vrcp.f32 %v5472_v3  ;;  %17998 = vmatprep.subr.bf16.mxu0 %v23868_v19 }
0x2956   : > { %v19458_v14 = vpop.eup %19457 }
0x2957   : > { %v5476_v17 = vmul.f32 %v19458_v14, %v21615_v59 }
0x29ba   : > { %v5479_v50 = vpop.permute.xlu1 %5478 }
0x29bb   : > { %v5481_v32 = vmul.f32 %v19458_v14, %v5479_v50 }
0x29bd   : > { %5483 = vrot.lane.b32.xlu0 %v5481_v32, %s23829_s1 }
0x2a2f   : > { %v5484_v30 = vpop.permute.xlu0 %5483 }
0x2a30   : > { %v22031_v57 = vadd.f32 %v5484_v30, %v5476_v17 }
0x2a32   : > { %19459 = vtanh.f32 %v22031_v57 }
0x2a3c   : > { %v19460_v59 = vpop.eup %19459 }
0x2a3d   : > { %5489 = vrot.lane.b32.xlu0 %v19460_v59, %s23829_s1  ;;  %v22100_v59 = vpack.c.bf16 %v5679_v18, %v5678_v5 }
0x2a3f   : > { %18006 = vmatpush3.bf16.msra.mxu1 %v22100_v59 }
0x2a40   : > { %18007 = vmatprep.subr.bf16.mxu1 %v23868_v19 }
0x2aaf   : > { %v5490_v32 = vpop.permute.xlu0 %5489 }
0x2ab0   : > { %v5492_v50 = vmul.f32 %v19458_v14, %v5490_v32  ;;  %v5681_v32 = vld [vmem:[#allocation30 + $0x18] sm:$0xff] }
0x2ab2   : > { %5572 = vrot.lane.b32.xlu1 %v5492_v50, %s20223_s29  ;;  %v22103_v50 = vpack.c.bf16 %v5681_v32, %v5680_v61 }
0x2ab4   : > { %18009 = vmatpush3.bf16.msra.mxu1 %v22103_v50 }
0x2ab5   : > { %18042 = vmatprep.subr.bf16.mxu1 %v23868_v19 }
0x2b24   : > { %v22044_v37 = vpop.permute.xlu1 %5572 }
0x2b25   : > { %15764 = vmatmul.mubr.msk.f32.vlgmr.msra.gmra.mrb[54].mxu0 %vm867_vm5, %v22044_v37 }
0x2b26   : > { %18000 = vmatpush3.bf16.msra.mxu0 %v21620_v49  ;;  %15774 = vmatprep.mubr.msk.f32.mxu0 %vm20219_vm4, %v23867_v4  ;;  %v22090_v49 = vld [vmem:[#allocation28] ss:$0 sm:$0xff] }
0x2b27   : > { %18001 = vmatprep.subr.bf16.mxu0 %v23868_v19 }
0x2b2a   : > { %18003 = vmatpush3.bf16.msra.mxu0 %v21627_v34 }
0x2b2b   : > { %18010 = vmatprep.subr.bf16.mxu0 %v23868_v19 }
0x2b2d   : > { %15775 = vmatmul.mubr.msk.f32.vlgmr.msra.gmra.mrb[56].mxu0 %vm867_vm5, %v21950_v16 }
0x2b2e   : > { %15820 = vmatprep.mubr.msk.f32.mxu0 %vm20219_vm4, %v23867_v4 }
0x2b33   : > { %18013 = vmatpush3.bf16.xpose.msk.msra.mxu0 %vm20910_vm7, %v21664_v21 }
0x2b34   : > { %18014 = vmatprep.subr.bf16.mxu0 %v23868_v19 }
0x2b3b   : > { %18017 = vmatpush3.bf16.xpose.msk.msra.mxu0 %vm20910_vm7, %v21677_v23 }
0x2b3c   : > { %18018 = vmatprep.subr.bf16.mxu0 %v23868_v19 }
0x2b43   : > { %18021 = vmatpush3.bf16.xpose.msk.msra.mxu0 %vm20910_vm7, %v21689_v26 }
0x2b44   : > { %18022 = vmatprep.subr.bf16.mxu0 %v23868_v19 }
0x2b4b   : > { %18025 = vmatpush3.bf16.xpose.msk.msra.mxu0 %vm20910_vm7, %v21701_v62 }
0x2b4c   : > { %18026 = vmatprep.subr.bf16.mxu0 %v23868_v19 }
0x2b53   : > { %18029 = vmatpush3.bf16.xpose.msk.msra.mxu0 %vm20910_vm7, %v21713_v47 }
0x2b54   : > { %18030 = vmatprep.subr.bf16.mxu0 %v23868_v19 }
0x2b5b   : > { %18033 = vmatpush3.bf16.xpose.msk.msra.mxu0 %vm20910_vm7, %v21725_v22 }
0x2b5c   : > { %18034 = vmatprep.subr.bf16.mxu0 %v23868_v19 }
0x2b63   : > { %18037 = vmatpush3.bf16.xpose.msk.msra.mxu0 %vm20910_vm7, %v21737_v40 }
0x2b64   : > { %18038 = vmatprep.subr.bf16.mxu0 %v23868_v19 }
0x2b6b   : > { %18041 = vmatpush3.bf16.xpose.msk.msra.mxu0 %vm20910_vm7, %v21749_v24 }
0x2b6c   : > { %18074 = vmatprep.subr.bf16.mxu0 %v23868_v19 }
0x2bf8   : > { %v5642_v14 = vpop.f32.mrb[54].mxu0 }
0x2bf9   : > { %v5643_v34 = vadd.f32 %v5642_v14, %v22020_v48  ;;  %v15765_v21 = vpop.f32.mrb[55].mxu0 }
0x2bfb   : > { %v5653_v23 = vadd.f32 %v22090_v49, %v5643_v34 }
0x2bfd   : > { %19461 = vtanh.f32 %v5653_v23  ;;  %v13146_v22 = vmul.f32 -1.442695, %v5653_v23 }
0x2bff   : > { %19463 = vpow2.f32 %v13146_v22 }
0x2c00   : > { %v5752_v26 = vpop.f32.mrb[56].mxu0 }
0x2c01   : > { %v15776_v62 = vpop.f32.mrb[57].mxu0 }
0x2c07   : > { %v19462_v47 = vpop.eup %19461 }
0x2c08   : > { %5663 = vrot.lane.b32.xlu0 %v19462_v47, %s23829_s1 }
0x2c09   : > { %v19464_v40 = vpop.eup %19463 }
0x2c0a   : > { %v5657_v24 = vadd.f32 1.0, %v19464_v40 }
0x2c0c   : > { %19465 = vrcp.f32 %v5657_v24 }
0x2c16   : > { %v19466_v16 = vpop.eup %19465 }
0x2c17   : > { %v5661_v48 = vmul.f32 %v19466_v16, %v21642_v63 }
0x2c7a   : > { %v5664_v3 = vpop.permute.xlu0 %5663 }
0x2c7b   : > { %v5666_v17 = vmul.f32 %v19466_v16, %v5664_v3 }
0x2c7d   : > { %5668 = vrot.lane.b32.xlu1 %v5666_v17, %s23829_s1 }
0x2cef   : > { %v5669_v30 = vpop.permute.xlu1 %5668 }
0x2cf0   : > { %v22097_v25 = vadd.f32 %v5669_v30, %v5661_v48 }
0x2cf2   : > { %19467 = vtanh.f32 %v22097_v25 }
0x2cfc   : > { %v19468_v63 = vpop.eup %19467 }
0x2cfd   : > { %5674 = vrot.lane.b32.xlu0 %v19468_v63, %s23829_s1 }
0x2d6f   : > { %v5675_v14 = vpop.permute.xlu0 %5674 }
0x2d70   : > { %v5677_v34 = vmul.f32 %v19466_v16, %v5675_v14 }
0x2d72   : > { %5757 = vrot.lane.b32.xlu1 %v5677_v34, %s20223_s29 }
0x2de4   : > { %v22110_v21 = vpop.permute.xlu1 %5757 }
0x2de5   : > { %15786 = vmatmul.mubr.msk.f32.vlgmr.msra.gmra.mrb[32].mxu1 %vm867_vm5, %v22110_v21 }
0x2de6   : > { %18045 = vmatpush3.bf16.xpose.msk.msra.mxu1 %vm20910_vm7, %v21666_v11  ;;  %15855 = vmatprep.mubr.msk.f32.mxu1 %vm20219_vm4, %v23867_v4 }
0x2de7   : > { %18046 = vmatprep.subr.bf16.mxu1 %v23868_v19 }
0x2dee   : > { %18049 = vmatpush3.bf16.xpose.msk.msra.mxu1 %vm20910_vm7, %v21679_v13  ;;  %v22148_v13 = vld [vmem:[#allocation33] ss:$0 sm:$0xff] }
0x2def   : > { %18050 = vmatprep.subr.bf16.mxu1 %v23868_v19 }
0x2df6   : > { %18053 = vmatpush3.bf16.xpose.msk.msra.mxu1 %vm20910_vm7, %v21691_v55 }
0x2df7   : > { %18054 = vmatprep.subr.bf16.mxu1 %v23868_v19 }
0x2dfe   : > { %18057 = vmatpush3.bf16.xpose.msk.msra.mxu1 %vm20910_vm7, %v21703_v33 }
0x2dff   : > { %18058 = vmatprep.subr.bf16.mxu1 %v23868_v19 }
0x2e06   : > { %18061 = vmatpush3.bf16.xpose.msk.msra.mxu1 %vm20910_vm7, %v21715_v27 }
0x2e07   : > { %18062 = vmatprep.subr.bf16.mxu1 %v23868_v19 }
0x2e0e   : > { %18065 = vmatpush3.bf16.xpose.msk.msra.mxu1 %vm20910_vm7, %v21727_v41 }
0x2e0f   : > { %18066 = vmatprep.subr.bf16.mxu1 %v23868_v19 }
0x2e16   : > { %18069 = vmatpush3.bf16.xpose.msk.msra.mxu1 %vm20910_vm7, %v21739_v9 }
0x2e17   : > { %18070 = vmatprep.subr.bf16.mxu1 %v23868_v19 }
0x2e1e   : > { %18073 = vmatpush3.bf16.xpose.msk.msra.mxu1 %vm20910_vm7, %v21751_v7 }
0x2e1f   : > { %18098 = vmatprep.subr.bf16.mxu1 %v23868_v19 }
0x2eb8   : > { %v5827_v11 = vpop.f32.mrb[32].mxu1 }
0x2eb9   : > { %v5828_v55 = vadd.f32 %v5827_v11, %v5752_v26  ;;  %v15787_v33 = vpop.f32.mrb[33].mxu1 }
0x2ebb   : > { %v5838_v27 = vadd.f32 %v22148_v13, %v5828_v55 }
0x2ebd   : > { %19469 = vtanh.f32 %v5838_v27  ;;  %v13150_v9 = vmul.f32 -1.442695, %v5838_v27 }
0x2ebf   : > { %19471 = vpow2.f32 %v13150_v9 }
0x2ec7   : > { %v19470_v41 = vpop.eup %19469 }
0x2ec8   : > { %5848 = vrot.lane.b32.xlu0 %v19470_v41, %s23829_s1 }
0x2ec9   : > { %v19472_v23 = vpop.eup %19471 }
0x2eca   : > { %v5842_v62 = vadd.f32 1.0, %v19472_v23 }
0x2ecc   : > { %19473 = vrcp.f32 %v5842_v62 }
0x2ed6   : > { %v19474_v47 = vpop.eup %19473 }
0x2ed7   : > { %v5846_v40 = vmul.f32 %v19474_v47, %v21661_v45 }
0x2f3a   : > { %v5849_v7 = vpop.permute.xlu0 %5848 }
0x2f3b   : > { %v5851_v22 = vmul.f32 %v19474_v47, %v5849_v7 }
0x2f3d   : > { %5853 = vrot.lane.b32.xlu1 %v5851_v22, %s23829_s1 }
0x2faf   : > { %v5854_v26 = vpop.permute.xlu1 %5853 }
0x2fb0   : > { %v22154_v24 = vadd.f32 %v5854_v26, %v5846_v40 }
0x2fb2   : > { %19475 = vtanh.f32 %v22154_v24 }
0x2fbc   : > { %v19476_v16 = vpop.eup %19475 }
0x2fbd   : > { %5859 = vrot.lane.b32.xlu0 %v19476_v16, %s23829_s1 }
0x302f   : > { %v5860_v3 = vpop.permute.xlu0 %5859 }
0x3030   : > { %v22158_v17 = vmul.f32 %v19474_v47, %v5860_v3 }
0x3032   : > { %v5870_v48 = vrot.slane %v22158_v17, %v21011_v46 }
0x3034   : > { %v5871_v30 = vcombine.high %v5870_v48, %v5870_v48  ;;  %v5878_v5 = vrot.slane %v5870_v48, %v21011_v46 }
0x3036   : > { %v5921_v18 = vrot.slane %v5878_v5, %v21015_v54  ;;  %v5885_v45 = vrot.slane %v5871_v30, %v21011_v46 }
0x3038   : > { %5922 = vrot.lane.b32.xlu0 %v5921_v18, %s20223_s29  ;;  %v6047_v61 = vrot.slane %v5885_v45, %v21015_v54  ;;  %v23940_v45 = vld [vmem:[#allocation71_spill] sm:$0xff] }
0x303a   : > { %6048 = vrot.lane.b32.xlu1 %v6047_v61, %s20223_s29  ;;  %v23941_v61 = vld [vmem:[#allocation72_spill] sm:$0xff] }
0x30aa   : > { %v5923_v32 = vpop.permute.xlu0 %5922 }
0x30ab   : > { %15821 = vmatmul.mubr.msk.f32.vlgmr.msra.gmra.mrb[58].mxu0 %vm867_vm5, %v5923_v32  ;;  %v23943_v32 = vld [vmem:[#allocation74_spill] sm:$0xff] }
0x30ac   : > { %v6049_v63 = vpop.permute.xlu1 %6048  ;;  %18076 = vmatpush3.bf16.msra.mxu0 %v21780_v2  ;;  %15890 = vmatprep.mubr.msk.f32.mxu0 %vm20219_vm4, %v23867_v4  ;;  %v23932_v2 = vld [vmem:[#allocation64_spill] sm:$0xff] }
0x30ad   : > { %15856 = vmatmul.mubr.msk.f32.vlgmr.msra.gmra.mrb[34].mxu1 %vm867_vm5, %v6049_v63  ;;  %18077 = vmatprep.subr.bf16.mxu0 %v23868_v19  ;;  %v23944_v63 = vld [vmem:[#allocation75_spill] sm:$0xff] }
0x30ae   : > { %18100 = vmatpush3.bf16.msra.mxu1 %v21778_v51  ;;  %15925 = vmatprep.mubr.msk.f32.mxu1 %vm20219_vm4, %v23867_v4  ;;  %v23931_v51 = vld [vmem:[#allocation62_spill] sm:$0xff] }
0x30af   : > { %18101 = vmatprep.subr.bf16.mxu1 %v23868_v19 }
0x30b0   : > { %18079 = vmatpush3.bf16.msra.mxu0 %v21787_v20  ;;  %v6170_v20 = vld [vmem:[#allocation15] sm:$0x3] }
0x30b1   : > { %18080 = vmatprep.subr.bf16.mxu0 %v23868_v19 }
0x30b2   : > { %18103 = vmatpush3.bf16.msra.mxu1 %v21783_v10  ;;  %v23933_v10 = vld [vmem:[#allocation63_spill] sm:$0xff] }
0x30b3   : > { %18104 = vmatprep.subr.bf16.mxu1 %v23868_v19 }
0x30b4   : > { %18082 = vmatpush3.bf16.msra.mxu0 %v21795_v38 }
0x30b5   : > { %18083 = vmatprep.subr.bf16.mxu0 %v23868_v19 }
0x30b6   : > { %18106 = vmatpush3.bf16.msra.mxu1 %v21791_v15  ;;  %v6172_v15 = vrot.slane %v6170_v20, 1 }
0x30b7   : > { %18107 = vmatprep.subr.bf16.mxu1 %v23868_v19 }
0x30b8   : > { %18085 = vmatpush3.bf16.msra.mxu0 %v21811_v1 }
0x30b9   : > { %18086 = vmatprep.subr.bf16.mxu0 %v23868_v19 }
0x30ba   : > { %18109 = vmatpush3.bf16.msra.mxu1 %v21799_v28 }
0x30bb   : > { %18110 = vmatprep.subr.bf16.mxu1 %v23868_v19 }
0x30bc   : > { %18088 = vmatpush3.bf16.msra.mxu0 %v21819_v44 }
0x30bd   : > { %18089 = vmatprep.subr.bf16.mxu0 %v23868_v19 }
0x30be   : > { %18112 = vmatpush3.bf16.msra.mxu1 %v21813_v12 }
0x30bf   : > { %18113 = vmatprep.subr.bf16.mxu1 %v23868_v19 }
0x30c0   : > { %18091 = vmatpush3.bf16.msra.mxu0 %v21827_v53 }
0x30c1   : > { %18092 = vmatprep.subr.bf16.mxu0 %v23868_v19 }
0x30c2   : > { %18115 = vmatpush3.bf16.msra.mxu1 %v21821_v29 }
0x30c3   : > { %18116 = vmatprep.subr.bf16.mxu1 %v23868_v19 }
0x30c4   : > { %18094 = vmatpush3.bf16.msra.mxu0 %v21835_v35 }
0x30c5   : > { %18095 = vmatprep.subr.bf16.mxu0 %v23868_v19 }
0x30c6   : > { %18118 = vmatpush3.bf16.msra.mxu1 %v23931_v51  ;;  %v23945_v51 = vld [vmem:[#allocation76_spill] sm:$0xff] }
0x30c7   : > { %18119 = vmatprep.subr.bf16.mxu1 %v23868_v19 }
0x30c8   : > { %18097 = vmatpush3.bf16.msra.mxu0 %v23932_v2  ;;  %v23946_v2 = vld [vmem:[#allocation77_spill] sm:$0xff] }
0x30c9   : > { %18122 = vmatprep.subr.bf16.mxu0 %v23868_v19 }
0x30ca   : > { %18121 = vmatpush3.bf16.msra.mxu1 %v23933_v10  ;;  %v23947_v10 = vld [vmem:[#allocation78_spill] sm:$0xff] }
0x30cb   : > { %18154 = vmatprep.subr.bf16.mxu1 %v23868_v19 }
0x317e   : > { %v6040_v38 = vpop.f32.mrb[58].mxu0 }
0x317f   : > { %v15822_v28 = vpop.f32.mrb[59].mxu0  ;;  %v6175_v29 = vadd.f32 %v6170_v20, %v6040_v38  ;;  %v23948_v20 = vld [vmem:[#allocation79_spill] sm:$0xff] }
0x3180   : > { %v6166_v1 = vpop.f32.mrb[34].mxu1  ;;  %v6693_v28 = vld [vmem:[#allocation21] sm:$0xff] }
0x3181   : > { %v6176_v12 = vadd.f32 %v6172_v15, %v6166_v1  ;;  %v15857_v44 = vpop.f32.mrb[35].mxu1  ;;  %v23949_v15 = vld [vmem:[#allocation80_spill] sm:$0xff]  ;;  %v6694_v1 = vld [vmem:[#allocation21 + $0x8] sm:$0xff] }
0x3183   : > { %v6179_v53 = vrot.slane %v6176_v12, 7 }
0x3185   : > { %v6180_v35 = vsel %vm1826_vm8, %v6179_v53, %v6175_v29 }
0x3186   : > { %v6182_v14 = vsel %vm840_vm3, %v6180_v35, -inf  ;;  %v22304_v35 = vpack.c.bf16 %v6694_v1, %v6693_v28 }
0x3187   : > { %6183 = vmax.xlane.f32.xlu1 %v6182_v14  ;;  %v6695_v14 = vld [vmem:[#allocation21 + $0x10] sm:$0xff] }
0x3214   : > { %v6184_v34 = vpop.xlane.xlu1 %6183 }
0x3215   : > { %v6186_v11 = vrot.slane %v6184_v34, 1  ;;  %v6189_v55 = vsub.f32 %v6175_v29, %v6184_v34  ;;  %v6696_v34 = vld [vmem:[#allocation21 + $0x18] sm:$0xff] }
0x3217   : > { %v6190_v33 = vsub.f32 %v6176_v12, %v6186_v11  ;;  %v6191_v27 = vmul.f32 1.442695, %v6189_v55  ;;  %v22309_v55 = vpack.c.bf16 %v6696_v34, %v6695_v14  ;;  %v7135_v34 = vld [vmem:[#allocation31 + $0x10] sm:$0xff] }
0x3219   : > { %v6193_v41 = vmul.f32 1.442695, %v6190_v33  ;;  %v6837_v33 = vld [vmem:[#allocation22] sm:$0xff] }
0x321b   : > { %19477 = vpow2.f32 %v6193_v41 }
0x321c   : > { %19479 = vpow2.f32 %v6191_v27  ;;  %v6838_v27 = vld [vmem:[#allocation22 + $0x8] sm:$0xff] }
0x321d   : > { %v22315_v41 = vpack.c.bf16 %v6838_v27, %v6837_v33 }
0x3225   : > { %v19478_v9 = vpop.eup %19477 }
0x3226   : > { %v6197_v23 = vrot.slane %v19478_v9, 7  ;;  %v19480_v62 = vpop.eup %19479 }
0x3228   : > { %v6198_v47 = vsel %vm1826_vm8, %v6197_v23, %v19480_v62  ;;  %v6840_v23 = vld [vmem:[#allocation22 + $0x18] sm:$0xff] }
0x3229   : > { %v6200_v7 = vsel %vm840_vm3, %v6198_v47, 0.0  ;;  %v6948_v47 = vld [vmem:[#allocation27] sm:$0xff] }
0x322a   : > { %6201 = vadd.xlane.f32.xlu0 %v6200_v7  ;;  %v6949_v7 = vld [vmem:[#allocation27 + $0x8] sm:$0xff] }
0x3240   : > { %6541 = vrot.lane.b32.xlu0 %v22158_v17, %s20223_s29 }
0x32b7   : > { %v6202_v22 = vpop.xlane.xlu0 %6201 }
0x32b8   : > { %19481 = vrcp.f32 %v6202_v22 }
0x32c2   : > { %v19482_v40 = vpop.eup %19481 }
0x32c3   : > { %v6204_v26 = vmul.f32 %v19482_v40, %v6202_v22  ;;  %v22326_v22 = vpack.c.bf16 %v6949_v7, %v6948_v47 }
0x32c5   : > { %v6205_v16 = vsub.f32 2.0, %v6204_v26  ;;  %v6951_v26 = vld [vmem:[#allocation27 + $0x18] sm:$0xff] }
0x32c7   : > { %v6206_v3 = vmul.f32 %v19482_v40, %v6205_v16  ;;  %v6950_v40 = vld [vmem:[#allocation27 + $0x10] sm:$0xff] }
0x32c8   : > { %v22332_v16 = vpack.c.bf16 %v6951_v26, %v6950_v40 }
0x32c9   : > { %v6208_v48 = vrot.slane %v6206_v3, 1  ;;  %v6211_v30 = vmul.f32 %v19480_v62, %v6206_v3 }
0x32cb   : > { %15891 = vmatmul.mubr.f32.vlgmr.msra.gmra.mrb[60].mxu0 %v6211_v30  ;;  %v6212_v5 = vmul.f32 %v19478_v9, %v6208_v48  ;;  %v6839_v9 = vld [vmem:[#allocation22 + $0x10] sm:$0xff] }
0x32cc   : > { %18125 = vmatpush3.bf16.xpose.msk.msra.mxu0 %vm20910_vm7, %v21847_v52  ;;  %15960 = vmatprep.mubr.msk.f32.mxu0 %vm20219_vm4, %v23867_v4  ;;  %v23935_v52 = vld [vmem:[#allocation66_spill] sm:$0xff]  ;;  %v22320_v62 = vpack.c.bf16 %v6840_v23, %v6839_v9 }
0x32cd   : > { %15926 = vmatmul.mubr.f32.vlgmr.msra.gmra.mrb[36].mxu1 %v6212_v5  ;;  %v12505_v17 = vrot.slane %v6212_v5, 7  ;;  %18126 = vmatprep.subr.bf16.mxu0 %v23868_v19 }
0x32ce   : > { %18157 = vmatpush3.bf16.xpose.msk.msra.mxu1 %vm20910_vm7, %v21849_v31  ;;  %15995 = vmatprep.mubr.msk.f32.mxu1 %vm20219_vm4, %v23867_v4  ;;  %v23934_v31 = vld [vmem:[#allocation65_spill] sm:$0xff] }
0x32cf   : > { %v12506_v18 = vsel %vm1826_vm8, %v12505_v17, %v6211_v30  ;;  %18158 = vmatprep.subr.bf16.mxu1 %v23868_v19  ;;  %v23950_v17 = vld [vmem:[#allocation81_spill] sm:$0xff] }
0x32d0   : > { %12526 = vst [vmem:[%s20797_s28 + $0x6] sm:$0x3] %v12506_v18 }
0x32d4   : > { %18129 = vmatpush3.bf16.xpose.msk.msra.mxu0 %vm20910_vm7, %v21866_v60  ;;  %v23936_v60 = vld [vmem:[#allocation67_spill] sm:$0xff] }
0x32d5   : > { %18130 = vmatprep.subr.bf16.mxu0 %v23868_v19 }
0x32d6   : > { %18161 = vmatpush3.bf16.xpose.msk.msra.mxu1 %vm20910_vm7, %v21868_v6  ;;  %v23937_v6 = vld [vmem:[#allocation68_spill] sm:$0xff] }
0x32d7   : > { %18162 = vmatprep.subr.bf16.mxu1 %v23868_v19 }
0x32dc   : > { %18133 = vmatpush3.bf16.xpose.msk.msra.mxu0 %vm20910_vm7, %v21878_v42  ;;  %v23938_v42 = vld [vmem:[#allocation69_spill] sm:$0xff] }
0x32dd   : > { %18134 = vmatprep.subr.bf16.mxu0 %v23868_v19 }
0x32de   : > { %18165 = vmatpush3.bf16.xpose.msk.msra.mxu1 %vm20910_vm7, %v21880_v0  ;;  %v23939_v0 = vld [vmem:[#allocation70_spill] sm:$0xff] }
0x32df   : > { %18166 = vmatprep.subr.bf16.mxu1 %v23868_v19 }
0x32e4   : > { %18137 = vmatpush3.bf16.xpose.msk.msra.mxu0 %vm20910_vm7, %v23934_v31 }
0x32e5   : > { %18138 = vmatprep.subr.bf16.mxu0 %v23868_v19 }
0x32e6   : > { %18169 = vmatpush3.bf16.xpose.msk.msra.mxu1 %vm20910_vm7, %v23935_v52 }
0x32e7   : > { %18170 = vmatprep.subr.bf16.mxu1 %v23868_v19 }
0x32ec   : > { %18141 = vmatpush3.bf16.xpose.msk.msra.mxu0 %vm20910_vm7, %v23936_v60 }
0x32ed   : > { %18142 = vmatprep.subr.bf16.mxu0 %v23868_v19 }
0x32ee   : > { %18173 = vmatpush3.bf16.xpose.msk.msra.mxu1 %vm20910_vm7, %v23937_v6 }
0x32ef   : > { %18174 = vmatprep.subr.bf16.mxu1 %v23868_v19 }
0x32f4   : > { %18145 = vmatpush3.bf16.xpose.msk.msra.mxu0 %vm20910_vm7, %v23938_v42 }
0x32f5   : > { %18146 = vmatprep.subr.bf16.mxu0 %v23868_v19 }
0x32f6   : > { %18177 = vmatpush3.bf16.xpose.msk.msra.mxu1 %vm20910_vm7, %v23939_v0  ;;  %v23951_v0 = vmov 1.0  }
0x32f7   : > { %18178 = vmatprep.subr.bf16.mxu1 %v23868_v19 }
0x32fc   : > { %18149 = vmatpush3.bf16.xpose.msk.msra.mxu0 %vm20910_vm7, %v21926_v43  ;;  %v22282_v43 = vpop.permute.xlu0 %6541 }
0x32fd   : > { %18150 = vmatprep.subr.bf16.mxu0 %v23868_v19 }
0x32fe   : > { %18181 = vmatpush3.bf16.xpose.msk.msra.mxu1 %vm20910_vm7, %v21928_v8  ;;  %v23942_v8 = vld [vmem:[#allocation73_spill] sm:$0xff] }
0x32ff   : > { %18182 = vmatprep.subr.bf16.mxu1 %v23868_v19 }
0x3304   : > { %18153 = vmatpush3.bf16.xpose.msk.msra.mxu0 %vm20910_vm7, %v23940_v45 }
0x3305   : > { %18186 = vmatprep.subr.bf16.mxu0 %v23868_v19 }
0x3306   : > { %18185 = vmatpush3.bf16.xpose.msk.msra.mxu1 %vm20910_vm7, %v23941_v61 }
0x3307   : > { %18192 = vmatprep.subr.bf16.mxu1 %v23868_v19 }
0x330d   : > { %15996 = vmatmul.mubr.msk.f32.vlgmr.msra.gmra.mrb[38].mxu1 %vm867_vm5, %v22282_v43 }
0x330e   : > { %18194 = vmatpush3.bf16.msra.mxu1 %v23942_v8  ;;  %16041 = vmatprep.mubr.msk.f32.mxu1 %vm20219_vm4, %v23867_v4 }
0x330f   : > { %18195 = vmatprep.subr.bf16.mxu1 %v23868_v19 }
0x3312   : > { %18197 = vmatpush3.bf16.msra.mxu1 %v23943_v32 }
0x3313   : > { %18198 = vmatprep.subr.bf16.mxu1 %v23868_v19 }
0x3316   : > { %18200 = vmatpush3.bf16.msra.mxu1 %v23944_v63 }
0x3317   : > { %18201 = vmatprep.subr.bf16.mxu1 %v23868_v19 }
0x331a   : > { %18203 = vmatpush3.bf16.msra.mxu1 %v23945_v51 }
0x331b   : > { %18204 = vmatprep.subr.bf16.mxu1 %v23868_v19 }
0x331e   : > { %18206 = vmatpush3.bf16.msra.mxu1 %v23946_v2 }
0x331f   : > { %18207 = vmatprep.subr.bf16.mxu1 %v23868_v19 }
0x3322   : > { %18209 = vmatpush3.bf16.msra.mxu1 %v23947_v10 }
0x3323   : > { %18210 = vmatprep.subr.bf16.mxu1 %v23868_v19 }
0x3326   : > { %18212 = vmatpush3.bf16.msra.mxu1 %v23948_v20 }
0x3327   : > { %18213 = vmatprep.subr.bf16.mxu1 %v23868_v19 }
0x332a   : > { %18215 = vmatpush3.bf16.msra.mxu1 %v23949_v15 }
0x332b   : > { %18240 = vmatprep.subr.bf16.mxu1 %v23868_v19 }
0x339e   : > { %v6311_v38 = vpop.f32.mrb[60].mxu0 }
0x339f   : > { %v15892_v12 = vpop.f32.mrb[61].mxu0 }
0x33a0   : > { %v6381_v44 = vpop.f32.mrb[36].mxu1 }
0x33a1   : > { %v6419_v29 = vrot.slane %v6381_v44, 7  ;;  %v15927_v53 = vpop.f32.mrb[37].mxu1 }
0x33a2   : > { %v7134_v53 = vld [vmem:[#allocation31 + $0x8] sm:$0xff] }
0x33a3   : > { %v6420_v11 = vsel %vm1826_vm8, %v6419_v29, %v6311_v38  ;;  %v7133_v29 = vld [vmem:[#allocation31] sm:$0xff] }
0x33a4   : > { %15961 = vmatmul.mubr.msk.f32.vlgmr.msra.gmra.mrb[62].mxu0 %vm867_vm5, %v6420_v11  ;;  %v22366_v14 = vpack.c.bf16 %v7134_v53, %v7133_v29  ;;  %v7356_v29 = vld [vmem:[#allocation10 + $0x98] sm:$0xff] }
0x33a5   : > { %18188 = vmatpush3.bf16.msra.mxu0 %v22304_v35  ;;  %16006 = vmatprep.mubr.msk.f32.mxu0 %vm20219_vm4, %v23867_v4 }
0x33a6   : > { %18189 = vmatprep.subr.bf16.mxu0 %v23868_v19 }
0x33a9   : > { %18191 = vmatpush3.bf16.msra.mxu0 %v22309_v55 }
0x33aa   : > { %18216 = vmatprep.subr.bf16.mxu0 %v23868_v19 }
0x33ac   : > { %16007 = vmatmul.mubr.msk.f32.vlgmr.msra.gmra.mrb[64].mxu0 %vm867_vm5, %v6420_v11  ;;  %v7136_v11 = vld [vmem:[#allocation31 + $0x18] sm:$0xff] }
0x33ad   : > { %18218 = vmatpush3.bf16.msra.mxu0 %v22315_v41  ;;  %16052 = vmatprep.mubr.msk.f32.mxu0 %vm20219_vm4, %v23867_v4 }
0x33ae   : > { %18219 = vmatprep.subr.bf16.mxu0 %v23868_v19 }
0x33b1   : > { %18221 = vmatpush3.bf16.msra.mxu0 %v22320_v62 }
0x33b2   : > { %18222 = vmatprep.subr.bf16.mxu0 %v23868_v19 }
0x33b4   : > { %16053 = vmatmul.mubr.msk.f32.vlgmr.msra.gmra.mrb[66].mxu0 %vm867_vm5, %v22044_v37 }
0x33b5   : > { %18224 = vmatpush3.bf16.msra.mxu0 %v22326_v22  ;;  %16063 = vmatprep.mubr.msk.f32.mxu0 %vm20219_vm4, %v23867_v4 }
0x33b6   : > { %18225 = vmatprep.subr.bf16.mxu0 %v23868_v19 }
0x33b9   : > { %18227 = vmatpush3.bf16.msra.mxu0 %v22332_v16 }
0x33ba   : > { %18228 = vmatprep.subr.bf16.mxu0 %v23868_v19 }
0x33bc   : > { %16064 = vmatmul.mubr.msk.f32.vlgmr.msra.gmra.mrb[68].mxu0 %vm867_vm5, %v22110_v21 }
0x33bd   : > { %18230 = vmatpush3.bf16.msra.mxu0 %v22034_v56  ;;  %16074 = vmatprep.mubr.msk.f32.mxu0 %vm20219_vm4, %v23867_v4 }
0x33be   : > { %18231 = vmatprep.subr.bf16.mxu0 %v23868_v19 }
0x33c1   : > { %18233 = vmatpush3.bf16.msra.mxu0 %v22037_v39 }
0x33c2   : > { %18234 = vmatprep.subr.bf16.mxu0 %v23868_v19 }
0x33e0   : > { %v6659_v37 = vpop.f32.mrb[38].mxu1 }
0x33e1   : > { %v15997_v3 = vpop.f32.mrb[39].mxu1 }
0x3477   : > { %v6537_v48 = vpop.f32.mrb[62].mxu0 }
0x3478   : > { %v6660_v30 = vadd.f32 %v6659_v37, %v6537_v48  ;;  %v15962_v5 = vpop.f32.mrb[63].mxu0 }
0x347a   : > { %v6670_v18 = vadd.f32 %v23950_v17, %v6660_v30 }
0x347c   : > { %12478 = vst [vmem:[%s20795_s19 + $0x6] sm:$0x3] %v6670_v18  ;;  %v6671_v21 = vsel %vm840_vm3, %v6670_v18, -inf }
0x347d   : > { %6672 = vmax.xlane.f32.xlu1 %v6671_v21 }
0x347f   : > { %v6763_v56 = vpop.f32.mrb[64].mxu0 }
0x3480   : > { %v16008_v31 = vpop.f32.mrb[65].mxu0 }
0x3487   : > { %v6907_v52 = vpop.f32.mrb[66].mxu0 }
0x3488   : > { %v16054_v60 = vpop.f32.mrb[67].mxu0 }
0x348f   : > { %v7018_v6 = vpop.f32.mrb[68].mxu0 }
0x3490   : > { %v16065_v42 = vpop.f32.mrb[69].mxu0 }
0x350a   : > { %v6673_v39 = vpop.xlane.xlu1 %6672 }
0x350b   : > { %vm6674_vm12 = vcmp.eq.f32.partialorder %v6670_v18, %v6673_v39 }
0x350c   : > { %16042 = vmatmul.mubr.msk.f32.vlgmr.msra.gmra.mrb[40].mxu1 %vm6674_vm12, %v23951_v0 }
0x350d   : > { %18242 = vmatpush3.bf16.msra.mxu1 %v22100_v59  ;;  %16096 = vmatprep.mubr.msk.f32.mxu1 %vm20219_vm4, %v23867_v4 }
0x350e   : > { %18243 = vmatprep.subr.bf16.mxu1 %v23868_v19 }
0x3511   : > { %18245 = vmatpush3.bf16.msra.mxu1 %v22103_v50 }
0x3512   : > { %18278 = vmatprep.subr.bf16.mxu1 %v23868_v19 }
0x35df   : > { %v6833_v45 = vpop.f32.mrb[40].mxu1 }
0x35e0   : > { %v6834_v61 = vadd.f32 %v6833_v45, %v6763_v56  ;;  %v16043_v8 = vpop.f32.mrb[41].mxu1 }
0x35e2   : > { %v6911_v32 = vadd.f32 %v6907_v52, %v6834_v61 }
0x35e4   : > { %v6919_v63 = vadd.f32 %v22025_v58, %v6911_v32 }
0x35e6   : > { %19483 = vtanh.f32 %v6919_v63  ;;  %v13225_v59 = vmul.f32 -1.442695, %v6919_v63 }
0x35e8   : > { %19485 = vpow2.f32 %v13225_v59 }
0x35f0   : > { %v19484_v51 = vpop.eup %19483 }
0x35f1   : > { %6929 = vrot.lane.b32.xlu1 %v19484_v51, %s23829_s1 }
0x35f2   : > { %v19486_v2 = vpop.eup %19485 }
0x35f3   : > { %v6923_v10 = vadd.f32 1.0, %v19486_v2 }
0x35f5   : > { %19487 = vrcp.f32 %v6923_v10  ;;  %v7337_v10 = vld [vmem:[#allocation10] sm:$0xff] }
0x35ff   : > { %v19488_v20 = vpop.eup %19487 }
0x3600   : > { %v6927_v38 = vmul.f32 %v19488_v20, %v22031_v57  ;;  %v22373_v57 = vpack.c.bf16 %v7136_v11, %v7135_v34  ;;  %v7341_v11 = vld [vmem:[#allocation10 + $0x20] sm:$0xff] }
0x3663   : > { %v6930_v15 = vpop.permute.xlu1 %6929 }
0x3664   : > { %v6932_v50 = vmul.f32 %v19488_v20, %v6930_v15  ;;  %v7353_v15 = vld [vmem:[#allocation10 + $0x80] sm:$0xff] }
0x3666   : > { %6934 = vrot.lane.b32.xlu0 %v6932_v50, %s23829_s1 }
0x36d8   : > { %v6935_v28 = vpop.permute.xlu0 %6934 }
0x36d9   : > { %v22361_v1 = vadd.f32 %v6935_v28, %v6927_v38  ;;  %v7354_v38 = vld [vmem:[#allocation10 + $0x88] sm:$0xff] }
0x36db   : > { %19489 = vtanh.f32 %v22361_v1 }
0x36e5   : > { %v19490_v58 = vpop.eup %19489 }
0x36e6   : > { %6940 = vrot.lane.b32.xlu1 %v19490_v58, %s23829_s1  ;;  %v22412_v58 = vpack.c.bf16 %v7354_v38, %v7353_v15  ;;  %v7368_v15 = vld [vmem:[#allocation10 + $0xf8] sm:$0xff] }
0x3758   : > { %v6941_v12 = vpop.permute.xlu1 %6940 }
0x3759   : > { %v6943_v44 = vmul.f32 %v19488_v20, %v6941_v12  ;;  %v7338_v20 = vld [vmem:[#allocation10 + $0x8] sm:$0xff]  ;;  %v7340_v12 = vld [vmem:[#allocation10 + $0x18] sm:$0xff] }
0x375a   : > { %v22410_v50 = vpack.c.bf16 %v7338_v20, %v7337_v10  ;;  %v7352_v10 = vld [vmem:[#allocation10 + $0x78] sm:$0xff]  ;;  %v7367_v20 = vld [vmem:[#allocation10 + $0xf0] sm:$0xff] }
0x375b   : > { %7023 = vrot.lane.b32.xlu0 %v6943_v44, %s20223_s29  ;;  %v7355_v44 = vld [vmem:[#allocation10 + $0x90] sm:$0xff] }
0x375c   : > { %v22425_v34 = vpack.c.bf16 %v7356_v29, %v7355_v44 }
0x37cd   : > { %v22368_v33 = vpop.permute.xlu0 %7023 }
0x37ce   : > { %16075 = vmatmul.mubr.msk.f32.vlgmr.msra.gmra.mrb[70].mxu0 %vm867_vm5, %v22368_v33 }
0x37cf   : > { %18236 = vmatpush3.bf16.msra.mxu0 %v22366_v14  ;;  %16085 = vmatprep.mubr.msk.f32.mxu0 %vm20219_vm4, %v23867_v4 }
0x37d0   : > { %18237 = vmatprep.subr.bf16.mxu0 %v23868_v19 }
0x37d3   : > { %18239 = vmatpush3.bf16.msra.mxu0 %v22373_v57 }
0x37d4   : > { %18246 = vmatprep.subr.bf16.mxu0 %v23868_v19 }
0x37d6   : > { %16086 = vmatmul.mubr.msk.f32.vlgmr.msra.gmra.mrb[72].mxu0 %vm867_vm5, %v22282_v43 }
0x37d7   : > { %16131 = vmatprep.mubr.msk.f32.mxu0 %vm20219_vm4, %v23867_v4 }
0x37dc   : > { %18249 = vmatpush3.bf16.xpose.msk.msra.mxu0 %vm20910_vm7, %v22410_v50 }
0x37dd   : > { %18250 = vmatprep.subr.bf16.mxu0 %v23868_v19 }
0x38a1   : > { %v7093_v27 = vpop.f32.mrb[70].mxu0 }
0x38a2   : > { %v7094_v9 = vadd.f32 %v7093_v27, %v7018_v6  ;;  %v16076_v23 = vpop.f32.mrb[71].mxu0  ;;  %v7342_v27 = vld [vmem:[#allocation10 + $0x28] sm:$0xff] }
0x38a3   : > { %v7358_v23 = vld [vmem:[#allocation10 + $0xa8] sm:$0xff] }
0x38a4   : > { %v7104_v47 = vadd.f32 %v22090_v49, %v7094_v9  ;;  %v7357_v9 = vld [vmem:[#allocation10 + $0xa0] sm:$0xff] }
0x38a6   : > { %19491 = vtanh.f32 %v7104_v47  ;;  %v13229_v37 = vmul.f32 -1.442695, %v7104_v47  ;;  %v22435_v47 = vpack.c.bf16 %v7342_v27, %v7341_v11 }
0x38a8   : > { %19493 = vpow2.f32 %v13229_v37  ;;  %v7359_v37 = vld [vmem:[#allocation10 + $0xb0] sm:$0xff] }
0x38a9   : > { %v7203_v7 = vpop.f32.mrb[72].mxu0 }
0x38aa   : > { %v16087_v40 = vpop.f32.mrb[73].mxu0 }
0x38ab   : > { %v7343_v40 = vld [vmem:[#allocation10 + $0x30] sm:$0xff] }
0x38b0   : > { %v19492_v26 = vpop.eup %19491 }
0x38b1   : > { %7114 = vrot.lane.b32.xlu1 %v19492_v26, %s23829_s1  ;;  %v7344_v26 = vld [vmem:[#allocation10 + $0x38] sm:$0xff] }
0x38b2   : > { %v19494_v3 = vpop.eup %19493 }
0x38b3   : > { %v7108_v48 = vadd.f32 1.0, %v19494_v3  ;;  %v7360_v3 = vld [vmem:[#allocation10 + $0xb8] sm:$0xff] }
0x38b5   : > { %19495 = vrcp.f32 %v7108_v48  ;;  %v22447_v48 = vpack.c.bf16 %v7344_v26, %v7343_v40 }
0x38bf   : > { %v19496_v43 = vpop.eup %19495 }
0x38c0   : > { %v7112_v17 = vmul.f32 %v19496_v43, %v22097_v25 }
0x3923   : > { %v7115_v30 = vpop.permute.xlu1 %7114 }
0x3924   : > { %v7117_v5 = vmul.f32 %v19496_v43, %v7115_v30  ;;  %v7345_v30 = vld [vmem:[#allocation10 + $0x40] sm:$0xff] }
0x3926   : > { %7119 = vrot.lane.b32.xlu0 %v7117_v5, %s23829_s1  ;;  %v7346_v5 = vld [vmem:[#allocation10 + $0x48] sm:$0xff] }
0x3998   : > { %v7120_v18 = vpop.permute.xlu0 %7119 }
0x3999   : > { %v22388_v49 = vadd.f32 %v7120_v18, %v7112_v17  ;;  %v7361_v17 = vld [vmem:[#allocation10 + $0xc0] sm:$0xff]  ;;  %v7362_v18 = vld [vmem:[#allocation10 + $0xc8] sm:$0xff] }
0x399b   : > { %19497 = vtanh.f32 %v22388_v49 }
0x39a5   : > { %v19498_v21 = vpop.eup %19497 }
0x39a6   : > { %7125 = vrot.lane.b32.xlu1 %v19498_v21, %s23829_s1  ;;  %v22459_v21 = vpack.c.bf16 %v7346_v5, %v7345_v30 }
0x3a18   : > { %v7126_v56 = vpop.permute.xlu1 %7125 }
0x3a19   : > { %v7128_v31 = vmul.f32 %v19496_v43, %v7126_v56  ;;  %v22449_v43 = vpack.c.bf16 %v7360_v3, %v7359_v37  ;;  %v22461_v56 = vpack.c.bf16 %v7362_v18, %v7361_v17 }
0x3a1b   : > { %7208 = vrot.lane.b32.xlu0 %v7128_v31, %s20223_s29  ;;  %v7347_v31 = vld [vmem:[#allocation10 + $0x50] sm:$0xff] }
0x3a8d   : > { %v22393_v52 = vpop.permute.xlu0 %7208 }
0x3a8e   : > { %16097 = vmatmul.mubr.msk.f32.vlgmr.msra.gmra.mrb[42].mxu1 %vm867_vm5, %v22393_v52 }
0x3a8f   : > { %16166 = vmatprep.mubr.msk.f32.mxu1 %vm20219_vm4, %v23867_v4  ;;  %18281 = vmatpush3.bf16.xpose.msk.msra.mxu1 %vm20910_vm7, %v22412_v58 }
0x3a90   : > { %18282 = vmatprep.subr.bf16.mxu1 %v23868_v19 }
0x3a97   : > { %18285 = vmatpush3.bf16.xpose.msk.msra.mxu1 %vm20910_vm7, %v22425_v34 }
0x3a98   : > { %18286 = vmatprep.subr.bf16.mxu1 %v23868_v19 }
0x3b61   : > { %v7278_v25 = vpop.f32.mrb[42].mxu1 }
0x3b62   : > { %v7279_v60 = vadd.f32 %v7278_v25, %v7203_v7  ;;  %v16098_v6 = vpop.f32.mrb[43].mxu1  ;;  %v22437_v7 = vpack.c.bf16 %v7358_v23, %v7357_v9  ;;  %v7348_v25 = vld [vmem:[#allocation10 + $0x58] sm:$0xff] }
0x3b63   : > { %v7364_v6 = vld [vmem:[#allocation10 + $0xd8] sm:$0xff] }
0x3b64   : > { %v7289_v42 = vadd.f32 %v22148_v13, %v7279_v60  ;;  %18289 = vmatpush3.bf16.xpose.msk.msra.mxu1 %vm20910_vm7, %v22437_v7  ;;  %v7363_v60 = vld [vmem:[#allocation10 + $0xd0] sm:$0xff] }
0x3b65   : > { %18290 = vmatprep.subr.bf16.mxu1 %v23868_v19 }
0x3b66   : > { %19499 = vtanh.f32 %v7289_v42  ;;  %v13233_v45 = vmul.f32 -1.442695, %v7289_v42  ;;  %v22471_v42 = vpack.c.bf16 %v7348_v25, %v7347_v31 }
0x3b68   : > { %19501 = vpow2.f32 %v13233_v45  ;;  %v7349_v45 = vld [vmem:[#allocation10 + $0x60] sm:$0xff] }
0x3b6c   : > { %18293 = vmatpush3.bf16.xpose.msk.msra.mxu1 %vm20910_vm7, %v22449_v43 }
0x3b6d   : > { %18294 = vmatprep.subr.bf16.mxu1 %v23868_v19 }
0x3b70   : > { %v19500_v39 = vpop.eup %19499 }
0x3b71   : > { %7299 = vrot.lane.b32.xlu1 %v19500_v39, %s23829_s1  ;;  %v22473_v39 = vpack.c.bf16 %v7364_v6, %v7363_v60 }
0x3b72   : > { %v19502_v61 = vpop.eup %19501 }
0x3b73   : > { %v7293_v8 = vadd.f32 1.0, %v19502_v61  ;;  %v7350_v61 = vld [vmem:[#allocation10 + $0x68] sm:$0xff] }
0x3b74   : > { %18297 = vmatpush3.bf16.xpose.msk.msra.mxu1 %vm20910_vm7, %v22461_v56 }
0x3b75   : > { %19503 = vrcp.f32 %v7293_v8  ;;  %18298 = vmatprep.subr.bf16.mxu1 %v23868_v19  ;;  %v7365_v8 = vld [vmem:[#allocation10 + $0xe0] sm:$0xff] }
0x3b7c   : > { %18301 = vmatpush3.bf16.xpose.msk.msra.mxu1 %vm20910_vm7, %v22473_v39 }
0x3b7d   : > { %18302 = vmatprep.subr.bf16.mxu1 %v23868_v19 }
0x3b7f   : > { %v22401_v32 = vpop.eup %19503 }
0x3b80   : > { %v7297_v59 = vmul.f32 %v22401_v32, %v22154_v24  ;;  %v7339_v24 = vld [vmem:[#allocation10 + $0x10] sm:$0xff] }
0x3b81   : > { %v22423_v53 = vpack.c.bf16 %v7340_v12, %v7339_v24 }
0x3b83   : > { %18253 = vmatpush3.bf16.xpose.msk.msra.mxu0 %vm20910_vm7, %v22423_v53 }
0x3b84   : > { %18254 = vmatprep.subr.bf16.mxu0 %v23868_v19 }
0x3b8b   : > { %18257 = vmatpush3.bf16.xpose.msk.msra.mxu0 %vm20910_vm7, %v22435_v47 }
0x3b8c   : > { %18258 = vmatprep.subr.bf16.mxu0 %v23868_v19 }
0x3b93   : > { %18261 = vmatpush3.bf16.xpose.msk.msra.mxu0 %vm20910_vm7, %v22447_v48 }
0x3b94   : > { %18262 = vmatprep.subr.bf16.mxu0 %v23868_v19 }
0x3b9b   : > { %18265 = vmatpush3.bf16.xpose.msk.msra.mxu0 %vm20910_vm7, %v22459_v21 }
0x3b9c   : > { %18266 = vmatprep.subr.bf16.mxu0 %v23868_v19 }
0x3ba3   : > { %18269 = vmatpush3.bf16.xpose.msk.msra.mxu0 %vm20910_vm7, %v22471_v42 }
0x3ba4   : > { %18270 = vmatprep.subr.bf16.mxu0 %v23868_v19 }
0x3be3   : > { %v7300_v63 = vpop.permute.xlu1 %7299 }
0x3be4   : > { %v7302_v51 = vmul.f32 %v22401_v32, %v7300_v63  ;;  %v7366_v63 = vld [vmem:[#allocation10 + $0xe8] sm:$0xff] }
0x3be6   : > { %7304 = vrot.lane.b32.xlu0 %v7302_v51, %s23829_s1  ;;  %v22483_v51 = vpack.c.bf16 %v7350_v61, %v7349_v45  ;;  %v7680_v45 = vld [vmem:[#allocation13 + $0x80] sm:$0xff]  ;;  %v7681_v61 = vld [vmem:[#allocation13 + $0x88] sm:$0xff] }
0x3be8   : > { %18273 = vmatpush3.bf16.xpose.msk.msra.mxu0 %vm20910_vm7, %v22483_v51 }
0x3be9   : > { %18274 = vmatprep.subr.bf16.mxu0 %v23868_v19 }
0x3c58   : > { %v7305_v13 = vpop.permute.xlu0 %7304 }
0x3c59   : > { %v22407_v2 = vadd.f32 %v7305_v13, %v7297_v59  ;;  %v22485_v59 = vpack.c.bf16 %v7366_v63, %v7365_v8  ;;  %v7351_v13 = vld [vmem:[#allocation10 + $0x70] sm:$0xff]  ;;  %v7664_v8 = vld [vmem:[#allocation13] sm:$0xff]  ;;  %v22524_v63 = vpack.c.bf16 %v7681_v61, %v7680_v45 }
0x3c5a   : > { %v22495_v38 = vpack.c.bf16 %v7352_v10, %v7351_v13  ;;  %v7665_v13 = vld [vmem:[#allocation13 + $0x8] sm:$0xff]  ;;  %v7682_v10 = vld [vmem:[#allocation13 + $0x90] sm:$0xff] }
0x3c5b   : > { %19505 = vtanh.f32 %v22407_v2  ;;  %18305 = vmatpush3.bf16.xpose.msk.msra.mxu1 %vm20910_vm7, %v22485_v59 }
0x3c5c   : > { %18306 = vmatprep.subr.bf16.mxu1 %v23868_v19  ;;  %18277 = vmatpush3.bf16.xpose.msk.msra.mxu0 %vm20910_vm7, %v22495_v38 }
0x3c5d   : > { %18310 = vmatprep.subr.bf16.mxu0 %v23868_v19 }
0x3c65   : > { %v19506_v28 = vpop.eup %19505 }
0x3c66   : > { %7310 = vrot.lane.b32.xlu1 %v19506_v28, %s23829_s1  ;;  %v22497_v28 = vpack.c.bf16 %v7368_v15, %v7367_v20  ;;  %v7683_v20 = vld [vmem:[#allocation13 + $0x98] sm:$0xff]  ;;  %v22526_v15 = vpack.c.bf16 %v7665_v13, %v7664_v8 }
0x3c68   : > { %18309 = vmatpush3.bf16.xpose.msk.msra.mxu1 %vm20910_vm7, %v22497_v28 }
0x3c69   : > { %18334 = vmatprep.subr.bf16.mxu1 %v23868_v19 }
0x3cd8   : > { %v7311_v24 = vpop.permute.xlu1 %7310 }
0x3cd9   : > { %v7313_v12 = vmul.f32 %v22401_v32, %v7311_v24  ;;  %v7621_v32 = vld [vmem:[#allocation15] sm:$0x3]  ;;  %v7666_v24 = vld [vmem:[#allocation13 + $0x10] sm:$0xff] }
0x3cda   : > { %v7623_v37 = vrot.slane %v7621_v32, 1 }
0x3cdb   : > { %v7321_v44 = vrot.slane %v7313_v12, %v21011_v46 }
0x3cdd   : > { %v7322_v29 = vcombine.high %v7321_v44, %v7321_v44  ;;  %v7329_v11 = vrot.slane %v7321_v44, %v21011_v46  ;;  %v7667_v44 = vld [vmem:[#allocation13 + $0x18] sm:$0xff] }
0x3cdf   : > { %v7372_v27 = vrot.slane %v7329_v11, %v21015_v54  ;;  %v7336_v9 = vrot.slane %v7322_v29, %v21011_v46  ;;  %v22529_v29 = vpack.c.bf16 %v7683_v20, %v7682_v10  ;;  %v7684_v11 = vld [vmem:[#allocation13 + $0xa0] sm:$0xff]  ;;  %v7670_v20 = vld [vmem:[#allocation13 + $0x30] sm:$0xff] }
0x3ce1   : > { %7373 = vrot.lane.b32.xlu1 %v7372_v27, %s20223_s29  ;;  %v7498_v23 = vrot.slane %v7336_v9, %v21015_v54  ;;  %v7685_v27 = vld [vmem:[#allocation13 + $0xa8] sm:$0xff]  ;;  %v7668_v9 = vld [vmem:[#allocation13 + $0x20] sm:$0xff] }
0x3ce3   : > { %7499 = vrot.lane.b32.xlu0 %v7498_v23, %s20223_s29  ;;  %v7669_v23 = vld [vmem:[#allocation13 + $0x28] sm:$0xff] }
0x3d53   : > { %v7374_v40 = vpop.permute.xlu1 %7373 }
0x3d54   : > { %16132 = vmatmul.mubr.msk.f32.vlgmr.msra.gmra.mrb[74].mxu0 %vm867_vm5, %v7374_v40  ;;  %v22537_v40 = vpack.c.bf16 %v7685_v27, %v7684_v11  ;;  %v7672_v27 = vld [vmem:[#allocation13 + $0x40] sm:$0xff] }
0x3d55   : > { %v7500_v26 = vpop.permute.xlu0 %7499  ;;  %16201 = vmatprep.mubr.msk.f32.mxu0 %vm20219_vm4, %v23867_v4  ;;  %18312 = vmatpush3.bf16.msra.mxu0 %v22526_v15 }
0x3d56   : > { %16167 = vmatmul.mubr.msk.f32.vlgmr.msra.gmra.mrb[44].mxu1 %vm867_vm5, %v7500_v26  ;;  %18313 = vmatprep.subr.bf16.mxu0 %v23868_v19  ;;  %v22541_v26 = vpack.c.bf16 %v7669_v23, %v7668_v9  ;;  %v7673_v9 = vld [vmem:[#allocation13 + $0x48] sm:$0xff]  ;;  %v7690_v23 = vld [vmem:[#allocation13 + $0xd0] sm:$0xff] }
0x3d57   : > { %16236 = vmatprep.mubr.msk.f32.mxu1 %vm20219_vm4, %v23867_v4  ;;  %18336 = vmatpush3.bf16.msra.mxu1 %v22524_v63 }
0x3d58   : > { %18337 = vmatprep.subr.bf16.mxu1 %v23868_v19 }
0x3d5b   : > { %18339 = vmatpush3.bf16.msra.mxu1 %v22529_v29 }
0x3d5c   : > { %18340 = vmatprep.subr.bf16.mxu1 %v23868_v19 }
0x3d5f   : > { %18342 = vmatpush3.bf16.msra.mxu1 %v22537_v40 }
0x3d60   : > { %18343 = vmatprep.subr.bf16.mxu1 %v23868_v19 }
0x3e27   : > { %v7491_v3 = vpop.f32.mrb[74].mxu0 }
0x3e28   : > { %v16133_v30 = vpop.f32.mrb[75].mxu0  ;;  %v7626_v31 = vadd.f32 %v7621_v32, %v7491_v3  ;;  %v7686_v32 = vld [vmem:[#allocation13 + $0xb0] sm:$0xff] }
0x3e29   : > { %v7617_v5 = vpop.f32.mrb[44].mxu1 }
0x3e2a   : > { %v7627_v17 = vadd.f32 %v7623_v37, %v7617_v5  ;;  %v16168_v18 = vpop.f32.mrb[45].mxu1  ;;  %v7687_v37 = vld [vmem:[#allocation13 + $0xb8] sm:$0xff] }
0x3e2b   : > { %v22545_v3 = vpack.c.bf16 %v7687_v37, %v7686_v32  ;;  %v22565_v32 = vpack.c.bf16 %v7673_v9, %v7672_v27  ;;  %v7691_v37 = vld [vmem:[#allocation13 + $0xd8] sm:$0xff]  ;;  %v7678_v27 = vld [vmem:[#allocation13 + $0x70] sm:$0xff] }
0x3e2c   : > { %v7630_v25 = vrot.slane %v7627_v17, 7  ;;  %v7679_v9 = vld [vmem:[#allocation13 + $0x78] sm:$0xff] }
0x3e2d   : > { %18345 = vmatpush3.bf16.msra.mxu1 %v22545_v3 }
0x3e2e   : > { %v7631_v60 = vsel %vm1826_vm8, %v7630_v25, %v7626_v31  ;;  %18346 = vmatprep.subr.bf16.mxu1 %v23868_v19 }
0x3e2f   : > { %v7633_v6 = vsel %vm840_vm3, %v7631_v60, -inf }
0x3e30   : > { %7634 = vmax.xlane.f32.xlu0 %v7633_v6 }
0x3e46   : > { %7992 = vrot.lane.b32.xlu0 %v7313_v12, %s20223_s29  ;;  %v22533_v12 = vpack.c.bf16 %v7667_v44, %v7666_v24  ;;  %v7671_v24 = vld [vmem:[#allocation13 + $0x38] sm:$0xff]  ;;  %v7688_v44 = vld [vmem:[#allocation13 + $0xc0] sm:$0xff] }
0x3e47   : > { %v22557_v11 = vpack.c.bf16 %v7671_v24, %v7670_v20  ;;  %v7694_v20 = vld [vmem:[#allocation13 + $0xf0] sm:$0xff] }
0x3e48   : > { %18315 = vmatpush3.bf16.msra.mxu0 %v22533_v12 }
0x3e49   : > { %18316 = vmatprep.subr.bf16.mxu0 %v23868_v19 }
0x3e4c   : > { %18318 = vmatpush3.bf16.msra.mxu0 %v22541_v26 }
0x3e4d   : > { %18319 = vmatprep.subr.bf16.mxu0 %v23868_v19 }
0x3e50   : > { %18321 = vmatpush3.bf16.msra.mxu0 %v22557_v11 }
0x3e51   : > { %18322 = vmatprep.subr.bf16.mxu0 %v23868_v19 }
0x3e54   : > { %18324 = vmatpush3.bf16.msra.mxu0 %v22565_v32 }
0x3e55   : > { %18325 = vmatprep.subr.bf16.mxu0 %v23868_v19 }
0x3ebd   : > { %v7635_v30 = vpop.xlane.xlu0 %7634 }
0x3ebe   : > { %v7637_v5 = vrot.slane %v7635_v30, 1  ;;  %v7640_v18 = vsub.f32 %v7626_v31, %v7635_v30  ;;  %v22567_v30 = vpack.c.bf16 %v7691_v37, %v7690_v23  ;;  %v22588_v23 = vpack.c.bf16 %v7679_v9, %v7678_v27 }
0x3ec0   : > { %v7641_v25 = vsub.f32 %v7627_v17, %v7637_v5  ;;  %v7642_v60 = vmul.f32 1.442695, %v7640_v18  ;;  %v7689_v17 = vld [vmem:[#allocation13 + $0xc8] sm:$0xff]  ;;  %v7674_v5 = vld [vmem:[#allocation13 + $0x50] sm:$0xff]  ;;  %v7675_v18 = vld [vmem:[#allocation13 + $0x58] sm:$0xff]  ;;  %23954 = vst [vmem:[#allocation63_spill] sm:$0xff] %v22588_v23 }
0x3ec1   : > { %v22559_v31 = vpack.c.bf16 %v7689_v17, %v7688_v44  ;;  %v7695_v44 = vld [vmem:[#allocation13 + $0xf8] sm:$0xff] }
0x3ec2   : > { %v7644_v6 = vmul.f32 1.442695, %v7641_v25  ;;  %v7692_v25 = vld [vmem:[#allocation13 + $0xe0] sm:$0xff]  ;;  %v22583_v17 = vpack.c.bf16 %v7695_v44, %v7694_v20  ;;  %v7837_v44 = vld [vmem:[#allocation18 + $0x8] sm:$0xff] }
0x3ec3   : > { %18348 = vmatpush3.bf16.msra.mxu1 %v22559_v31  ;;  %v7836_v20 = vld [vmem:[#allocation18] sm:$0xff] }
0x3ec4   : > { %19507 = vpow2.f32 %v7644_v6  ;;  %18349 = vmatprep.subr.bf16.mxu1 %v23868_v19  ;;  %v7693_v6 = vld [vmem:[#allocation13 + $0xe8] sm:$0xff]  ;;  %23953 = vst [vmem:[#allocation64_spill] sm:$0xff] %v22583_v17 }
0x3ec5   : > { %19509 = vpow2.f32 %v7642_v60  ;;  %v22573_v60 = vpack.c.bf16 %v7675_v18, %v7674_v5 }
0x3ec7   : > { %18351 = vmatpush3.bf16.msra.mxu1 %v22567_v30  ;;  %18327 = vmatpush3.bf16.msra.mxu0 %v22573_v60 }
0x3ec8   : > { %18352 = vmatprep.subr.bf16.mxu1 %v23868_v19  ;;  %18328 = vmatprep.subr.bf16.mxu0 %v23868_v19 }
0x3ece   : > { %v22552_v45 = vpop.eup %19507 }
0x3ecf   : > { %v7648_v61 = vrot.slane %v22552_v45, 7  ;;  %v19510_v8 = vpop.eup %19509 }
0x3ed1   : > { %v7649_v13 = vsel %vm1826_vm8, %v7648_v61, %v19510_v8  ;;  %v22575_v61 = vpack.c.bf16 %v7693_v6, %v7692_v25  ;;  %v7852_v6 = vld [vmem:[#allocation19] sm:$0xff] }
0x3ed2   : > { %v7651_v10 = vsel %vm840_vm3, %v7649_v13, 0.0  ;;  %v7676_v13 = vld [vmem:[#allocation13 + $0x60] sm:$0xff] }
0x3ed3   : > { %7652 = vadd.xlane.f32.xlu1 %v7651_v10  ;;  %23952 = vst [vmem:[#allocation62_spill] sm:$0xff] %v22575_v61  ;;  %18354 = vmatpush3.bf16.msra.mxu1 %v22575_v61  ;;  %v7677_v10 = vld [vmem:[#allocation13 + $0x68] sm:$0xff]  ;;  %v22595_v61 = vpack.c.bf16 %v7837_v44, %v7836_v20 }
0x3ed4   : > { %18355 = vmatprep.subr.bf16.mxu1 %v23868_v19  ;;  %v22581_v24 = vpack.c.bf16 %v7677_v10, %v7676_v13  ;;  %v7853_v13 = vld [vmem:[#allocation19 + $0x8] sm:$0xff]  ;;  %v7840_v20 = vld [vmem:[#allocation18 + $0x20] sm:$0xff] }
0x3ed5   : > { %v7841_v44 = vld [vmem:[#allocation18 + $0x28] sm:$0xff] }
0x3ed6   : > { %18330 = vmatpush3.bf16.msra.mxu0 %v22581_v24 }
0x3ed7   : > { %18357 = vmatpush3.bf16.msra.mxu1 %v22583_v17  ;;  %18331 = vmatprep.subr.bf16.mxu0 %v23868_v19  ;;  %v22593_v17 = vpack.c.bf16 %v7853_v13, %v7852_v6  ;;  %v7856_v13 = vld [vmem:[#allocation19 + $0x20] sm:$0xff] }
0x3ed8   : > { %18390 = vmatprep.subr.bf16.mxu1 %v23868_v19 }
0x3eda   : > { %18333 = vmatpush3.bf16.msra.mxu0 %v22588_v23 }
0x3edb   : > { %18358 = vmatprep.subr.bf16.mxu0 %v23868_v19 }
0x3f60   : > { %v7653_v37 = vpop.xlane.xlu1 %7652 }
0x3f61   : > { %19511 = vrcp.f32 %v7653_v37 }
0x3f6b   : > { %v19512_v5 = vpop.eup %19511 }
0x3f6c   : > { %v7655_v18 = vmul.f32 %v19512_v5, %v7653_v37 }
0x3f6e   : > { %v7656_v25 = vsub.f32 2.0, %v7655_v18  ;;  %v7855_v18 = vld [vmem:[#allocation19 + $0x18] sm:$0xff] }
0x3f70   : > { %v7657_v10 = vmul.f32 %v19512_v5, %v7656_v25  ;;  %v7854_v5 = vld [vmem:[#allocation19 + $0x10] sm:$0xff]  ;;  %v7839_v25 = vld [vmem:[#allocation18 + $0x18] sm:$0xff] }
0x3f71   : > { %v22612_v6 = vpack.c.bf16 %v7855_v18, %v7854_v5  ;;  %v7859_v5 = vld [vmem:[#allocation19 + $0x38] sm:$0xff]  ;;  %v7842_v18 = vld [vmem:[#allocation18 + $0x30] sm:$0xff] }
0x3f72   : > { %v7659_v27 = vrot.slane %v7657_v10, 1  ;;  %v7662_v9 = vmul.f32 %v19510_v8, %v7657_v10  ;;  %v7838_v8 = vld [vmem:[#allocation18 + $0x10] sm:$0xff]  ;;  %v7857_v10 = vld [vmem:[#allocation19 + $0x28] sm:$0xff] }
0x3f74   : > { %16202 = vmatmul.mubr.f32.vlgmr.msra.gmra.mrb[76].mxu0 %v7662_v9  ;;  %v7663_v23 = vmul.f32 %v22552_v45, %v7659_v27  ;;  %v22624_v27 = vpack.c.bf16 %v7857_v10, %v7856_v13  ;;  %v7860_v13 = vld [vmem:[#allocation19 + $0x40] sm:$0xff]  ;;  %v7861_v10 = vld [vmem:[#allocation19 + $0x48] sm:$0xff] }
0x3f75   : > { %18361 = vmatpush3.bf16.xpose.msk.msra.mxu0 %vm20910_vm7, %v22593_v17  ;;  %16271 = vmatprep.mubr.msk.f32.mxu0 %vm20219_vm4, %v23867_v4 }
0x3f76   : > { %16237 = vmatmul.mubr.f32.vlgmr.msra.gmra.mrb[46].mxu1 %v7663_v23  ;;  %v12507_v37 = vrot.slane %v7663_v23, 7  ;;  %18362 = vmatprep.subr.bf16.mxu0 %v23868_v19  ;;  %v22614_v23 = vpack.c.bf16 %v7839_v25, %v7838_v8 }
0x3f77   : > { %18393 = vmatpush3.bf16.xpose.msk.msra.mxu1 %vm20910_vm7, %v22595_v61  ;;  %16306 = vmatprep.mubr.msk.f32.mxu1 %vm20219_vm4, %v23867_v4 }
0x3f78   : > { %v12508_v45 = vsel %vm1826_vm8, %v12507_v37, %v7662_v9  ;;  %18394 = vmatprep.subr.bf16.mxu1 %v23868_v19  ;;  %v22626_v9 = vpack.c.bf16 %v7841_v44, %v7840_v20  ;;  %v7858_v37 = vld [vmem:[#allocation19 + $0x30] sm:$0xff]  ;;  %v7844_v20 = vld [vmem:[#allocation18 + $0x40] sm:$0xff]  ;;  %v7845_v44 = vld [vmem:[#allocation18 + $0x48] sm:$0xff] }
0x3f79   : > { %12527 = vst [vmem:[%s20797_s28 + $0x8] sm:$0x3] %v12508_v45  ;;  %v7843_v45 = vld [vmem:[#allocation18 + $0x38] sm:$0xff]  ;;  %v22636_v8 = vpack.c.bf16 %v7859_v5, %v7858_v37  ;;  %v22648_v37 = vpack.c.bf16 %v7861_v10, %v7860_v13  ;;  %v22650_v5 = vpack.c.bf16 %v7845_v44, %v7844_v20  ;;  %v7864_v20 = vld [vmem:[#allocation19 + $0x60] sm:$0xff]  ;;  %v7865_v44 = vld [vmem:[#allocation19 + $0x68] sm:$0xff] }
0x3f7a   : > { %v22638_v25 = vpack.c.bf16 %v7843_v45, %v7842_v18  ;;  %v7862_v18 = vld [vmem:[#allocation19 + $0x50] sm:$0xff]  ;;  %v7863_v45 = vld [vmem:[#allocation19 + $0x58] sm:$0xff] }
0x3f7b   : > { %23955 = vst [vmem:[#allocation65_spill] sm:$0xff] %v22636_v8  ;;  %23957 = vst [vmem:[#allocation67_spill] sm:$0xff] %v22648_v37  ;;  %v22660_v13 = vpack.c.bf16 %v7863_v45, %v7862_v18  ;;  %v22672_v18 = vpack.c.bf16 %v7865_v44, %v7864_v20  ;;  %v7867_v45 = vld [vmem:[#allocation19 + $0x78] sm:$0xff] }
0x3f7c   : > { %23956 = vst [vmem:[#allocation66_spill] sm:$0xff] %v22638_v25  ;;  %23958 = vst [vmem:[#allocation68_spill] sm:$0xff] %v22650_v5 }
0x3f7d   : > { %18365 = vmatpush3.bf16.xpose.msk.msra.mxu0 %vm20910_vm7, %v22612_v6  ;;  %23959 = vst [vmem:[#allocation69_spill] sm:$0xff] %v22660_v13 }
0x3f7e   : > { %18366 = vmatprep.subr.bf16.mxu0 %v23868_v19 }
0x3f7f   : > { %18397 = vmatpush3.bf16.xpose.msk.msra.mxu1 %vm20910_vm7, %v22614_v23 }
0x3f80   : > { %18398 = vmatprep.subr.bf16.mxu1 %v23868_v19 }
0x3f85   : > { %18369 = vmatpush3.bf16.xpose.msk.msra.mxu0 %vm20910_vm7, %v22624_v27 }
0x3f86   : > { %18370 = vmatprep.subr.bf16.mxu0 %v23868_v19 }
0x3f87   : > { %18401 = vmatpush3.bf16.xpose.msk.msra.mxu1 %vm20910_vm7, %v22626_v9 }
0x3f88   : > { %18402 = vmatprep.subr.bf16.mxu1 %v23868_v19 }
0x3f8d   : > { %18373 = vmatpush3.bf16.xpose.msk.msra.mxu0 %vm20910_vm7, %v22636_v8  ;;  %v7847_v8 = vld [vmem:[#allocation18 + $0x58] sm:$0xff] }
0x3f8e   : > { %18374 = vmatprep.subr.bf16.mxu0 %v23868_v19 }
0x3f8f   : > { %18405 = vmatpush3.bf16.xpose.msk.msra.mxu1 %vm20910_vm7, %v22638_v25  ;;  %v7846_v25 = vld [vmem:[#allocation18 + $0x50] sm:$0xff] }
0x3f90   : > { %18406 = vmatprep.subr.bf16.mxu1 %v23868_v19  ;;  %v22662_v10 = vpack.c.bf16 %v7847_v8, %v7846_v25  ;;  %v7866_v25 = vld [vmem:[#allocation19 + $0x70] sm:$0xff] }
0x3f91   : > { %v22684_v20 = vpack.c.bf16 %v7867_v45, %v7866_v25 }
0x3f92   : > { %23960 = vst [vmem:[#allocation70_spill] sm:$0xff] %v22662_v10 }
0x3f93   : > { %23961 = vst [vmem:[#allocation71_spill] sm:$0xff] %v22684_v20 }
0x3f95   : > { %18377 = vmatpush3.bf16.xpose.msk.msra.mxu0 %vm20910_vm7, %v22648_v37  ;;  %v7849_v37 = vld [vmem:[#allocation18 + $0x68] sm:$0xff] }
0x3f96   : > { %18378 = vmatprep.subr.bf16.mxu0 %v23868_v19 }
0x3f97   : > { %18409 = vmatpush3.bf16.xpose.msk.msra.mxu1 %vm20910_vm7, %v22650_v5  ;;  %v7848_v5 = vld [vmem:[#allocation18 + $0x60] sm:$0xff] }
0x3f98   : > { %18410 = vmatprep.subr.bf16.mxu1 %v23868_v19  ;;  %v22674_v8 = vpack.c.bf16 %v7849_v37, %v7848_v5  ;;  %v22696_v5 = vpop.permute.xlu0 %7992 }
0x3f9d   : > { %18381 = vmatpush3.bf16.xpose.msk.msra.mxu0 %vm20910_vm7, %v22660_v13  ;;  %v7851_v13 = vld [vmem:[#allocation18 + $0x78] sm:$0xff] }
0x3f9e   : > { %18382 = vmatprep.subr.bf16.mxu0 %v23868_v19 }
0x3f9f   : > { %18413 = vmatpush3.bf16.xpose.msk.msra.mxu1 %vm20910_vm7, %v22662_v10  ;;  %v7850_v10 = vld [vmem:[#allocation18 + $0x70] sm:$0xff] }
0x3fa0   : > { %18414 = vmatprep.subr.bf16.mxu1 %v23868_v19  ;;  %v22686_v37 = vpack.c.bf16 %v7851_v13, %v7850_v10 }
0x3fa2   : > { %23962 = vst [vmem:[#allocation72_spill] sm:$0xff] %v22686_v37 }
0x3fa5   : > { %18385 = vmatpush3.bf16.xpose.msk.msra.mxu0 %vm20910_vm7, %v22672_v18 }
0x3fa6   : > { %18386 = vmatprep.subr.bf16.mxu0 %v23868_v19 }
0x3fa7   : > { %18417 = vmatpush3.bf16.xpose.msk.msra.mxu1 %vm20910_vm7, %v22674_v8 }
0x3fa8   : > { %18418 = vmatprep.subr.bf16.mxu1 %v23868_v19 }
0x3fad   : > { %18389 = vmatpush3.bf16.xpose.msk.msra.mxu0 %vm20910_vm7, %v22684_v20 }
0x3fae   : > { %18422 = vmatprep.subr.bf16.mxu0 %v23868_v19 }
0x3faf   : > { %18421 = vmatpush3.bf16.xpose.msk.msra.mxu1 %vm20910_vm7, %v22686_v37 }
0x3fb0   : > { %18428 = vmatprep.subr.bf16.mxu1 %v23868_v19 }
0x3fb6   : > { %16307 = vmatmul.mubr.msk.f32.vlgmr.msra.gmra.mrb[48].mxu1 %vm867_vm5, %v22696_v5 }
0x3fb7   : > { %16352 = vmatprep.mubr.msk.f32.mxu1 %vm20219_vm4, %v23867_v4 }
0x4047   : > { %v7762_v13 = vpop.f32.mrb[76].mxu0 }
0x4048   : > { %v16203_v10 = vpop.f32.mrb[77].mxu0 }
0x4049   : > { %v7832_v44 = vpop.f32.mrb[46].mxu1  ;;  %v8133_v10 = vld [vmem:[#allocation16 + $0x28] sm:$0xff] }
0x404a   : > { %v7870_v25 = vrot.slane %v7832_v44, 7  ;;  %v16238_v45 = vpop.f32.mrb[47].mxu1  ;;  %v8134_v44 = vld [vmem:[#allocation16 + $0x30] sm:$0xff] }
0x404c   : > { %v7871_v20 = vsel %vm1826_vm8, %v7870_v25, %v7762_v13  ;;  %v8135_v25 = vld [vmem:[#allocation16 + $0x38] sm:$0xff] }
0x404d   : > { %16272 = vmatmul.mubr.msk.f32.vlgmr.msra.gmra.mrb[78].mxu0 %vm867_vm5, %v7871_v20  ;;  %v22740_v45 = vpack.c.bf16 %v8135_v25, %v8134_v44  ;;  %v8141_v44 = vld [vmem:[#allocation16 + $0x68] sm:$0xff] }
0x404e   : > { %18424 = vmatpush3.bf16.msra.mxu0 %v22304_v35  ;;  %16317 = vmatprep.mubr.msk.f32.mxu0 %vm20219_vm4, %v23867_v4 }
0x404f   : > { %18425 = vmatprep.subr.bf16.mxu0 %v23868_v19  ;;  %23966 = vst [vmem:[#allocation76_spill] sm:$0xff] %v22740_v45 }
0x4052   : > { %18427 = vmatpush3.bf16.msra.mxu0 %v22309_v55 }
0x4053   : > { %18452 = vmatprep.subr.bf16.mxu0 %v23868_v19 }
0x4055   : > { %16318 = vmatmul.mubr.msk.f32.vlgmr.msra.gmra.mrb[80].mxu0 %vm867_vm5, %v7871_v20  ;;  %v8131_v20 = vld [vmem:[#allocation16 + $0x18] sm:$0xff] }
0x4056   : > { %18454 = vmatpush3.bf16.msra.mxu0 %v22315_v41  ;;  %16363 = vmatprep.mubr.msk.f32.mxu0 %vm20219_vm4, %v23867_v4  ;;  %v8128_v41 = vld [vmem:[#allocation16] sm:$0xff] }
0x4057   : > { %18455 = vmatprep.subr.bf16.mxu0 %v23868_v19 }
0x405a   : > { %18457 = vmatpush3.bf16.msra.mxu0 %v22320_v62  ;;  %v8129_v62 = vld [vmem:[#allocation16 + $0x8] sm:$0xff] }
0x405b   : > { %18458 = vmatprep.subr.bf16.mxu0 %v23868_v19 }
0x405d   : > { %16364 = vmatmul.mubr.msk.f32.vlgmr.msra.gmra.mrb[82].mxu0 %vm867_vm5, %v22368_v33  ;;  %v22729_v33 = vpack.c.bf16 %v8129_v62, %v8128_v41  ;;  %v8137_v41 = vld [vmem:[#allocation16 + $0x48] sm:$0xff] }
0x405e   : > { %18460 = vmatpush3.bf16.msra.mxu0 %v22326_v22  ;;  %16374 = vmatprep.mubr.msk.f32.mxu0 %vm20219_vm4, %v23867_v4  ;;  %v8130_v22 = vld [vmem:[#allocation16 + $0x10] sm:$0xff] }
0x405f   : > { %18461 = vmatprep.subr.bf16.mxu0 %v23868_v19  ;;  %23963 = vst [vmem:[#allocation73_spill] sm:$0xff] %v22729_v33  ;;  %18430 = vmatpush3.bf16.msra.mxu1 %v22729_v33  ;;  %v22732_v13 = vpack.c.bf16 %v8131_v20, %v8130_v22  ;;  %v8138_v22 = vld [vmem:[#allocation16 + $0x50] sm:$0xff]  ;;  %v8139_v20 = vld [vmem:[#allocation16 + $0x58] sm:$0xff] }
0x4060   : > { %18431 = vmatprep.subr.bf16.mxu1 %v23868_v19 }
0x4061   : > { %23964 = vst [vmem:[#allocation74_spill] sm:$0xff] %v22732_v13 }
0x4062   : > { %18463 = vmatpush3.bf16.msra.mxu0 %v22332_v16  ;;  %v8132_v16 = vld [vmem:[#allocation16 + $0x20] sm:$0xff] }
0x4063   : > { %18464 = vmatprep.subr.bf16.mxu0 %v23868_v19  ;;  %18433 = vmatpush3.bf16.msra.mxu1 %v22732_v13 }
0x4064   : > { %18434 = vmatprep.subr.bf16.mxu1 %v23868_v19 }
0x4065   : > { %16375 = vmatmul.mubr.msk.f32.vlgmr.msra.gmra.mrb[84].mxu0 %vm867_vm5, %v22393_v52  ;;  %v22736_v52 = vpack.c.bf16 %v8133_v10, %v8132_v16  ;;  %v22748_v16 = vpack.c.bf16 %v8139_v20, %v8138_v22  ;;  %v8140_v10 = vld [vmem:[#allocation16 + $0x60] sm:$0xff] }
0x4066   : > { %16385 = vmatprep.mubr.msk.f32.mxu0 %vm20219_vm4, %v23867_v4  ;;  %v22752_v25 = vpack.c.bf16 %v8141_v44, %v8140_v10  ;;  %v22761_v20 = vld [vmem:[#allocation34] ss:$0 sm:$0xff] }
0x4067   : > { %23965 = vst [vmem:[#allocation75_spill] sm:$0xff] %v22736_v52  ;;  %18436 = vmatpush3.bf16.msra.mxu1 %v22736_v52  ;;  %23968 = vst [vmem:[#allocation78_spill] sm:$0xff] %v22748_v16 }
0x4068   : > { %18437 = vmatprep.subr.bf16.mxu1 %v23868_v19  ;;  %23969 = vst [vmem:[#allocation79_spill] sm:$0xff] %v22752_v25  ;;  %23971 = vst [vmem:[#allocation81_spill] sm:$0xff] %v22761_v20 }
0x406b   : > { %18439 = vmatpush3.bf16.msra.mxu1 %v22740_v45 }
0x406c   : > { %18440 = vmatprep.subr.bf16.mxu1 %v23868_v19 }
0x4089   : > { %v8110_v35 = vpop.f32.mrb[48].mxu1 }
0x408a   : > { %v16308_v55 = vpop.f32.mrb[49].mxu1 }
0x408b   : > { %v8136_v55 = vld [vmem:[#allocation16 + $0x40] sm:$0xff] }
0x408c   : > { %v22744_v62 = vpack.c.bf16 %v8137_v41, %v8136_v55  ;;  %v8142_v55 = vld [vmem:[#allocation16 + $0x70] sm:$0xff]  ;;  %v8143_v41 = vld [vmem:[#allocation16 + $0x78] sm:$0xff] }
0x408d   : > { %v22756_v45 = vpack.c.bf16 %v8143_v41, %v8142_v55 }
0x408e   : > { %23967 = vst [vmem:[#allocation77_spill] sm:$0xff] %v22744_v62  ;;  %18442 = vmatpush3.bf16.msra.mxu1 %v22744_v62 }
0x408f   : > { %18443 = vmatprep.subr.bf16.mxu1 %v23868_v19  ;;  %23970 = vst [vmem:[#allocation80_spill] sm:$0xff] %v22756_v45 }
0x4092   : > { %18445 = vmatpush3.bf16.msra.mxu1 %v22748_v16 }
0x4093   : > { %18446 = vmatprep.subr.bf16.mxu1 %v23868_v19 }
0x4096   : > { %18448 = vmatpush3.bf16.msra.mxu1 %v22752_v25 }
0x4097   : > { %18449 = vmatprep.subr.bf16.mxu1 %v23868_v19 }
0x409a   : > { %18451 = vmatpush3.bf16.msra.mxu1 %v22756_v45 }
0x409b   : > { %18476 = vmatprep.subr.bf16.mxu1 %v23868_v19 }
0x4120   : > { %v7988_v22 = vpop.f32.mrb[78].mxu0 }
0x4121   : > { %v8111_v16 = vadd.f32 %v8110_v35, %v7988_v22  ;;  %v16273_v10 = vpop.f32.mrb[79].mxu0 }
0x4122   : > { %v22771_v10 = vld [vmem:[#allocation24] ss:$0 sm:$0xff] }
0x4123   : > { %v8121_v44 = vadd.f32 %v22761_v20, %v8111_v16 }
0x4125   : > { %12479 = vst [vmem:[%s20795_s19 + $0x8] sm:$0x3] %v8121_v44  ;;  %v8122_v62 = vsel %vm840_vm3, %v8121_v44, -inf }
0x4126   : > { %8123 = vmax.xlane.f32.xlu1 %v8122_v62 }
0x4128   : > { %v8214_v25 = vpop.f32.mrb[80].mxu0 }
0x4129   : > { %v16319_v55 = vpop.f32.mrb[81].mxu0 }
0x4130   : > { %v8358_v41 = vpop.f32.mrb[82].mxu0 }
0x4131   : > { %v16365_v52 = vpop.f32.mrb[83].mxu0 }
0x4138   : > { %v22766_v13 = vpop.f32.mrb[84].mxu0 }
0x4139   : > { %v16376_v45 = vpop.f32.mrb[85].mxu0 }
0x41b3   : > { %v8124_v33 = vpop.xlane.xlu1 %8123 }
0x41b4   : > { %vm8125_vm13 = vcmp.eq.f32.partialorder %v8121_v44, %v8124_v33 }
0x41b5   : > { %16353 = vmatmul.mubr.msk.f32.vlgmr.msra.gmra.mrb[50].mxu1 %vm8125_vm13, %v23951_v0 }
0x41b6   : > { %16407 = vmatprep.mubr.msk.f32.mxu1 %vm20219_vm4, %v23867_v4 }
0x4288   : > { %v8284_v35 = vpop.f32.mrb[50].mxu1 }
0x4289   : > { %v8285_v16 = vadd.f32 %v8284_v35, %v8214_v25  ;;  %v16354_v22 = vpop.f32.mrb[51].mxu1 }
0x428a   : > { %v8396_v22 = vld [vmem:[#allocation25 + $0x8] sm:$0xff] }
0x428b   : > { %v8362_v62 = vadd.f32 %v8358_v41, %v8285_v16  ;;  %v8395_v16 = vld [vmem:[#allocation25] sm:$0xff] }
0x428d   : > { %v8370_v55 = vadd.f32 %v22771_v10, %v8362_v62  ;;  %v8397_v62 = vld [vmem:[#allocation25 + $0x10] sm:$0xff] }
0x428f   : > { %19513 = vtanh.f32 %v8370_v55  ;;  %v13308_v45 = vmul.f32 -1.442695, %v8370_v55  ;;  %v22780_v55 = vpack.c.bf16 %v8396_v22, %v8395_v16  ;;  %v8580_v22 = vld [vmem:[#allocation30] sm:$0xff] }
0x4291   : > { %19515 = vpow2.f32 %v13308_v45  ;;  %18466 = vmatpush3.bf16.msra.mxu0 %v22780_v55 }
0x4292   : > { %18467 = vmatprep.subr.bf16.mxu0 %v23868_v19 }
0x4299   : > { %v19514_v52 = vpop.eup %19513 }
0x429a   : > { %8380 = vrot.lane.b32.xlu1 %v19514_v52, %s23829_s1  ;;  %v8398_v52 = vld [vmem:[#allocation25 + $0x18] sm:$0xff] }
0x429b   : > { %v19516_v33 = vpop.eup %19515  ;;  %v22783_v45 = vpack.c.bf16 %v8398_v52, %v8397_v62  ;;  %v8581_v62 = vld [vmem:[#allocation30 + $0x8] sm:$0xff]  ;;  %v8582_v52 = vld [vmem:[#allocation30 + $0x10] sm:$0xff] }
0x429c   : > { %v8374_v44 = vadd.f32 1.0, %v19516_v33 }
0x429d   : > { %18469 = vmatpush3.bf16.msra.mxu0 %v22783_v45 }
0x429e   : > { %19517 = vrcp.f32 %v8374_v44  ;;  %18470 = vmatprep.subr.bf16.mxu0 %v23868_v19 }
0x42a8   : > { %v19518_v0 = vpop.eup %19517 }
0x42a9   : > { %v8378_v25 = vmul.f32 %v19518_v0, %v22361_v1 }
0x430c   : > { %v8381_v20 = vpop.permute.xlu1 %8380 }
0x430d   : > { %v8383_v37 = vmul.f32 %v19518_v0, %v8381_v20 }
0x430f   : > { %8385 = vrot.lane.b32.xlu0 %v8383_v37, %s23829_s1 }
0x4381   : > { %v8386_v35 = vpop.permute.xlu0 %8385 }
0x4382   : > { %v22777_v41 = vadd.f32 %v8386_v35, %v8378_v25 }
0x4384   : > { %19519 = vtanh.f32 %v22777_v41 }
0x438e   : > { %v19520_v1 = vpop.eup %19519 }
0x438f   : > { %8391 = vrot.lane.b32.xlu0 %v19520_v1, %s23829_s1  ;;  %v22846_v1 = vpack.c.bf16 %v8581_v62, %v8580_v22 }
0x4391   : > { %18478 = vmatpush3.bf16.msra.mxu1 %v22846_v1 }
0x4392   : > { %18479 = vmatprep.subr.bf16.mxu1 %v23868_v19 }
0x4401   : > { %v8392_v37 = vpop.permute.xlu0 %8391 }
0x4402   : > { %v8394_v20 = vmul.f32 %v19518_v0, %v8392_v37  ;;  %v8583_v37 = vld [vmem:[#allocation30 + $0x18] sm:$0xff] }
0x4404   : > { %8474 = vrot.lane.b32.xlu1 %v8394_v20, %s20223_s29  ;;  %v22849_v20 = vpack.c.bf16 %v8583_v37, %v8582_v52 }
0x4406   : > { %18481 = vmatpush3.bf16.msra.mxu1 %v22849_v20 }
0x4407   : > { %18514 = vmatprep.subr.bf16.mxu1 %v23868_v19 }
0x4476   : > { %v22790_v33 = vpop.permute.xlu1 %8474 }
0x4477   : > { %16386 = vmatmul.mubr.msk.f32.vlgmr.msra.gmra.mrb[86].mxu0 %vm867_vm5, %v22790_v33 }
0x4478   : > { %18472 = vmatpush3.bf16.msra.mxu0 %v22366_v14  ;;  %16396 = vmatprep.mubr.msk.f32.mxu0 %vm20219_vm4, %v23867_v4  ;;  %v22836_v14 = vld [vmem:[#allocation28] ss:$0 sm:$0xff] }
0x4479   : > { %18473 = vmatprep.subr.bf16.mxu0 %v23868_v19 }
0x447c   : > { %18475 = vmatpush3.bf16.msra.mxu0 %v22373_v57 }
0x447d   : > { %18482 = vmatprep.subr.bf16.mxu0 %v23868_v19 }
0x447f   : > { %16397 = vmatmul.mubr.msk.f32.vlgmr.msra.gmra.mrb[88].mxu0 %vm867_vm5, %v22696_v5 }
0x4480   : > { %16442 = vmatprep.mubr.msk.f32.mxu0 %vm20219_vm4, %v23867_v4 }
0x4485   : > { %18485 = vmatpush3.bf16.xpose.msk.msra.mxu0 %vm20910_vm7, %v22410_v50 }
0x4486   : > { %18486 = vmatprep.subr.bf16.mxu0 %v23868_v19 }
0x448d   : > { %18489 = vmatpush3.bf16.xpose.msk.msra.mxu0 %vm20910_vm7, %v22423_v53 }
0x448e   : > { %18490 = vmatprep.subr.bf16.mxu0 %v23868_v19 }
0x4495   : > { %18493 = vmatpush3.bf16.xpose.msk.msra.mxu0 %vm20910_vm7, %v22435_v47 }
0x4496   : > { %18494 = vmatprep.subr.bf16.mxu0 %v23868_v19 }
0x449d   : > { %18497 = vmatpush3.bf16.xpose.msk.msra.mxu0 %vm20910_vm7, %v22447_v48 }
0x449e   : > { %18498 = vmatprep.subr.bf16.mxu0 %v23868_v19 }
0x44a5   : > { %18501 = vmatpush3.bf16.xpose.msk.msra.mxu0 %vm20910_vm7, %v22459_v21 }
0x44a6   : > { %18502 = vmatprep.subr.bf16.mxu0 %v23868_v19 }
0x44ad   : > { %18505 = vmatpush3.bf16.xpose.msk.msra.mxu0 %vm20910_vm7, %v22471_v42 }
0x44ae   : > { %18506 = vmatprep.subr.bf16.mxu0 %v23868_v19 }
0x44b5   : > { %18509 = vmatpush3.bf16.xpose.msk.msra.mxu0 %vm20910_vm7, %v22483_v51 }
0x44b6   : > { %18510 = vmatprep.subr.bf16.mxu0 %v23868_v19 }
0x44bd   : > { %18513 = vmatpush3.bf16.xpose.msk.msra.mxu0 %vm20910_vm7, %v22495_v38 }
0x44be   : > { %18546 = vmatprep.subr.bf16.mxu0 %v23868_v19 }
0x454a   : > { %v8544_v0 = vpop.f32.mrb[86].mxu0 }
0x454b   : > { %v8545_v57 = vadd.f32 %v8544_v0, %v22766_v13  ;;  %v16387_v50 = vpop.f32.mrb[87].mxu0 }
0x454d   : > { %v8555_v53 = vadd.f32 %v22836_v14, %v8545_v57 }
0x454f   : > { %19521 = vtanh.f32 %v8555_v53  ;;  %v13312_v42 = vmul.f32 -1.442695, %v8555_v53 }
0x4551   : > { %19523 = vpow2.f32 %v13312_v42 }
0x4552   : > { %v8654_v47 = vpop.f32.mrb[88].mxu0 }
0x4553   : > { %v16398_v48 = vpop.f32.mrb[89].mxu0 }
0x4559   : > { %v19522_v21 = vpop.eup %19521 }
0x455a   : > { %8565 = vrot.lane.b32.xlu0 %v19522_v21, %s23829_s1 }
0x455b   : > { %v19524_v51 = vpop.eup %19523 }
0x455c   : > { %v8559_v38 = vadd.f32 1.0, %v19524_v51 }
0x455e   : > { %19525 = vrcp.f32 %v8559_v38 }
0x4568   : > { %v19526_v5 = vpop.eup %19525 }
0x4569   : > { %v8563_v13 = vmul.f32 %v19526_v5, %v22388_v49 }
0x45cc   : > { %v8566_v44 = vpop.permute.xlu0 %8565 }
0x45cd   : > { %v8568_v25 = vmul.f32 %v19526_v5, %v8566_v44 }
0x45cf   : > { %8570 = vrot.lane.b32.xlu1 %v8568_v25, %s23829_s1 }
0x4641   : > { %v8571_v35 = vpop.permute.xlu1 %8570 }
0x4642   : > { %v22843_v16 = vadd.f32 %v8571_v35, %v8563_v13 }
0x4644   : > { %19527 = vtanh.f32 %v22843_v16 }
0x464e   : > { %v19528_v49 = vpop.eup %19527 }
0x464f   : > { %8576 = vrot.lane.b32.xlu0 %v19528_v49, %s23829_s1 }
0x46c1   : > { %v8577_v0 = vpop.permute.xlu0 %8576 }
0x46c2   : > { %v8579_v57 = vmul.f32 %v19526_v5, %v8577_v0 }
0x46c4   : > { %8659 = vrot.lane.b32.xlu1 %v8579_v57, %s20223_s29 }
0x4736   : > { %v22856_v50 = vpop.permute.xlu1 %8659 }
0x4737   : > { %16408 = vmatmul.mubr.msk.f32.vlgmr.msra.gmra.mrb[52].mxu1 %vm867_vm5, %v22856_v50 }
0x4738   : > { %18517 = vmatpush3.bf16.xpose.msk.msra.mxu1 %vm20910_vm7, %v22412_v58  ;;  %16477 = vmatprep.mubr.msk.f32.mxu1 %vm20219_vm4, %v23867_v4 }
0x4739   : > { %18518 = vmatprep.subr.bf16.mxu1 %v23868_v19 }
0x4740   : > { %18521 = vmatpush3.bf16.xpose.msk.msra.mxu1 %vm20910_vm7, %v22425_v34  ;;  %v22894_v34 = vld [vmem:[#allocation33] ss:$0 sm:$0xff] }
0x4741   : > { %18522 = vmatprep.subr.bf16.mxu1 %v23868_v19 }
0x4748   : > { %18525 = vmatpush3.bf16.xpose.msk.msra.mxu1 %vm20910_vm7, %v22437_v7 }
0x4749   : > { %18526 = vmatprep.subr.bf16.mxu1 %v23868_v19 }
0x4750   : > { %18529 = vmatpush3.bf16.xpose.msk.msra.mxu1 %vm20910_vm7, %v22449_v43 }
0x4751   : > { %18530 = vmatprep.subr.bf16.mxu1 %v23868_v19 }
0x4758   : > { %18533 = vmatpush3.bf16.xpose.msk.msra.mxu1 %vm20910_vm7, %v22461_v56 }
0x4759   : > { %18534 = vmatprep.subr.bf16.mxu1 %v23868_v19 }
0x4760   : > { %18537 = vmatpush3.bf16.xpose.msk.msra.mxu1 %vm20910_vm7, %v22473_v39 }
0x4761   : > { %18538 = vmatprep.subr.bf16.mxu1 %v23868_v19 }
0x4768   : > { %18541 = vmatpush3.bf16.xpose.msk.msra.mxu1 %vm20910_vm7, %v22485_v59 }
0x4769   : > { %18542 = vmatprep.subr.bf16.mxu1 %v23868_v19 }
0x4770   : > { %18545 = vmatpush3.bf16.xpose.msk.msra.mxu1 %vm20910_vm7, %v22497_v28 }
0x4771   : > { %18570 = vmatprep.subr.bf16.mxu1 %v23868_v19 }
0x480a   : > { %v8729_v58 = vpop.f32.mrb[52].mxu1 }
0x480b   : > { %v8730_v7 = vadd.f32 %v8729_v58, %v8654_v47  ;;  %v16409_v43 = vpop.f32.mrb[53].mxu1 }
0x480d   : > { %v8740_v56 = vadd.f32 %v22894_v34, %v8730_v7 }
0x480f   : > { %19529 = vtanh.f32 %v8740_v56  ;;  %v13316_v59 = vmul.f32 -1.442695, %v8740_v56 }
0x4811   : > { %19531 = vpow2.f32 %v13316_v59 }
0x4819   : > { %v19530_v39 = vpop.eup %19529 }
0x481a   : > { %8750 = vrot.lane.b32.xlu0 %v19530_v39, %s23829_s1 }
0x481b   : > { %v19532_v53 = vpop.eup %19531 }
0x481c   : > { %v8744_v48 = vadd.f32 1.0, %v19532_v53 }
0x481e   : > { %19533 = vrcp.f32 %v8744_v48 }
0x4828   : > { %v19534_v21 = vpop.eup %19533 }
0x4829   : > { %v8748_v51 = vmul.f32 %v19534_v21, %v22407_v2 }
0x488c   : > { %v8751_v28 = vpop.permute.xlu0 %8750 }
0x488d   : > { %v8753_v42 = vmul.f32 %v19534_v21, %v8751_v28 }
0x488f   : > { %8755 = vrot.lane.b32.xlu1 %v8753_v42, %s23829_s1 }
0x4901   : > { %v8756_v47 = vpop.permute.xlu1 %8755 }
0x4902   : > { %v22900_v38 = vadd.f32 %v8756_v47, %v8748_v51 }
0x4904   : > { %19535 = vtanh.f32 %v22900_v38 }
0x490e   : > { %v19536_v5 = vpop.eup %19535 }
0x490f   : > { %8761 = vrot.lane.b32.xlu0 %v19536_v5, %s23829_s1 }
0x4981   : > { %v8762_v44 = vpop.permute.xlu0 %8761 }
0x4982   : > { %v22904_v25 = vmul.f32 %v19534_v21, %v8762_v44 }
0x4984   : > { %v8772_v13 = vrot.slane %v22904_v25, %v21011_v46 }
0x4986   : > { %v8773_v35 = vcombine.high %v8772_v13, %v8772_v13  ;;  %v8780_v22 = vrot.slane %v8772_v13, %v21011_v46 }
0x4988   : > { %v8787_v62 = vrot.slane %v8773_v35, %v21011_v46  ;;  %v8823_v2 = vrot.slane %v8780_v22, %v21015_v54 }
0x498a   : > { %8824 = vrot.lane.b32.xlu0 %v8823_v2, %s20223_s29  ;;  %v8949_v52 = vrot.slane %v8787_v62, %v21015_v54  ;;  %v23981_v2 = vld [vmem:[#allocation71_spill] sm:$0xff] }
0x498c   : > { %8950 = vrot.lane.b32.xlu1 %v8949_v52, %s20223_s29  ;;  %v23982_v52 = vld [vmem:[#allocation72_spill] sm:$0xff] }
0x49fc   : > { %v8825_v37 = vpop.permute.xlu0 %8824 }
0x49fd   : > { %16443 = vmatmul.mubr.msk.f32.vlgmr.msra.gmra.mrb[90].mxu0 %vm867_vm5, %v8825_v37  ;;  %v23984_v37 = vld [vmem:[#allocation74_spill] sm:$0xff] }
0x49fe   : > { %v8951_v49 = vpop.permute.xlu1 %8950  ;;  %18548 = vmatpush3.bf16.msra.mxu0 %v22526_v15  ;;  %16512 = vmatprep.mubr.msk.f32.mxu0 %vm20219_vm4, %v23867_v4  ;;  %v23973_v15 = vld [vmem:[#allocation63_spill] sm:$0xff] }
0x49ff   : > { %16478 = vmatmul.mubr.msk.f32.vlgmr.msra.gmra.mrb[54].mxu1 %vm867_vm5, %v8951_v49  ;;  %18549 = vmatprep.subr.bf16.mxu0 %v23868_v19  ;;  %v23985_v49 = vld [vmem:[#allocation75_spill] sm:$0xff] }
0x4a00   : > { %18572 = vmatpush3.bf16.msra.mxu1 %v22524_v63  ;;  %16547 = vmatprep.mubr.msk.f32.mxu1 %vm20219_vm4, %v23867_v4  ;;  %v23972_v63 = vld [vmem:[#allocation62_spill] sm:$0xff] }
0x4a01   : > { %18573 = vmatprep.subr.bf16.mxu1 %v23868_v19 }
0x4a02   : > { %18551 = vmatpush3.bf16.msra.mxu0 %v22533_v12  ;;  %v9072_v12 = vld [vmem:[#allocation15] sm:$0x3] }
0x4a03   : > { %18552 = vmatprep.subr.bf16.mxu0 %v23868_v19 }
0x4a04   : > { %18575 = vmatpush3.bf16.msra.mxu1 %v22529_v29  ;;  %v23974_v29 = vld [vmem:[#allocation64_spill] sm:$0xff] }
0x4a05   : > { %18576 = vmatprep.subr.bf16.mxu1 %v23868_v19 }
0x4a06   : > { %18554 = vmatpush3.bf16.msra.mxu0 %v22541_v26 }
0x4a07   : > { %18555 = vmatprep.subr.bf16.mxu0 %v23868_v19 }
0x4a08   : > { %18578 = vmatpush3.bf16.msra.mxu1 %v22537_v40  ;;  %v9074_v40 = vrot.slane %v9072_v12, 1 }
0x4a09   : > { %18579 = vmatprep.subr.bf16.mxu1 %v23868_v19 }
0x4a0a   : > { %18557 = vmatpush3.bf16.msra.mxu0 %v22557_v11 }
0x4a0b   : > { %18558 = vmatprep.subr.bf16.mxu0 %v23868_v19 }
0x4a0c   : > { %18581 = vmatpush3.bf16.msra.mxu1 %v22545_v3 }
0x4a0d   : > { %18582 = vmatprep.subr.bf16.mxu1 %v23868_v19 }
0x4a0e   : > { %18560 = vmatpush3.bf16.msra.mxu0 %v22565_v32 }
0x4a0f   : > { %18561 = vmatprep.subr.bf16.mxu0 %v23868_v19 }
0x4a10   : > { %18584 = vmatpush3.bf16.msra.mxu1 %v22559_v31 }
0x4a11   : > { %18585 = vmatprep.subr.bf16.mxu1 %v23868_v19 }
0x4a12   : > { %18563 = vmatpush3.bf16.msra.mxu0 %v22573_v60 }
0x4a13   : > { %18564 = vmatprep.subr.bf16.mxu0 %v23868_v19 }
0x4a14   : > { %18587 = vmatpush3.bf16.msra.mxu1 %v22567_v30 }
0x4a15   : > { %18588 = vmatprep.subr.bf16.mxu1 %v23868_v19 }
0x4a16   : > { %18566 = vmatpush3.bf16.msra.mxu0 %v22581_v24 }
0x4a17   : > { %18567 = vmatprep.subr.bf16.mxu0 %v23868_v19 }
0x4a18   : > { %18590 = vmatpush3.bf16.msra.mxu1 %v23972_v63  ;;  %v23986_v63 = vld [vmem:[#allocation76_spill] sm:$0xff] }
0x4a19   : > { %18591 = vmatprep.subr.bf16.mxu1 %v23868_v19 }
0x4a1a   : > { %18569 = vmatpush3.bf16.msra.mxu0 %v23973_v15  ;;  %v23987_v15 = vld [vmem:[#allocation77_spill] sm:$0xff] }
0x4a1b   : > { %18594 = vmatprep.subr.bf16.mxu0 %v23868_v19 }
0x4a1c   : > { %18593 = vmatpush3.bf16.msra.mxu1 %v23974_v29  ;;  %v23988_v29 = vld [vmem:[#allocation78_spill] sm:$0xff] }
0x4a1d   : > { %18626 = vmatprep.subr.bf16.mxu1 %v23868_v19 }
0x4ad0   : > { %v8942_v26 = vpop.f32.mrb[90].mxu0 }
0x4ad1   : > { %v16444_v3 = vpop.f32.mrb[91].mxu0  ;;  %v9077_v30 = vadd.f32 %v9072_v12, %v8942_v26  ;;  %v23989_v12 = vld [vmem:[#allocation79_spill] sm:$0xff] }
0x4ad2   : > { %v9068_v11 = vpop.f32.mrb[54].mxu1  ;;  %v9595_v3 = vld [vmem:[#allocation21] sm:$0xff] }
0x4ad3   : > { %v9078_v31 = vadd.f32 %v9074_v40, %v9068_v11  ;;  %v16479_v32 = vpop.f32.mrb[55].mxu1  ;;  %v23990_v40 = vld [vmem:[#allocation80_spill] sm:$0xff]  ;;  %v9596_v11 = vld [vmem:[#allocation21 + $0x8] sm:$0xff] }
0x4ad5   : > { %v9081_v60 = vrot.slane %v9078_v31, 7 }
0x4ad7   : > { %v9082_v24 = vsel %vm1826_vm8, %v9081_v60, %v9077_v30 }
0x4ad8   : > { %v9084_v0 = vsel %vm840_vm3, %v9082_v24, -inf  ;;  %v23050_v24 = vpack.c.bf16 %v9596_v11, %v9595_v3 }
0x4ad9   : > { %9085 = vmax.xlane.f32.xlu1 %v9084_v0  ;;  %v9597_v0 = vld [vmem:[#allocation21 + $0x10] sm:$0xff] }
0x4b66   : > { %v9086_v57 = vpop.xlane.xlu1 %9085 }
0x4b67   : > { %v9088_v58 = vrot.slane %v9086_v57, 1  ;;  %v9091_v7 = vsub.f32 %v9077_v30, %v9086_v57  ;;  %v9598_v57 = vld [vmem:[#allocation21 + $0x18] sm:$0xff] }
0x4b69   : > { %v9092_v43 = vsub.f32 %v9078_v31, %v9088_v58  ;;  %v9093_v56 = vmul.f32 1.442695, %v9091_v7  ;;  %v23055_v7 = vpack.c.bf16 %v9598_v57, %v9597_v0  ;;  %v10037_v57 = vld [vmem:[#allocation31 + $0x10] sm:$0xff] }
0x4b6b   : > { %v9095_v39 = vmul.f32 1.442695, %v9092_v43  ;;  %v9739_v43 = vld [vmem:[#allocation22] sm:$0xff] }
0x4b6d   : > { %19537 = vpow2.f32 %v9095_v39 }
0x4b6e   : > { %19539 = vpow2.f32 %v9093_v56  ;;  %v9740_v56 = vld [vmem:[#allocation22 + $0x8] sm:$0xff] }
0x4b6f   : > { %v23061_v39 = vpack.c.bf16 %v9740_v56, %v9739_v43 }
0x4b77   : > { %v19538_v59 = vpop.eup %19537 }
0x4b78   : > { %v9099_v53 = vrot.slane %v19538_v59, 7  ;;  %v19540_v48 = vpop.eup %19539 }
0x4b7a   : > { %v9100_v21 = vsel %vm1826_vm8, %v9099_v53, %v19540_v48  ;;  %v9742_v53 = vld [vmem:[#allocation22 + $0x18] sm:$0xff] }
0x4b7b   : > { %v9102_v28 = vsel %vm840_vm3, %v9100_v21, 0.0  ;;  %v9850_v21 = vld [vmem:[#allocation27] sm:$0xff] }
0x4b7c   : > { %9103 = vadd.xlane.f32.xlu0 %v9102_v28  ;;  %v9851_v28 = vld [vmem:[#allocation27 + $0x8] sm:$0xff] }
0x4b92   : > { %9443 = vrot.lane.b32.xlu0 %v22904_v25, %s20223_s29 }
0x4c09   : > { %v9104_v42 = vpop.xlane.xlu0 %9103 }
0x4c0a   : > { %19541 = vrcp.f32 %v9104_v42 }
0x4c14   : > { %v19542_v51 = vpop.eup %19541 }
0x4c15   : > { %v9106_v47 = vmul.f32 %v19542_v51, %v9104_v42  ;;  %v23072_v42 = vpack.c.bf16 %v9851_v28, %v9850_v21 }
0x4c17   : > { %v9107_v5 = vsub.f32 2.0, %v9106_v47  ;;  %v9853_v47 = vld [vmem:[#allocation27 + $0x18] sm:$0xff] }
0x4c19   : > { %v9108_v44 = vmul.f32 %v19542_v51, %v9107_v5  ;;  %v9852_v51 = vld [vmem:[#allocation27 + $0x10] sm:$0xff] }
0x4c1a   : > { %v23078_v5 = vpack.c.bf16 %v9853_v47, %v9852_v51 }
0x4c1b   : > { %v9110_v13 = vrot.slane %v9108_v44, 1  ;;  %v9113_v35 = vmul.f32 %v19540_v48, %v9108_v44 }
0x4c1d   : > { %16513 = vmatmul.mubr.f32.vlgmr.msra.gmra.mrb[92].mxu0 %v9113_v35  ;;  %v9114_v22 = vmul.f32 %v19538_v59, %v9110_v13  ;;  %v9741_v59 = vld [vmem:[#allocation22 + $0x10] sm:$0xff] }
0x4c1e   : > { %18597 = vmatpush3.bf16.xpose.msk.msra.mxu0 %vm20910_vm7, %v22593_v17  ;;  %16582 = vmatprep.mubr.msk.f32.mxu0 %vm20219_vm4, %v23867_v4  ;;  %v23976_v17 = vld [vmem:[#allocation66_spill] sm:$0xff]  ;;  %v23066_v48 = vpack.c.bf16 %v9742_v53, %v9741_v59 }
0x4c1f   : > { %16548 = vmatmul.mubr.f32.vlgmr.msra.gmra.mrb[56].mxu1 %v9114_v22  ;;  %v12509_v25 = vrot.slane %v9114_v22, 7  ;;  %18598 = vmatprep.subr.bf16.mxu0 %v23868_v19 }
0x4c20   : > { %18629 = vmatpush3.bf16.xpose.msk.msra.mxu1 %vm20910_vm7, %v22595_v61  ;;  %16617 = vmatprep.mubr.msk.f32.mxu1 %vm20219_vm4, %v23867_v4  ;;  %v23975_v61 = vld [vmem:[#allocation65_spill] sm:$0xff] }
0x4c21   : > { %v12510_v62 = vsel %vm1826_vm8, %v12509_v25, %v9113_v35  ;;  %18630 = vmatprep.subr.bf16.mxu1 %v23868_v19  ;;  %v23991_v25 = vld [vmem:[#allocation81_spill] sm:$0xff] }
0x4c22   : > { %12528 = vst [vmem:[%s20797_s28 + $0xa] sm:$0x3] %v12510_v62 }
0x4c26   : > { %18601 = vmatpush3.bf16.xpose.msk.msra.mxu0 %vm20910_vm7, %v22612_v6  ;;  %v23977_v6 = vld [vmem:[#allocation67_spill] sm:$0xff] }
0x4c27   : > { %18602 = vmatprep.subr.bf16.mxu0 %v23868_v19 }
0x4c28   : > { %18633 = vmatpush3.bf16.xpose.msk.msra.mxu1 %vm20910_vm7, %v22614_v23  ;;  %v23978_v23 = vld [vmem:[#allocation68_spill] sm:$0xff] }
0x4c29   : > { %18634 = vmatprep.subr.bf16.mxu1 %v23868_v19 }
0x4c2e   : > { %18605 = vmatpush3.bf16.xpose.msk.msra.mxu0 %vm20910_vm7, %v22624_v27  ;;  %v23979_v27 = vld [vmem:[#allocation69_spill] sm:$0xff] }
0x4c2f   : > { %18606 = vmatprep.subr.bf16.mxu0 %v23868_v19 }
0x4c30   : > { %18637 = vmatpush3.bf16.xpose.msk.msra.mxu1 %vm20910_vm7, %v22626_v9  ;;  %v23980_v9 = vld [vmem:[#allocation70_spill] sm:$0xff] }
0x4c31   : > { %18638 = vmatprep.subr.bf16.mxu1 %v23868_v19 }
0x4c36   : > { %18609 = vmatpush3.bf16.xpose.msk.msra.mxu0 %vm20910_vm7, %v23975_v61 }
0x4c37   : > { %18610 = vmatprep.subr.bf16.mxu0 %v23868_v19 }
0x4c38   : > { %18641 = vmatpush3.bf16.xpose.msk.msra.mxu1 %vm20910_vm7, %v23976_v17 }
0x4c39   : > { %18642 = vmatprep.subr.bf16.mxu1 %v23868_v19 }
0x4c3e   : > { %18613 = vmatpush3.bf16.xpose.msk.msra.mxu0 %vm20910_vm7, %v23977_v6 }
0x4c3f   : > { %18614 = vmatprep.subr.bf16.mxu0 %v23868_v19 }
0x4c40   : > { %18645 = vmatpush3.bf16.xpose.msk.msra.mxu1 %vm20910_vm7, %v23978_v23 }
0x4c41   : > { %18646 = vmatprep.subr.bf16.mxu1 %v23868_v19 }
0x4c46   : > { %18617 = vmatpush3.bf16.xpose.msk.msra.mxu0 %vm20910_vm7, %v23979_v27 }
0x4c47   : > { %18618 = vmatprep.subr.bf16.mxu0 %v23868_v19 }
0x4c48   : > { %18649 = vmatpush3.bf16.xpose.msk.msra.mxu1 %vm20910_vm7, %v23980_v9  ;;  %v23992_v9 = vmov 1.0  }
0x4c49   : > { %18650 = vmatprep.subr.bf16.mxu1 %v23868_v19 }
0x4c4e   : > { %18621 = vmatpush3.bf16.xpose.msk.msra.mxu0 %vm20910_vm7, %v22672_v18  ;;  %v23028_v18 = vpop.permute.xlu0 %9443 }
0x4c4f   : > { %18622 = vmatprep.subr.bf16.mxu0 %v23868_v19 }
0x4c50   : > { %18653 = vmatpush3.bf16.xpose.msk.msra.mxu1 %vm20910_vm7, %v22674_v8  ;;  %v23983_v8 = vld [vmem:[#allocation73_spill] sm:$0xff] }
0x4c51   : > { %18654 = vmatprep.subr.bf16.mxu1 %v23868_v19 }
0x4c56   : > { %18625 = vmatpush3.bf16.xpose.msk.msra.mxu0 %vm20910_vm7, %v23981_v2 }
0x4c57   : > { %18658 = vmatprep.subr.bf16.mxu0 %v23868_v19 }
0x4c58   : > { %18657 = vmatpush3.bf16.xpose.msk.msra.mxu1 %vm20910_vm7, %v23982_v52 }
0x4c59   : > { %18664 = vmatprep.subr.bf16.mxu1 %v23868_v19 }
0x4c5f   : > { %16618 = vmatmul.mubr.msk.f32.vlgmr.msra.gmra.mrb[58].mxu1 %vm867_vm5, %v23028_v18 }
0x4c60   : > { %18666 = vmatpush3.bf16.msra.mxu1 %v23983_v8  ;;  %16663 = vmatprep.mubr.msk.f32.mxu1 %vm20219_vm4, %v23867_v4 }
0x4c61   : > { %18667 = vmatprep.subr.bf16.mxu1 %v23868_v19 }
0x4c64   : > { %18669 = vmatpush3.bf16.msra.mxu1 %v23984_v37 }
0x4c65   : > { %18670 = vmatprep.subr.bf16.mxu1 %v23868_v19 }
0x4c68   : > { %18672 = vmatpush3.bf16.msra.mxu1 %v23985_v49 }
0x4c69   : > { %18673 = vmatprep.subr.bf16.mxu1 %v23868_v19 }
0x4c6c   : > { %18675 = vmatpush3.bf16.msra.mxu1 %v23986_v63 }
0x4c6d   : > { %18676 = vmatprep.subr.bf16.mxu1 %v23868_v19 }
0x4c70   : > { %18678 = vmatpush3.bf16.msra.mxu1 %v23987_v15 }
0x4c71   : > { %18679 = vmatprep.subr.bf16.mxu1 %v23868_v19 }
0x4c74   : > { %18681 = vmatpush3.bf16.msra.mxu1 %v23988_v29 }
0x4c75   : > { %18682 = vmatprep.subr.bf16.mxu1 %v23868_v19 }
0x4c78   : > { %18684 = vmatpush3.bf16.msra.mxu1 %v23989_v12 }
0x4c79   : > { %18685 = vmatprep.subr.bf16.mxu1 %v23868_v19 }
0x4c7c   : > { %18687 = vmatpush3.bf16.msra.mxu1 %v23990_v40 }
0x4c7d   : > { %18712 = vmatprep.subr.bf16.mxu1 %v23868_v19 }
0x4cf0   : > { %v9213_v26 = vpop.f32.mrb[92].mxu0 }
0x4cf1   : > { %v16514_v31 = vpop.f32.mrb[93].mxu0 }
0x4cf2   : > { %v9283_v32 = vpop.f32.mrb[56].mxu1 }
0x4cf3   : > { %v9321_v30 = vrot.slane %v9283_v32, 7  ;;  %v16549_v60 = vpop.f32.mrb[57].mxu1 }
0x4cf4   : > { %v10036_v60 = vld [vmem:[#allocation31 + $0x8] sm:$0xff] }
0x4cf5   : > { %v9322_v58 = vsel %vm1826_vm8, %v9321_v30, %v9213_v26  ;;  %v10035_v30 = vld [vmem:[#allocation31] sm:$0xff] }
0x4cf6   : > { %16583 = vmatmul.mubr.msk.f32.vlgmr.msra.gmra.mrb[94].mxu0 %vm867_vm5, %v9322_v58  ;;  %v23112_v0 = vpack.c.bf16 %v10036_v60, %v10035_v30  ;;  %v10258_v30 = vld [vmem:[#allocation10 + $0x98] sm:$0xff] }
0x4cf7   : > { %18660 = vmatpush3.bf16.msra.mxu0 %v23050_v24  ;;  %16628 = vmatprep.mubr.msk.f32.mxu0 %vm20219_vm4, %v23867_v4 }
0x4cf8   : > { %18661 = vmatprep.subr.bf16.mxu0 %v23868_v19 }
0x4cfb   : > { %18663 = vmatpush3.bf16.msra.mxu0 %v23055_v7 }
0x4cfc   : > { %18688 = vmatprep.subr.bf16.mxu0 %v23868_v19 }
0x4cfe   : > { %16629 = vmatmul.mubr.msk.f32.vlgmr.msra.gmra.mrb[96].mxu0 %vm867_vm5, %v9322_v58  ;;  %v10038_v58 = vld [vmem:[#allocation31 + $0x18] sm:$0xff] }
0x4cff   : > { %18690 = vmatpush3.bf16.msra.mxu0 %v23061_v39  ;;  %16674 = vmatprep.mubr.msk.f32.mxu0 %vm20219_vm4, %v23867_v4 }
0x4d00   : > { %18691 = vmatprep.subr.bf16.mxu0 %v23868_v19 }
0x4d03   : > { %18693 = vmatpush3.bf16.msra.mxu0 %v23066_v48 }
0x4d04   : > { %18694 = vmatprep.subr.bf16.mxu0 %v23868_v19 }
0x4d06   : > { %16675 = vmatmul.mubr.msk.f32.vlgmr.msra.gmra.mrb[98].mxu0 %vm867_vm5, %v22790_v33 }
0x4d07   : > { %18696 = vmatpush3.bf16.msra.mxu0 %v23072_v42  ;;  %16685 = vmatprep.mubr.msk.f32.mxu0 %vm20219_vm4, %v23867_v4 }
0x4d08   : > { %18697 = vmatprep.subr.bf16.mxu0 %v23868_v19 }
0x4d0b   : > { %18699 = vmatpush3.bf16.msra.mxu0 %v23078_v5 }
0x4d0c   : > { %18700 = vmatprep.subr.bf16.mxu0 %v23868_v19 }
0x4d0e   : > { %16686 = vmatmul.mubr.msk.f32.vlgmr.msra.gmra.mrb[100].mxu0 %vm867_vm5, %v22856_v50 }
0x4d0f   : > { %18702 = vmatpush3.bf16.msra.mxu0 %v22780_v55  ;;  %16696 = vmatprep.mubr.msk.f32.mxu0 %vm20219_vm4, %v23867_v4 }
0x4d10   : > { %18703 = vmatprep.subr.bf16.mxu0 %v23868_v19 }
0x4d13   : > { %18705 = vmatpush3.bf16.msra.mxu0 %v22783_v45 }
0x4d14   : > { %18706 = vmatprep.subr.bf16.mxu0 %v23868_v19 }
0x4d32   : > { %v9561_v33 = vpop.f32.mrb[58].mxu1 }
0x4d33   : > { %v16619_v44 = vpop.f32.mrb[59].mxu1 }
0x4dc9   : > { %v9439_v13 = vpop.f32.mrb[94].mxu0 }
0x4dca   : > { %v9562_v35 = vadd.f32 %v9561_v33, %v9439_v13  ;;  %v16584_v22 = vpop.f32.mrb[95].mxu0 }
0x4dcc   : > { %v9572_v62 = vadd.f32 %v23991_v25, %v9562_v35 }
0x4dce   : > { %12480 = vst [vmem:[%s20795_s19 + $0xa] sm:$0x3] %v9572_v62  ;;  %v9573_v50 = vsel %vm840_vm3, %v9572_v62, -inf }
0x4dcf   : > { %9574 = vmax.xlane.f32.xlu1 %v9573_v50 }
0x4dd1   : > { %v9665_v55 = vpop.f32.mrb[96].mxu0 }
0x4dd2   : > { %v16630_v61 = vpop.f32.mrb[97].mxu0 }
0x4dd9   : > { %v9809_v17 = vpop.f32.mrb[98].mxu0 }
0x4dda   : > { %v16676_v6 = vpop.f32.mrb[99].mxu0 }
0x4de1   : > { %v9920_v23 = vpop.f32.mrb[100].mxu0 }
0x4de2   : > { %v16687_v27 = vpop.f32.mrb[101].mxu0 }
0x4e5c   : > { %v9575_v45 = vpop.xlane.xlu1 %9574 }
0x4e5d   : > { %vm9576_vm14 = vcmp.eq.f32.partialorder %v9572_v62, %v9575_v45 }
0x4e5e   : > { %16664 = vmatmul.mubr.msk.f32.vlgmr.msra.gmra.mrb[60].mxu1 %vm9576_vm14, %v23992_v9 }
0x4e5f   : > { %18714 = vmatpush3.bf16.msra.mxu1 %v22846_v1  ;;  %16718 = vmatprep.mubr.msk.f32.mxu1 %vm20219_vm4, %v23867_v4 }
0x4e60   : > { %18715 = vmatprep.subr.bf16.mxu1 %v23868_v19 }
0x4e63   : > { %18717 = vmatpush3.bf16.msra.mxu1 %v22849_v20 }
0x4e64   : > { %18750 = vmatprep.subr.bf16.mxu1 %v23868_v19 }
0x4f31   : > { %v9735_v2 = vpop.f32.mrb[60].mxu1 }
0x4f32   : > { %v9736_v52 = vadd.f32 %v9735_v2, %v9665_v55  ;;  %v16665_v8 = vpop.f32.mrb[61].mxu1 }
0x4f34   : > { %v9813_v37 = vadd.f32 %v9809_v17, %v9736_v52 }
0x4f36   : > { %v9821_v49 = vadd.f32 %v22771_v10, %v9813_v37 }
0x4f38   : > { %19543 = vtanh.f32 %v9821_v49  ;;  %v13391_v1 = vmul.f32 -1.442695, %v9821_v49 }
0x4f3a   : > { %19545 = vpow2.f32 %v13391_v1 }
0x4f42   : > { %v19544_v63 = vpop.eup %19543 }
0x4f43   : > { %9831 = vrot.lane.b32.xlu1 %v19544_v63, %s23829_s1 }
0x4f44   : > { %v19546_v15 = vpop.eup %19545 }
0x4f45   : > { %v9825_v29 = vadd.f32 1.0, %v19546_v15 }
0x4f47   : > { %19547 = vrcp.f32 %v9825_v29  ;;  %v10239_v29 = vld [vmem:[#allocation10] sm:$0xff] }
0x4f51   : > { %v19548_v12 = vpop.eup %19547 }
0x4f52   : > { %v9829_v26 = vmul.f32 %v19548_v12, %v22777_v41  ;;  %v23119_v41 = vpack.c.bf16 %v10038_v58, %v10037_v57  ;;  %v10243_v58 = vld [vmem:[#allocation10 + $0x20] sm:$0xff] }
0x4fb5   : > { %v9832_v40 = vpop.permute.xlu1 %9831 }
0x4fb6   : > { %v9834_v20 = vmul.f32 %v19548_v12, %v9832_v40  ;;  %v10255_v40 = vld [vmem:[#allocation10 + $0x80] sm:$0xff] }
0x4fb8   : > { %9836 = vrot.lane.b32.xlu0 %v9834_v20, %s23829_s1 }
0x502a   : > { %v9837_v3 = vpop.permute.xlu0 %9836 }
0x502b   : > { %v23107_v11 = vadd.f32 %v9837_v3, %v9829_v26  ;;  %v10256_v26 = vld [vmem:[#allocation10 + $0x88] sm:$0xff] }
0x502d   : > { %19549 = vtanh.f32 %v23107_v11 }
0x5037   : > { %v19550_v10 = vpop.eup %19549 }
0x5038   : > { %9842 = vrot.lane.b32.xlu1 %v19550_v10, %s23829_s1  ;;  %v23158_v10 = vpack.c.bf16 %v10256_v26, %v10255_v40  ;;  %v10270_v40 = vld [vmem:[#allocation10 + $0xf8] sm:$0xff] }
0x50aa   : > { %v9843_v31 = vpop.permute.xlu1 %9842 }
0x50ab   : > { %v9845_v32 = vmul.f32 %v19548_v12, %v9843_v31  ;;  %v10240_v12 = vld [vmem:[#allocation10 + $0x8] sm:$0xff]  ;;  %v10242_v31 = vld [vmem:[#allocation10 + $0x18] sm:$0xff] }
0x50ac   : > { %v23156_v20 = vpack.c.bf16 %v10240_v12, %v10239_v29  ;;  %v10254_v29 = vld [vmem:[#allocation10 + $0x78] sm:$0xff]  ;;  %v10269_v12 = vld [vmem:[#allocation10 + $0xf0] sm:$0xff] }
0x50ad   : > { %9925 = vrot.lane.b32.xlu0 %v9845_v32, %s20223_s29  ;;  %v10257_v32 = vld [vmem:[#allocation10 + $0x90] sm:$0xff] }
0x50ae   : > { %v23171_v57 = vpack.c.bf16 %v10258_v30, %v10257_v32 }
0x511f   : > { %v23114_v43 = vpop.permute.xlu0 %9925 }
0x5120   : > { %16697 = vmatmul.mubr.msk.f32.vlgmr.msra.gmra.mrb[102].mxu0 %vm867_vm5, %v23114_v43 }
0x5121   : > { %18708 = vmatpush3.bf16.msra.mxu0 %v23112_v0  ;;  %16707 = vmatprep.mubr.msk.f32.mxu0 %vm20219_vm4, %v23867_v4 }
0x5122   : > { %18709 = vmatprep.subr.bf16.mxu0 %v23868_v19 }
0x5125   : > { %18711 = vmatpush3.bf16.msra.mxu0 %v23119_v41 }
0x5126   : > { %18718 = vmatprep.subr.bf16.mxu0 %v23868_v19 }
0x5128   : > { %16708 = vmatmul.mubr.msk.f32.vlgmr.msra.gmra.mrb[104].mxu0 %vm867_vm5, %v23028_v18 }
0x5129   : > { %16753 = vmatprep.mubr.msk.f32.mxu0 %vm20219_vm4, %v23867_v4 }
0x512e   : > { %18721 = vmatpush3.bf16.xpose.msk.msra.mxu0 %vm20910_vm7, %v23156_v20 }
0x512f   : > { %18722 = vmatprep.subr.bf16.mxu0 %v23868_v19 }
0x51f3   : > { %v9995_v56 = vpop.f32.mrb[102].mxu0 }
0x51f4   : > { %v9996_v59 = vadd.f32 %v9995_v56, %v9920_v23  ;;  %v16698_v53 = vpop.f32.mrb[103].mxu0  ;;  %v10244_v56 = vld [vmem:[#allocation10 + $0x28] sm:$0xff] }
0x51f5   : > { %v10260_v53 = vld [vmem:[#allocation10 + $0xa8] sm:$0xff] }
0x51f6   : > { %v10006_v21 = vadd.f32 %v22836_v14, %v9996_v59  ;;  %v10259_v59 = vld [vmem:[#allocation10 + $0xa0] sm:$0xff] }
0x51f8   : > { %19551 = vtanh.f32 %v10006_v21  ;;  %v13395_v33 = vmul.f32 -1.442695, %v10006_v21  ;;  %v23181_v21 = vpack.c.bf16 %v10244_v56, %v10243_v58 }
0x51fa   : > { %19553 = vpow2.f32 %v13395_v33  ;;  %v10261_v33 = vld [vmem:[#allocation10 + $0xb0] sm:$0xff] }
0x51fb   : > { %v10105_v28 = vpop.f32.mrb[104].mxu0 }
0x51fc   : > { %v16709_v51 = vpop.f32.mrb[105].mxu0 }
0x51fd   : > { %v10245_v51 = vld [vmem:[#allocation10 + $0x30] sm:$0xff] }
0x5202   : > { %v19552_v47 = vpop.eup %19551 }
0x5203   : > { %10016 = vrot.lane.b32.xlu1 %v19552_v47, %s23829_s1  ;;  %v10246_v47 = vld [vmem:[#allocation10 + $0x38] sm:$0xff] }
0x5204   : > { %v19554_v44 = vpop.eup %19553 }
0x5205   : > { %v10010_v13 = vadd.f32 1.0, %v19554_v44  ;;  %v10262_v44 = vld [vmem:[#allocation10 + $0xb8] sm:$0xff] }
0x5207   : > { %19555 = vrcp.f32 %v10010_v13  ;;  %v23193_v13 = vpack.c.bf16 %v10246_v47, %v10245_v51 }
0x5211   : > { %v19556_v18 = vpop.eup %19555 }
0x5212   : > { %v10014_v25 = vmul.f32 %v19556_v18, %v22843_v16 }
0x5275   : > { %v10017_v35 = vpop.permute.xlu1 %10016 }
0x5276   : > { %v10019_v22 = vmul.f32 %v19556_v18, %v10017_v35  ;;  %v10247_v35 = vld [vmem:[#allocation10 + $0x40] sm:$0xff] }
0x5278   : > { %10021 = vrot.lane.b32.xlu0 %v10019_v22, %s23829_s1  ;;  %v10248_v22 = vld [vmem:[#allocation10 + $0x48] sm:$0xff] }
0x52ea   : > { %v10022_v62 = vpop.permute.xlu0 %10021 }
0x52eb   : > { %v23134_v14 = vadd.f32 %v10022_v62, %v10014_v25  ;;  %v10263_v25 = vld [vmem:[#allocation10 + $0xc0] sm:$0xff]  ;;  %v10264_v62 = vld [vmem:[#allocation10 + $0xc8] sm:$0xff] }
0x52ed   : > { %19557 = vtanh.f32 %v23134_v14 }
0x52f7   : > { %v19558_v50 = vpop.eup %19557 }
0x52f8   : > { %10027 = vrot.lane.b32.xlu1 %v19558_v50, %s23829_s1  ;;  %v23205_v50 = vpack.c.bf16 %v10248_v22, %v10247_v35 }
0x536a   : > { %v10028_v55 = vpop.permute.xlu1 %10027 }
0x536b   : > { %v10030_v61 = vmul.f32 %v19556_v18, %v10028_v55  ;;  %v23195_v18 = vpack.c.bf16 %v10262_v44, %v10261_v33  ;;  %v23207_v55 = vpack.c.bf16 %v10264_v62, %v10263_v25 }
0x536d   : > { %10110 = vrot.lane.b32.xlu0 %v10030_v61, %s20223_s29  ;;  %v10249_v61 = vld [vmem:[#allocation10 + $0x50] sm:$0xff] }
0x53df   : > { %v23139_v17 = vpop.permute.xlu0 %10110 }
0x53e0   : > { %16719 = vmatmul.mubr.msk.f32.vlgmr.msra.gmra.mrb[62].mxu1 %vm867_vm5, %v23139_v17 }
0x53e1   : > { %16788 = vmatprep.mubr.msk.f32.mxu1 %vm20219_vm4, %v23867_v4  ;;  %18753 = vmatpush3.bf16.xpose.msk.msra.mxu1 %vm20910_vm7, %v23158_v10 }
0x53e2   : > { %18754 = vmatprep.subr.bf16.mxu1 %v23868_v19 }
0x53e9   : > { %18757 = vmatpush3.bf16.xpose.msk.msra.mxu1 %vm20910_vm7, %v23171_v57 }
0x53ea   : > { %18758 = vmatprep.subr.bf16.mxu1 %v23868_v19 }
0x54b3   : > { %v10180_v16 = vpop.f32.mrb[62].mxu1 }
0x54b4   : > { %v10181_v6 = vadd.f32 %v10180_v16, %v10105_v28  ;;  %v16720_v23 = vpop.f32.mrb[63].mxu1  ;;  %v23183_v28 = vpack.c.bf16 %v10260_v53, %v10259_v59  ;;  %v10250_v16 = vld [vmem:[#allocation10 + $0x58] sm:$0xff] }
0x54b5   : > { %v10266_v23 = vld [vmem:[#allocation10 + $0xd8] sm:$0xff] }
0x54b6   : > { %v10191_v27 = vadd.f32 %v22894_v34, %v10181_v6  ;;  %18761 = vmatpush3.bf16.xpose.msk.msra.mxu1 %vm20910_vm7, %v23183_v28  ;;  %v10265_v6 = vld [vmem:[#allocation10 + $0xd0] sm:$0xff] }
0x54b7   : > { %18762 = vmatprep.subr.bf16.mxu1 %v23868_v19 }
0x54b8   : > { %19559 = vtanh.f32 %v10191_v27  ;;  %v13399_v2 = vmul.f32 -1.442695, %v10191_v27  ;;  %v23217_v27 = vpack.c.bf16 %v10250_v16, %v10249_v61 }
0x54ba   : > { %19561 = vpow2.f32 %v13399_v2  ;;  %v10251_v2 = vld [vmem:[#allocation10 + $0x60] sm:$0xff] }
0x54be   : > { %18765 = vmatpush3.bf16.xpose.msk.msra.mxu1 %vm20910_vm7, %v23195_v18 }
0x54bf   : > { %18766 = vmatprep.subr.bf16.mxu1 %v23868_v19 }
0x54c2   : > { %v19560_v45 = vpop.eup %19559 }
0x54c3   : > { %10201 = vrot.lane.b32.xlu1 %v19560_v45, %s23829_s1  ;;  %v23219_v45 = vpack.c.bf16 %v10266_v23, %v10265_v6 }
0x54c4   : > { %v19562_v52 = vpop.eup %19561 }
0x54c5   : > { %v10195_v8 = vadd.f32 1.0, %v19562_v52  ;;  %v10252_v52 = vld [vmem:[#allocation10 + $0x68] sm:$0xff] }
0x54c6   : > { %18769 = vmatpush3.bf16.xpose.msk.msra.mxu1 %vm20910_vm7, %v23207_v55 }
0x54c7   : > { %19563 = vrcp.f32 %v10195_v8  ;;  %18770 = vmatprep.subr.bf16.mxu1 %v23868_v19  ;;  %v10267_v8 = vld [vmem:[#allocation10 + $0xe0] sm:$0xff] }
0x54ce   : > { %18773 = vmatpush3.bf16.xpose.msk.msra.mxu1 %vm20910_vm7, %v23219_v45 }
0x54cf   : > { %18774 = vmatprep.subr.bf16.mxu1 %v23868_v19 }
0x54d1   : > { %v23147_v37 = vpop.eup %19563 }
0x54d2   : > { %v10199_v1 = vmul.f32 %v23147_v37, %v22900_v38  ;;  %v10241_v38 = vld [vmem:[#allocation10 + $0x10] sm:$0xff] }
0x54d3   : > { %v23169_v60 = vpack.c.bf16 %v10242_v31, %v10241_v38 }
0x54d5   : > { %18725 = vmatpush3.bf16.xpose.msk.msra.mxu0 %vm20910_vm7, %v23169_v60 }
0x54d6   : > { %18726 = vmatprep.subr.bf16.mxu0 %v23868_v19 }
0x54dd   : > { %18729 = vmatpush3.bf16.xpose.msk.msra.mxu0 %vm20910_vm7, %v23181_v21 }
0x54de   : > { %18730 = vmatprep.subr.bf16.mxu0 %v23868_v19 }
0x54e5   : > { %18733 = vmatpush3.bf16.xpose.msk.msra.mxu0 %vm20910_vm7, %v23193_v13 }
0x54e6   : > { %18734 = vmatprep.subr.bf16.mxu0 %v23868_v19 }
0x54ed   : > { %18737 = vmatpush3.bf16.xpose.msk.msra.mxu0 %vm20910_vm7, %v23205_v50 }
0x54ee   : > { %18738 = vmatprep.subr.bf16.mxu0 %v23868_v19 }
0x54f5   : > { %18741 = vmatpush3.bf16.xpose.msk.msra.mxu0 %vm20910_vm7, %v23217_v27 }
0x54f6   : > { %18742 = vmatprep.subr.bf16.mxu0 %v23868_v19 }
0x5535   : > { %v10202_v49 = vpop.permute.xlu1 %10201 }
0x5536   : > { %v10204_v63 = vmul.f32 %v23147_v37, %v10202_v49  ;;  %v10268_v49 = vld [vmem:[#allocation10 + $0xe8] sm:$0xff] }
0x5538   : > { %10206 = vrot.lane.b32.xlu0 %v10204_v63, %s23829_s1  ;;  %v23229_v63 = vpack.c.bf16 %v10252_v52, %v10251_v2  ;;  %v10582_v2 = vld [vmem:[#allocation13 + $0x80] sm:$0xff]  ;;  %v10583_v52 = vld [vmem:[#allocation13 + $0x88] sm:$0xff] }
0x553a   : > { %18745 = vmatpush3.bf16.xpose.msk.msra.mxu0 %vm20910_vm7, %v23229_v63 }
0x553b   : > { %18746 = vmatprep.subr.bf16.mxu0 %v23868_v19 }
0x55aa   : > { %v10207_v34 = vpop.permute.xlu0 %10206 }
0x55ab   : > { %v23153_v15 = vadd.f32 %v10207_v34, %v10199_v1  ;;  %v23231_v1 = vpack.c.bf16 %v10268_v49, %v10267_v8  ;;  %v10253_v34 = vld [vmem:[#allocation10 + $0x70] sm:$0xff]  ;;  %v10566_v8 = vld [vmem:[#allocation13] sm:$0xff]  ;;  %v18807_v49 = vpack.c.bf16 %v10583_v52, %v10582_v2 }
0x55ac   : > { %v23241_v26 = vpack.c.bf16 %v10254_v29, %v10253_v34  ;;  %v10567_v34 = vld [vmem:[#allocation13 + $0x8] sm:$0xff]  ;;  %v10584_v29 = vld [vmem:[#allocation13 + $0x90] sm:$0xff] }
0x55ad   : > { %19565 = vtanh.f32 %v23153_v15  ;;  %18777 = vmatpush3.bf16.xpose.msk.msra.mxu1 %vm20910_vm7, %v23231_v1 }
0x55ae   : > { %18778 = vmatprep.subr.bf16.mxu1 %v23868_v19  ;;  %18749 = vmatpush3.bf16.xpose.msk.msra.mxu0 %vm20910_vm7, %v23241_v26 }
0x55af   : > { %18782 = vmatprep.subr.bf16.mxu0 %v23868_v19 }
0x55b7   : > { %v19566_v3 = vpop.eup %19565 }
0x55b8   : > { %10212 = vrot.lane.b32.xlu1 %v19566_v3, %s23829_s1  ;;  %v23243_v3 = vpack.c.bf16 %v10270_v40, %v10269_v12  ;;  %v10585_v12 = vld [vmem:[#allocation13 + $0x98] sm:$0xff]  ;;  %v18783_v40 = vpack.c.bf16 %v10567_v34, %v10566_v8 }
0x55ba   : > { %18781 = vmatpush3.bf16.xpose.msk.msra.mxu1 %vm20910_vm7, %v23243_v3 }
0x55bb   : > { %18806 = vmatprep.subr.bf16.mxu1 %v23868_v19 }
0x562a   : > { %v10213_v38 = vpop.permute.xlu1 %10212 }
0x562b   : > { %v10215_v31 = vmul.f32 %v23147_v37, %v10213_v38  ;;  %v10523_v37 = vld [vmem:[#allocation15] sm:$0x3]  ;;  %v10568_v38 = vld [vmem:[#allocation13 + $0x10] sm:$0xff] }
0x562c   : > { %v10525_v33 = vrot.slane %v10523_v37, 1 }
0x562d   : > { %v10223_v32 = vrot.slane %v10215_v31, %v21011_v46 }
0x562f   : > { %v10224_v30 = vcombine.high %v10223_v32, %v10223_v32  ;;  %v10231_v58 = vrot.slane %v10223_v32, %v21011_v46  ;;  %v10569_v32 = vld [vmem:[#allocation13 + $0x18] sm:$0xff] }
0x5631   : > { %v10238_v56 = vrot.slane %v10224_v30, %v21011_v46  ;;  %v10274_v59 = vrot.slane %v10231_v58, %v21015_v54  ;;  %v18810_v30 = vpack.c.bf16 %v10585_v12, %v10584_v29  ;;  %v18786_v58 = vpack.c.bf16 %v10569_v32, %v10568_v38  ;;  %v10572_v29 = vld [vmem:[#allocation13 + $0x30] sm:$0xff]  ;;  %v10573_v12 = vld [vmem:[#allocation13 + $0x38] sm:$0xff]  ;;  %v10574_v32 = vld [vmem:[#allocation13 + $0x40] sm:$0xff] }
0x5632   : > { %v18792_v38 = vpack.c.bf16 %v10573_v12, %v10572_v29 }
0x5633   : > { %10275 = vrot.lane.b32.xlu1 %v10274_v59, %s20223_s29  ;;  %v10400_v53 = vrot.slane %v10238_v56, %v21015_v54  ;;  %v10586_v56 = vld [vmem:[#allocation13 + $0xa0] sm:$0xff]  ;;  %v10587_v59 = vld [vmem:[#allocation13 + $0xa8] sm:$0xff] }
0x5635   : > { %10401 = vrot.lane.b32.xlu0 %v10400_v53, %s20223_s29  ;;  %v10571_v53 = vld [vmem:[#allocation13 + $0x28] sm:$0xff] }
0x56a5   : > { %v10276_v51 = vpop.permute.xlu1 %10275 }
0x56a6   : > { %16754 = vmatmul.mubr.msk.f32.vlgmr.msra.gmra.mrb[106].mxu0 %vm867_vm5, %v10276_v51  ;;  %v18813_v51 = vpack.c.bf16 %v10587_v59, %v10586_v56  ;;  %v10593_v59 = vld [vmem:[#allocation13 + $0xd8] sm:$0xff] }
0x56a7   : > { %v10402_v47 = vpop.permute.xlu0 %10401  ;;  %16823 = vmatprep.mubr.msk.f32.mxu0 %vm20219_vm4, %v23867_v4  ;;  %18784 = vmatpush3.bf16.msra.mxu0 %v18783_v40  ;;  %v10590_v40 = vld [vmem:[#allocation13 + $0xc0] sm:$0xff] }
0x56a8   : > { %16789 = vmatmul.mubr.msk.f32.vlgmr.msra.gmra.mrb[64].mxu1 %vm867_vm5, %v10402_v47  ;;  %18785 = vmatprep.subr.bf16.mxu0 %v23868_v19 }
0x56a9   : > { %16858 = vmatprep.mubr.msk.f32.mxu1 %vm20219_vm4, %v23867_v4  ;;  %18808 = vmatpush3.bf16.msra.mxu1 %v18807_v49 }
0x56aa   : > { %18809 = vmatprep.subr.bf16.mxu1 %v23868_v19 }
0x56ab   : > { %18787 = vmatpush3.bf16.msra.mxu0 %v18786_v58  ;;  %v10592_v58 = vld [vmem:[#allocation13 + $0xd0] sm:$0xff] }
0x56ac   : > { %18788 = vmatprep.subr.bf16.mxu0 %v23868_v19 }
0x56ad   : > { %18811 = vmatpush3.bf16.msra.mxu1 %v18810_v30  ;;  %v10575_v30 = vld [vmem:[#allocation13 + $0x48] sm:$0xff] }
0x56ae   : > { %18812 = vmatprep.subr.bf16.mxu1 %v23868_v19  ;;  %v18795_v56 = vpack.c.bf16 %v10575_v30, %v10574_v32  ;;  %v10738_v30 = vld [vmem:[#allocation18] sm:$0xff] }
0x56b1   : > { %18814 = vmatpush3.bf16.msra.mxu1 %v18813_v51  ;;  %v10577_v51 = vld [vmem:[#allocation13 + $0x58] sm:$0xff] }
0x56b2   : > { %18815 = vmatprep.subr.bf16.mxu1 %v23868_v19 }
0x5779   : > { %v10393_v44 = vpop.f32.mrb[106].mxu0 }
0x577a   : > { %v16755_v35 = vpop.f32.mrb[107].mxu0  ;;  %v10528_v61 = vadd.f32 %v10523_v37, %v10393_v44  ;;  %v10588_v37 = vld [vmem:[#allocation13 + $0xb0] sm:$0xff] }
0x577b   : > { %v10519_v22 = vpop.f32.mrb[64].mxu1 }
0x577c   : > { %v10529_v25 = vadd.f32 %v10525_v33, %v10519_v22  ;;  %v16790_v62 = vpop.f32.mrb[65].mxu1  ;;  %v10589_v33 = vld [vmem:[#allocation13 + $0xb8] sm:$0xff] }
0x577d   : > { %v18816_v44 = vpack.c.bf16 %v10589_v33, %v10588_v37  ;;  %v10595_v33 = vld [vmem:[#allocation13 + $0xe8] sm:$0xff] }
0x577e   : > { %v10532_v16 = vrot.slane %v10529_v25, 7 }
0x577f   : > { %18817 = vmatpush3.bf16.msra.mxu1 %v18816_v44 }
0x5780   : > { %v10533_v6 = vsel %vm1826_vm8, %v10532_v16, %v10528_v61  ;;  %18818 = vmatprep.subr.bf16.mxu1 %v23868_v19 }
0x5781   : > { %v10535_v23 = vsel %vm840_vm3, %v10533_v6, -inf }
0x5782   : > { %10536 = vmax.xlane.f32.xlu0 %v10535_v23 }
0x5798   : > { %10894 = vrot.lane.b32.xlu0 %v10215_v31, %s20223_s29  ;;  %v10570_v31 = vld [vmem:[#allocation13 + $0x20] sm:$0xff] }
0x5799   : > { %v18789_v47 = vpack.c.bf16 %v10571_v53, %v10570_v31  ;;  %v18822_v31 = vpack.c.bf16 %v10593_v59, %v10592_v58  ;;  %v10576_v53 = vld [vmem:[#allocation13 + $0x50] sm:$0xff] }
0x579a   : > { %v18798_v37 = vpack.c.bf16 %v10577_v51, %v10576_v53  ;;  %v10739_v58 = vld [vmem:[#allocation18 + $0x8] sm:$0xff] }
0x579b   : > { %18790 = vmatpush3.bf16.msra.mxu0 %v18789_v47  ;;  %v10594_v47 = vld [vmem:[#allocation13 + $0xe0] sm:$0xff]  ;;  %v18863_v53 = vpack.c.bf16 %v10739_v58, %v10738_v30  ;;  %v10747_v58 = vld [vmem:[#allocation18 + $0x48] sm:$0xff] }
0x579c   : > { %18791 = vmatprep.subr.bf16.mxu0 %v23868_v19  ;;  %v18825_v44 = vpack.c.bf16 %v10595_v33, %v10594_v47  ;;  %v10757_v33 = vld [vmem:[#allocation19 + $0x18] sm:$0xff]  ;;  %v10746_v30 = vld [vmem:[#allocation18 + $0x40] sm:$0xff] }
0x579f   : > { %18793 = vmatpush3.bf16.msra.mxu0 %v18792_v38 }
0x57a0   : > { %18794 = vmatprep.subr.bf16.mxu0 %v23868_v19 }
0x57a3   : > { %18796 = vmatpush3.bf16.msra.mxu0 %v18795_v56 }
0x57a4   : > { %18797 = vmatprep.subr.bf16.mxu0 %v23868_v19 }
0x57a7   : > { %18799 = vmatpush3.bf16.msra.mxu0 %v18798_v37  ;;  %v10756_v37 = vld [vmem:[#allocation19 + $0x10] sm:$0xff] }
0x57a8   : > { %18800 = vmatprep.subr.bf16.mxu0 %v23868_v19 }
0x580f   : > { %v10537_v35 = vpop.xlane.xlu0 %10536 }
0x5810   : > { %v10539_v22 = vrot.slane %v10537_v35, 1  ;;  %v10542_v62 = vsub.f32 %v10528_v61, %v10537_v35  ;;  %v10591_v61 = vld [vmem:[#allocation13 + $0xc8] sm:$0xff]  ;;  %v10578_v35 = vld [vmem:[#allocation13 + $0x60] sm:$0xff] }
0x5812   : > { %v10543_v16 = vsub.f32 %v10529_v25, %v10539_v22  ;;  %v10544_v6 = vmul.f32 1.442695, %v10542_v62  ;;  %v18819_v25 = vpack.c.bf16 %v10591_v61, %v10590_v40  ;;  %v10579_v22 = vld [vmem:[#allocation13 + $0x68] sm:$0xff]  ;;  %v10596_v62 = vld [vmem:[#allocation13 + $0xf0] sm:$0xff] }
0x5813   : > { %v10754_v61 = vld [vmem:[#allocation19] sm:$0xff] }
0x5814   : > { %v10546_v23 = vmul.f32 1.442695, %v10543_v16  ;;  %18820 = vmatpush3.bf16.msra.mxu1 %v18819_v25  ;;  %v18801_v16 = vpack.c.bf16 %v10579_v22, %v10578_v35  ;;  %v10755_v25 = vld [vmem:[#allocation19 + $0x8] sm:$0xff]  ;;  %v18835_v35 = vpack.c.bf16 %v10757_v33, %v10756_v37 }
0x5815   : > { %18821 = vmatprep.subr.bf16.mxu1 %v23868_v19  ;;  %v18831_v56 = vpack.c.bf16 %v10755_v25, %v10754_v61  ;;  %v10762_v25 = vld [vmem:[#allocation19 + $0x40] sm:$0xff] }
0x5816   : > { %19567 = vpow2.f32 %v10546_v23  ;;  %18802 = vmatpush3.bf16.msra.mxu0 %v18801_v16  ;;  %v10759_v16 = vld [vmem:[#allocation19 + $0x28] sm:$0xff] }
0x5817   : > { %19569 = vpow2.f32 %v10544_v6  ;;  %v10597_v6 = vld [vmem:[#allocation13 + $0xf8] sm:$0xff]  ;;  %18803 = vmatprep.subr.bf16.mxu0 %v23868_v19 }
0x5818   : > { %18823 = vmatpush3.bf16.msra.mxu1 %v18822_v31  ;;  %v18828_v23 = vpack.c.bf16 %v10597_v6, %v10596_v62  ;;  %v10758_v62 = vld [vmem:[#allocation19 + $0x20] sm:$0xff] }
0x5819   : > { %18824 = vmatprep.subr.bf16.mxu1 %v23868_v19  ;;  %v10742_v6 = vld [vmem:[#allocation18 + $0x20] sm:$0xff] }
0x581c   : > { %18826 = vmatpush3.bf16.msra.mxu1 %v18825_v44  ;;  %v10741_v44 = vld [vmem:[#allocation18 + $0x18] sm:$0xff] }
0x581d   : > { %18827 = vmatprep.subr.bf16.mxu1 %v23868_v19 }
0x5820   : > { %v23277_v2 = vpop.eup %19567  ;;  %18829 = vmatpush3.bf16.msra.mxu1 %v18828_v23  ;;  %v10743_v23 = vld [vmem:[#allocation18 + $0x28] sm:$0xff] }
0x5821   : > { %v10550_v52 = vrot.slane %v23277_v2, 7  ;;  %v19570_v8 = vpop.eup %19569  ;;  %18862 = vmatprep.subr.bf16.mxu1 %v23868_v19 }
0x5823   : > { %v10551_v49 = vsel %vm1826_vm8, %v10550_v52, %v19570_v8  ;;  %v10580_v52 = vld [vmem:[#allocation13 + $0x70] sm:$0xff] }
0x5824   : > { %v10553_v34 = vsel %vm840_vm3, %v10551_v49, 0.0  ;;  %v10581_v49 = vld [vmem:[#allocation13 + $0x78] sm:$0xff] }
0x5825   : > { %10554 = vadd.xlane.f32.xlu1 %v10553_v34  ;;  %v18804_v34 = vpack.c.bf16 %v10581_v49, %v10580_v52  ;;  %v18839_v52 = vpack.c.bf16 %v10759_v16, %v10758_v62  ;;  %v18871_v49 = vpack.c.bf16 %v10743_v23, %v10742_v6  ;;  %v10768_v16 = vld [vmem:[#allocation19 + $0x70] sm:$0xff]  ;;  %v10769_v6 = vld [vmem:[#allocation19 + $0x78] sm:$0xff] }
0x5826   : > { %v10752_v23 = vld [vmem:[#allocation18 + $0x70] sm:$0xff] }
0x5827   : > { %18805 = vmatpush3.bf16.msra.mxu0 %v18804_v34  ;;  %v10760_v34 = vld [vmem:[#allocation19 + $0x30] sm:$0xff] }
0x5828   : > { %18830 = vmatprep.subr.bf16.mxu0 %v23868_v19 }
0x58b2   : > { %v10555_v29 = vpop.xlane.xlu1 %10554 }
0x58b3   : > { %19571 = vrcp.f32 %v10555_v29 }
0x58bd   : > { %v19572_v12 = vpop.eup %19571 }
0x58be   : > { %v10557_v40 = vmul.f32 %v19572_v12, %v10555_v29  ;;  %v10761_v29 = vld [vmem:[#allocation19 + $0x38] sm:$0xff] }
0x58c0   : > { %v10558_v38 = vsub.f32 2.0, %v10557_v40  ;;  %v10745_v40 = vld [vmem:[#allocation18 + $0x38] sm:$0xff] }
0x58c2   : > { %v10559_v32 = vmul.f32 %v19572_v12, %v10558_v38  ;;  %v10744_v12 = vld [vmem:[#allocation18 + $0x30] sm:$0xff]  ;;  %v18843_v38 = vpack.c.bf16 %v10761_v29, %v10760_v34  ;;  %v23346_v29 = vpop.permute.xlu0 %10894 }
0x58c3   : > { %v18875_v61 = vpack.c.bf16 %v10745_v40, %v10744_v12 }
0x58c4   : > { %v10561_v59 = vrot.slane %v10559_v32, 1  ;;  %v10564_v31 = vmul.f32 %v19570_v8, %v10559_v32  ;;  %v10740_v8 = vld [vmem:[#allocation18 + $0x10] sm:$0xff]  ;;  %v10763_v32 = vld [vmem:[#allocation19 + $0x48] sm:$0xff] }
0x58c5   : > { %v18867_v22 = vpack.c.bf16 %v10741_v44, %v10740_v8  ;;  %v10767_v8 = vld [vmem:[#allocation19 + $0x68] sm:$0xff]  ;;  %v10750_v44 = vld [vmem:[#allocation18 + $0x60] sm:$0xff] }
0x58c6   : > { %16824 = vmatmul.mubr.f32.vlgmr.msra.gmra.mrb[108].mxu0 %v10564_v31  ;;  %v10565_v51 = vmul.f32 %v23277_v2, %v10561_v59  ;;  %v18879_v59 = vpack.c.bf16 %v10747_v58, %v10746_v30  ;;  %v11033_v30 = vld [vmem:[#allocation16 + $0x18] sm:$0xff] }
0x58c7   : > { %18833 = vmatpush3.bf16.xpose.msk.msra.mxu0 %vm20910_vm7, %v18831_v56  ;;  %16893 = vmatprep.mubr.msk.f32.mxu0 %vm20219_vm4, %v23867_v4  ;;  %v18847_v56 = vpack.c.bf16 %v10763_v32, %v10762_v25 }
0x58c8   : > { %16859 = vmatmul.mubr.f32.vlgmr.msra.gmra.mrb[66].mxu1 %v10565_v51  ;;  %v12511_v47 = vrot.slane %v10565_v51, 7  ;;  %18834 = vmatprep.subr.bf16.mxu0 %v23868_v19  ;;  %v10748_v51 = vld [vmem:[#allocation18 + $0x50] sm:$0xff] }
0x58c9   : > { %18865 = vmatpush3.bf16.xpose.msk.msra.mxu1 %vm20910_vm7, %v18863_v53  ;;  %16928 = vmatprep.mubr.msk.f32.mxu1 %vm20219_vm4, %v23867_v4  ;;  %v10765_v53 = vld [vmem:[#allocation19 + $0x58] sm:$0xff] }
0x58ca   : > { %v12512_v2 = vsel %vm1826_vm8, %v12511_v47, %v10564_v31  ;;  %18866 = vmatprep.subr.bf16.mxu1 %v23868_v19  ;;  %v10764_v31 = vld [vmem:[#allocation19 + $0x50] sm:$0xff]  ;;  %v10749_v47 = vld [vmem:[#allocation18 + $0x58] sm:$0xff] }
0x58cb   : > { %12529 = vst [vmem:[%s20797_s28 + $0xc] sm:$0x3] %v12512_v2  ;;  %v18851_v37 = vpack.c.bf16 %v10765_v53, %v10764_v31  ;;  %v18883_v33 = vpack.c.bf16 %v10749_v47, %v10748_v51  ;;  %v10766_v2 = vld [vmem:[#allocation19 + $0x60] sm:$0xff]  ;;  %v11037_v31 = vld [vmem:[#allocation16 + $0x38] sm:$0xff]  ;;  %v11039_v47 = vld [vmem:[#allocation16 + $0x48] sm:$0xff] }
0x58cc   : > { %v11038_v51 = vld [vmem:[#allocation16 + $0x40] sm:$0xff] }
0x58cf   : > { %18837 = vmatpush3.bf16.xpose.msk.msra.mxu0 %vm20910_vm7, %v18835_v35  ;;  %v10751_v35 = vld [vmem:[#allocation18 + $0x68] sm:$0xff] }
0x58d0   : > { %18838 = vmatprep.subr.bf16.mxu0 %v23868_v19  ;;  %v18887_v62 = vpack.c.bf16 %v10751_v35, %v10750_v44  ;;  %v11042_v44 = vld [vmem:[#allocation16 + $0x60] sm:$0xff]  ;;  %v11043_v35 = vld [vmem:[#allocation16 + $0x68] sm:$0xff] }
0x58d1   : > { %18869 = vmatpush3.bf16.xpose.msk.msra.mxu1 %vm20910_vm7, %v18867_v22  ;;  %v18855_v22 = vpack.c.bf16 %v10767_v8, %v10766_v2  ;;  %v11041_v2 = vld [vmem:[#allocation16 + $0x58] sm:$0xff] }
0x58d2   : > { %18870 = vmatprep.subr.bf16.mxu1 %v23868_v19 }
0x58d7   : > { %18841 = vmatpush3.bf16.xpose.msk.msra.mxu0 %vm20910_vm7, %v18839_v52  ;;  %v10753_v52 = vld [vmem:[#allocation18 + $0x78] sm:$0xff] }
0x58d8   : > { %18842 = vmatprep.subr.bf16.mxu0 %v23868_v19  ;;  %v18891_v34 = vpack.c.bf16 %v10753_v52, %v10752_v23  ;;  %v23387_v52 = vld [vmem:[#allocation34] ss:$0 sm:$0xff] }
0x58d9   : > { %18873 = vmatpush3.bf16.xpose.msk.msra.mxu1 %vm20910_vm7, %v18871_v49  ;;  %v18859_v49 = vpack.c.bf16 %v10769_v6, %v10768_v16  ;;  %v11045_v16 = vld [vmem:[#allocation16 + $0x78] sm:$0xff] }
0x58da   : > { %18874 = vmatprep.subr.bf16.mxu1 %v23868_v19 }
0x58df   : > { %18845 = vmatpush3.bf16.xpose.msk.msra.mxu0 %vm20910_vm7, %v18843_v38 }
0x58e0   : > { %18846 = vmatprep.subr.bf16.mxu0 %v23868_v19 }
0x58e1   : > { %18877 = vmatpush3.bf16.xpose.msk.msra.mxu1 %vm20910_vm7, %v18875_v61 }
0x58e2   : > { %18878 = vmatprep.subr.bf16.mxu1 %v23868_v19 }
0x58e7   : > { %18849 = vmatpush3.bf16.xpose.msk.msra.mxu0 %vm20910_vm7, %v18847_v56  ;;  %v11035_v56 = vld [vmem:[#allocation16 + $0x28] sm:$0xff] }
0x58e8   : > { %18850 = vmatprep.subr.bf16.mxu0 %v23868_v19 }
0x58e9   : > { %18881 = vmatpush3.bf16.xpose.msk.msra.mxu1 %vm20910_vm7, %v18879_v59 }
0x58ea   : > { %18882 = vmatprep.subr.bf16.mxu1 %v23868_v19 }
0x58ef   : > { %18853 = vmatpush3.bf16.xpose.msk.msra.mxu0 %vm20910_vm7, %v18851_v37  ;;  %v18913_v37 = vpack.c.bf16 %v11039_v47, %v11038_v51 }
0x58f0   : > { %18854 = vmatprep.subr.bf16.mxu0 %v23868_v19 }
0x58f1   : > { %18885 = vmatpush3.bf16.xpose.msk.msra.mxu1 %vm20910_vm7, %v18883_v33  ;;  %v11040_v33 = vld [vmem:[#allocation16 + $0x50] sm:$0xff] }
0x58f2   : > { %18886 = vmatprep.subr.bf16.mxu1 %v23868_v19  ;;  %v18916_v8 = vpack.c.bf16 %v11041_v2, %v11040_v33  ;;  %v11297_v2 = vld [vmem:[#allocation25] sm:$0xff] }
0x58f7   : > { %18857 = vmatpush3.bf16.xpose.msk.msra.mxu0 %vm20910_vm7, %v18855_v22  ;;  %v18919_v22 = vpack.c.bf16 %v11043_v35, %v11042_v44  ;;  %v11299_v44 = vld [vmem:[#allocation25 + $0x10] sm:$0xff] }
0x58f8   : > { %18858 = vmatprep.subr.bf16.mxu0 %v23868_v19 }
0x58f9   : > { %18889 = vmatpush3.bf16.xpose.msk.msra.mxu1 %vm20910_vm7, %v18887_v62  ;;  %v11044_v62 = vld [vmem:[#allocation16 + $0x70] sm:$0xff] }
0x58fa   : > { %18890 = vmatprep.subr.bf16.mxu1 %v23868_v19  ;;  %v18922_v6 = vpack.c.bf16 %v11045_v16, %v11044_v62 }
0x58ff   : > { %18861 = vmatpush3.bf16.xpose.msk.msra.mxu0 %vm20910_vm7, %v18859_v49 }
0x5900   : > { %18894 = vmatprep.subr.bf16.mxu0 %v23868_v19 }
0x5901   : > { %18893 = vmatpush3.bf16.xpose.msk.msra.mxu1 %vm20910_vm7, %v18891_v34 }
0x5902   : > { %18900 = vmatprep.subr.bf16.mxu1 %v23868_v19 }
0x5908   : > { %16929 = vmatmul.mubr.msk.f32.vlgmr.msra.gmra.mrb[68].mxu1 %vm867_vm5, %v23346_v29 }
0x5909   : > { %16974 = vmatprep.mubr.msk.f32.mxu1 %vm20219_vm4, %v23867_v4 }
0x5999   : > { %v10664_v12 = vpop.f32.mrb[108].mxu0 }
0x599a   : > { %v16825_v40 = vpop.f32.mrb[109].mxu0 }
0x599b   : > { %v10734_v38 = vpop.f32.mrb[66].mxu1 }
0x599c   : > { %v10772_v61 = vrot.slane %v10734_v38, 7  ;;  %v16860_v25 = vpop.f32.mrb[67].mxu1 }
0x599e   : > { %v10773_v32 = vsel %vm1826_vm8, %v10772_v61, %v10664_v12 }
0x599f   : > { %16894 = vmatmul.mubr.msk.f32.vlgmr.msra.gmra.mrb[110].mxu0 %vm867_vm5, %v10773_v32 }
0x59a0   : > { %18896 = vmatpush3.bf16.msra.mxu0 %v23050_v24  ;;  %16939 = vmatprep.mubr.msk.f32.mxu0 %vm20219_vm4, %v23867_v4 }
0x59a1   : > { %18897 = vmatprep.subr.bf16.mxu0 %v23868_v19 }
0x59a4   : > { %18899 = vmatpush3.bf16.msra.mxu0 %v23055_v7 }
0x59a5   : > { %18924 = vmatprep.subr.bf16.mxu0 %v23868_v19 }
0x59a7   : > { %16940 = vmatmul.mubr.msk.f32.vlgmr.msra.gmra.mrb[112].mxu0 %vm867_vm5, %v10773_v32 }
0x59a8   : > { %18926 = vmatpush3.bf16.msra.mxu0 %v23061_v39  ;;  %16985 = vmatprep.mubr.msk.f32.mxu0 %vm20219_vm4, %v23867_v4  ;;  %v11030_v39 = vld [vmem:[#allocation16] sm:$0xff] }
0x59a9   : > { %18927 = vmatprep.subr.bf16.mxu0 %v23868_v19 }
0x59ac   : > { %18929 = vmatpush3.bf16.msra.mxu0 %v23066_v48  ;;  %v11031_v48 = vld [vmem:[#allocation16 + $0x8] sm:$0xff] }
0x59ad   : > { %18930 = vmatprep.subr.bf16.mxu0 %v23868_v19 }
0x59af   : > { %16986 = vmatmul.mubr.msk.f32.vlgmr.msra.gmra.mrb[114].mxu0 %vm867_vm5, %v23114_v43  ;;  %v18901_v43 = vpack.c.bf16 %v11031_v48, %v11030_v39 }
0x59b0   : > { %18932 = vmatpush3.bf16.msra.mxu0 %v23072_v42  ;;  %16996 = vmatprep.mubr.msk.f32.mxu0 %vm20219_vm4, %v23867_v4  ;;  %v11032_v42 = vld [vmem:[#allocation16 + $0x10] sm:$0xff] }
0x59b1   : > { %18933 = vmatprep.subr.bf16.mxu0 %v23868_v19  ;;  %18902 = vmatpush3.bf16.msra.mxu1 %v18901_v43  ;;  %v18904_v58 = vpack.c.bf16 %v11033_v30, %v11032_v42  ;;  %v13473_v30 = vld [vmem:[#allocation24] ss:$0 sm:$0xff] }
0x59b2   : > { %18903 = vmatprep.subr.bf16.mxu1 %v23868_v19 }
0x59b4   : > { %18935 = vmatpush3.bf16.msra.mxu0 %v23078_v5  ;;  %v11034_v5 = vld [vmem:[#allocation16 + $0x20] sm:$0xff] }
0x59b5   : > { %18936 = vmatprep.subr.bf16.mxu0 %v23868_v19  ;;  %18905 = vmatpush3.bf16.msra.mxu1 %v18904_v58  ;;  %v18907_v59 = vpack.c.bf16 %v11035_v56, %v11034_v5 }
0x59b6   : > { %18906 = vmatprep.subr.bf16.mxu1 %v23868_v19 }
0x59b7   : > { %16997 = vmatmul.mubr.msk.f32.vlgmr.msra.gmra.mrb[116].mxu0 %vm867_vm5, %v23139_v17  ;;  %v11036_v17 = vld [vmem:[#allocation16 + $0x30] sm:$0xff] }
0x59b8   : > { %17007 = vmatprep.mubr.msk.f32.mxu0 %vm20219_vm4, %v23867_v4  ;;  %v18910_v53 = vpack.c.bf16 %v11037_v31, %v11036_v17 }
0x59b9   : > { %18908 = vmatpush3.bf16.msra.mxu1 %v18907_v59 }
0x59ba   : > { %18909 = vmatprep.subr.bf16.mxu1 %v23868_v19 }
0x59bd   : > { %18911 = vmatpush3.bf16.msra.mxu1 %v18910_v53 }
0x59be   : > { %18912 = vmatprep.subr.bf16.mxu1 %v23868_v19 }
0x59c1   : > { %18914 = vmatpush3.bf16.msra.mxu1 %v18913_v37 }
0x59c2   : > { %18915 = vmatprep.subr.bf16.mxu1 %v23868_v19 }
0x59c5   : > { %18917 = vmatpush3.bf16.msra.mxu1 %v18916_v8  ;;  %v11298_v8 = vld [vmem:[#allocation25 + $0x8] sm:$0xff] }
0x59c6   : > { %18918 = vmatprep.subr.bf16.mxu1 %v23868_v19  ;;  %v18937_v35 = vpack.c.bf16 %v11298_v8, %v11297_v2 }
0x59c8   : > { %18938 = vmatpush3.bf16.msra.mxu0 %v18937_v35 }
0x59c9   : > { %18920 = vmatpush3.bf16.msra.mxu1 %v18919_v22  ;;  %v11300_v22 = vld [vmem:[#allocation25 + $0x18] sm:$0xff]  ;;  %18939 = vmatprep.subr.bf16.mxu0 %v23868_v19 }
0x59ca   : > { %18921 = vmatprep.subr.bf16.mxu1 %v23868_v19  ;;  %v18940_v62 = vpack.c.bf16 %v11300_v22, %v11299_v44 }
0x59cc   : > { %18941 = vmatpush3.bf16.msra.mxu0 %v18940_v62 }
0x59cd   : > { %18923 = vmatpush3.bf16.msra.mxu1 %v18922_v6  ;;  %18942 = vmatprep.subr.bf16.mxu0 %v23868_v19 }
0x59ce   : > { %18948 = vmatprep.subr.bf16.mxu1 %v23868_v19 }
0x59db   : > { %v11012_v24 = vpop.f32.mrb[68].mxu1 }
0x59dc   : > { %v16930_v7 = vpop.f32.mrb[69].mxu1 }
0x5a72   : > { %v10890_v23 = vpop.f32.mrb[110].mxu0 }
0x5a73   : > { %v11013_v49 = vadd.f32 %v11012_v24, %v10890_v23  ;;  %v16895_v34 = vpop.f32.mrb[111].mxu0 }
0x5a75   : > { %v11023_v12 = vadd.f32 %v23387_v52, %v11013_v49 }
0x5a77   : > { %12481 = vst [vmem:[%s20795_s19 + $0xc] sm:$0x3] %v11023_v12  ;;  %v11024_v40 = vsel %vm840_vm3, %v11023_v12, -inf }
0x5a78   : > { %11025 = vmax.xlane.f32.xlu1 %v11024_v40 }
0x5a7a   : > { %v11116_v38 = vpop.f32.mrb[112].mxu0 }
0x5a7b   : > { %v16941_v61 = vpop.f32.mrb[113].mxu0 }
0x5a82   : > { %v11260_v25 = vpop.f32.mrb[114].mxu0 }
0x5a83   : > { %v16987_v32 = vpop.f32.mrb[115].mxu0 }
0x5a84   : > { %v11483_v32 = vld [vmem:[#allocation30 + $0x8] sm:$0xff] }
0x5a8a   : > { %v23392_v7 = vpop.f32.mrb[116].mxu0 }
0x5a8b   : > { %v16998_v39 = vpop.f32.mrb[117].mxu0 }
0x5b05   : > { %v11026_v48 = vpop.xlane.xlu1 %11025 }
0x5b06   : > { %vm11027_vm15 = vcmp.eq.f32.partialorder %v11023_v12, %v11026_v48  ;;  %v11485_v48 = vld [vmem:[#allocation30 + $0x18] sm:$0xff] }
0x5b07   : > { %16975 = vmatmul.mubr.msk.f32.vlgmr.msra.gmra.mrb[70].mxu1 %vm11027_vm15, %v23992_v9 }
0x5b08   : > { %17029 = vmatprep.mubr.msk.f32.mxu1 %vm20219_vm4, %v23867_v4 }
0x5bda   : > { %v11186_v24 = vpop.f32.mrb[70].mxu1 }
0x5bdb   : > { %v11187_v42 = vadd.f32 %v11186_v24, %v11116_v38  ;;  %v16976_v43 = vpop.f32.mrb[71].mxu1 }
0x5bdd   : > { %v11264_v58 = vadd.f32 %v11260_v25, %v11187_v42  ;;  %v11482_v25 = vld [vmem:[#allocation30] sm:$0xff] }
0x5bde   : > { %v18949_v39 = vpack.c.bf16 %v11483_v32, %v11482_v25  ;;  %v12038_v32 = vld [vmem:[#allocation13 + $0xa8] sm:$0xff] }
0x5bdf   : > { %v11272_v5 = vadd.f32 %v13473_v30, %v11264_v58 }
0x5be0   : > { %18950 = vmatpush3.bf16.msra.mxu1 %v18949_v39 }
0x5be1   : > { %19573 = vtanh.f32 %v11272_v5  ;;  %v13474_v59 = vmul.f32 -1.442695, %v11272_v5  ;;  %18951 = vmatprep.subr.bf16.mxu1 %v23868_v19 }
0x5be3   : > { %19575 = vpow2.f32 %v13474_v59 }
0x5beb   : > { %v19574_v56 = vpop.eup %19573 }
0x5bec   : > { %11282 = vrot.lane.b32.xlu1 %v19574_v56, %s23829_s1 }
0x5bed   : > { %v19576_v17 = vpop.eup %19575 }
0x5bee   : > { %v11276_v31 = vadd.f32 1.0, %v19576_v17 }
0x5bf0   : > { %19577 = vrcp.f32 %v11276_v31 }
0x5bfa   : > { %v19578_v53 = vpop.eup %19577 }
0x5bfb   : > { %v11280_v47 = vmul.f32 %v19578_v53, %v23107_v11 }
0x5c5e   : > { %v11283_v9 = vpop.permute.xlu1 %11282 }
0x5c5f   : > { %v11285_v51 = vmul.f32 %v19578_v53, %v11283_v9 }
0x5c61   : > { %11287 = vrot.lane.b32.xlu0 %v11285_v51, %s23829_s1 }
0x5cd3   : > { %v11288_v37 = vpop.permute.xlu0 %11287 }
0x5cd4   : > { %v23400_v33 = vadd.f32 %v11288_v37, %v11280_v47 }
0x5cd6   : > { %19579 = vtanh.f32 %v23400_v33 }
0x5ce0   : > { %v19580_v16 = vpop.eup %19579 }
0x5ce1   : > { %11293 = vrot.lane.b32.xlu0 %v19580_v16, %s23829_s1 }
0x5d53   : > { %v11294_v11 = vpop.permute.xlu0 %11293 }
0x5d54   : > { %v11296_v6 = vmul.f32 %v19578_v53, %v11294_v11 }
0x5d56   : > { %11376 = vrot.lane.b32.xlu1 %v11296_v6, %s20223_s29 }
0x5dc8   : > { %v11377_v23 = vpop.permute.xlu1 %11376 }
0x5dc9   : > { %12533 = vst.msk [vmem:[#allocation2] sm:$0x3] %vm12532_vm0, %v11377_v23  ;;  %17008 = vmatmul.mubr.msk.f32.vlgmr.msra.gmra.mrb[118].mxu0 %vm867_vm5, %v11377_v23 }
0x5dca   : > { %18944 = vmatpush3.bf16.msra.mxu0 %v23112_v0  ;;  %17018 = vmatprep.mubr.msk.f32.mxu0 %vm20219_vm4, %v23867_v4 }
0x5dcb   : > { %18945 = vmatprep.subr.bf16.mxu0 %v23868_v19 }
0x5dce   : > { %18947 = vmatpush3.bf16.msra.mxu0 %v23119_v41  ;;  %v13477_v41 = vld [vmem:[#allocation28] ss:$0 sm:$0xff] }
0x5dcf   : > { %18954 = vmatprep.subr.bf16.mxu0 %v23868_v19 }
0x5dd1   : > { %17019 = vmatmul.mubr.msk.f32.vlgmr.msra.gmra.mrb[120].mxu0 %vm867_vm5, %v23346_v29 }
0x5dd2   : > { %17064 = vmatprep.mubr.msk.f32.mxu0 %vm20219_vm4, %v23867_v4 }
0x5dd7   : > { %18957 = vmatpush3.bf16.xpose.msk.msra.mxu0 %vm20910_vm7, %v23156_v20 }
0x5dd8   : > { %18958 = vmatprep.subr.bf16.mxu0 %v23868_v19 }
0x5ddf   : > { %18961 = vmatpush3.bf16.xpose.msk.msra.mxu0 %vm20910_vm7, %v23169_v60 }
0x5de0   : > { %18962 = vmatprep.subr.bf16.mxu0 %v23868_v19 }
0x5de7   : > { %18965 = vmatpush3.bf16.xpose.msk.msra.mxu0 %vm20910_vm7, %v23181_v21 }
0x5de8   : > { %18966 = vmatprep.subr.bf16.mxu0 %v23868_v19 }
0x5def   : > { %18969 = vmatpush3.bf16.xpose.msk.msra.mxu0 %vm20910_vm7, %v23193_v13 }
0x5df0   : > { %18970 = vmatprep.subr.bf16.mxu0 %v23868_v19 }
0x5df7   : > { %18973 = vmatpush3.bf16.xpose.msk.msra.mxu0 %vm20910_vm7, %v23205_v50 }
0x5df8   : > { %18974 = vmatprep.subr.bf16.mxu0 %v23868_v19 }
0x5dff   : > { %18977 = vmatpush3.bf16.xpose.msk.msra.mxu0 %vm20910_vm7, %v23217_v27 }
0x5e00   : > { %18978 = vmatprep.subr.bf16.mxu0 %v23868_v19 }
0x5e07   : > { %18981 = vmatpush3.bf16.xpose.msk.msra.mxu0 %vm20910_vm7, %v23229_v63 }
0x5e08   : > { %18982 = vmatprep.subr.bf16.mxu0 %v23868_v19 }
0x5e0f   : > { %18985 = vmatpush3.bf16.xpose.msk.msra.mxu0 %vm20910_vm7, %v23241_v26 }
0x5e10   : > { %19018 = vmatprep.subr.bf16.mxu0 %v23868_v19 }
0x5e9c   : > { %v11446_v0 = vpop.f32.mrb[118].mxu0 }
0x5e9d   : > { %v11447_v20 = vadd.f32 %v11446_v0, %v23392_v7  ;;  %v17009_v60 = vpop.f32.mrb[119].mxu0  ;;  %v11484_v7 = vld [vmem:[#allocation30 + $0x10] sm:$0xff] }
0x5e9e   : > { %v18952_v24 = vpack.c.bf16 %v11485_v48, %v11484_v7  ;;  %v12022_v7 = vld [vmem:[#allocation13 + $0x28] sm:$0xff] }
0x5e9f   : > { %v11457_v21 = vadd.f32 %v13477_v41, %v11447_v20 }
0x5ea0   : > { %18953 = vmatpush3.bf16.msra.mxu1 %v18952_v24  ;;  %v12039_v24 = vld [vmem:[#allocation13 + $0xb0] sm:$0xff] }
0x5ea1   : > { %19581 = vtanh.f32 %v11457_v21  ;;  %v13478_v63 = vmul.f32 -1.442695, %v11457_v21  ;;  %18986 = vmatprep.subr.bf16.mxu1 %v23868_v19 }
0x5ea3   : > { %19583 = vpow2.f32 %v13478_v63 }
0x5ea4   : > { %v11556_v13 = vpop.f32.mrb[120].mxu0 }
0x5ea5   : > { %v17020_v50 = vpop.f32.mrb[121].mxu0 }
0x5ea6   : > { %v12034_v50 = vld [vmem:[#allocation13 + $0x88] sm:$0xff] }
0x5eab   : > { %v19582_v27 = vpop.eup %19581 }
0x5eac   : > { %11467 = vrot.lane.b32.xlu0 %v19582_v27, %s23829_s1  ;;  %v12017_v27 = vld [vmem:[#allocation13] sm:$0xff] }
0x5ead   : > { %v19584_v29 = vpop.eup %19583 }
0x5eae   : > { %v11461_v49 = vadd.f32 1.0, %v19584_v29  ;;  %v12018_v29 = vld [vmem:[#allocation13 + $0x8] sm:$0xff] }
0x5eb0   : > { %19585 = vrcp.f32 %v11461_v49  ;;  %v12035_v49 = vld [vmem:[#allocation13 + $0x90] sm:$0xff] }
0x5eba   : > { %v19586_v26 = vpop.eup %19585 }
0x5ebb   : > { %v11465_v40 = vmul.f32 %v19586_v26, %v23134_v14 }
0x5f1e   : > { %v11468_v34 = vpop.permute.xlu0 %11467 }
0x5f1f   : > { %v11470_v12 = vmul.f32 %v19586_v26, %v11468_v34  ;;  %v19019_v34 = vpack.c.bf16 %v12018_v29, %v12017_v27 }
0x5f21   : > { %11472 = vrot.lane.b32.xlu1 %v11470_v12, %s23829_s1  ;;  %v12019_v12 = vld [vmem:[#allocation13 + $0x10] sm:$0xff] }
0x5f93   : > { %v11473_v38 = vpop.permute.xlu1 %11472 }
0x5f94   : > { %v23455_v61 = vadd.f32 %v11473_v38, %v11465_v40  ;;  %v12020_v40 = vld [vmem:[#allocation13 + $0x18] sm:$0xff] }
0x5f95   : > { %v19022_v25 = vpack.c.bf16 %v12020_v40, %v12019_v12  ;;  %v12206_v12 = vld [vmem:[#allocation19 + $0x8] sm:$0xff] }
0x5f96   : > { %19587 = vtanh.f32 %v23455_v61 }
0x5fa0   : > { %v19588_v42 = vpop.eup %19587 }
0x5fa1   : > { %11478 = vrot.lane.b32.xlu0 %v19588_v42, %s23829_s1  ;;  %v12040_v42 = vld [vmem:[#allocation13 + $0xb8] sm:$0xff] }
0x6013   : > { %v11479_v14 = vpop.permute.xlu0 %11478 }
0x6014   : > { %v11481_v43 = vmul.f32 %v19586_v26, %v11479_v14  ;;  %v12036_v26 = vld [vmem:[#allocation13 + $0x98] sm:$0xff]  ;;  %v19052_v14 = vpack.c.bf16 %v12040_v42, %v12039_v24 }
0x6015   : > { %v19046_v38 = vpack.c.bf16 %v12036_v26, %v12035_v49  ;;  %v12207_v24 = vld [vmem:[#allocation19 + $0x10] sm:$0xff]  ;;  %v12208_v42 = vld [vmem:[#allocation19 + $0x18] sm:$0xff] }
0x6016   : > { %11561 = vrot.lane.b32.xlu1 %v11481_v43, %s20223_s29 }
0x6088   : > { %v11562_v30 = vpop.permute.xlu1 %11561 }
0x6089   : > { %12540 = vst.msk [vmem:[#allocation4] sm:$0x3] %vm12532_vm0, %v11562_v30  ;;  %17030 = vmatmul.mubr.msk.f32.vlgmr.msra.gmra.mrb[72].mxu1 %vm867_vm5, %v11562_v30 }
0x608a   : > { %18989 = vmatpush3.bf16.xpose.msk.msra.mxu1 %vm20910_vm7, %v23158_v10  ;;  %17099 = vmatprep.mubr.msk.f32.mxu1 %vm20219_vm4, %v23867_v4 }
0x608b   : > { %18990 = vmatprep.subr.bf16.mxu1 %v23868_v19 }
0x6092   : > { %18993 = vmatpush3.bf16.xpose.msk.msra.mxu1 %vm20910_vm7, %v23171_v57  ;;  %v13481_v57 = vld [vmem:[#allocation33] ss:$0 sm:$0xff] }
0x6093   : > { %18994 = vmatprep.subr.bf16.mxu1 %v23868_v19 }
0x609a   : > { %18997 = vmatpush3.bf16.xpose.msk.msra.mxu1 %vm20910_vm7, %v23183_v28 }
0x609b   : > { %18998 = vmatprep.subr.bf16.mxu1 %v23868_v19 }
0x60a2   : > { %19001 = vmatpush3.bf16.xpose.msk.msra.mxu1 %vm20910_vm7, %v23195_v18 }
0x60a3   : > { %19002 = vmatprep.subr.bf16.mxu1 %v23868_v19 }
0x60aa   : > { %19005 = vmatpush3.bf16.xpose.msk.msra.mxu1 %vm20910_vm7, %v23207_v55 }
0x60ab   : > { %19006 = vmatprep.subr.bf16.mxu1 %v23868_v19 }
0x60b2   : > { %19009 = vmatpush3.bf16.xpose.msk.msra.mxu1 %vm20910_vm7, %v23219_v45 }
0x60b3   : > { %19010 = vmatprep.subr.bf16.mxu1 %v23868_v19 }
0x60ba   : > { %19013 = vmatpush3.bf16.xpose.msk.msra.mxu1 %vm20910_vm7, %v23231_v1 }
0x60bb   : > { %19014 = vmatprep.subr.bf16.mxu1 %v23868_v19 }
0x60c2   : > { %19017 = vmatpush3.bf16.xpose.msk.msra.mxu1 %vm20910_vm7, %v23243_v3 }
0x60c3   : > { %19042 = vmatprep.subr.bf16.mxu1 %v23868_v19 }
0x615c   : > { %v11631_v10 = vpop.f32.mrb[72].mxu1 }
0x615d   : > { %v11632_v28 = vadd.f32 %v11631_v10, %v11556_v13  ;;  %v17031_v18 = vpop.f32.mrb[73].mxu1  ;;  %v12033_v13 = vld [vmem:[#allocation13 + $0x80] sm:$0xff] }
0x615e   : > { %v19043_v63 = vpack.c.bf16 %v12034_v50, %v12033_v13  ;;  %v12032_v13 = vld [vmem:[#allocation13 + $0x78] sm:$0xff] }
0x615f   : > { %v11642_v55 = vadd.f32 %v13481_v57, %v11632_v28 }
0x6161   : > { %19589 = vtanh.f32 %v11642_v55  ;;  %v13482_v58 = vmul.f32 -1.442695, %v11642_v55 }
0x6163   : > { %19591 = vpow2.f32 %v13482_v58 }
0x616b   : > { %v19590_v45 = vpop.eup %19589 }
0x616c   : > { %11652 = vrot.lane.b32.xlu0 %v19590_v45, %s23829_s1 }
0x616d   : > { %v19592_v1 = vpop.eup %19591 }
0x616e   : > { %v11646_v5 = vadd.f32 1.0, %v19592_v1 }
0x6170   : > { %19593 = vrcp.f32 %v11646_v5 }
0x617a   : > { %v19594_v56 = vpop.eup %19593 }
0x617b   : > { %v11650_v3 = vmul.f32 %v19594_v56, %v23153_v15 }
0x61de   : > { %v11653_v59 = vpop.permute.xlu0 %11652 }
0x61df   : > { %v11655_v17 = vmul.f32 %v19594_v56, %v11653_v59 }
0x61e1   : > { %11657 = vrot.lane.b32.xlu1 %v11655_v17, %s23829_s1  ;;  %v12023_v17 = vld [vmem:[#allocation13 + $0x30] sm:$0xff] }
0x6253   : > { %v11658_v31 = vpop.permute.xlu1 %11657 }
0x6254   : > { %v23501_v53 = vadd.f32 %v11658_v31, %v11650_v3  ;;  %v12024_v3 = vld [vmem:[#allocation13 + $0x38] sm:$0xff]  ;;  %v12041_v31 = vld [vmem:[#allocation13 + $0xc0] sm:$0xff] }
0x6256   : > { %19595 = vtanh.f32 %v23501_v53 }
0x6260   : > { %v19596_v9 = vpop.eup %19595 }
0x6261   : > { %11663 = vrot.lane.b32.xlu0 %v19596_v9, %s23829_s1  ;;  %v19028_v9 = vpack.c.bf16 %v12024_v3, %v12023_v17 }
0x62d3   : > { %v11664_v51 = vpop.permute.xlu0 %11663 }
0x62d4   : > { %v23505_v47 = vmul.f32 %v19594_v56, %v11664_v51  ;;  %v12042_v51 = vld [vmem:[#allocation13 + $0xc8] sm:$0xff] }
0x62d6   : > { %v11674_v37 = vrot.slane %v23505_v47, %v21011_v46 }
0x62d8   : > { %v11675_v2 = vcombine.high %v11674_v37, %v11674_v37  ;;  %v11682_v8 = vrot.slane %v11674_v37, %v21011_v46  ;;  %v19055_v37 = vpack.c.bf16 %v12042_v51, %v12041_v31  ;;  %v12213_v31 = vld [vmem:[#allocation19 + $0x40] sm:$0xff] }
0x62d9   : > { %v12197_v51 = vld [vmem:[#allocation18 + $0x40] sm:$0xff] }
0x62da   : > { %v11689_v44 = vrot.slane %v11675_v2, %v21011_v46  ;;  %v11725_v15 = vrot.slane %v11682_v8, %v21015_v54  ;;  %v11974_v46 = vld [vmem:[#allocation15] sm:$0x3]  ;;  %v12026_v8 = vld [vmem:[#allocation13 + $0x48] sm:$0xff] }
0x62db   : > { %v11976_v16 = vrot.slane %v11974_v46, 1  ;;  %v12025_v2 = vld [vmem:[#allocation13 + $0x40] sm:$0xff] }
0x62dc   : > { %11726 = vrot.lane.b32.xlu0 %v11725_v15, %s20223_s29  ;;  %v11851_v35 = vrot.slane %v11689_v44, %v21015_v54  ;;  %v12043_v44 = vld [vmem:[#allocation13 + $0xd0] sm:$0xff]  ;;  %v19031_v15 = vpack.c.bf16 %v12026_v8, %v12025_v2 }
0x62de   : > { %11852 = vrot.lane.b32.xlu1 %v11851_v35, %s20223_s29  ;;  %v12044_v35 = vld [vmem:[#allocation13 + $0xd8] sm:$0xff] }
0x634e   : > { %v11727_v22 = vpop.permute.xlu0 %11726 }
0x634f   : > { %17065 = vmatmul.mubr.msk.f32.vlgmr.msra.gmra.mrb[122].mxu0 %vm867_vm5, %v11727_v22  ;;  %v19058_v22 = vpack.c.bf16 %v12044_v35, %v12043_v44  ;;  %v12215_v44 = vld [vmem:[#allocation19 + $0x50] sm:$0xff] }
0x6350   : > { %v11853_v62 = vpop.permute.xlu1 %11852  ;;  %17134 = vmatprep.mubr.msk.f32.mxu0 %vm20219_vm4, %v23867_v4  ;;  %19020 = vmatpush3.bf16.msra.mxu0 %v19019_v34  ;;  %v12205_v34 = vld [vmem:[#allocation19] sm:$0xff]  ;;  %v12199_v35 = vld [vmem:[#allocation18 + $0x50] sm:$0xff] }
0x6351   : > { %17100 = vmatmul.mubr.msk.f32.vlgmr.msra.gmra.mrb[74].mxu1 %vm867_vm5, %v11853_v62  ;;  %19021 = vmatprep.subr.bf16.mxu0 %v23868_v19  ;;  %v12027_v62 = vld [vmem:[#allocation13 + $0x50] sm:$0xff] }
0x6352   : > { %17169 = vmatprep.mubr.msk.f32.mxu1 %vm20219_vm4, %v23867_v4  ;;  %19044 = vmatpush3.bf16.msra.mxu1 %v19043_v63 }
0x6353   : > { %19045 = vmatprep.subr.bf16.mxu1 %v23868_v19 }
0x6354   : > { %19023 = vmatpush3.bf16.msra.mxu0 %v19022_v25  ;;  %v12190_v25 = vld [vmem:[#allocation18 + $0x8] sm:$0xff] }
0x6355   : > { %19024 = vmatprep.subr.bf16.mxu0 %v23868_v19 }
0x6356   : > { %19047 = vmatpush3.bf16.msra.mxu1 %v19046_v38  ;;  %v12189_v38 = vld [vmem:[#allocation18] sm:$0xff] }
0x6357   : > { %19048 = vmatprep.subr.bf16.mxu1 %v23868_v19 }
0x6422   : > { %v11844_v11 = vpop.f32.mrb[122].mxu0 }
0x6423   : > { %v17066_v6 = vpop.f32.mrb[123].mxu0  ;;  %v11979_v41 = vadd.f32 %v11974_v46, %v11844_v11  ;;  %v12028_v46 = vld [vmem:[#allocation13 + $0x58] sm:$0xff] }
0x6424   : > { %v11970_v23 = vpop.f32.mrb[74].mxu1  ;;  %v19034_v11 = vpack.c.bf16 %v12028_v46, %v12027_v62  ;;  %v12046_v6 = vld [vmem:[#allocation13 + $0xe8] sm:$0xff] }
0x6425   : > { %v11980_v54 = vadd.f32 %v11976_v16, %v11970_v23  ;;  %v17101_v0 = vpop.f32.mrb[75].mxu1  ;;  %v12045_v16 = vld [vmem:[#allocation13 + $0xe0] sm:$0xff] }
0x6426   : > { %v19061_v23 = vpack.c.bf16 %v12046_v6, %v12045_v16  ;;  %v12030_v0 = vld [vmem:[#allocation13 + $0x68] sm:$0xff] }
0x6427   : > { %v11983_v20 = vrot.slane %v11980_v54, 7  ;;  %v12217_v16 = vld [vmem:[#allocation19 + $0x60] sm:$0xff] }
0x6428   : > { %v12201_v6 = vld [vmem:[#allocation18 + $0x60] sm:$0xff] }
0x6429   : > { %v11984_v60 = vsel %vm1826_vm8, %v11983_v20, %v11979_v41 }
0x642a   : > { %v11986_v21 = vsel %vm840_vm3, %v11984_v60, -inf  ;;  %v12048_v60 = vld [vmem:[#allocation13 + $0xf8] sm:$0xff] }
0x642b   : > { %11987 = vmax.xlane.f32.xlu1 %v11986_v21 }
0x643c   : > { %12535 = vrot.lane.b32.xlu1 %v23400_v33, %s20225_s26  ;;  %v12037_v33 = vld [vmem:[#allocation13 + $0xa0] sm:$0xff] }
0x643d   : > { %v19049_v39 = vpack.c.bf16 %v12038_v32, %v12037_v33  ;;  %v19067_v33 = vpack.c.bf16 %v12206_v12, %v12205_v34 }
0x643f   : > { %19050 = vmatpush3.bf16.msra.mxu1 %v19049_v39 }
0x6440   : > { %12542 = vrot.lane.b32.xlu1 %v23455_v61, %s20225_s26  ;;  %v12021_v61 = vld [vmem:[#allocation13 + $0x20] sm:$0xff]  ;;  %19051 = vmatprep.subr.bf16.mxu1 %v23868_v19 }
0x6441   : > { %v19025_v48 = vpack.c.bf16 %v12022_v7, %v12021_v61  ;;  %v19099_v7 = vpack.c.bf16 %v12190_v25, %v12189_v38 }
0x6443   : > { %19026 = vmatpush3.bf16.msra.mxu0 %v19025_v48  ;;  %19053 = vmatpush3.bf16.msra.mxu1 %v19052_v14 }
0x6444   : > { %19027 = vmatprep.subr.bf16.mxu0 %v23868_v19  ;;  %19054 = vmatprep.subr.bf16.mxu1 %v23868_v19 }
0x6447   : > { %19029 = vmatpush3.bf16.msra.mxu0 %v19028_v9  ;;  %19056 = vmatpush3.bf16.msra.mxu1 %v19055_v37  ;;  %v12214_v9 = vld [vmem:[#allocation19 + $0x48] sm:$0xff] }
0x6448   : > { %19030 = vmatprep.subr.bf16.mxu0 %v23868_v19  ;;  %19057 = vmatprep.subr.bf16.mxu1 %v23868_v19  ;;  %v12198_v37 = vld [vmem:[#allocation18 + $0x48] sm:$0xff]  ;;  %v19083_v2 = vpack.c.bf16 %v12214_v9, %v12213_v31 }
0x6449   : > { %v19115_v8 = vpack.c.bf16 %v12198_v37, %v12197_v51 }
0x644b   : > { %19032 = vmatpush3.bf16.msra.mxu0 %v19031_v15  ;;  %19059 = vmatpush3.bf16.msra.mxu1 %v19058_v22  ;;  %v12216_v15 = vld [vmem:[#allocation19 + $0x58] sm:$0xff] }
0x644c   : > { %19033 = vmatprep.subr.bf16.mxu0 %v23868_v19  ;;  %19060 = vmatprep.subr.bf16.mxu1 %v23868_v19  ;;  %v12200_v22 = vld [vmem:[#allocation18 + $0x58] sm:$0xff]  ;;  %v19087_v62 = vpack.c.bf16 %v12216_v15, %v12215_v44 }
0x644d   : > { %v19119_v46 = vpack.c.bf16 %v12200_v22, %v12199_v35 }
0x644f   : > { %19035 = vmatpush3.bf16.msra.mxu0 %v19034_v11  ;;  %19062 = vmatpush3.bf16.msra.mxu1 %v19061_v23  ;;  %v12218_v11 = vld [vmem:[#allocation19 + $0x68] sm:$0xff] }
0x6450   : > { %19036 = vmatprep.subr.bf16.mxu0 %v23868_v19  ;;  %19063 = vmatprep.subr.bf16.mxu1 %v23868_v19  ;;  %v12202_v23 = vld [vmem:[#allocation18 + $0x68] sm:$0xff] }
0x64b8   : > { %v11988_v43 = vpop.xlane.xlu1 %11987 }
0x64b9   : > { %v11990_v30 = vrot.slane %v11988_v43, 1  ;;  %v11993_v10 = vsub.f32 %v11979_v41, %v11988_v43  ;;  %v12047_v41 = vld [vmem:[#allocation13 + $0xf0] sm:$0xff] }
0x64ba   : > { %v19064_v21 = vpack.c.bf16 %v12048_v60, %v12047_v41  ;;  %v12191_v43 = vld [vmem:[#allocation18 + $0x10] sm:$0xff] }
0x64bb   : > { %v11994_v57 = vsub.f32 %v11980_v54, %v11990_v30  ;;  %v11995_v18 = vmul.f32 1.442695, %v11993_v10  ;;  %v12029_v54 = vld [vmem:[#allocation13 + $0x60] sm:$0xff]  ;;  %v19071_v10 = vpack.c.bf16 %v12208_v42, %v12207_v24  ;;  %v12219_v41 = vld [vmem:[#allocation19 + $0x70] sm:$0xff] }
0x64bc   : > { %v12536_v28 = vpop.permute.xlu1 %12535  ;;  %v19037_v20 = vpack.c.bf16 %v12030_v0, %v12029_v54  ;;  %19065 = vmatpush3.bf16.msra.mxu1 %v19064_v21  ;;  %v12192_v30 = vld [vmem:[#allocation18 + $0x18] sm:$0xff]  ;;  %v19091_v54 = vpack.c.bf16 %v12218_v11, %v12217_v16  ;;  %v19123_v0 = vpack.c.bf16 %v12202_v23, %v12201_v6  ;;  %v12203_v60 = vld [vmem:[#allocation18 + $0x70] sm:$0xff] }
0x64bd   : > { %v11997_v55 = vmul.f32 1.442695, %v11994_v57  ;;  %12538 = vst.msk [vmem:[#allocation3] sm:$0x3] %vm12532_vm0, %v12536_v28  ;;  %19098 = vmatprep.subr.bf16.mxu1 %v23868_v19  ;;  %v19103_v57 = vpack.c.bf16 %v12192_v30, %v12191_v43  ;;  %v12209_v28 = vld [vmem:[#allocation19 + $0x20] sm:$0xff]  ;;  %v12204_v21 = vld [vmem:[#allocation18 + $0x78] sm:$0xff] }
0x64be   : > { %19038 = vmatpush3.bf16.msra.mxu0 %v19037_v20  ;;  %v12220_v20 = vld [vmem:[#allocation19 + $0x78] sm:$0xff] }
0x64bf   : > { %19597 = vpow2.f32 %v11997_v55  ;;  %19039 = vmatprep.subr.bf16.mxu0 %v23868_v19  ;;  %v12194_v55 = vld [vmem:[#allocation18 + $0x28] sm:$0xff] }
0x64c0   : > { %v12543_v45 = vpop.permute.xlu1 %12542  ;;  %19599 = vpow2.f32 %v11995_v18  ;;  %v12210_v18 = vld [vmem:[#allocation19 + $0x28] sm:$0xff] }
0x64c1   : > { %12545 = vst.msk [vmem:[#allocation5] sm:$0x3] %vm12532_vm0, %v12543_v45  ;;  %v19075_v45 = vpack.c.bf16 %v12210_v18, %v12209_v28 }
0x64c9   : > { %v23536_v58 = vpop.eup %19597 }
0x64ca   : > { %v12001_v1 = vrot.slane %v23536_v58, 7  ;;  %v23539_v5 = vpop.eup %19599 }
0x64cc   : > { %v12002_v56 = vsel %vm1826_vm8, %v12001_v1, %v23539_v5  ;;  %v12211_v1 = vld [vmem:[#allocation19 + $0x30] sm:$0xff] }
0x64cd   : > { %v12004_v59 = vsel %vm840_vm3, %v12002_v56, 0.0  ;;  %v12195_v56 = vld [vmem:[#allocation18 + $0x30] sm:$0xff] }
0x64ce   : > { %12005 = vadd.xlane.f32.xlu0 %v12004_v59  ;;  %v12196_v59 = vld [vmem:[#allocation18 + $0x38] sm:$0xff] }
0x64cf   : > { %v19111_v3 = vpack.c.bf16 %v12196_v59, %v12195_v56 }
0x64e4   : > { %12345 = vrot.lane.b32.xlu0 %v23505_v47, %s20223_s29  ;;  %v12031_v47 = vld [vmem:[#allocation13 + $0x70] sm:$0xff]  ;;  %s20051_s29 = scalar_lea.vmem %s23630_s22, 256 }
0x64e5   : > { %v19040_v50 = vpack.c.bf16 %v12032_v13, %v12031_v47  ;;  %v19095_v47 = vpack.c.bf16 %v12220_v20, %v12219_v41  ;;  %v19127_v13 = vpack.c.bf16 %v12204_v21, %v12203_v60  ;;  %p20052_p1 = scmp.ne.s32.totalorder %s23630_s22, %s20051_s29 }
0x64e7   : > { %19041 = vmatpush3.bf16.msra.mxu0 %v19040_v50  ;;  %p20053_p11 = pnand %p20052_p1, %p23997_p10 }
0x64e8   : > { %12549 = vrot.lane.b32.xlu0 %v23501_v53, %s20225_s26  ;;  %19066 = vmatprep.subr.bf16.mxu0 %v23868_v19  ;;  %s20226_s26 = smov [#allocation37]  }
0x64e9   : > { %p20054_p0 = pneg %p20053_p11  ;;  %s20055_s1 = sshll.u32 %s20226_s26, 4  ;;  %s20056_s1 = int_to_ptr.vmem [resolvable:$false] %s20055_s1 }
0x64ea   : > { %s20057_s2 = scalar_lea.vmem %s20056_s1, 512  ;;  %p20058_p2 = scmp.lt.s32.totalorder %s23630_s22, %s20056_s1 }
0x64eb   : > { %p20059_p3 = scmp.lt.s32.totalorder %s20057_s2, %s20051_s29 }
0x64ed   : > { %p20060_p5 = por %p20059_p3, %p20058_p2 }
0x64ef   : > { %p20061_p6 = pnand %p20060_p5, %p20054_p0 }
0x655b   : > { %v12006_v27 = vpop.xlane.xlu0 %12005 }
0x655c   : > { %19601 = vrcp.f32 %v12006_v27 }
0x655f   : > { %v23557_v63 = vpop.permute.xlu0 %12345 }
0x6560   : > { %12547 = vst.msk [vmem:[#allocation6] sm:$0x3] %vm12532_vm0, %v23557_v63 }
0x6563   : > { %v12550_v53 = vpop.permute.xlu0 %12549 }
0x6564   : > { %12552 = vst.msk [vmem:[#allocation7] sm:$0x3] %vm12532_vm0, %v12550_v53 }
0x6566   : > { %v19602_v29 = vpop.eup %19601 }
0x6567   : > { %v12008_v49 = vmul.f32 %v19602_v29, %v12006_v27 }
0x6569   : > { %v12009_v26 = vsub.f32 2.0, %v12008_v49 }
0x656b   : > { %v12010_v40 = vmul.f32 %v19602_v29, %v12009_v26 }
0x656d   : > { %v12012_v32 = vrot.slane %v12010_v40, 1  ;;  %v12015_v61 = vmul.f32 %v23539_v5, %v12010_v40  ;;  %v12212_v5 = vld [vmem:[#allocation19 + $0x38] sm:$0xff] }
0x656e   : > { %v19079_v17 = vpack.c.bf16 %v12212_v5, %v12211_v1 }
0x656f   : > { %17135 = vmatmul.mubr.f32.vlgmr.msra.gmra.mrb[124].mxu0 %v12015_v61  ;;  %v12016_v39 = vmul.f32 %v23536_v58, %v12012_v32 }
0x6570   : > { %19069 = vmatpush3.bf16.xpose.msk.msra.mxu0 %vm20910_vm7, %v19067_v33  ;;  %17204 = vmatprep.mubr.msk.f32.mxu0 %vm20219_vm4, %v23867_v4 }
0x6571   : > { %17170 = vmatmul.mubr.f32.vlgmr.msra.gmra.mrb[76].mxu1 %v12016_v39  ;;  %v12513_v48 = vrot.slane %v12016_v39, 7  ;;  %19070 = vmatprep.subr.bf16.mxu0 %v23868_v19 }
0x6572   : > { %19101 = vmatpush3.bf16.xpose.msk.msra.mxu1 %vm20910_vm7, %v19099_v7  ;;  %17239 = vmatprep.mubr.msk.f32.mxu1 %vm20219_vm4, %v23867_v4  ;;  %v12193_v4 = vld [vmem:[#allocation18 + $0x20] sm:$0xff] }
0x6573   : > { %v12514_v14 = vsel %vm1826_vm8, %v12513_v48, %v12015_v61  ;;  %19102 = vmatprep.subr.bf16.mxu1 %v23868_v19  ;;  %v19107_v58 = vpack.c.bf16 %v12194_v55, %v12193_v4 }
0x6574   : > { %12530 = vst [vmem:[%s20797_s28 + $0xe] sm:$0x3] %v12514_v14 }
0x6578   : > { %19073 = vmatpush3.bf16.xpose.msk.msra.mxu0 %vm20910_vm7, %v19071_v10 }
0x6579   : > { %19074 = vmatprep.subr.bf16.mxu0 %v23868_v19 }
0x657a   : > { %19105 = vmatpush3.bf16.xpose.msk.msra.mxu1 %vm20910_vm7, %v19103_v57 }
0x657b   : > { %19106 = vmatprep.subr.bf16.mxu1 %v23868_v19 }
0x6580   : > { %19077 = vmatpush3.bf16.xpose.msk.msra.mxu0 %vm20910_vm7, %v19075_v45 }
0x6581   : > { %19078 = vmatprep.subr.bf16.mxu0 %v23868_v19 }
0x6582   : > { %19109 = vmatpush3.bf16.xpose.msk.msra.mxu1 %vm20910_vm7, %v19107_v58 }
0x6583   : > { %19110 = vmatprep.subr.bf16.mxu1 %v23868_v19 }
0x6588   : > { %19081 = vmatpush3.bf16.xpose.msk.msra.mxu0 %vm20910_vm7, %v19079_v17 }
0x6589   : > { %19082 = vmatprep.subr.bf16.mxu0 %v23868_v19 }
0x658a   : > { %19113 = vmatpush3.bf16.xpose.msk.msra.mxu1 %vm20910_vm7, %v19111_v3 }
0x658b   : > { %19114 = vmatprep.subr.bf16.mxu1 %v23868_v19 }
0x6590   : > { %19085 = vmatpush3.bf16.xpose.msk.msra.mxu0 %vm20910_vm7, %v19083_v2 }
0x6591   : > { %19086 = vmatprep.subr.bf16.mxu0 %v23868_v19 }
0x6592   : > { %19117 = vmatpush3.bf16.xpose.msk.msra.mxu1 %vm20910_vm7, %v19115_v8 }
0x6593   : > { %19118 = vmatprep.subr.bf16.mxu1 %v23868_v19 }
0x6598   : > { %19089 = vmatpush3.bf16.xpose.msk.msra.mxu0 %vm20910_vm7, %v19087_v62 }
0x6599   : > { %19090 = vmatprep.subr.bf16.mxu0 %v23868_v19 }
0x659a   : > { %19121 = vmatpush3.bf16.xpose.msk.msra.mxu1 %vm20910_vm7, %v19119_v46 }
0x659b   : > { %19122 = vmatprep.subr.bf16.mxu1 %v23868_v19 }
0x65a0   : > { %19093 = vmatpush3.bf16.xpose.msk.msra.mxu0 %vm20910_vm7, %v19091_v54 }
0x65a1   : > { %19094 = vmatprep.subr.bf16.mxu0 %v23868_v19 }
0x65a2   : > { %19125 = vmatpush3.bf16.xpose.msk.msra.mxu1 %vm20910_vm7, %v19123_v0 }
0x65a3   : > { %19126 = vmatprep.subr.bf16.mxu1 %v23868_v19 }
0x65a8   : > { %19097 = vmatpush3.bf16.xpose.msk.msra.mxu0 %vm20910_vm7, %v19095_v47 }
0x65aa   : > { %19129 = vmatpush3.bf16.xpose.msk.msra.mxu1 %vm20910_vm7, %v19127_v13 }
0x65b1   : > { %17240 = vmatmul.mubr.msk.f32.vlgmr.msra.gmra.mrb[78].mxu1 %vm867_vm5, %v23557_v63 }
0x6642   : > { %v12115_v50 = vpop.f32.mrb[124].mxu0 }
0x6643   : > { %v17136_v27 = vpop.f32.mrb[125].mxu0 }
0x6644   : > { %v12185_v19 = vpop.f32.mrb[76].mxu1 }
0x6645   : > { %v12223_v53 = vrot.slane %v12185_v19, 7  ;;  %v17171_v29 = vpop.f32.mrb[77].mxu1 }
0x6647   : > { %v12224_v49 = vsel %vm1826_vm8, %v12223_v53, %v12115_v50 }
0x6648   : > { %12554 = vst.msk [vmem:[#allocation8] sm:$0x3] %vm12532_vm0, %v12224_v49  ;;  %17205 = vmatmul.mubr.msk.f32.vlgmr.msra.gmra.mrb[126].mxu0 %vm867_vm5, %v12224_v49 }
0x6684   : > { %v12463_v26 = vpop.f32.mrb[78].mxu1 }
0x6685   : > { %v17241_v34 = vpop.f32.mrb[79].mxu1 }
0x6686   : > { %20064 = shalt.err (!%p20061_p6)
}
0x6687   : > { %s20065_s28 = scalar_lea.hbm %s23627_s25, 256  ;;  %s20069_s27 = scalar_lea.hbm %s23996_s18, 512 }
0x6688   : > { %p20066_p7 = scmp.ne.s32.totalorder %s23627_s25, %s20065_s28  ;;  %p20070_p4 = scmp.lt.u32.totalorder %s23627_s25, %s23996_s18 }
0x6689   : > { %p20071_p8 = scmp.lt.u32.totalorder %s20069_s27, %s20065_s28  ;;  %p20073_p1 = scmp.lt.u32.totalorder %s20065_s28, %s23627_s25 }
0x668a   : > { %p20067_p9 = pnand %p20066_p7, %p23997_p10 }
0x668b   : > { %p20072_p13 = por %p20071_p8, %p20070_p4 }
0x668c   : > { %p20068_p12 = pneg %p20067_p9 }
0x668d   : > { %p20074_p11 = por %p20073_p1, %p20072_p13 }
0x668f   : > { %p20075_p0 = pnand %p20074_p11, %p20068_p12 }
0x6691   : > { %20078 = shalt.err (!%p20075_p0)
}
0x6692   : > { %s23831_s2 = smov 2   ;;  %s23998_s29 = smov 32  }
0x6693   : > { %19195 = dma.vmem_to_hbm [thread:$0]  (%p23997_p10), %s23630_s22, 256, %s23627_s25, %s12562_s24, %s23998_s29, %s23998_s29, %s23831_s2  }
0x6694   : > { %s12576_s28 = sshll.u32 %s20795_s19, 4  ;;  %s23999_s27 = sld [smem:[#allocation85_spill]]  ;;  %s23668_s28 = int_to_ptr.vmem [resolvable:$true] %s12576_s28 }
0x6695   : > { %s12557_s25 = scalar_lea.sflag [#allocation12], %s20792_s30  ;;  %s20079_s22 = scalar_lea.vmem %s23668_s28, 256 }
0x6696   : > { %p20080_p2 = scmp.ne.s32.totalorder %s23668_s28, %s20079_s22  ;;  %s20228_s24 = smov [#allocation36]  }
0x6697   : > { %s20083_s23 = sshll.u32 %s20228_s24, 4  ;;  %s20084_s23 = int_to_ptr.vmem [resolvable:$false] %s20083_s23 }
0x6698   : > { %p20081_p3 = pnand %p20080_p2, %p23997_p10  ;;  %s20085_s2 = scalar_lea.vmem %s20084_s23, 512 }
0x6699   : > { %p20086_p6 = scmp.lt.s32.totalorder %s23668_s28, %s20084_s23  ;;  %p20087_p7 = scmp.lt.s32.totalorder %s20085_s2, %s20079_s22 }
0x669a   : > { %s24000_s1 = smov %s23999_s27  ;;  %s23666_s26 = scalar_lea.hbm %s23999_s27, %s13560_s16 }
0x669b   : > { %p20082_p5 = pneg %p20081_p3  ;;  %p20088_p9 = por %p20087_p7, %p20086_p6 }
0x669d   : > { %p20089_p12 = pnand %p20088_p9, %p20082_p5 }
0x671b   : > { %v12341_v36 = vpop.f32.mrb[126].mxu0 }
0x671c   : > { %v12464_v63 = vadd.f32 %v12463_v26, %v12341_v36  ;;  %v17206_v12 = vpop.f32.mrb[127].mxu0 }
0x671e   : > { %v12474_v40 = vadd.f32 %v23387_v52, %v12464_v63 }
0x6720   : > { %12482 = vst [vmem:[%s20795_s19 + $0xe] sm:$0x3] %v12474_v40  ;;  %12555 = vst [vmem:[#allocation9] sm:$0x3] %v12474_v40 }
0x6721   : > { %20092 = shalt.err (!%p20089_p12)
}
0x6722   : > { %s20093_s19 = scalar_lea.hbm %s23666_s26, 256  ;;  %s20097_s21 = scalar_lea.hbm %s24000_s1, 512 }
0x6723   : > { %p20094_p4 = scmp.ne.s32.totalorder %s23666_s26, %s20093_s19  ;;  %p20098_p1 = scmp.lt.u32.totalorder %s23666_s26, %s24000_s1 }
0x6724   : > { %p20099_p11 = scmp.lt.u32.totalorder %s20097_s21, %s20093_s19  ;;  %p20101_p2 = scmp.lt.u32.totalorder %s20093_s19, %s23666_s26 }
0x6725   : > { %p20095_p8 = pnand %p20094_p4, %p23997_p10 }
0x6726   : > { %p20100_p0 = por %p20099_p11, %p20098_p1 }
0x6727   : > { %p20096_p13 = pneg %p20095_p8 }
0x6728   : > { %p20102_p3 = por %p20101_p2, %p20100_p0 }
0x672a   : > { %p20103_p5 = pnand %p20102_p3, %p20096_p13 }
0x672c   : > { %20106 = shalt.err (!%p20103_p5)
}
0x672d   : > { %s24001_s2 = smov 2  }
0x672e   : > { %19194 = dma.vmem_to_hbm [thread:$0]  (%p23997_p10), %s23668_s28, 256, %s23666_s26, %s12557_s25, %s23998_s29, %s23998_s29, %s24001_s2  }
0x672f PF: > { %s24002_s22 = sld [smem:[#allocation55_spill]]  ;;  %s24003_s23 = sld [smem:[#allocation50_spill]] }
0x6730   : > { %s24004_s16 = sld [smem:[#allocation58_spill]] }
0x6735   : > { %p19286_p6 = scmp.ge.s32.totalorder %s24002_s22, 2  ;;  %s12608_s17 = sand.u32 1, %s24003_s23  }
0x6736   : > { %p24005_p7 = scmp.ne.s32.totalorder %s24004_s16, 0  ;;  %s12609_s19 = scalar_lea.sflag [#allocation12], %s12608_s17 }
0x6738   : > { %p19248_p9 = pnand %p19286_p6, %p24005_p7 }
0x673a   : > { %20168 = dma.done.wait (!%p19248_p9), %s12609_s19, 256  }
0x673b   : > { %20170 = vsyncadd (!%p19248_p9), %s12609_s19, 4294967040  ;;  %s12618_s0 = scalar_lea.sflag [#allocation38], %s12608_s17 }
0x673c   : > { %20172 = dma.done.wait (!%p19248_p9), %s12618_s0, 256  }
0x673d   : > { %20174 = vsyncadd (!%p19248_p9), %s12618_s0, 4294967040  ;;  %s43_s29 = sadd.s32 1, %s24002_s22   ;;  %s24006_s24 = sld [smem:[#allocation51_spill]] }
0x673e   : > { %p40_p12 = scmp.ge.s32.totalorder %s43_s29, 4   ;;  %s24007_s25 = sld [smem:[#allocation52_spill]] }
0x673f   : > { %s24008_s26 = sld [smem:[#allocation59_spill]]  ;;  %s24009_s27 = sld [smem:[#allocation54_spill]] }
0x6740   : > { %s24010_s28 = sld [smem:[#allocation56_spill]]  ;;  %42 = sbr.rel (!%p40_p12) target bundleno = 21 (0x15), region = 205 }
0x6747   :  { %12623 = vsyncpa [#allocation11], 1 }
0x6748   :  { %12625 = vsyncpa [#allocation11 + $0x1], 1 }
0x6749   :  { %12626 = vsyncpa [#allocation14], 1 }
0x674a   :  { %12627 = vsyncpa [#allocation17], 1 }
0x674b   :  { %12628 = vsyncpa [#allocation20], 1 }
0x674c   :  { %12629 = vsyncpa [#allocation23], 1 }
0x674d   :  { %12630 = vsyncpa [#allocation26], 1 }
0x674e   :  { %12631 = vsyncpa [#allocation29], 1 }
0x674f   :  { %12632 = vsyncpa [#allocation32], 1 }
0x6750   :  { %12633 = vsyncpa [#allocation35], 1 }
0x6751   :  { %12634 = vsyncpa [#allocation12], 1 }
0x6752   :  { %12636 = vsyncpa [#allocation12 + $0x1], 1 }
0x6753   :  { %12637 = vsyncpa [#allocation38], 1 }
0x6754   :  { %12639 = vsyncpa [#allocation38 + $0x1], 1 }

</bundles_post_ra>
